<compile_context>
chip_gen: v6e
topology: v6e:2x2x1
jax: 0.10.0
libtpu: 0.0.40
codegen_flags: <defaults>
</compile_context>

<pallas_src>
import functools
import math

import jax
import jax.numpy as jnp
from jax.experimental import pallas as pl
from jax.experimental.pallas import tpu as pltpu

_SQRT2 = math.sqrt(2.0)


def _gelu_exact(x):
    # Matches torch.nn.functional.gelu default (erf-based, exact).
    return 0.5 * x * (1.0 + jax.lax.erf(x / _SQRT2))


def _round_up(n, m):
    return ((n + m - 1) // m) * m


def _plan_rows(rows, target=2048):
    """Pick a large row tile (HBM-bound kernels) but keep >=2 grid steps when
    possible so v7x can shard the 'parallel' axis across its two TensorCores."""
    half = (rows + 1) // 2
    tm = max(8, min(target, _round_up(half, 8)))
    rows_p = _round_up(rows, tm)
    return tm, rows_p


def _pad_rows(a, rows_p):
    rows = a.shape[0]
    if rows == rows_p:
        return a
    return jnp.pad(a, ((0, rows_p - rows), (0, 0)))


def _cparams():
    return pltpu.CompilerParams(
        dimension_semantics=("parallel",),
        vmem_limit_bytes=32 * 1024 * 1024,
    )


# --------------------------------------------------------------------------
# Pallas kernels
# --------------------------------------------------------------------------
def _fc0_kernel(x_ref, g_ref, wx_ref, wg_ref, b_ref, o_ref):
    # y = x @ Wx + gridx * Wg[0] + gridy * Wg[1] + b   (== Linear([x, gx, gy]))
    y = jnp.dot(x_ref[...], wx_ref[...], preferred_element_type=jnp.float32)
    g = g_ref[...]                         # (tm, 2)
    wg = wg_ref[...]                       # (2, width)
    y = y + g[:, 0:1] * wg[0:1, :] + g[:, 1:2] * wg[1:2, :] + b_ref[...]
    o_ref[...] = y.astype(o_ref.dtype)


def fc0_pallas(x2d, grid2, wx, wg, b, *, tm, rows_p):
    rows, cin = x2d.shape
    width = wx.shape[1]
    xp = _pad_rows(x2d, rows_p)
    gp = _pad_rows(grid2, rows_p)
    y = pl.pallas_call(
        _fc0_kernel,
        out_shape=jax.ShapeDtypeStruct((rows_p, width), jnp.float32),
        grid=(rows_p // tm,),
        in_specs=[
            pl.BlockSpec((tm, cin), lambda i: (i, 0)),
            pl.BlockSpec((tm, 2), lambda i: (i, 0)),
            pl.BlockSpec((cin, width), lambda i: (0, 0)),
            pl.BlockSpec((2, width), lambda i: (0, 0)),
            pl.BlockSpec((1, width), lambda i: (0, 0)),
        ],
        out_specs=pl.BlockSpec((tm, width), lambda i: (i, 0)),
        compiler_params=_cparams(),
    )(xp, gp, wx, wg, b.reshape(1, width))
    return y[:rows]


def _pw_residual_kernel(x_ref, spec_ref, w_ref, b_ref, o_ref, *, apply_gelu):
    # out = gelu( spectral_conv(x) + conv1x1(x) )   (gelu omitted on last block)
    y = jnp.dot(x_ref[...], w_ref[...], preferred_element_type=jnp.float32)
    y = y + b_ref[...] + spec_ref[...]
    if apply_gelu:
        y = _gelu_exact(y)
    o_ref[...] = y.astype(o_ref.dtype)


def pw_residual_pallas(x2d, spec2d, w, b, *, apply_gelu, tm, rows_p):
    rows, cin = x2d.shape
    cout = w.shape[1]
    xp = _pad_rows(x2d, rows_p)
    sp = _pad_rows(spec2d, rows_p)
    y = pl.pallas_call(
        functools.partial(_pw_residual_kernel, apply_gelu=apply_gelu),
        out_shape=jax.ShapeDtypeStruct((rows_p, cout), jnp.float32),
        grid=(rows_p // tm,),
        in_specs=[
            pl.BlockSpec((tm, cin), lambda i: (i, 0)),
            pl.BlockSpec((tm, cout), lambda i: (i, 0)),
            pl.BlockSpec((cin, cout), lambda i: (0, 0)),
            pl.BlockSpec((1, cout), lambda i: (0, 0)),
        ],
        out_specs=pl.BlockSpec((tm, cout), lambda i: (i, 0)),
        compiler_params=_cparams(),
    )(xp, sp, w, b.reshape(1, cout))
    return y[:rows]


def _head_kernel(x_ref, w1_ref, b1_ref, w2t_ref, b2_ref, o_ref, *, vpu_cout):
    h = jnp.dot(x_ref[...], w1_ref[...], preferred_element_type=jnp.float32)
    h = _gelu_exact(h + b1_ref[...])
    if vpu_cout:
        # Small output width: VPU lane-reduction instead of a 1..8-column MXU matmul.
        w2t = w2t_ref[...]                 # (cout, chid), lane-dense
        cols = [jnp.sum(h * w2t[o:o + 1, :], axis=-1, keepdims=True)
                for o in range(w2t.shape[0])]
        y = cols[0] if len(cols) == 1 else jnp.concatenate(cols, axis=-1)
    else:
        y = jax.lax.dot_general(h, w2t_ref[...],
                                dimension_numbers=(((1,), (1,)), ((), ())),
                                preferred_element_type=jnp.float32)
    y = y + b2_ref[...]
    o_ref[...] = y.astype(o_ref.dtype)


def head_pallas(x2d, w1, b1, w2t, b2, *, tm, rows_p):
    rows, cin = x2d.shape
    chid = w1.shape[1]
    cout = w2t.shape[0]
    xp = _pad_rows(x2d, rows_p)
    y = pl.pallas_call(
        functools.partial(_head_kernel, vpu_cout=(cout <= 8)),
        out_shape=jax.ShapeDtypeStruct((rows_p, cout), jnp.float32),
        grid=(rows_p // tm,),
        in_specs=[
            pl.BlockSpec((tm, cin), lambda i: (i, 0)),
            pl.BlockSpec((cin, chid), lambda i: (0, 0)),
            pl.BlockSpec((1, chid), lambda i: (0, 0)),
            pl.BlockSpec((cout, chid), lambda i: (0, 0)),
            pl.BlockSpec((1, cout), lambda i: (0, 0)),
        ],
        out_specs=pl.BlockSpec((tm, cout), lambda i: (i, 0)),
        compiler_params=_cparams(),
    )(xp, w1, b1.reshape(1, chid), w2t, b2.reshape(1, cout))
    return y[:rows]


def _spectral_kernel(xr_ref, xi_ref, wr_ref, wi_ref, or_ref, oi_ref, *, ci):
    # out[b, o, m] = sum_i x[b, i, m] * w[i, o, m]   (complex), modes m on lanes.
    b, co, mb = or_ref.shape
    acc_r = jnp.zeros((b, co, mb), jnp.float32)
    acc_i = jnp.zeros((b, co, mb), jnp.float32)
    for i in range(ci):                    # unrolled VPU FMAs over in-channels
        xr_i = xr_ref[i][:, None, :]       # (B, 1, MB)
        xi_i = xi_ref[i][:, None, :]
        wr_i = wr_ref[i][None, :, :]       # (1, Co, MB)
        wi_i = wi_ref[i][None, :, :]
        acc_r = acc_r + xr_i * wr_i - xi_i * wi_i
        acc_i = acc_i + xr_i * wi_i + xi_i * wr_i
    or_ref[...] = acc_r
    oi_ref[...] = acc_i


def spectral_mul_pallas(xr, xi, wr, wi):
    # xr, xi: (Ci, B, Mp) ; wr, wi: (Ci, Co, Mp) ; out: (B, Co, Mp) -- all f32,
    # Mp a multiple of 128 so every block is lane-dense.
    Ci, B, Mp = xr.shape
    Co = wr.shape[1]
    MB = Mp
    for cand in (512, 256, 128):
        if Mp % cand == 0:
            MB = cand
            break
    return pl.pallas_call(
        functools.partial(_spectral_kernel, ci=Ci),
        out_shape=(
            jax.ShapeDtypeStruct((B, Co, Mp), jnp.float32),
            jax.ShapeDtypeStruct((B, Co, Mp), jnp.float32),
        ),
        grid=(Mp // MB,),
        in_specs=[
            pl.BlockSpec((Ci, B, MB), lambda j: (0, 0, j)),
            pl.BlockSpec((Ci, B, MB), lambda j: (0, 0, j)),
            pl.BlockSpec((Ci, Co, MB), lambda j: (0, 0, j)),
            pl.BlockSpec((Ci, Co, MB), lambda j: (0, 0, j)),
        ],
        out_specs=(
            pl.BlockSpec((B, Co, MB), lambda j: (0, 0, j)),
            pl.BlockSpec((B, Co, MB), lambda j: (0, 0, j)),
        ),
        compiler_params=_cparams(),
    )(xr, xi, wr, wi)


# --------------------------------------------------------------------------
# SpectralConv2d_fast (FFT glue in JAX, mode mixing in Pallas)
# --------------------------------------------------------------------------
def spectral_conv2d(x, wr, wi, modes1, modes2):
    # x: (B, H, W, Ci) f32 ; wr, wi: (Ci, Co, Mp) f32 kernel-layout weights.
    B, H, W, Ci = x.shape
    Co = wr.shape[1]
    Mp = wr.shape[2]
    m = modes1 * modes2

    x_ft = jnp.fft.rfft2(x, axes=(1, 2))           # (B, H, Wf, Ci) complex64
    low = x_ft[:, :modes1, :modes2, :]
    high = x_ft[:, H - modes1:, :modes2, :]

    def to_kernel(z):                               # (B, m1, m2, Ci) -> (Ci, B, m)
        return jnp.transpose(z, (3, 0, 1, 2)).reshape(Ci, B, m)

    xin = jnp.concatenate([to_kernel(low), to_kernel(high)], axis=-1)   # (Ci, B, 2m)
    xin = jnp.pad(xin, ((0, 0), (0, 0), (0, Mp - 2 * m)))
    out_r, out_i = spectral_mul_pallas(
        jnp.real(xin).astype(jnp.float32), jnp.imag(xin).astype(jnp.float32), wr, wi)

    out_c = (out_r + 1j * out_i).astype(jnp.complex64)[:, :, :2 * m]    # (B, Co, 2m)
    out_low = jnp.transpose(out_c[:, :, :m].reshape(B, Co, modes1, modes2), (0, 2, 3, 1))
    out_high = jnp.transpose(out_c[:, :, m:].reshape(B, Co, modes1, modes2), (0, 2, 3, 1))

    Wf = W // 2 + 1
    if H >= 2 * modes1:
        # Assemble out_ft by pad + concat (no zeros + scatter round-trips).
        zlow = jnp.pad(out_low, ((0, 0), (0, 0), (0, Wf - modes2), (0, 0)))
        zhigh = jnp.pad(out_high, ((0, 0), (0, 0), (0, Wf - modes2), (0, 0)))
        zmid = jnp.zeros((B, H - 2 * modes1, Wf, Co), jnp.complex64)
        out_ft = jnp.concatenate([zlow, zmid, zhigh], axis=1)
    else:
        out_ft = jnp.zeros((B, H, Wf, Co), jnp.complex64)
        out_ft = out_ft.at[:, :modes1, :modes2, :].set(out_low)
        out_ft = out_ft.at[:, H - modes1:, :modes2, :].set(out_high)
    return jnp.fft.irfft2(out_ft, s=(H, W), axes=(1, 2)).astype(jnp.float32)


# --------------------------------------------------------------------------
# FNO2d parameters + forward
# --------------------------------------------------------------------------
def init_params(key, in_channels, out_channels, modes1, modes2, width):
    keys = iter(jax.random.split(key, 32))
    p = {}
    cin0 = in_channels + 2
    w0 = jax.random.normal(next(keys), (cin0, width), jnp.float32) / jnp.sqrt(cin0)
    p["fc0_wx"] = w0[:in_channels]                 # for the raw input channels
    p["fc0_wg"] = w0[in_channels:]                 # for gridx / gridy channels
    p["fc0_b"] = jnp.zeros((width,), jnp.float32)

    scale = 1.0 / (width * width)
    m = modes1 * modes2
    mpad = _round_up(2 * m, 128)
    for l in range(4):
        wc_parts = []
        for _ in range(2):                         # weights1, weights2
            wr = scale * jax.random.uniform(next(keys), (width, width, modes1, modes2), jnp.float32)
            wi = scale * jax.random.uniform(next(keys), (width, width, modes1, modes2), jnp.float32)
            wc_parts.append((wr + 1j * wi).astype(jnp.complex64).reshape(width, width, m))
        # Precompute kernel layout once: (Ci, Co, Mp) with [w1 | w2] on the mode axis.
        wc = jnp.concatenate(wc_parts, axis=-1)
        wc = jnp.pad(wc, ((0, 0), (0, 0), (0, mpad - 2 * m)))
        p[f"spec{l}_wr"] = jnp.real(wc).astype(jnp.float32)
        p[f"spec{l}_wi"] = jnp.imag(wc).astype(jnp.float32)
        p[f"w{l}_w"] = jax.random.normal(next(keys), (width, width), jnp.float32) / jnp.sqrt(width)
        p[f"w{l}_b"] = jnp.zeros((width,), jnp.float32)

    p["fc1_w"] = jax.random.normal(next(keys), (width, 128), jnp.float32) / jnp.sqrt(width)
    p["fc1_b"] = jnp.zeros((128,), jnp.float32)
    fc2 = jax.random.normal(next(keys), (128, out_channels), jnp.float32) / jnp.sqrt(128.0)
    p["fc2_wt"] = fc2.T                            # (out_channels, 128) lane-dense
    p["fc2_b"] = jnp.zeros((out_channels,), jnp.float32)
    return p


def fno2d_forward(params, x, *, modes1, modes2, width):
    # x: (B, size_x, size_y, in_channels)
    B, H, W, Cin = x.shape
    rows = B * H * W
    tm, rows_p = _plan_rows(rows)

    # get_grid: constant under jit; kept as a tiny (rows, 2) side input instead of
    # materializing the concatenated (B, H, W, Cin+2) slab in HBM.
    gridx = jnp.broadcast_to(
        jnp.linspace(0.0, 1.0, H, dtype=jnp.float32).reshape(1, H, 1, 1), (B, H, W, 1))
    gridy = jnp.broadcast_to(
        jnp.linspace(0.0, 1.0, W, dtype=jnp.float32).reshape(1, 1, W, 1), (B, H, W, 1))
    grid2 = jnp.concatenate([gridx, gridy], axis=-1).reshape(rows, 2)

    h = fc0_pallas(x.reshape(rows, Cin), grid2,
                   params["fc0_wx"], params["fc0_wg"], params["fc0_b"],
                   tm=tm, rows_p=rows_p)
    h = h.reshape(B, H, W, width)

    # 4 Fourier blocks: x = gelu(conv_l(x) + w_l(x))  (no gelu on the last one)
    for l in range(4):
        spec = spectral_conv2d(h, params[f"spec{l}_wr"], params[f"spec{l}_wi"], modes1, modes2)
        h = pw_residual_pallas(
            h.reshape(rows, width), spec.reshape(rows, width),
            params[f"w{l}_w"], params[f"w{l}_b"],
            apply_gelu=(l < 3), tm=tm, rows_p=rows_p,
        ).reshape(B, H, W, width)

    out = head_pallas(
        h.reshape(rows, width),
        params["fc1_w"], params["fc1_b"],
        params["fc2_wt"], params["fc2_b"],
        tm=tm, rows_p=rows_p,
    )
    return out.reshape(B, H, W, -1)


if __name__ == "__main__":
    B, H, W = 2, 16, 16
    in_channels, out_channels = 4, 1
    modes1, modes2, width = 6, 6, 32

    key = jax.random.PRNGKey(0)
    pkey, xkey = jax.random.split(key)
    params = init_params(pkey, in_channels, out_channels, modes1, modes2, width)
    x = jax.random.normal(xkey, (B, H, W, in_channels), dtype=jnp.float32)

    fwd = jax.jit(functools.partial(fno2d_forward, modes1=modes1, modes2=modes2, width=width))
    y = fwd(params, x)
    jax.block_until_ready(y)
    assert y.shape == (B, H, W, out_channels)
    assert bool(jnp.all(jnp.isfinite(y)))
    print("KERNEL_OK")
</pallas_src>

<mosaic_0001>
module attributes {stable_mosaic.version = 11 : i64} {
  func.func @_fc0_kernel(%arg0: i32, %arg1: memref<256x4xf32, #tpu.memory_space<vmem>>, %arg2: memref<256x2xf32, #tpu.memory_space<vmem>>, %arg3: memref<4x32xf32, #tpu.memory_space<vmem>>, %arg4: memref<2x32xf32, #tpu.memory_space<vmem>>, %arg5: memref<1x32xf32, #tpu.memory_space<vmem>>, %arg6: memref<256x32xf32, #tpu.memory_space<vmem>>) attributes {dimension_semantics = [#tpu.dimension_semantics<parallel>], iteration_bounds = array<i64: 2>, scalar_prefetch = 0 : i64, scratch_operands = 0 : i64, tpu.core_type = #tpu.core_type<tc>, window_params = [{transform_indices = @transform_0, window_bounds = array<i64: 256, 4>}, {transform_indices = @transform_1, window_bounds = array<i64: 256, 2>}, {pipeline_mode = #tpu.pipeline_mode<synchronous>, transform_indices = @transform_2, window_bounds = array<i64: 4, 32>}, {pipeline_mode = #tpu.pipeline_mode<synchronous>, transform_indices = @transform_3, window_bounds = array<i64: 2, 32>}, {pipeline_mode = #tpu.pipeline_mode<synchronous>, transform_indices = @transform_4, window_bounds = array<i64: 1, 32>}, {transform_indices = @transform_5, window_bounds = array<i64: 256, 32>}]} {
    %c0 = arith.constant 0 : index
    %c0_0 = arith.constant 0 : index
    %0 = vector.load %arg1[%c0, %c0_0] : memref<256x4xf32, #tpu.memory_space<vmem>>, vector<256x4xf32>
    %c0_1 = arith.constant 0 : index
    %c0_2 = arith.constant 0 : index
    %1 = vector.load %arg3[%c0_1, %c0_2] : memref<4x32xf32, #tpu.memory_space<vmem>>, vector<4x32xf32>
    %cst = arith.constant dense<0.000000e+00> : vector<256x32xf32>
    %2 = tpu.matmul %0, %1, %cst {dimension_numbers = #tpu.dot_dimension_numbers<[1], [0], [0], [1], [0, 0, 1, 1], [], []>} : vector<256x4xf32>, vector<4x32xf32>, vector<256x32xf32> -> vector<256x32xf32>
    %c0_3 = arith.constant 0 : index
    %c0_4 = arith.constant 0 : index
    %3 = vector.load %arg2[%c0_3, %c0_4] : memref<256x2xf32, #tpu.memory_space<vmem>>, vector<256x2xf32>
    %c0_5 = arith.constant 0 : index
    %c0_6 = arith.constant 0 : index
    %4 = vector.load %arg4[%c0_5, %c0_6] : memref<2x32xf32, #tpu.memory_space<vmem>>, vector<2x32xf32>
    %5 = vector.extract_strided_slice %3 {offsets = [0, 0], sizes = [256, 1], strides = [1, 1]} : vector<256x2xf32> to vector<256x1xf32>
    %6 = vector.extract_strided_slice %4 {offsets = [0, 0], sizes = [1, 32], strides = [1, 1]} : vector<2x32xf32> to vector<1x32xf32>
    %7 = vector.broadcast %5 : vector<256x1xf32> to vector<256x32xf32>
    %8 = vector.broadcast %6 : vector<1x32xf32> to vector<256x32xf32>
    %9 = arith.mulf %7, %8 : vector<256x32xf32>
    %10 = arith.addf %2, %9 : vector<256x32xf32>
    %11 = vector.extract_strided_slice %3 {offsets = [0, 1], sizes = [256, 1], strides = [1, 1]} : vector<256x2xf32> to vector<256x1xf32>
    %12 = vector.extract_strided_slice %4 {offsets = [1, 0], sizes = [1, 32], strides = [1, 1]} : vector<2x32xf32> to vector<1x32xf32>
    %13 = vector.broadcast %11 : vector<256x1xf32> to vector<256x32xf32>
    %14 = vector.broadcast %12 : vector<1x32xf32> to vector<256x32xf32>
    %15 = arith.mulf %13, %14 : vector<256x32xf32>
    %16 = arith.addf %10, %15 : vector<256x32xf32>
    %c0_7 = arith.constant 0 : index
    %c0_8 = arith.constant 0 : index
    %17 = vector.load %arg5[%c0_7, %c0_8] : memref<1x32xf32, #tpu.memory_space<vmem>>, vector<1x32xf32>
    %18 = vector.broadcast %17 : vector<1x32xf32> to vector<256x32xf32>
    %19 = arith.addf %16, %18 : vector<256x32xf32>
    %c0_9 = arith.constant 0 : index
    %c0_10 = arith.constant 0 : index
    %20 = vector.load %arg6[%c0_9, %c0_10] : memref<256x32xf32, #tpu.memory_space<vmem>>, vector<256x32xf32>
    tpu.vector_store %arg6[%c0_9, %c0_10], %19 {strides = array<i32>} : memref<256x32xf32, #tpu.memory_space<vmem>>, vector<256x32xf32>,
    return
  }
  func.func @transform_0(%arg0: i32) -> (i32, i32) {
    %c0_i32 = arith.constant 0 : i32
    %c0_i32_0 = arith.constant 0 : i32
    return %arg0, %c0_i32 : i32, i32
  }
  func.func @transform_1(%arg0: i32) -> (i32, i32) {
    %c0_i32 = arith.constant 0 : i32
    %c0_i32_0 = arith.constant 0 : i32
    return %arg0, %c0_i32 : i32, i32
  }
  func.func @transform_2(%arg0: i32) -> (i32, i32) {
    %c0_i32 = arith.constant 0 : i32
    %c0_i32_0 = arith.constant 0 : i32
    %c0_i32_1 = arith.constant 0 : i32
    return %c0_i32, %c0_i32_0 : i32, i32
  }
  func.func @transform_3(%arg0: i32) -> (i32, i32) {
    %c0_i32 = arith.constant 0 : i32
    %c0_i32_0 = arith.constant 0 : i32
    %c0_i32_1 = arith.constant 0 : i32
    return %c0_i32, %c0_i32_0 : i32, i32
  }
  func.func @transform_4(%arg0: i32) -> (i32, i32) {
    %c0_i32 = arith.constant 0 : i32
    %c0_i32_0 = arith.constant 0 : i32
    %c0_i32_1 = arith.constant 0 : i32
    return %c0_i32, %c0_i32_0 : i32, i32
  }
  func.func @transform_5(%arg0: i32) -> (i32, i32) {
    %c0_i32 = arith.constant 0 : i32
    %c0_i32_0 = arith.constant 0 : i32
    return %arg0, %c0_i32 : i32, i32
  }
}

module attributes {stable_mosaic.version = 11 : i64} {
  func.func @_spectral_kernel(%arg0: i32, %arg1: memref<32x2x128xf32, #tpu.memory_space<vmem>>, %arg2: memref<32x2x128xf32, #tpu.memory_space<vmem>>, %arg3: memref<32x32x128xf32, #tpu.memory_space<vmem>>, %arg4: memref<32x32x128xf32, #tpu.memory_space<vmem>>, %arg5: memref<2x32x128xf32, #tpu.memory_space<vmem>>, %arg6: memref<2x32x128xf32, #tpu.memory_space<vmem>>) attributes {dimension_semantics = [#tpu.dimension_semantics<parallel>], iteration_bounds = array<i64: 1>, scalar_prefetch = 0 : i64, scratch_operands = 0 : i64, tpu.core_type = #tpu.core_type<tc>, window_params = [{transform_indices = @transform_0, window_bounds = array<i64: 32, 2, 128>}, {transform_indices = @transform_1, window_bounds = array<i64: 32, 2, 128>}, {transform_indices = @transform_2, window_bounds = array<i64: 32, 32, 128>}, {transform_indices = @transform_3, window_bounds = array<i64: 32, 32, 128>}, {transform_indices = @transform_4, window_bounds = array<i64: 2, 32, 128>}, {transform_indices = @transform_5, window_bounds = array<i64: 2, 32, 128>}]} {
    %cst = arith.constant 0.000000e+00 : f32
    %0 = vector.broadcast %cst : f32 to vector<2x32x128xf32>
    %cst_0 = arith.constant 0.000000e+00 : f32
    %1 = vector.broadcast %cst_0 : f32 to vector<2x32x128xf32>
    %c0 = arith.constant 0 : index
    %c0_1 = arith.constant 0 : index
    %c0_2 = arith.constant 0 : index
    %2 = vector.load %arg1[%c0, %c0_1, %c0_2] : memref<32x2x128xf32, #tpu.memory_space<vmem>>, vector<1x2x128xf32>
    %3 = vector.shape_cast %2 : vector<1x2x128xf32> to vector<2x128xf32>
    %4 = vector.shape_cast %3 : vector<2x128xf32> to vector<2x1x128xf32>
    %c0_3 = arith.constant 0 : index
    %c0_4 = arith.constant 0 : index
    %c0_5 = arith.constant 0 : index
    %5 = vector.load %arg2[%c0_3, %c0_4, %c0_5] : memref<32x2x128xf32, #tpu.memory_space<vmem>>, vector<1x2x128xf32>
    %6 = vector.shape_cast %5 : vector<1x2x128xf32> to vector<2x128xf32>
    %7 = vector.shape_cast %6 : vector<2x128xf32> to vector<2x1x128xf32>
    %c0_6 = arith.constant 0 : index
    %c0_7 = arith.constant 0 : index
    %c0_8 = arith.constant 0 : index
    %8 = vector.load %arg3[%c0_6, %c0_7, %c0_8] : memref<32x32x128xf32, #tpu.memory_space<vmem>>, vector<1x32x128xf32>
    %9 = vector.shape_cast %8 : vector<1x32x128xf32> to vector<32x128xf32>
    %10 = vector.shape_cast %9 : vector<32x128xf32> to vector<1x32x128xf32>
    %c0_9 = arith.constant 0 : index
    %c0_10 = arith.constant 0 : index
    %c0_11 = arith.constant 0 : index
    %11 = vector.load %arg4[%c0_9, %c0_10, %c0_11] : memref<32x32x128xf32, #tpu.memory_space<vmem>>, vector<1x32x128xf32>
    %12 = vector.shape_cast %11 : vector<1x32x128xf32> to vector<32x128xf32>
    %13 = vector.shape_cast %12 : vector<32x128xf32> to vector<1x32x128xf32>
    %14 = vector.broadcast %4 : vector<2x1x128xf32> to vector<2x32x128xf32>
    %15 = vector.broadcast %10 : vector<1x32x128xf32> to vector<2x32x128xf32>
    %16 = arith.mulf %14, %15 : vector<2x32x128xf32>
    %17 = arith.addf %0, %16 : vector<2x32x128xf32>
    %18 = vector.broadcast %7 : vector<2x1x128xf32> to vector<2x32x128xf32>
    %19 = vector.broadcast %13 : vector<1x32x128xf32> to vector<2x32x128xf32>
    %20 = arith.mulf %18, %19 : vector<2x32x128xf32>
    %21 = arith.subf %17, %20 : vector<2x32x128xf32>
    %22 = vector.broadcast %4 : vector<2x1x128xf32> to vector<2x32x128xf32>
    %23 = vector.broadcast %13 : vector<1x32x128xf32> to vector<2x32x128xf32>
    %24 = arith.mulf %22, %23 : vector<2x32x128xf32>
    %25 = arith.addf %1, %24 : vector<2x32x128xf32>
    %26 = vector.broadcast %7 : vector<2x1x128xf32> to vector<2x32x128xf32>
    %27 = vector.broadcast %10 : vector<1x32x128xf32> to vector<2x32x128xf32>
    %28 = arith.mulf %26, %27 : vector<2x32x128xf32>
    %29 = arith.addf %25, %28 : vector<2x32x128xf32>
    %c1 = arith.constant 1 : index
    %c0_12 = arith.constant 0 : index
    %c0_13 = arith.constant 0 : index
    %30 = vector.load %arg1[%c1, %c0_12, %c0_13] : memref<32x2x128xf32, #tpu.memory_space<vmem>>, vector<1x2x128xf32>
    %31 = vector.shape_cast %30 : vector<1x2x128xf32> to vector<2x128xf32>
    %32 = vector.shape_cast %31 : vector<2x128xf32> to vector<2x1x128xf32>
    %c1_14 = arith.constant 1 : index
    %c0_15 = arith.constant 0 : index
    %c0_16 = arith.constant 0 : index
    %33 = vector.load %arg2[%c1_14, %c0_15, %c0_16] : memref<32x2x128xf32, #tpu.memory_space<vmem>>, vector<1x2x128xf32>
    %34 = vector.shape_cast %33 : vector<1x2x128xf32> to vector<2x128xf32>
    %35 = vector.shape_cast %34 : vector<2x128xf32> to vector<2x1x128xf32>
    %c1_17 = arith.constant 1 : index
    %c0_18 = arith.constant 0 : index
    %c0_19 = arith.constant 0 : index
    %36 = vector.load %arg3[%c1_17, %c0_18, %c0_19] : memref<32x32x128xf32, #tpu.memory_space<vmem>>, vector<1x32x128xf32>
    %37 = vector.shape_cast %36 : vector<1x32x128xf32> to vector<32x128xf32>
    %38 = vector.shape_cast %37 : vector<32x128xf32> to vector<1x32x128xf32>
    %c1_20 = arith.constant 1 : index
    %c0_21 = arith.constant 0 : index
    %c0_22 = arith.constant 0 : index
    %39 = vector.load %arg4[%c1_20, %c0_21, %c0_22] : memref<32x32x128xf32, #tpu.memory_space<vmem>>, vector<1x32x128xf32>
    %40 = vector.shape_cast %39 : vector<1x32x128xf32> to vector<32x128xf32>
    %41 = vector.shape_cast %40 : vector<32x128xf32> to vector<1x32x128xf32>
    %42 = vector.broadcast %32 : vector<2x1x128xf32> to vector<2x32x128xf32>
    %43 = vector.broadcast %38 : vector<1x32x128xf32> to vector<2x32x128xf32>
    %44 = arith.mulf %42, %43 : vector<2x32x128xf32>
    %45 = arith.addf %21, %44 : vector<2x32x128xf32>
    %46 = vector.broadcast %35 : vector<2x1x128xf32> to vector<2x32x128xf32>
    %47 = vector.broadcast %41 : vector<1x32x128xf32> to vector<2x32x128xf32>
    %48 = arith.mulf %46, %47 : vector<2x32x128xf32>
    %49 = arith.subf %45, %48 : vector<2x32x128xf32>
    %50 = vector.broadcast %32 : vector<2x1x128xf32> to vector<2x32x128xf32>
    %51 = vector.broadcast %41 : vector<1x32x128xf32> to vector<2x32x128xf32>
    %52 = arith.mulf %50, %51 : vector<2x32x128xf32>
    %53 = arith.addf %29, %52 : vector<2x32x128xf32>
    %54 = vector.broadcast %35 : vector<2x1x128xf32> to vector<2x32x128xf32>
    %55 = vector.broadcast %38 : vector<1x32x128xf32> to vector<2x32x128xf32>
    %56 = arith.mulf %54, %55 : vector<2x32x128xf32>
    %57 = arith.addf %53, %56 : vector<2x32x128xf32>
    %c2 = arith.constant 2 : index
    %c0_23 = arith.constant 0 : index
    %c0_24 = arith.constant 0 : index
    %58 = vector.load %arg1[%c2, %c0_23, %c0_24] : memref<32x2x128xf32, #tpu.memory_space<vmem>>, vector<1x2x128xf32>
    %59 = vector.shape_cast %58 : vector<1x2x128xf32> to vector<2x128xf32>
    %60 = vector.shape_cast %59 : vector<2x128xf32> to vector<2x1x128xf32>
    %c2_25 = arith.constant 2 : index
    %c0_26 = arith.constant 0 : index
    %c0_27 = arith.constant 0 : index
    %61 = vector.load %arg2[%c2_25, %c0_26, %c0_27] : memref<32x2x128xf32, #tpu.memory_space<vmem>>, vector<1x2x128xf32>
    %62 = vector.shape_cast %61 : vector<1x2x128xf32> to vector<2x128xf32>
    %63 = vector.shape_cast %62 : vector<2x128xf32> to vector<2x1x128xf32>
    %c2_28 = arith.constant 2 : index
    %c0_29 = arith.constant 0 : index
    %c0_30 = arith.constant 0 : index
    %64 = vector.load %arg3[%c2_28, %c0_29, %c0_30] : memref<32x32x128xf32, #tpu.memory_space<vmem>>, vector<1x32x128xf32>
    %65 = vector.shape_cast %64 : vector<1x32x128xf32> to vector<32x128xf32>
    %66 = vector.shape_cast %65 : vector<32x128xf32> to vector<1x32x128xf32>
    %c2_31 = arith.constant 2 : index
    %c0_32 = arith.constant 0 : index
    %c0_33 = arith.constant 0 : index
    %67 = vector.load %arg4[%c2_31, %c0_32, %c0_33] : memref<32x32x128xf32, #tpu.memory_space<vmem>>, vector<1x32x128xf32>
    %68 = vector.shape_cast %67 : vector<1x32x128xf32> to vector<32x128xf32>
    %69 = vector.shape_cast %68 : vector<32x128xf32> to vector<1x32x128xf32>
    %70 = vector.broadcast %60 : vector<2x1x128xf32> to vector<2x32x128xf32>
    %71 = vector.broadcast %66 : vector<1x32x128xf32> to vector<2x32x128xf32>
    %72 = arith.mulf %70, %71 : vector<2x32x128xf32>
    %73 = arith.addf %49, %72 : vector<2x32x128xf32>
    %74 = vector.broadcast %63 : vector<2x1x128xf32> to vector<2x32x128xf32>
    %75 = vector.broadcast %69 : vector<1x32x128xf32> to vector<2x32x128xf32>
    %76 = arith.mulf %74, %75 : vector<2x32x128xf32>
    %77 = arith.subf %73, %76 : vector<2x32x128xf32>
    %78 = vector.broadcast %60 : vector<2x1x128xf32> to vector<2x32x128xf32>
    %79 = vector.broadcast %69 : vector<1x32x128xf32> to vector<2x32x128xf32>
    %80 = arith.mulf %78, %79 : vector<2x32x128xf32>
    %81 = arith.addf %57, %80 : vector<2x32x128xf32>
    %82 = vector.broadcast %63 : vector<2x1x128xf32> to vector<2x32x128xf32>
    %83 = vector.broadcast %66 : vector<1x32x128xf32> to vector<2x32x128xf32>
    %84 = arith.mulf %82, %83 : vector<2x32x128xf32>
    %85 = arith.addf %81, %84 : vector<2x32x128xf32>
    %c3 = arith.constant 3 : index
    %c0_34 = arith.constant 0 : index
    %c0_35 = arith.constant 0 : index
    %86 = vector.load %arg1[%c3, %c0_34, %c0_35] : memref<32x2x128xf32, #tpu.memory_space<vmem>>, vector<1x2x128xf32>
    %87 = vector.shape_cast %86 : vector<1x2x128xf32> to vector<2x128xf32>
    %88 = vector.shape_cast %87 : vector<2x128xf32> to vector<2x1x128xf32>
    %c3_36 = arith.constant 3 : index
    %c0_37 = arith.constant 0 : index
    %c0_38 = arith.constant 0 : index
    %89 = vector.load %arg2[%c3_36, %c0_37, %c0_38] : memref<32x2x128xf32, #tpu.memory_space<vmem>>, vector<1x2x128xf32>
    %90 = vector.shape_cast %89 : vector<1x2x128xf32> to vector<2x128xf32>
    %91 = vector.shape_cast %90 : vector<2x128xf32> to vector<2x1x128xf32>
    %c3_39 = arith.constant 3 : index
    %c0_40 = arith.constant 0 : index
    %c0_41 = arith.constant 0 : index
    %92 = vector.load %arg3[%c3_39, %c0_40, %c0_41] : memref<32x32x128xf32, #tpu.memory_space<vmem>>, vector<1x32x128xf32>
    %93 = vector.shape_cast %92 : vector<1x32x128xf32> to vector<32x128xf32>
    %94 = vector.shape_cast %93 : vector<32x128xf32> to vector<1x32x128xf32>
    %c3_42 = arith.constant 3 : index
    %c0_43 = arith.constant 0 : index
    %c0_44 = arith.constant 0 : index
    %95 = vector.load %arg4[%c3_42, %c0_43, %c0_44] : memref<32x32x128xf32, #tpu.memory_space<vmem>>, vector<1x32x128xf32>
    %96 = vector.shape_cast %95 : vector<1x32x128xf32> to vector<32x128xf32>
    %97 = vector.shape_cast %96 : vector<32x128xf32> to vector<1x32x128xf32>
    %98 = vector.broadcast %88 : vector<2x1x128xf32> to vector<2x32x128xf32>
    %99 = vector.broadcast %94 : vector<1x32x128xf32> to vector<2x32x128xf32>
    %100 = arith.mulf %98, %99 : vector<2x32x128xf32>
    %101 = arith.addf %77, %100 : vector<2x32x128xf32>
    %102 = vector.broadcast %91 : vector<2x1x128xf32> to vector<2x32x128xf32>
    %103 = vector.broadcast %97 : vector<1x32x128xf32> to vector<2x32x128xf32>
    %104 = arith.mulf %102, %103 : vector<2x32x128xf32>
    %105 = arith.subf %101, %104 : vector<2x32x128xf32>
    %106 = vector.broadcast %88 : vector<2x1x128xf32> to vector<2x32x128xf32>
    %107 = vector.broadcast %97 : vector<1x32x128xf32> to vector<2x32x128xf32>
    %108 = arith.mulf %106, %107 : vector<2x32x128xf32>
    %109 = arith.addf %85, %108 : vector<2x32x128xf32>
    %110 = vector.broadcast %91 : vector<2x1x128xf32> to vector<2x32x128xf32>
    %111 = vector.broadcast %94 : vector<1x32x128xf32> to vector<2x32x128xf32>
    %112 = arith.mulf %110, %111 : vector<2x32x128xf32>
    %113 = arith.addf %109, %112 : vector<2x32x128xf32>
    %c4 = arith.constant 4 : index
    %c0_45 = arith.constant 0 : index
    %c0_46 = arith.constant 0 : index
    %114 = vector.load %arg1[%c4, %c0_45, %c0_46] : memref<32x2x128xf32, #tpu.memory_space<vmem>>, vector<1x2x128xf32>
    %115 = vector.shape_cast %114 : vector<1x2x128xf32> to vector<2x128xf32>
    %116 = vector.shape_cast %115 : vector<2x128xf32> to vector<2x1x128xf32>
    %c4_47 = arith.constant 4 : index
    %c0_48 = arith.constant 0 : index
    %c0_49 = arith.constant 0 : index
    %117 = vector.load %arg2[%c4_47, %c0_48, %c0_49] : memref<32x2x128xf32, #tpu.memory_space<vmem>>, vector<1x2x128xf32>
    %118 = vector.shape_cast %117 : vector<1x2x128xf32> to vector<2x128xf32>
    %119 = vector.shape_cast %118 : vector<2x128xf32> to vector<2x1x128xf32>
    %c4_50 = arith.constant 4 : index
    %c0_51 = arith.constant 0 : index
    %c0_52 = arith.constant 0 : index
    %120 = vector.load %arg3[%c4_50, %c0_51, %c0_52] : memref<32x32x128xf32, #tpu.memory_space<vmem>>, vector<1x32x128xf32>
    %121 = vector.shape_cast %120 : vector<1x32x128xf32> to vector<32x128xf32>
    %122 = vector.shape_cast %121 : vector<32x128xf32> to vector<1x32x128xf32>
    %c4_53 = arith.constant 4 : index
    %c0_54 = arith.constant 0 : index
    %c0_55 = arith.constant 0 : index
    %123 = vector.load %arg4[%c4_53, %c0_54, %c0_55] : memref<32x32x128xf32, #tpu.memory_space<vmem>>, vector<1x32x128xf32>
    %124 = vector.shape_cast %123 : vector<1x32x128xf32> to vector<32x128xf32>
    %125 = vector.shape_cast %124 : vector<32x128xf32> to vector<1x32x128xf32>
    %126 = vector.broadcast %116 : vector<2x1x128xf32> to vector<2x32x128xf32>
    %127 = vector.broadcast %122 : vector<1x32x128xf32> to vector<2x32x128xf32>
    %128 = arith.mulf %126, %127 : vector<2x32x128xf32>
    %129 = arith.addf %105, %128 : vector<2x32x128xf32>
    %130 = vector.broadcast %119 : vector<2x1x128xf32> to vector<2x32x128xf32>
    %131 = vector.broadcast %125 : vector<1x32x128xf32> to vector<2x32x128xf32>
    %132 = arith.mulf %130, %131 : vector<2x32x128xf32>
    %133 = arith.subf %129, %132 : vector<2x32x128xf32>
    %134 = vector.broadcast %116 : vector<2x1x128xf32> to vector<2x32x128xf32>
    %135 = vector.broadcast %125 : vector<1x32x128xf32> to vector<2x32x128xf32>
    %136 = arith.mulf %134, %135 : vector<2x32x128xf32>
    %137 = arith.addf %113, %136 : vector<2x32x128xf32>
    %138 = vector.broadcast %119 : vector<2x1x128xf32> to vector<2x32x128xf32>
    %139 = vector.broadcast %122 : vector<1x32x128xf32> to vector<2x32x128xf32>
    %140 = arith.mulf %138, %139 : vector<2x32x128xf32>
    %141 = arith.addf %137, %140 : vector<2x32x128xf32>
    %c5 = arith.constant 5 : index
    %c0_56 = arith.constant 0 : index
    %c0_57 = arith.constant 0 : index
    %142 = vector.load %arg1[%c5, %c0_56, %c0_57] : memref<32x2x128xf32, #tpu.memory_space<vmem>>, vector<1x2x128xf32>
    %143 = vector.shape_cast %142 : vector<1x2x128xf32> to vector<2x128xf32>
    %144 = vector.shape_cast %143 : vector<2x128xf32> to vector<2x1x128xf32>
    %c5_58 = arith.constant 5 : index
    %c0_59 = arith.constant 0 : index
    %c0_60 = arith.constant 0 : index
    %145 = vector.load %arg2[%c5_58, %c0_59, %c0_60] : memref<32x2x128xf32, #tpu.memory_space<vmem>>, vector<1x2x128xf32>
    %146 = vector.shape_cast %145 : vector<1x2x128xf32> to vector<2x128xf32>
    %147 = vector.shape_cast %146 : vector<2x128xf32> to vector<2x1x128xf32>
    %c5_61 = arith.constant 5 : index
    %c0_62 = arith.constant 0 : index
    %c0_63 = arith.constant 0 : index
    %148 = vector.load %arg3[%c5_61, %c0_62, %c0_63] : memref<32x32x128xf32, #tpu.memory_space<vmem>>, vector<1x32x128xf32>
    %149 = vector.shape_cast %148 : vector<1x32x128xf32> to vector<32x128xf32>
    %150 = vector.shape_cast %149 : vector<32x128xf32> to vector<1x32x128xf32>
    %c5_64 = arith.constant 5 : index
    %c0_65 = arith.constant 0 : index
    %c0_66 = arith.constant 0 : index
    %151 = vector.load %arg4[%c5_64, %c0_65, %c0_66] : memref<32x32x128xf32, #tpu.memory_space<vmem>>, vector<1x32x128xf32>
    %152 = vector.shape_cast %151 : vector<1x32x128xf32> to vector<32x128xf32>
    %153 = vector.shape_cast %152 : vector<32x128xf32> to vector<1x32x128xf32>
    %154 = vector.broadcast %144 : vector<2x1x128xf32> to vector<2x32x128xf32>
    %155 = vector.broadcast %150 : vector<1x32x128xf32> to vector<2x32x128xf32>
    %156 = arith.mulf %154, %155 : vector<2x32x128xf32>
    %157 = arith.addf %133, %156 : vector<2x32x128xf32>
    %158 = vector.broadcast %147 : vector<2x1x128xf32> to vector<2x32x128xf32>
    %159 = vector.broadcast %153 : vector<1x32x128xf32> to vector<2x32x128xf32>
    %160 = arith.mulf %158, %159 : vector<2x32x128xf32>
    %161 = arith.subf %157, %160 : vector<2x32x128xf32>
    %162 = vector.broadcast %144 : vector<2x1x128xf32> to vector<2x32x128xf32>
    %163 = vector.broadcast %153 : vector<1x32x128xf32> to vector<2x32x128xf32>
    %164 = arith.mulf %162, %163 : vector<2x32x128xf32>
    %165 = arith.addf %141, %164 : vector<2x32x128xf32>
    %166 = vector.broadcast %147 : vector<2x1x128xf32> to vector<2x32x128xf32>
    %167 = vector.broadcast %150 : vector<1x32x128xf32> to vector<2x32x128xf32>
    %168 = arith.mulf %166, %167 : vector<2x32x128xf32>
    %169 = arith.addf %165, %168 : vector<2x32x128xf32>
    %c6 = arith.constant 6 : index
    %c0_67 = arith.constant 0 : index
    %c0_68 = arith.constant 0 : index
    %170 = vector.load %arg1[%c6, %c0_67, %c0_68] : memref<32x2x128xf32, #tpu.memory_space<vmem>>, vector<1x2x128xf32>
    %171 = vector.shape_cast %170 : vector<1x2x128xf32> to vector<2x128xf32>
    %172 = vector.shape_cast %171 : vector<2x128xf32> to vector<2x1x128xf32>
    %c6_69 = arith.constant 6 : index
    %c0_70 = arith.constant 0 : index
    %c0_71 = arith.constant 0 : index
    %173 = vector.load %arg2[%c6_69, %c0_70, %c0_71] : memref<32x2x128xf32, #tpu.memory_space<vmem>>, vector<1x2x128xf32>
    %174 = vector.shape_cast %173 : vector<1x2x128xf32> to vector<2x128xf32>
    %175 = vector.shape_cast %174 : vector<2x128xf32> to vector<2x1x128xf32>
    %c6_72 = arith.constant 6 : index
    %c0_73 = arith.constant 0 : index
    %c0_74 = arith.constant 0 : index
    %176 = vector.load %arg3[%c6_72, %c0_73, %c0_74] : memref<32x32x128xf32, #tpu.memory_space<vmem>>, vector<1x32x128xf32>
    %177 = vector.shape_cast %176 : vector<1x32x128xf32> to vector<32x128xf32>
    %178 = vector.shape_cast %177 : vector<32x128xf32> to vector<1x32x128xf32>
    %c6_75 = arith.constant 6 : index
    %c0_76 = arith.constant 0 : index
    %c0_77 = arith.constant 0 : index
    %179 = vector.load %arg4[%c6_75, %c0_76, %c0_77] : memref<32x32x128xf32, #tpu.memory_space<vmem>>, vector<1x32x128xf32>
    %180 = vector.shape_cast %179 : vector<1x32x128xf32> to vector<32x128xf32>
    %181 = vector.shape_cast %180 : vector<32x128xf32> to vector<1x32x128xf32>
    %182 = vector.broadcast %172 : vector<2x1x128xf32> to vector<2x32x128xf32>
    %183 = vector.broadcast %178 : vector<1x32x128xf32> to vector<2x32x128xf32>
    %184 = arith.mulf %182, %183 : vector<2x32x128xf32>
    %185 = arith.addf %161, %184 : vector<2x32x128xf32>
    %186 = vector.broadcast %175 : vector<2x1x128xf32> to vector<2x32x128xf32>
    %187 = vector.broadcast %181 : vector<1x32x128xf32> to vector<2x32x128xf32>
    %188 = arith.mulf %186, %187 : vector<2x32x128xf32>
    %189 = arith.subf %185, %188 : vector<2x32x128xf32>
    %190 = vector.broadcast %172 : vector<2x1x128xf32> to vector<2x32x128xf32>
    %191 = vector.broadcast %181 : vector<1x32x128xf32> to vector<2x32x128xf32>
    %192 = arith.mulf %190, %191 : vector<2x32x128xf32>
    %193 = arith.addf %169, %192 : vector<2x32x128xf32>
    %194 = vector.broadcast %175 : vector<2x1x128xf32> to vector<2x32x128xf32>
    %195 = vector.broadcast %178 : vector<1x32x128xf32> to vector<2x32x128xf32>
    %196 = arith.mulf %194, %195 : vector<2x32x128xf32>
    %197 = arith.addf %193, %196 : vector<2x32x128xf32>
    %c7 = arith.constant 7 : index
    %c0_78 = arith.constant 0 : index
    %c0_79 = arith.constant 0 : index
    %198 = vector.load %arg1[%c7, %c0_78, %c0_79] : memref<32x2x128xf32, #tpu.memory_space<vmem>>, vector<1x2x128xf32>
    %199 = vector.shape_cast %198 : vector<1x2x128xf32> to vector<2x128xf32>
    %200 = vector.shape_cast %199 : vector<2x128xf32> to vector<2x1x128xf32>
    %c7_80 = arith.constant 7 : index
    %c0_81 = arith.constant 0 : index
    %c0_82 = arith.constant 0 : index
    %201 = vector.load %arg2[%c7_80, %c0_81, %c0_82] : memref<32x2x128xf32, #tpu.memory_space<vmem>>, vector<1x2x128xf32>
    %202 = vector.shape_cast %201 : vector<1x2x128xf32> to vector<2x128xf32>
    %203 = vector.shape_cast %202 : vector<2x128xf32> to vector<2x1x128xf32>
    %c7_83 = arith.constant 7 : index
    %c0_84 = arith.constant 0 : index
    %c0_85 = arith.constant 0 : index
    %204 = vector.load %arg3[%c7_83, %c0_84, %c0_85] : memref<32x32x128xf32, #tpu.memory_space<vmem>>, vector<1x32x128xf32>
    %205 = vector.shape_cast %204 : vector<1x32x128xf32> to vector<32x128xf32>
    %206 = vector.shape_cast %205 : vector<32x128xf32> to vector<1x32x128xf32>
    %c7_86 = arith.constant 7 : index
    %c0_87 = arith.constant 0 : index
    %c0_88 = arith.constant 0 : index
    %207 = vector.load %arg4[%c7_86, %c0_87, %c0_88] : memref<32x32x128xf32, #tpu.memory_space<vmem>>, vector<1x32x128xf32>
    %208 = vector.shape_cast %207 : vector<1x32x128xf32> to vector<32x128xf32>
    %209 = vector.shape_cast %208 : vector<32x128xf32> to vector<1x32x128xf32>
    %210 = vector.broadcast %200 : vector<2x1x128xf32> to vector<2x32x128xf32>
    %211 = vector.broadcast %206 : vector<1x32x128xf32> to vector<2x32x128xf32>
    %212 = arith.mulf %210, %211 : vector<2x32x128xf32>
    %213 = arith.addf %189, %212 : vector<2x32x128xf32>
    %214 = vector.broadcast %203 : vector<2x1x128xf32> to vector<2x32x128xf32>
    %215 = vector.broadcast %209 : vector<1x32x128xf32> to vector<2x32x128xf32>
    %216 = arith.mulf %214, %215 : vector<2x32x128xf32>
    %217 = arith.subf %213, %216 : vector<2x32x128xf32>
    %218 = vector.broadcast %200 : vector<2x1x128xf32> to vector<2x32x128xf32>
    %219 = vector.broadcast %209 : vector<1x32x128xf32> to vector<2x32x128xf32>
    %220 = arith.mulf %218, %219 : vector<2x32x128xf32>
    %221 = arith.addf %197, %220 : vector<2x32x128xf32>
    %222 = vector.broadcast %203 : vector<2x1x128xf32> to vector<2x32x128xf32>
    %223 = vector.broadcast %206 : vector<1x32x128xf32> to vector<2x32x128xf32>
    %224 = arith.mulf %222, %223 : vector<2x32x128xf32>
    %225 = arith.addf %221, %224 : vector<2x32x128xf32>
    %c8 = arith.constant 8 : index
    %c0_89 = arith.constant 0 : index
    %c0_90 = arith.constant 0 : index
    %226 = vector.load %arg1[%c8, %c0_89, %c0_90] : memref<32x2x128xf32, #tpu.memory_space<vmem>>, vector<1x2x128xf32>
    %227 = vector.shape_cast %226 : vector<1x2x128xf32> to vector<2x128xf32>
    %228 = vector.shape_cast %227 : vector<2x128xf32> to vector<2x1x128xf32>
    %c8_91 = arith.constant 8 : index
    %c0_92 = arith.constant 0 : index
    %c0_93 = arith.constant 0 : index
    %229 = vector.load %arg2[%c8_91, %c0_92, %c0_93] : memref<32x2x128xf32, #tpu.memory_space<vmem>>, vector<1x2x128xf32>
    %230 = vector.shape_cast %229 : vector<1x2x128xf32> to vector<2x128xf32>
    %231 = vector.shape_cast %230 : vector<2x128xf32> to vector<2x1x128xf32>
    %c8_94 = arith.constant 8 : index
    %c0_95 = arith.constant 0 : index
    %c0_96 = arith.constant 0 : index
    %232 = vector.load %arg3[%c8_94, %c0_95, %c0_96] : memref<32x32x128xf32, #tpu.memory_space<vmem>>, vector<1x32x128xf32>
    %233 = vector.shape_cast %232 : vector<1x32x128xf32> to vector<32x128xf32>
    %234 = vector.shape_cast %233 : vector<32x128xf32> to vector<1x32x128xf32>
    %c8_97 = arith.constant 8 : index
    %c0_98 = arith.constant 0 : index
    %c0_99 = arith.constant 0 : index
    %235 = vector.load %arg4[%c8_97, %c0_98, %c0_99] : memref<32x32x128xf32, #tpu.memory_space<vmem>>, vector<1x32x128xf32>
    %236 = vector.shape_cast %235 : vector<1x32x128xf32> to vector<32x128xf32>
    %237 = vector.shape_cast %236 : vector<32x128xf32> to vector<1x32x128xf32>
    %238 = vector.broadcast %228 : vector<2x1x128xf32> to vector<2x32x128xf32>
    %239 = vector.broadcast %234 : vector<1x32x128xf32> to vector<2x32x128xf32>
    %240 = arith.mulf %238, %239 : vector<2x32x128xf32>
    %241 = arith.addf %217, %240 : vector<2x32x128xf32>
    %242 = vector.broadcast %231 : vector<2x1x128xf32> to vector<2x32x128xf32>
    %243 = vector.broadcast %237 : vector<1x32x128xf32> to vector<2x32x128xf32>
    %244 = arith.mulf %242, %243 : vector<2x32x128xf32>
    %245 = arith.subf %241, %244 : vector<2x32x128xf32>
    %246 = vector.broadcast %228 : vector<2x1x128xf32> to vector<2x32x128xf32>
    %247 = vector.broadcast %237 : vector<1x32x128xf32> to vector<2x32x128xf32>
    %248 = arith.mulf %246, %247 : vector<2x32x128xf32>
    %249 = arith.addf %225, %248 : vector<2x32x128xf32>
    %250 = vector.broadcast %231 : vector<2x1x128xf32> to vector<2x32x128xf32>
    %251 = vector.broadcast %234 : vector<1x32x128xf32> to vector<2x32x128xf32>
    %252 = arith.mulf %250, %251 : vector<2x32x128xf32>
    %253 = arith.addf %249, %252 : vector<2x32x128xf32>
    %c9 = arith.constant 9 : index
    %c0_100 = arith.constant 0 : index
    %c0_101 = arith.constant 0 : index
    %254 = vector.load %arg1[%c9, %c0_100, %c0_101] : memref<32x2x128xf32, #tpu.memory_space<vmem>>, vector<1x2x128xf32>
    %255 = vector.shape_cast %254 : vector<1x2x128xf32> to vector<2x128xf32>
    %256 = vector.shape_cast %255 : vector<2x128xf32> to vector<2x1x128xf32>
    %c9_102 = arith.constant 9 : index
    %c0_103 = arith.constant 0 : index
    %c0_104 = arith.constant 0 : index
    %257 = vector.load %arg2[%c9_102, %c0_103, %c0_104] : memref<32x2x128xf32, #tpu.memory_space<vmem>>, vector<1x2x128xf32>
    %258 = vector.shape_cast %257 : vector<1x2x128xf32> to vector<2x128xf32>
    %259 = vector.shape_cast %258 : vector<2x128xf32> to vector<2x1x128xf32>
    %c9_105 = arith.constant 9 : index
    %c0_106 = arith.constant 0 : index
    %c0_107 = arith.constant 0 : index
    %260 = vector.load %arg3[%c9_105, %c0_106, %c0_107] : memref<32x32x128xf32, #tpu.memory_space<vmem>>, vector<1x32x128xf32>
    %261 = vector.shape_cast %260 : vector<1x32x128xf32> to vector<32x128xf32>
    %262 = vector.shape_cast %261 : vector<32x128xf32> to vector<1x32x128xf32>
    %c9_108 = arith.constant 9 : index
    %c0_109 = arith.constant 0 : index
    %c0_110 = arith.constant 0 : index
    %263 = vector.load %arg4[%c9_108, %c0_109, %c0_110] : memref<32x32x128xf32, #tpu.memory_space<vmem>>, vector<1x32x128xf32>
    %264 = vector.shape_cast %263 : vector<1x32x128xf32> to vector<32x128xf32>
    %265 = vector.shape_cast %264 : vector<32x128xf32> to vector<1x32x128xf32>
    %266 = vector.broadcast %256 : vector<2x1x128xf32> to vector<2x32x128xf32>
    %267 = vector.broadcast %262 : vector<1x32x128xf32> to vector<2x32x128xf32>
    %268 = arith.mulf %266, %267 : vector<2x32x128xf32>
    %269 = arith.addf %245, %268 : vector<2x32x128xf32>
    %270 = vector.broadcast %259 : vector<2x1x128xf32> to vector<2x32x128xf32>
    %271 = vector.broadcast %265 : vector<1x32x128xf32> to vector<2x32x128xf32>
    %272 = arith.mulf %270, %271 : vector<2x32x128xf32>
    %273 = arith.subf %269, %272 : vector<2x32x128xf32>
    %274 = vector.broadcast %256 : vector<2x1x128xf32> to vector<2x32x128xf32>
    %275 = vector.broadcast %265 : vector<1x32x128xf32> to vector<2x32x128xf32>
    %276 = arith.mulf %274, %275 : vector<2x32x128xf32>
    %277 = arith.addf %253, %276 : vector<2x32x128xf32>
    %278 = vector.broadcast %259 : vector<2x1x128xf32> to vector<2x32x128xf32>
    %279 = vector.broadcast %262 : vector<1x32x128xf32> to vector<2x32x128xf32>
    %280 = arith.mulf %278, %279 : vector<2x32x128xf32>
    %281 = arith.addf %277, %280 : vector<2x32x128xf32>
    %c10 = arith.constant 10 : index
    %c0_111 = arith.constant 0 : index
    %c0_112 = arith.constant 0 : index
    %282 = vector.load %arg1[%c10, %c0_111, %c0_112] : memref<32x2x128xf32, #tpu.memory_space<vmem>>, vector<1x2x128xf32>
    %283 = vector.shape_cast %282 : vector<1x2x128xf32> to vector<2x128xf32>
    %284 = vector.shape_cast %283 : vector<2x128xf32> to vector<2x1x128xf32>
    %c10_113 = arith.constant 10 : index
    %c0_114 = arith.constant 0 : index
    %c0_115 = arith.constant 0 : index
    %285 = vector.load %arg2[%c10_113, %c0_114, %c0_115] : memref<32x2x128xf32, #tpu.memory_space<vmem>>, vector<1x2x128xf32>
    %286 = vector.shape_cast %285 : vector<1x2x128xf32> to vector<2x128xf32>
    %287 = vector.shape_cast %286 : vector<2x128xf32> to vector<2x1x128xf32>
    %c10_116 = arith.constant 10 : index
    %c0_117 = arith.constant 0 : index
    %c0_118 = arith.constant 0 : index
    %288 = vector.load %arg3[%c10_116, %c0_117, %c0_118] : memref<32x32x128xf32, #tpu.memory_space<vmem>>, vector<1x32x128xf32>
    %289 = vector.shape_cast %288 : vector<1x32x128xf32> to vector<32x128xf32>
    %290 = vector.shape_cast %289 : vector<32x128xf32> to vector<1x32x128xf32>
    %c10_119 = arith.constant 10 : index
    %c0_120 = arith.constant 0 : index
    %c0_121 = arith.constant 0 : index
    %291 = vector.load %arg4[%c10_119, %c0_120, %c0_121] : memref<32x32x128xf32, #tpu.memory_space<vmem>>, vector<1x32x128xf32>
    %292 = vector.shape_cast %291 : vector<1x32x128xf32> to vector<32x128xf32>
    %293 = vector.shape_cast %292 : vector<32x128xf32> to vector<1x32x128xf32>
    %294 = vector.broadcast %284 : vector<2x1x128xf32> to vector<2x32x128xf32>
    %295 = vector.broadcast %290 : vector<1x32x128xf32> to vector<2x32x128xf32>
    %296 = arith.mulf %294, %295 : vector<2x32x128xf32>
    %297 = arith.addf %273, %296 : vector<2x32x128xf32>
    %298 = vector.broadcast %287 : vector<2x1x128xf32> to vector<2x32x128xf32>
    %299 = vector.broadcast %293 : vector<1x32x128xf32> to vector<2x32x128xf32>
    %300 = arith.mulf %298, %299 : vector<2x32x128xf32>
    %301 = arith.subf %297, %300 : vector<2x32x128xf32>
    %302 = vector.broadcast %284 : vector<2x1x128xf32> to vector<2x32x128xf32>
    %303 = vector.broadcast %293 : vector<1x32x128xf32> to vector<2x32x128xf32>
    %304 = arith.mulf %302, %303 : vector<2x32x128xf32>
    %305 = arith.addf %281, %304 : vector<2x32x128xf32>
    %306 = vector.broadcast %287 : vector<2x1x128xf32> to vector<2x32x128xf32>
    %307 = vector.broadcast %290 : vector<1x32x128xf32> to vector<2x32x128xf32>
    %308 = arith.mulf %306, %307 : vector<2x32x128xf32>
    %309 = arith.addf %305, %308 : vector<2x32x128xf32>
    %c11 = arith.constant 11 : index
    %c0_122 = arith.constant 0 : index
    %c0_123 = arith.constant 0 : index
    %310 = vector.load %arg1[%c11, %c0_122, %c0_123] : memref<32x2x128xf32, #tpu.memory_space<vmem>>, vector<1x2x128xf32>
    %311 = vector.shape_cast %310 : vector<1x2x128xf32> to vector<2x128xf32>
    %312 = vector.shape_cast %311 : vector<2x128xf32> to vector<2x1x128xf32>
    %c11_124 = arith.constant 11 : index
    %c0_125 = arith.constant 0 : index
    %c0_126 = arith.constant 0 : index
    %313 = vector.load %arg2[%c11_124, %c0_125, %c0_126] : memref<32x2x128xf32, #tpu.memory_space<vmem>>, vector<1x2x128xf32>
    %314 = vector.shape_cast %313 : vector<1x2x128xf32> to vector<2x128xf32>
    %315 = vector.shape_cast %314 : vector<2x128xf32> to vector<2x1x128xf32>
    %c11_127 = arith.constant 11 : index
    %c0_128 = arith.constant 0 : index
    %c0_129 = arith.constant 0 : index
    %316 = vector.load %arg3[%c11_127, %c0_128, %c0_129] : memref<32x32x128xf32, #tpu.memory_space<vmem>>, vector<1x32x128xf32>
    %317 = vector.shape_cast %316 : vector<1x32x128xf32> to vector<32x128xf32>
    %318 = vector.shape_cast %317 : vector<32x128xf32> to vector<1x32x128xf32>
    %c11_130 = arith.constant 11 : index
    %c0_131 = arith.constant 0 : index
    %c0_132 = arith.constant 0 : index
    %319 = vector.load %arg4[%c11_130, %c0_131, %c0_132] : memref<32x32x128xf32, #tpu.memory_space<vmem>>, vector<1x32x128xf32>
    %320 = vector.shape_cast %319 : vector<1x32x128xf32> to vector<32x128xf32>
    %321 = vector.shape_cast %320 : vector<32x128xf32> to vector<1x32x128xf32>
    %322 = vector.broadcast %312 : vector<2x1x128xf32> to vector<2x32x128xf32>
    %323 = vector.broadcast %318 : vector<1x32x128xf32> to vector<2x32x128xf32>
    %324 = arith.mulf %322, %323 : vector<2x32x128xf32>
    %325 = arith.addf %301, %324 : vector<2x32x128xf32>
    %326 = vector.broadcast %315 : vector<2x1x128xf32> to vector<2x32x128xf32>
    %327 = vector.broadcast %321 : vector<1x32x128xf32> to vector<2x32x128xf32>
    %328 = arith.mulf %326, %327 : vector<2x32x128xf32>
    %329 = arith.subf %325, %328 : vector<2x32x128xf32>
    %330 = vector.broadcast %312 : vector<2x1x128xf32> to vector<2x32x128xf32>
    %331 = vector.broadcast %321 : vector<1x32x128xf32> to vector<2x32x128xf32>
    %332 = arith.mulf %330, %331 : vector<2x32x128xf32>
    %333 = arith.addf %309, %332 : vector<2x32x128xf32>
    %334 = vector.broadcast %315 : vector<2x1x128xf32> to vector<2x32x128xf32>
    %335 = vector.broadcast %318 : vector<1x32x128xf32> to vector<2x32x128xf32>
    %336 = arith.mulf %334, %335 : vector<2x32x128xf32>
    %337 = arith.addf %333, %336 : vector<2x32x128xf32>
    %c12 = arith.constant 12 : index
    %c0_133 = arith.constant 0 : index
    %c0_134 = arith.constant 0 : index
    %338 = vector.load %arg1[%c12, %c0_133, %c0_134] : memref<32x2x128xf32, #tpu.memory_space<vmem>>, vector<1x2x128xf32>
    %339 = vector.shape_cast %338 : vector<1x2x128xf32> to vector<2x128xf32>
    %340 = vector.shape_cast %339 : vector<2x128xf32> to vector<2x1x128xf32>
    %c12_135 = arith.constant 12 : index
    %c0_136 = arith.constant 0 : index
    %c0_137 = arith.constant 0 : index
    %341 = vector.load %arg2[%c12_135, %c0_136, %c0_137] : memref<32x2x128xf32, #tpu.memory_space<vmem>>, vector<1x2x128xf32>
    %342 = vector.shape_cast %341 : vector<1x2x128xf32> to vector<2x128xf32>
    %343 = vector.shape_cast %342 : vector<2x128xf32> to vector<2x1x128xf32>
    %c12_138 = arith.constant 12 : index
    %c0_139 = arith.constant 0 : index
    %c0_140 = arith.constant 0 : index
    %344 = vector.load %arg3[%c12_138, %c0_139, %c0_140] : memref<32x32x128xf32, #tpu.memory_space<vmem>>, vector<1x32x128xf32>
    %345 = vector.shape_cast %344 : vector<1x32x128xf32> to vector<32x128xf32>
    %346 = vector.shape_cast %345 : vector<32x128xf32> to vector<1x32x128xf32>
    %c12_141 = arith.constant 12 : index
    %c0_142 = arith.constant 0 : index
    %c0_143 = arith.constant 0 : index
    %347 = vector.load %arg4[%c12_141, %c0_142, %c0_143] : memref<32x32x128xf32, #tpu.memory_space<vmem>>, vector<1x32x128xf32>
    %348 = vector.shape_cast %347 : vector<1x32x128xf32> to vector<32x128xf32>
    %349 = vector.shape_cast %348 : vector<32x128xf32> to vector<1x32x128xf32>
    %350 = vector.broadcast %340 : vector<2x1x128xf32> to vector<2x32x128xf32>
    %351 = vector.broadcast %346 : vector<1x32x128xf32> to vector<2x32x128xf32>
    %352 = arith.mulf %350, %351 : vector<2x32x128xf32>
    %353 = arith.addf %329, %352 : vector<2x32x128xf32>
    %354 = vector.broadcast %343 : vector<2x1x128xf32> to vector<2x32x128xf32>
    %355 = vector.broadcast %349 : vector<1x32x128xf32> to vector<2x32x128xf32>
    %356 = arith.mulf %354, %355 : vector<2x32x128xf32>
    %357 = arith.subf %353, %356 : vector<2x32x128xf32>
    %358 = vector.broadcast %340 : vector<2x1x128xf32> to vector<2x32x128xf32>
    %359 = vector.broadcast %349 : vector<1x32x128xf32> to vector<2x32x128xf32>
    %360 = arith.mulf %358, %359 : vector<2x32x128xf32>
    %361 = arith.addf %337, %360 : vector<2x32x128xf32>
    %362 = vector.broadcast %343 : vector<2x1x128xf32> to vector<2x32x128xf32>
    %363 = vector.broadcast %346 : vector<1x32x128xf32> to vector<2x32x128xf32>
    %364 = arith.mulf %362, %363 : vector<2x32x128xf32>
    %365 = arith.addf %361, %364 : vector<2x32x128xf32>
    %c13 = arith.constant 13 : index
    %c0_144 = arith.constant 0 : index
    %c0_145 = arith.constant 0 : index
    %366 = vector.load %arg1[%c13, %c0_144, %c0_145] : memref<32x2x128xf32, #tpu.memory_space<vmem>>, vector<1x2x128xf32>
    %367 = vector.shape_cast %366 : vector<1x2x128xf32> to vector<2x128xf32>
    %368 = vector.shape_cast %367 : vector<2x128xf32> to vector<2x1x128xf32>
    %c13_146 = arith.constant 13 : index
    %c0_147 = arith.constant 0 : index
    %c0_148 = arith.constant 0 : index
    %369 = vector.load %arg2[%c13_146, %c0_147, %c0_148] : memref<32x2x128xf32, #tpu.memory_space<vmem>>, vector<1x2x128xf32>
    %370 = vector.shape_cast %369 : vector<1x2x128xf32> to vector<2x128xf32>
    %371 = vector.shape_cast %370 : vector<2x128xf32> to vector<2x1x128xf32>
    %c13_149 = arith.constant 13 : index
    %c0_150 = arith.constant 0 : index
    %c0_151 = arith.constant 0 : index
    %372 = vector.load %arg3[%c13_149, %c0_150, %c0_151] : memref<32x32x128xf32, #tpu.memory_space<vmem>>, vector<1x32x128xf32>
    %373 = vector.shape_cast %372 : vector<1x32x128xf32> to vector<32x128xf32>
    %374 = vector.shape_cast %373 : vector<32x128xf32> to vector<1x32x128xf32>
    %c13_152 = arith.constant 13 : index
    %c0_153 = arith.constant 0 : index
    %c0_154 = arith.constant 0 : index
    %375 = vector.load %arg4[%c13_152, %c0_153, %c0_154] : memref<32x32x128xf32, #tpu.memory_space<vmem>>, vector<1x32x128xf32>
    %376 = vector.shape_cast %375 : vector<1x32x128xf32> to vector<32x128xf32>
    %377 = vector.shape_cast %376 : vector<32x128xf32> to vector<1x32x128xf32>
    %378 = vector.broadcast %368 : vector<2x1x128xf32> to vector<2x32x128xf32>
    %379 = vector.broadcast %374 : vector<1x32x128xf32> to vector<2x32x128xf32>
    %380 = arith.mulf %378, %379 : vector<2x32x128xf32>
    %381 = arith.addf %357, %380 : vector<2x32x128xf32>
    %382 = vector.broadcast %371 : vector<2x1x128xf32> to vector<2x32x128xf32>
    %383 = vector.broadcast %377 : vector<1x32x128xf32> to vector<2x32x128xf32>
    %384 = arith.mulf %382, %383 : vector<2x32x128xf32>
    %385 = arith.subf %381, %384 : vector<2x32x128xf32>
    %386 = vector.broadcast %368 : vector<2x1x128xf32> to vector<2x32x128xf32>
    %387 = vector.broadcast %377 : vector<1x32x128xf32> to vector<2x32x128xf32>
    %388 = arith.mulf %386, %387 : vector<2x32x128xf32>
    %389 = arith.addf %365, %388 : vector<2x32x128xf32>
    %390 = vector.broadcast %371 : vector<2x1x128xf32> to vector<2x32x128xf32>
    %391 = vector.broadcast %374 : vector<1x32x128xf32> to vector<2x32x128xf32>
    %392 = arith.mulf %390, %391 : vector<2x32x128xf32>
    %393 = arith.addf %389, %392 : vector<2x32x128xf32>
    %c14 = arith.constant 14 : index
    %c0_155 = arith.constant 0 : index
    %c0_156 = arith.constant 0 : index
    %394 = vector.load %arg1[%c14, %c0_155, %c0_156] : memref<32x2x128xf32, #tpu.memory_space<vmem>>, vector<1x2x128xf32>
    %395 = vector.shape_cast %394 : vector<1x2x128xf32> to vector<2x128xf32>
    %396 = vector.shape_cast %395 : vector<2x128xf32> to vector<2x1x128xf32>
    %c14_157 = arith.constant 14 : index
    %c0_158 = arith.constant 0 : index
    %c0_159 = arith.constant 0 : index
    %397 = vector.load %arg2[%c14_157, %c0_158, %c0_159] : memref<32x2x128xf32, #tpu.memory_space<vmem>>, vector<1x2x128xf32>
    %398 = vector.shape_cast %397 : vector<1x2x128xf32> to vector<2x128xf32>
    %399 = vector.shape_cast %398 : vector<2x128xf32> to vector<2x1x128xf32>
    %c14_160 = arith.constant 14 : index
    %c0_161 = arith.constant 0 : index
    %c0_162 = arith.constant 0 : index
    %400 = vector.load %arg3[%c14_160, %c0_161, %c0_162] : memref<32x32x128xf32, #tpu.memory_space<vmem>>, vector<1x32x128xf32>
    %401 = vector.shape_cast %400 : vector<1x32x128xf32> to vector<32x128xf32>
    %402 = vector.shape_cast %401 : vector<32x128xf32> to vector<1x32x128xf32>
    %c14_163 = arith.constant 14 : index
    %c0_164 = arith.constant 0 : index
    %c0_165 = arith.constant 0 : index
    %403 = vector.load %arg4[%c14_163, %c0_164, %c0_165] : memref<32x32x128xf32, #tpu.memory_space<vmem>>, vector<1x32x128xf32>
    %404 = vector.shape_cast %403 : vector<1x32x128xf32> to vector<32x128xf32>
    %405 = vector.shape_cast %404 : vector<32x128xf32> to vector<1x32x128xf32>
    %406 = vector.broadcast %396 : vector<2x1x128xf32> to vector<2x32x128xf32>
    %407 = vector.broadcast %402 : vector<1x32x128xf32> to vector<2x32x128xf32>
    %408 = arith.mulf %406, %407 : vector<2x32x128xf32>
    %409 = arith.addf %385, %408 : vector<2x32x128xf32>
    %410 = vector.broadcast %399 : vector<2x1x128xf32> to vector<2x32x128xf32>
    %411 = vector.broadcast %405 : vector<1x32x128xf32> to vector<2x32x128xf32>
    %412 = arith.mulf %410, %411 : vector<2x32x128xf32>
    %413 = arith.subf %409, %412 : vector<2x32x128xf32>
    %414 = vector.broadcast %396 : vector<2x1x128xf32> to vector<2x32x128xf32>
    %415 = vector.broadcast %405 : vector<1x32x128xf32> to vector<2x32x128xf32>
    %416 = arith.mulf %414, %415 : vector<2x32x128xf32>
    %417 = arith.addf %393, %416 : vector<2x32x128xf32>
    %418 = vector.broadcast %399 : vector<2x1x128xf32> to vector<2x32x128xf32>
    %419 = vector.broadcast %402 : vector<1x32x128xf32> to vector<2x32x128xf32>
    %420 = arith.mulf %418, %419 : vector<2x32x128xf32>
    %421 = arith.addf %417, %420 : vector<2x32x128xf32>
    %c15 = arith.constant 15 : index
    %c0_166 = arith.constant 0 : index
    %c0_167 = arith.constant 0 : index
    %422 = vector.load %arg1[%c15, %c0_166, %c0_167] : memref<32x2x128xf32, #tpu.memory_space<vmem>>, vector<1x2x128xf32>
    %423 = vector.shape_cast %422 : vector<1x2x128xf32> to vector<2x128xf32>
    %424 = vector.shape_cast %423 : vector<2x128xf32> to vector<2x1x128xf32>
    %c15_168 = arith.constant 15 : index
    %c0_169 = arith.constant 0 : index
    %c0_170 = arith.constant 0 : index
    %425 = vector.load %arg2[%c15_168, %c0_169, %c0_170] : memref<32x2x128xf32, #tpu.memory_space<vmem>>, vector<1x2x128xf32>
    %426 = vector.shape_cast %425 : vector<1x2x128xf32> to vector<2x128xf32>
    %427 = vector.shape_cast %426 : vector<2x128xf32> to vector<2x1x128xf32>
    %c15_171 = arith.constant 15 : index
    %c0_172 = arith.constant 0 : index
    %c0_173 = arith.constant 0 : index
    %428 = vector.load %arg3[%c15_171, %c0_172, %c0_173] : memref<32x32x128xf32, #tpu.memory_space<vmem>>, vector<1x32x128xf32>
    %429 = vector.shape_cast %428 : vector<1x32x128xf32> to vector<32x128xf32>
    %430 = vector.shape_cast %429 : vector<32x128xf32> to vector<1x32x128xf32>
    %c15_174 = arith.constant 15 : index
    %c0_175 = arith.constant 0 : index
    %c0_176 = arith.constant 0 : index
    %431 = vector.load %arg4[%c15_174, %c0_175, %c0_176] : memref<32x32x128xf32, #tpu.memory_space<vmem>>, vector<1x32x128xf32>
    %432 = vector.shape_cast %431 : vector<1x32x128xf32> to vector<32x128xf32>
    %433 = vector.shape_cast %432 : vector<32x128xf32> to vector<1x32x128xf32>
    %434 = vector.broadcast %424 : vector<2x1x128xf32> to vector<2x32x128xf32>
    %435 = vector.broadcast %430 : vector<1x32x128xf32> to vector<2x32x128xf32>
    %436 = arith.mulf %434, %435 : vector<2x32x128xf32>
    %437 = arith.addf %413, %436 : vector<2x32x128xf32>
    %438 = vector.broadcast %427 : vector<2x1x128xf32> to vector<2x32x128xf32>
    %439 = vector.broadcast %433 : vector<1x32x128xf32> to vector<2x32x128xf32>
    %440 = arith.mulf %438, %439 : vector<2x32x128xf32>
    %441 = arith.subf %437, %440 : vector<2x32x128xf32>
    %442 = vector.broadcast %424 : vector<2x1x128xf32> to vector<2x32x128xf32>
    %443 = vector.broadcast %433 : vector<1x32x128xf32> to vector<2x32x128xf32>
    %444 = arith.mulf %442, %443 : vector<2x32x128xf32>
    %445 = arith.addf %421, %444 : vector<2x32x128xf32>
    %446 = vector.broadcast %427 : vector<2x1x128xf32> to vector<2x32x128xf32>
    %447 = vector.broadcast %430 : vector<1x32x128xf32> to vector<2x32x128xf32>
    %448 = arith.mulf %446, %447 : vector<2x32x128xf32>
    %449 = arith.addf %445, %448 : vector<2x32x128xf32>
    %c16 = arith.constant 16 : index
    %c0_177 = arith.constant 0 : index
    %c0_178 = arith.constant 0 : index
    %450 = vector.load %arg1[%c16, %c0_177, %c0_178] : memref<32x2x128xf32, #tpu.memory_space<vmem>>, vector<1x2x128xf32>
    %451 = vector.shape_cast %450 : vector<1x2x128xf32> to vector<2x128xf32>
    %452 = vector.shape_cast %451 : vector<2x128xf32> to vector<2x1x128xf32>
    %c16_179 = arith.constant 16 : index
    %c0_180 = arith.constant 0 : index
    %c0_181 = arith.constant 0 : index
    %453 = vector.load %arg2[%c16_179, %c0_180, %c0_181] : memref<32x2x128xf32, #tpu.memory_space<vmem>>, vector<1x2x128xf32>
    %454 = vector.shape_cast %453 : vector<1x2x128xf32> to vector<2x128xf32>
    %455 = vector.shape_cast %454 : vector<2x128xf32> to vector<2x1x128xf32>
    %c16_182 = arith.constant 16 : index
    %c0_183 = arith.constant 0 : index
    %c0_184 = arith.constant 0 : index
    %456 = vector.load %arg3[%c16_182, %c0_183, %c0_184] : memref<32x32x128xf32, #tpu.memory_space<vmem>>, vector<1x32x128xf32>
    %457 = vector.shape_cast %456 : vector<1x32x128xf32> to vector<32x128xf32>
    %458 = vector.shape_cast %457 : vector<32x128xf32> to vector<1x32x128xf32>
    %c16_185 = arith.constant 16 : index
    %c0_186 = arith.constant 0 : index
    %c0_187 = arith.constant 0 : index
    %459 = vector.load %arg4[%c16_185, %c0_186, %c0_187] : memref<32x32x128xf32, #tpu.memory_space<vmem>>, vector<1x32x128xf32>
    %460 = vector.shape_cast %459 : vector<1x32x128xf32> to vector<32x128xf32>
    %461 = vector.shape_cast %460 : vector<32x128xf32> to vector<1x32x128xf32>
    %462 = vector.broadcast %452 : vector<2x1x128xf32> to vector<2x32x128xf32>
    %463 = vector.broadcast %458 : vector<1x32x128xf32> to vector<2x32x128xf32>
    %464 = arith.mulf %462, %463 : vector<2x32x128xf32>
    %465 = arith.addf %441, %464 : vector<2x32x128xf32>
    %466 = vector.broadcast %455 : vector<2x1x128xf32> to vector<2x32x128xf32>
    %467 = vector.broadcast %461 : vector<1x32x128xf32> to vector<2x32x128xf32>
    %468 = arith.mulf %466, %467 : vector<2x32x128xf32>
    %469 = arith.subf %465, %468 : vector<2x32x128xf32>
    %470 = vector.broadcast %452 : vector<2x1x128xf32> to vector<2x32x128xf32>
    %471 = vector.broadcast %461 : vector<1x32x128xf32> to vector<2x32x128xf32>
    %472 = arith.mulf %470, %471 : vector<2x32x128xf32>
    %473 = arith.addf %449, %472 : vector<2x32x128xf32>
    %474 = vector.broadcast %455 : vector<2x1x128xf32> to vector<2x32x128xf32>
    %475 = vector.broadcast %458 : vector<1x32x128xf32> to vector<2x32x128xf32>
    %476 = arith.mulf %474, %475 : vector<2x32x128xf32>
    %477 = arith.addf %473, %476 : vector<2x32x128xf32>
    %c17 = arith.constant 17 : index
    %c0_188 = arith.constant 0 : index
    %c0_189 = arith.constant 0 : index
    %478 = vector.load %arg1[%c17, %c0_188, %c0_189] : memref<32x2x128xf32, #tpu.memory_space<vmem>>, vector<1x2x128xf32>
    %479 = vector.shape_cast %478 : vector<1x2x128xf32> to vector<2x128xf32>
    %480 = vector.shape_cast %479 : vector<2x128xf32> to vector<2x1x128xf32>
    %c17_190 = arith.constant 17 : index
    %c0_191 = arith.constant 0 : index
    %c0_192 = arith.constant 0 : index
    %481 = vector.load %arg2[%c17_190, %c0_191, %c0_192] : memref<32x2x128xf32, #tpu.memory_space<vmem>>, vector<1x2x128xf32>
    %482 = vector.shape_cast %481 : vector<1x2x128xf32> to vector<2x128xf32>
    %483 = vector.shape_cast %482 : vector<2x128xf32> to vector<2x1x128xf32>
    %c17_193 = arith.constant 17 : index
    %c0_194 = arith.constant 0 : index
    %c0_195 = arith.constant 0 : index
    %484 = vector.load %arg3[%c17_193, %c0_194, %c0_195] : memref<32x32x128xf32, #tpu.memory_space<vmem>>, vector<1x32x128xf32>
    %485 = vector.shape_cast %484 : vector<1x32x128xf32> to vector<32x128xf32>
    %486 = vector.shape_cast %485 : vector<32x128xf32> to vector<1x32x128xf32>
    %c17_196 = arith.constant 17 : index
    %c0_197 = arith.constant 0 : index
    %c0_198 = arith.constant 0 : index
    %487 = vector.load %arg4[%c17_196, %c0_197, %c0_198] : memref<32x32x128xf32, #tpu.memory_space<vmem>>, vector<1x32x128xf32>
    %488 = vector.shape_cast %487 : vector<1x32x128xf32> to vector<32x128xf32>
    %489 = vector.shape_cast %488 : vector<32x128xf32> to vector<1x32x128xf32>
    %490 = vector.broadcast %480 : vector<2x1x128xf32> to vector<2x32x128xf32>
    %491 = vector.broadcast %486 : vector<1x32x128xf32> to vector<2x32x128xf32>
    %492 = arith.mulf %490, %491 : vector<2x32x128xf32>
    %493 = arith.addf %469, %492 : vector<2x32x128xf32>
    %494 = vector.broadcast %483 : vector<2x1x128xf32> to vector<2x32x128xf32>
    %495 = vector.broadcast %489 : vector<1x32x128xf32> to vector<2x32x128xf32>
    %496 = arith.mulf %494, %495 : vector<2x32x128xf32>
    %497 = arith.subf %493, %496 : vector<2x32x128xf32>
    %498 = vector.broadcast %480 : vector<2x1x128xf32> to vector<2x32x128xf32>
    %499 = vector.broadcast %489 : vector<1x32x128xf32> to vector<2x32x128xf32>
    %500 = arith.mulf %498, %499 : vector<2x32x128xf32>
    %501 = arith.addf %477, %500 : vector<2x32x128xf32>
    %502 = vector.broadcast %483 : vector<2x1x128xf32> to vector<2x32x128xf32>
    %503 = vector.broadcast %486 : vector<1x32x128xf32> to vector<2x32x128xf32>
    %504 = arith.mulf %502, %503 : vector<2x32x128xf32>
    %505 = arith.addf %501, %504 : vector<2x32x128xf32>
    %c18 = arith.constant 18 : index
    %c0_199 = arith.constant 0 : index
    %c0_200 = arith.constant 0 : index
    %506 = vector.load %arg1[%c18, %c0_199, %c0_200] : memref<32x2x128xf32, #tpu.memory_space<vmem>>, vector<1x2x128xf32>
    %507 = vector.shape_cast %506 : vector<1x2x128xf32> to vector<2x128xf32>
    %508 = vector.shape_cast %507 : vector<2x128xf32> to vector<2x1x128xf32>
    %c18_201 = arith.constant 18 : index
    %c0_202 = arith.constant 0 : index
    %c0_203 = arith.constant 0 : index
    %509 = vector.load %arg2[%c18_201, %c0_202, %c0_203] : memref<32x2x128xf32, #tpu.memory_space<vmem>>, vector<1x2x128xf32>
    %510 = vector.shape_cast %509 : vector<1x2x128xf32> to vector<2x128xf32>
    %511 = vector.shape_cast %510 : vector<2x128xf32> to vector<2x1x128xf32>
    %c18_204 = arith.constant 18 : index
    %c0_205 = arith.constant 0 : index
    %c0_206 = arith.constant 0 : index
    %512 = vector.load %arg3[%c18_204, %c0_205, %c0_206] : memref<32x32x128xf32, #tpu.memory_space<vmem>>, vector<1x32x128xf32>
    %513 = vector.shape_cast %512 : vector<1x32x128xf32> to vector<32x128xf32>
    %514 = vector.shape_cast %513 : vector<32x128xf32> to vector<1x32x128xf32>
    %c18_207 = arith.constant 18 : index
    %c0_208 = arith.constant 0 : index
    %c0_209 = arith.constant 0 : index
    %515 = vector.load %arg4[%c18_207, %c0_208, %c0_209] : memref<32x32x128xf32, #tpu.memory_space<vmem>>, vector<1x32x128xf32>
    %516 = vector.shape_cast %515 : vector<1x32x128xf32> to vector<32x128xf32>
    %517 = vector.shape_cast %516 : vector<32x128xf32> to vector<1x32x128xf32>
    %518 = vector.broadcast %508 : vector<2x1x128xf32> to vector<2x32x128xf32>
    %519 = vector.broadcast %514 : vector<1x32x128xf32> to vector<2x32x128xf32>
    %520 = arith.mulf %518, %519 : vector<2x32x128xf32>
    %521 = arith.addf %497, %520 : vector<2x32x128xf32>
    %522 = vector.broadcast %511 : vector<2x1x128xf32> to vector<2x32x128xf32>
    %523 = vector.broadcast %517 : vector<1x32x128xf32> to vector<2x32x128xf32>
    %524 = arith.mulf %522, %523 : vector<2x32x128xf32>
    %525 = arith.subf %521, %524 : vector<2x32x128xf32>
    %526 = vector.broadcast %508 : vector<2x1x128xf32> to vector<2x32x128xf32>
    %527 = vector.broadcast %517 : vector<1x32x128xf32> to vector<2x32x128xf32>
    %528 = arith.mulf %526, %527 : vector<2x32x128xf32>
    %529 = arith.addf %505, %528 : vector<2x32x128xf32>
    %530 = vector.broadcast %511 : vector<2x1x128xf32> to vector<2x32x128xf32>
    %531 = vector.broadcast %514 : vector<1x32x128xf32> to vector<2x32x128xf32>
    %532 = arith.mulf %530, %531 : vector<2x32x128xf32>
    %533 = arith.addf %529, %532 : vector<2x32x128xf32>
    %c19 = arith.constant 19 : index
    %c0_210 = arith.constant 0 : index
    %c0_211 = arith.constant 0 : index
    %534 = vector.load %arg1[%c19, %c0_210, %c0_211] : memref<32x2x128xf32, #tpu.memory_space<vmem>>, vector<1x2x128xf32>
    %535 = vector.shape_cast %534 : vector<1x2x128xf32> to vector<2x128xf32>
    %536 = vector.shape_cast %535 : vector<2x128xf32> to vector<2x1x128xf32>
    %c19_212 = arith.constant 19 : index
    %c0_213 = arith.constant 0 : index
    %c0_214 = arith.constant 0 : index
    %537 = vector.load %arg2[%c19_212, %c0_213, %c0_214] : memref<32x2x128xf32, #tpu.memory_space<vmem>>, vector<1x2x128xf32>
    %538 = vector.shape_cast %537 : vector<1x2x128xf32> to vector<2x128xf32>
    %539 = vector.shape_cast %538 : vector<2x128xf32> to vector<2x1x128xf32>
    %c19_215 = arith.constant 19 : index
    %c0_216 = arith.constant 0 : index
    %c0_217 = arith.constant 0 : index
    %540 = vector.load %arg3[%c19_215, %c0_216, %c0_217] : memref<32x32x128xf32, #tpu.memory_space<vmem>>, vector<1x32x128xf32>
    %541 = vector.shape_cast %540 : vector<1x32x128xf32> to vector<32x128xf32>
    %542 = vector.shape_cast %541 : vector<32x128xf32> to vector<1x32x128xf32>
    %c19_218 = arith.constant 19 : index
    %c0_219 = arith.constant 0 : index
    %c0_220 = arith.constant 0 : index
    %543 = vector.load %arg4[%c19_218, %c0_219, %c0_220] : memref<32x32x128xf32, #tpu.memory_space<vmem>>, vector<1x32x128xf32>
    %544 = vector.shape_cast %543 : vector<1x32x128xf32> to vector<32x128xf32>
    %545 = vector.shape_cast %544 : vector<32x128xf32> to vector<1x32x128xf32>
    %546 = vector.broadcast %536 : vector<2x1x128xf32> to vector<2x32x128xf32>
    %547 = vector.broadcast %542 : vector<1x32x128xf32> to vector<2x32x128xf32>
    %548 = arith.mulf %546, %547 : vector<2x32x128xf32>
    %549 = arith.addf %525, %548 : vector<2x32x128xf32>
    %550 = vector.broadcast %539 : vector<2x1x128xf32> to vector<2x32x128xf32>
    %551 = vector.broadcast %545 : vector<1x32x128xf32> to vector<2x32x128xf32>
    %552 = arith.mulf %550, %551 : vector<2x32x128xf32>
    %553 = arith.subf %549, %552 : vector<2x32x128xf32>
    %554 = vector.broadcast %536 : vector<2x1x128xf32> to vector<2x32x128xf32>
    %555 = vector.broadcast %545 : vector<1x32x128xf32> to vector<2x32x128xf32>
    %556 = arith.mulf %554, %555 : vector<2x32x128xf32>
    %557 = arith.addf %533, %556 : vector<2x32x128xf32>
    %558 = vector.broadcast %539 : vector<2x1x128xf32> to vector<2x32x128xf32>
    %559 = vector.broadcast %542 : vector<1x32x128xf32> to vector<2x32x128xf32>
    %560 = arith.mulf %558, %559 : vector<2x32x128xf32>
    %561 = arith.addf %557, %560 : vector<2x32x128xf32>
    %c20 = arith.constant 20 : index
    %c0_221 = arith.constant 0 : index
    %c0_222 = arith.constant 0 : index
    %562 = vector.load %arg1[%c20, %c0_221, %c0_222] : memref<32x2x128xf32, #tpu.memory_space<vmem>>, vector<1x2x128xf32>
    %563 = vector.shape_cast %562 : vector<1x2x128xf32> to vector<2x128xf32>
    %564 = vector.shape_cast %563 : vector<2x128xf32> to vector<2x1x128xf32>
    %c20_223 = arith.constant 20 : index
    %c0_224 = arith.constant 0 : index
    %c0_225 = arith.constant 0 : index
    %565 = vector.load %arg2[%c20_223, %c0_224, %c0_225] : memref<32x2x128xf32, #tpu.memory_space<vmem>>, vector<1x2x128xf32>
    %566 = vector.shape_cast %565 : vector<1x2x128xf32> to vector<2x128xf32>
    %567 = vector.shape_cast %566 : vector<2x128xf32> to vector<2x1x128xf32>
    %c20_226 = arith.constant 20 : index
    %c0_227 = arith.constant 0 : index
    %c0_228 = arith.constant 0 : index
    %568 = vector.load %arg3[%c20_226, %c0_227, %c0_228] : memref<32x32x128xf32, #tpu.memory_space<vmem>>, vector<1x32x128xf32>
    %569 = vector.shape_cast %568 : vector<1x32x128xf32> to vector<32x128xf32>
    %570 = vector.shape_cast %569 : vector<32x128xf32> to vector<1x32x128xf32>
    %c20_229 = arith.constant 20 : index
    %c0_230 = arith.constant 0 : index
    %c0_231 = arith.constant 0 : index
    %571 = vector.load %arg4[%c20_229, %c0_230, %c0_231] : memref<32x32x128xf32, #tpu.memory_space<vmem>>, vector<1x32x128xf32>
    %572 = vector.shape_cast %571 : vector<1x32x128xf32> to vector<32x128xf32>
    %573 = vector.shape_cast %572 : vector<32x128xf32> to vector<1x32x128xf32>
    %574 = vector.broadcast %564 : vector<2x1x128xf32> to vector<2x32x128xf32>
    %575 = vector.broadcast %570 : vector<1x32x128xf32> to vector<2x32x128xf32>
    %576 = arith.mulf %574, %575 : vector<2x32x128xf32>
    %577 = arith.addf %553, %576 : vector<2x32x128xf32>
    %578 = vector.broadcast %567 : vector<2x1x128xf32> to vector<2x32x128xf32>
    %579 = vector.broadcast %573 : vector<1x32x128xf32> to vector<2x32x128xf32>
    %580 = arith.mulf %578, %579 : vector<2x32x128xf32>
    %581 = arith.subf %577, %580 : vector<2x32x128xf32>
    %582 = vector.broadcast %564 : vector<2x1x128xf32> to vector<2x32x128xf32>
    %583 = vector.broadcast %573 : vector<1x32x128xf32> to vector<2x32x128xf32>
    %584 = arith.mulf %582, %583 : vector<2x32x128xf32>
    %585 = arith.addf %561, %584 : vector<2x32x128xf32>
    %586 = vector.broadcast %567 : vector<2x1x128xf32> to vector<2x32x128xf32>
    %587 = vector.broadcast %570 : vector<1x32x128xf32> to vector<2x32x128xf32>
    %588 = arith.mulf %586, %587 : vector<2x32x128xf32>
    %589 = arith.addf %585, %588 : vector<2x32x128xf32>
    %c21 = arith.constant 21 : index
    %c0_232 = arith.constant 0 : index
    %c0_233 = arith.constant 0 : index
    %590 = vector.load %arg1[%c21, %c0_232, %c0_233] : memref<32x2x128xf32, #tpu.memory_space<vmem>>, vector<1x2x128xf32>
    %591 = vector.shape_cast %590 : vector<1x2x128xf32> to vector<2x128xf32>
    %592 = vector.shape_cast %591 : vector<2x128xf32> to vector<2x1x128xf32>
    %c21_234 = arith.constant 21 : index
    %c0_235 = arith.constant 0 : index
    %c0_236 = arith.constant 0 : index
    %593 = vector.load %arg2[%c21_234, %c0_235, %c0_236] : memref<32x2x128xf32, #tpu.memory_space<vmem>>, vector<1x2x128xf32>
    %594 = vector.shape_cast %593 : vector<1x2x128xf32> to vector<2x128xf32>
    %595 = vector.shape_cast %594 : vector<2x128xf32> to vector<2x1x128xf32>
    %c21_237 = arith.constant 21 : index
    %c0_238 = arith.constant 0 : index
    %c0_239 = arith.constant 0 : index
    %596 = vector.load %arg3[%c21_237, %c0_238, %c0_239] : memref<32x32x128xf32, #tpu.memory_space<vmem>>, vector<1x32x128xf32>
    %597 = vector.shape_cast %596 : vector<1x32x128xf32> to vector<32x128xf32>
    %598 = vector.shape_cast %597 : vector<32x128xf32> to vector<1x32x128xf32>
    %c21_240 = arith.constant 21 : index
    %c0_241 = arith.constant 0 : index
    %c0_242 = arith.constant 0 : index
    %599 = vector.load %arg4[%c21_240, %c0_241, %c0_242] : memref<32x32x128xf32, #tpu.memory_space<vmem>>, vector<1x32x128xf32>
    %600 = vector.shape_cast %599 : vector<1x32x128xf32> to vector<32x128xf32>
    %601 = vector.shape_cast %600 : vector<32x128xf32> to vector<1x32x128xf32>
    %602 = vector.broadcast %592 : vector<2x1x128xf32> to vector<2x32x128xf32>
    %603 = vector.broadcast %598 : vector<1x32x128xf32> to vector<2x32x128xf32>
    %604 = arith.mulf %602, %603 : vector<2x32x128xf32>
    %605 = arith.addf %581, %604 : vector<2x32x128xf32>
    %606 = vector.broadcast %595 : vector<2x1x128xf32> to vector<2x32x128xf32>
    %607 = vector.broadcast %601 : vector<1x32x128xf32> to vector<2x32x128xf32>
    %608 = arith.mulf %606, %607 : vector<2x32x128xf32>
    %609 = arith.subf %605, %608 : vector<2x32x128xf32>
    %610 = vector.broadcast %592 : vector<2x1x128xf32> to vector<2x32x128xf32>
    %611 = vector.broadcast %601 : vector<1x32x128xf32> to vector<2x32x128xf32>
    %612 = arith.mulf %610, %611 : vector<2x32x128xf32>
    %613 = arith.addf %589, %612 : vector<2x32x128xf32>
    %614 = vector.broadcast %595 : vector<2x1x128xf32> to vector<2x32x128xf32>
    %615 = vector.broadcast %598 : vector<1x32x128xf32> to vector<2x32x128xf32>
    %616 = arith.mulf %614, %615 : vector<2x32x128xf32>
    %617 = arith.addf %613, %616 : vector<2x32x128xf32>
    %c22 = arith.constant 22 : index
    %c0_243 = arith.constant 0 : index
    %c0_244 = arith.constant 0 : index
    %618 = vector.load %arg1[%c22, %c0_243, %c0_244] : memref<32x2x128xf32, #tpu.memory_space<vmem>>, vector<1x2x128xf32>
    %619 = vector.shape_cast %618 : vector<1x2x128xf32> to vector<2x128xf32>
    %620 = vector.shape_cast %619 : vector<2x128xf32> to vector<2x1x128xf32>
    %c22_245 = arith.constant 22 : index
    %c0_246 = arith.constant 0 : index
    %c0_247 = arith.constant 0 : index
    %621 = vector.load %arg2[%c22_245, %c0_246, %c0_247] : memref<32x2x128xf32, #tpu.memory_space<vmem>>, vector<1x2x128xf32>
    %622 = vector.shape_cast %621 : vector<1x2x128xf32> to vector<2x128xf32>
    %623 = vector.shape_cast %622 : vector<2x128xf32> to vector<2x1x128xf32>
    %c22_248 = arith.constant 22 : index
    %c0_249 = arith.constant 0 : index
    %c0_250 = arith.constant 0 : index
    %624 = vector.load %arg3[%c22_248, %c0_249, %c0_250] : memref<32x32x128xf32, #tpu.memory_space<vmem>>, vector<1x32x128xf32>
    %625 = vector.shape_cast %624 : vector<1x32x128xf32> to vector<32x128xf32>
    %626 = vector.shape_cast %625 : vector<32x128xf32> to vector<1x32x128xf32>
    %c22_251 = arith.constant 22 : index
    %c0_252 = arith.constant 0 : index
    %c0_253 = arith.constant 0 : index
    %627 = vector.load %arg4[%c22_251, %c0_252, %c0_253] : memref<32x32x128xf32, #tpu.memory_space<vmem>>, vector<1x32x128xf32>
    %628 = vector.shape_cast %627 : vector<1x32x128xf32> to vector<32x128xf32>
    %629 = vector.shape_cast %628 : vector<32x128xf32> to vector<1x32x128xf32>
    %630 = vector.broadcast %620 : vector<2x1x128xf32> to vector<2x32x128xf32>
    %631 = vector.broadcast %626 : vector<1x32x128xf32> to vector<2x32x128xf32>
    %632 = arith.mulf %630, %631 : vector<2x32x128xf32>
    %633 = arith.addf %609, %632 : vector<2x32x128xf32>
    %634 = vector.broadcast %623 : vector<2x1x128xf32> to vector<2x32x128xf32>
    %635 = vector.broadcast %629 : vector<1x32x128xf32> to vector<2x32x128xf32>
    %636 = arith.mulf %634, %635 : vector<2x32x128xf32>
    %637 = arith.subf %633, %636 : vector<2x32x128xf32>
    %638 = vector.broadcast %620 : vector<2x1x128xf32> to vector<2x32x128xf32>
    %639 = vector.broadcast %629 : vector<1x32x128xf32> to vector<2x32x128xf32>
    %640 = arith.mulf %638, %639 : vector<2x32x128xf32>
    %641 = arith.addf %617, %640 : vector<2x32x128xf32>
    %642 = vector.broadcast %623 : vector<2x1x128xf32> to vector<2x32x128xf32>
    %643 = vector.broadcast %626 : vector<1x32x128xf32> to vector<2x32x128xf32>
    %644 = arith.mulf %642, %643 : vector<2x32x128xf32>
    %645 = arith.addf %641, %644 : vector<2x32x128xf32>
    %c23 = arith.constant 23 : index
    %c0_254 = arith.constant 0 : index
    %c0_255 = arith.constant 0 : index
    %646 = vector.load %arg1[%c23, %c0_254, %c0_255] : memref<32x2x128xf32, #tpu.memory_space<vmem>>, vector<1x2x128xf32>
    %647 = vector.shape_cast %646 : vector<1x2x128xf32> to vector<2x128xf32>
    %648 = vector.shape_cast %647 : vector<2x128xf32> to vector<2x1x128xf32>
    %c23_256 = arith.constant 23 : index
    %c0_257 = arith.constant 0 : index
    %c0_258 = arith.constant 0 : index
    %649 = vector.load %arg2[%c23_256, %c0_257, %c0_258] : memref<32x2x128xf32, #tpu.memory_space<vmem>>, vector<1x2x128xf32>
    %650 = vector.shape_cast %649 : vector<1x2x128xf32> to vector<2x128xf32>
    %651 = vector.shape_cast %650 : vector<2x128xf32> to vector<2x1x128xf32>
    %c23_259 = arith.constant 23 : index
    %c0_260 = arith.constant 0 : index
    %c0_261 = arith.constant 0 : index
    %652 = vector.load %arg3[%c23_259, %c0_260, %c0_261] : memref<32x32x128xf32, #tpu.memory_space<vmem>>, vector<1x32x128xf32>
    %653 = vector.shape_cast %652 : vector<1x32x128xf32> to vector<32x128xf32>
    %654 = vector.shape_cast %653 : vector<32x128xf32> to vector<1x32x128xf32>
    %c23_262 = arith.constant 23 : index
    %c0_263 = arith.constant 0 : index
    %c0_264 = arith.constant 0 : index
    %655 = vector.load %arg4[%c23_262, %c0_263, %c0_264] : memref<32x32x128xf32, #tpu.memory_space<vmem>>, vector<1x32x128xf32>
    %656 = vector.shape_cast %655 : vector<1x32x128xf32> to vector<32x128xf32>
    %657 = vector.shape_cast %656 : vector<32x128xf32> to vector<1x32x128xf32>
    %658 = vector.broadcast %648 : vector<2x1x128xf32> to vector<2x32x128xf32>
    %659 = vector.broadcast %654 : vector<1x32x128xf32> to vector<2x32x128xf32>
    %660 = arith.mulf %658, %659 : vector<2x32x128xf32>
    %661 = arith.addf %637, %660 : vector<2x32x128xf32>
    %662 = vector.broadcast %651 : vector<2x1x128xf32> to vector<2x32x128xf32>
    %663 = vector.broadcast %657 : vector<1x32x128xf32> to vector<2x32x128xf32>
    %664 = arith.mulf %662, %663 : vector<2x32x128xf32>
    %665 = arith.subf %661, %664 : vector<2x32x128xf32>
    %666 = vector.broadcast %648 : vector<2x1x128xf32> to vector<2x32x128xf32>
    %667 = vector.broadcast %657 : vector<1x32x128xf32> to vector<2x32x128xf32>
    %668 = arith.mulf %666, %667 : vector<2x32x128xf32>
    %669 = arith.addf %645, %668 : vector<2x32x128xf32>
    %670 = vector.broadcast %651 : vector<2x1x128xf32> to vector<2x32x128xf32>
    %671 = vector.broadcast %654 : vector<1x32x128xf32> to vector<2x32x128xf32>
    %672 = arith.mulf %670, %671 : vector<2x32x128xf32>
    %673 = arith.addf %669, %672 : vector<2x32x128xf32>
    %c24 = arith.constant 24 : index
    %c0_265 = arith.constant 0 : index
    %c0_266 = arith.constant 0 : index
    %674 = vector.load %arg1[%c24, %c0_265, %c0_266] : memref<32x2x128xf32, #tpu.memory_space<vmem>>, vector<1x2x128xf32>
    %675 = vector.shape_cast %674 : vector<1x2x128xf32> to vector<2x128xf32>
    %676 = vector.shape_cast %675 : vector<2x128xf32> to vector<2x1x128xf32>
    %c24_267 = arith.constant 24 : index
    %c0_268 = arith.constant 0 : index
    %c0_269 = arith.constant 0 : index
    %677 = vector.load %arg2[%c24_267, %c0_268, %c0_269] : memref<32x2x128xf32, #tpu.memory_space<vmem>>, vector<1x2x128xf32>
    %678 = vector.shape_cast %677 : vector<1x2x128xf32> to vector<2x128xf32>
    %679 = vector.shape_cast %678 : vector<2x128xf32> to vector<2x1x128xf32>
    %c24_270 = arith.constant 24 : index
    %c0_271 = arith.constant 0 : index
    %c0_272 = arith.constant 0 : index
    %680 = vector.load %arg3[%c24_270, %c0_271, %c0_272] : memref<32x32x128xf32, #tpu.memory_space<vmem>>, vector<1x32x128xf32>
    %681 = vector.shape_cast %680 : vector<1x32x128xf32> to vector<32x128xf32>
    %682 = vector.shape_cast %681 : vector<32x128xf32> to vector<1x32x128xf32>
    %c24_273 = arith.constant 24 : index
    %c0_274 = arith.constant 0 : index
    %c0_275 = arith.constant 0 : index
    %683 = vector.load %arg4[%c24_273, %c0_274, %c0_275] : memref<32x32x128xf32, #tpu.memory_space<vmem>>, vector<1x32x128xf32>
    %684 = vector.shape_cast %683 : vector<1x32x128xf32> to vector<32x128xf32>
    %685 = vector.shape_cast %684 : vector<32x128xf32> to vector<1x32x128xf32>
    %686 = vector.broadcast %676 : vector<2x1x128xf32> to vector<2x32x128xf32>
    %687 = vector.broadcast %682 : vector<1x32x128xf32> to vector<2x32x128xf32>
    %688 = arith.mulf %686, %687 : vector<2x32x128xf32>
    %689 = arith.addf %665, %688 : vector<2x32x128xf32>
    %690 = vector.broadcast %679 : vector<2x1x128xf32> to vector<2x32x128xf32>
    %691 = vector.broadcast %685 : vector<1x32x128xf32> to vector<2x32x128xf32>
    %692 = arith.mulf %690, %691 : vector<2x32x128xf32>
    %693 = arith.subf %689, %692 : vector<2x32x128xf32>
    %694 = vector.broadcast %676 : vector<2x1x128xf32> to vector<2x32x128xf32>
    %695 = vector.broadcast %685 : vector<1x32x128xf32> to vector<2x32x128xf32>
    %696 = arith.mulf %694, %695 : vector<2x32x128xf32>
    %697 = arith.addf %673, %696 : vector<2x32x128xf32>
    %698 = vector.broadcast %679 : vector<2x1x128xf32> to vector<2x32x128xf32>
    %699 = vector.broadcast %682 : vector<1x32x128xf32> to vector<2x32x128xf32>
    %700 = arith.mulf %698, %699 : vector<2x32x128xf32>
    %701 = arith.addf %697, %700 : vector<2x32x128xf32>
    %c25 = arith.constant 25 : index
    %c0_276 = arith.constant 0 : index
    %c0_277 = arith.constant 0 : index
    %702 = vector.load %arg1[%c25, %c0_276, %c0_277] : memref<32x2x128xf32, #tpu.memory_space<vmem>>, vector<1x2x128xf32>
    %703 = vector.shape_cast %702 : vector<1x2x128xf32> to vector<2x128xf32>
    %704 = vector.shape_cast %703 : vector<2x128xf32> to vector<2x1x128xf32>
    %c25_278 = arith.constant 25 : index
    %c0_279 = arith.constant 0 : index
    %c0_280 = arith.constant 0 : index
    %705 = vector.load %arg2[%c25_278, %c0_279, %c0_280] : memref<32x2x128xf32, #tpu.memory_space<vmem>>, vector<1x2x128xf32>
    %706 = vector.shape_cast %705 : vector<1x2x128xf32> to vector<2x128xf32>
    %707 = vector.shape_cast %706 : vector<2x128xf32> to vector<2x1x128xf32>
    %c25_281 = arith.constant 25 : index
    %c0_282 = arith.constant 0 : index
    %c0_283 = arith.constant 0 : index
    %708 = vector.load %arg3[%c25_281, %c0_282, %c0_283] : memref<32x32x128xf32, #tpu.memory_space<vmem>>, vector<1x32x128xf32>
    %709 = vector.shape_cast %708 : vector<1x32x128xf32> to vector<32x128xf32>
    %710 = vector.shape_cast %709 : vector<32x128xf32> to vector<1x32x128xf32>
    %c25_284 = arith.constant 25 : index
    %c0_285 = arith.constant 0 : index
    %c0_286 = arith.constant 0 : index
    %711 = vector.load %arg4[%c25_284, %c0_285, %c0_286] : memref<32x32x128xf32, #tpu.memory_space<vmem>>, vector<1x32x128xf32>
    %712 = vector.shape_cast %711 : vector<1x32x128xf32> to vector<32x128xf32>
    %713 = vector.shape_cast %712 : vector<32x128xf32> to vector<1x32x128xf32>
    %714 = vector.broadcast %704 : vector<2x1x128xf32> to vector<2x32x128xf32>
    %715 = vector.broadcast %710 : vector<1x32x128xf32> to vector<2x32x128xf32>
    %716 = arith.mulf %714, %715 : vector<2x32x128xf32>
    %717 = arith.addf %693, %716 : vector<2x32x128xf32>
    %718 = vector.broadcast %707 : vector<2x1x128xf32> to vector<2x32x128xf32>
    %719 = vector.broadcast %713 : vector<1x32x128xf32> to vector<2x32x128xf32>
    %720 = arith.mulf %718, %719 : vector<2x32x128xf32>
    %721 = arith.subf %717, %720 : vector<2x32x128xf32>
    %722 = vector.broadcast %704 : vector<2x1x128xf32> to vector<2x32x128xf32>
    %723 = vector.broadcast %713 : vector<1x32x128xf32> to vector<2x32x128xf32>
    %724 = arith.mulf %722, %723 : vector<2x32x128xf32>
    %725 = arith.addf %701, %724 : vector<2x32x128xf32>
    %726 = vector.broadcast %707 : vector<2x1x128xf32> to vector<2x32x128xf32>
    %727 = vector.broadcast %710 : vector<1x32x128xf32> to vector<2x32x128xf32>
    %728 = arith.mulf %726, %727 : vector<2x32x128xf32>
    %729 = arith.addf %725, %728 : vector<2x32x128xf32>
    %c26 = arith.constant 26 : index
    %c0_287 = arith.constant 0 : index
    %c0_288 = arith.constant 0 : index
    %730 = vector.load %arg1[%c26, %c0_287, %c0_288] : memref<32x2x128xf32, #tpu.memory_space<vmem>>, vector<1x2x128xf32>
    %731 = vector.shape_cast %730 : vector<1x2x128xf32> to vector<2x128xf32>
    %732 = vector.shape_cast %731 : vector<2x128xf32> to vector<2x1x128xf32>
    %c26_289 = arith.constant 26 : index
    %c0_290 = arith.constant 0 : index
    %c0_291 = arith.constant 0 : index
    %733 = vector.load %arg2[%c26_289, %c0_290, %c0_291] : memref<32x2x128xf32, #tpu.memory_space<vmem>>, vector<1x2x128xf32>
    %734 = vector.shape_cast %733 : vector<1x2x128xf32> to vector<2x128xf32>
    %735 = vector.shape_cast %734 : vector<2x128xf32> to vector<2x1x128xf32>
    %c26_292 = arith.constant 26 : index
    %c0_293 = arith.constant 0 : index
    %c0_294 = arith.constant 0 : index
    %736 = vector.load %arg3[%c26_292, %c0_293, %c0_294] : memref<32x32x128xf32, #tpu.memory_space<vmem>>, vector<1x32x128xf32>
    %737 = vector.shape_cast %736 : vector<1x32x128xf32> to vector<32x128xf32>
    %738 = vector.shape_cast %737 : vector<32x128xf32> to vector<1x32x128xf32>
    %c26_295 = arith.constant 26 : index
    %c0_296 = arith.constant 0 : index
    %c0_297 = arith.constant 0 : index
    %739 = vector.load %arg4[%c26_295, %c0_296, %c0_297] : memref<32x32x128xf32, #tpu.memory_space<vmem>>, vector<1x32x128xf32>
    %740 = vector.shape_cast %739 : vector<1x32x128xf32> to vector<32x128xf32>
    %741 = vector.shape_cast %740 : vector<32x128xf32> to vector<1x32x128xf32>
    %742 = vector.broadcast %732 : vector<2x1x128xf32> to vector<2x32x128xf32>
    %743 = vector.broadcast %738 : vector<1x32x128xf32> to vector<2x32x128xf32>
    %744 = arith.mulf %742, %743 : vector<2x32x128xf32>
    %745 = arith.addf %721, %744 : vector<2x32x128xf32>
    %746 = vector.broadcast %735 : vector<2x1x128xf32> to vector<2x32x128xf32>
    %747 = vector.broadcast %741 : vector<1x32x128xf32> to vector<2x32x128xf32>
    %748 = arith.mulf %746, %747 : vector<2x32x128xf32>
    %749 = arith.subf %745, %748 : vector<2x32x128xf32>
    %750 = vector.broadcast %732 : vector<2x1x128xf32> to vector<2x32x128xf32>
    %751 = vector.broadcast %741 : vector<1x32x128xf32> to vector<2x32x128xf32>
    %752 = arith.mulf %750, %751 : vector<2x32x128xf32>
    %753 = arith.addf %729, %752 : vector<2x32x128xf32>
    %754 = vector.broadcast %735 : vector<2x1x128xf32> to vector<2x32x128xf32>
    %755 = vector.broadcast %738 : vector<1x32x128xf32> to vector<2x32x128xf32>
    %756 = arith.mulf %754, %755 : vector<2x32x128xf32>
    %757 = arith.addf %753, %756 : vector<2x32x128xf32>
    %c27 = arith.constant 27 : index
    %c0_298 = arith.constant 0 : index
    %c0_299 = arith.constant 0 : index
    %758 = vector.load %arg1[%c27, %c0_298, %c0_299] : memref<32x2x128xf32, #tpu.memory_space<vmem>>, vector<1x2x128xf32>
    %759 = vector.shape_cast %758 : vector<1x2x128xf32> to vector<2x128xf32>
    %760 = vector.shape_cast %759 : vector<2x128xf32> to vector<2x1x128xf32>
    %c27_300 = arith.constant 27 : index
    %c0_301 = arith.constant 0 : index
    %c0_302 = arith.constant 0 : index
    %761 = vector.load %arg2[%c27_300, %c0_301, %c0_302] : memref<32x2x128xf32, #tpu.memory_space<vmem>>, vector<1x2x128xf32>
    %762 = vector.shape_cast %761 : vector<1x2x128xf32> to vector<2x128xf32>
    %763 = vector.shape_cast %762 : vector<2x128xf32> to vector<2x1x128xf32>
    %c27_303 = arith.constant 27 : index
    %c0_304 = arith.constant 0 : index
    %c0_305 = arith.constant 0 : index
    %764 = vector.load %arg3[%c27_303, %c0_304, %c0_305] : memref<32x32x128xf32, #tpu.memory_space<vmem>>, vector<1x32x128xf32>
    %765 = vector.shape_cast %764 : vector<1x32x128xf32> to vector<32x128xf32>
    %766 = vector.shape_cast %765 : vector<32x128xf32> to vector<1x32x128xf32>
    %c27_306 = arith.constant 27 : index
    %c0_307 = arith.constant 0 : index
    %c0_308 = arith.constant 0 : index
    %767 = vector.load %arg4[%c27_306, %c0_307, %c0_308] : memref<32x32x128xf32, #tpu.memory_space<vmem>>, vector<1x32x128xf32>
    %768 = vector.shape_cast %767 : vector<1x32x128xf32> to vector<32x128xf32>
    %769 = vector.shape_cast %768 : vector<32x128xf32> to vector<1x32x128xf32>
    %770 = vector.broadcast %760 : vector<2x1x128xf32> to vector<2x32x128xf32>
    %771 = vector.broadcast %766 : vector<1x32x128xf32> to vector<2x32x128xf32>
    %772 = arith.mulf %770, %771 : vector<2x32x128xf32>
    %773 = arith.addf %749, %772 : vector<2x32x128xf32>
    %774 = vector.broadcast %763 : vector<2x1x128xf32> to vector<2x32x128xf32>
    %775 = vector.broadcast %769 : vector<1x32x128xf32> to vector<2x32x128xf32>
    %776 = arith.mulf %774, %775 : vector<2x32x128xf32>
    %777 = arith.subf %773, %776 : vector<2x32x128xf32>
    %778 = vector.broadcast %760 : vector<2x1x128xf32> to vector<2x32x128xf32>
    %779 = vector.broadcast %769 : vector<1x32x128xf32> to vector<2x32x128xf32>
    %780 = arith.mulf %778, %779 : vector<2x32x128xf32>
    %781 = arith.addf %757, %780 : vector<2x32x128xf32>
    %782 = vector.broadcast %763 : vector<2x1x128xf32> to vector<2x32x128xf32>
    %783 = vector.broadcast %766 : vector<1x32x128xf32> to vector<2x32x128xf32>
    %784 = arith.mulf %782, %783 : vector<2x32x128xf32>
    %785 = arith.addf %781, %784 : vector<2x32x128xf32>
    %c28 = arith.constant 28 : index
    %c0_309 = arith.constant 0 : index
    %c0_310 = arith.constant 0 : index
    %786 = vector.load %arg1[%c28, %c0_309, %c0_310] : memref<32x2x128xf32, #tpu.memory_space<vmem>>, vector<1x2x128xf32>
    %787 = vector.shape_cast %786 : vector<1x2x128xf32> to vector<2x128xf32>
    %788 = vector.shape_cast %787 : vector<2x128xf32> to vector<2x1x128xf32>
    %c28_311 = arith.constant 28 : index
    %c0_312 = arith.constant 0 : index
    %c0_313 = arith.constant 0 : index
    %789 = vector.load %arg2[%c28_311, %c0_312, %c0_313] : memref<32x2x128xf32, #tpu.memory_space<vmem>>, vector<1x2x128xf32>
    %790 = vector.shape_cast %789 : vector<1x2x128xf32> to vector<2x128xf32>
    %791 = vector.shape_cast %790 : vector<2x128xf32> to vector<2x1x128xf32>
    %c28_314 = arith.constant 28 : index
    %c0_315 = arith.constant 0 : index
    %c0_316 = arith.constant 0 : index
    %792 = vector.load %arg3[%c28_314, %c0_315, %c0_316] : memref<32x32x128xf32, #tpu.memory_space<vmem>>, vector<1x32x128xf32>
    %793 = vector.shape_cast %792 : vector<1x32x128xf32> to vector<32x128xf32>
    %794 = vector.shape_cast %793 : vector<32x128xf32> to vector<1x32x128xf32>
    %c28_317 = arith.constant 28 : index
    %c0_318 = arith.constant 0 : index
    %c0_319 = arith.constant 0 : index
    %795 = vector.load %arg4[%c28_317, %c0_318, %c0_319] : memref<32x32x128xf32, #tpu.memory_space<vmem>>, vector<1x32x128xf32>
    %796 = vector.shape_cast %795 : vector<1x32x128xf32> to vector<32x128xf32>
    %797 = vector.shape_cast %796 : vector<32x128xf32> to vector<1x32x128xf32>
    %798 = vector.broadcast %788 : vector<2x1x128xf32> to vector<2x32x128xf32>
    %799 = vector.broadcast %794 : vector<1x32x128xf32> to vector<2x32x128xf32>
    %800 = arith.mulf %798, %799 : vector<2x32x128xf32>
    %801 = arith.addf %777, %800 : vector<2x32x128xf32>
    %802 = vector.broadcast %791 : vector<2x1x128xf32> to vector<2x32x128xf32>
    %803 = vector.broadcast %797 : vector<1x32x128xf32> to vector<2x32x128xf32>
    %804 = arith.mulf %802, %803 : vector<2x32x128xf32>
    %805 = arith.subf %801, %804 : vector<2x32x128xf32>
    %806 = vector.broadcast %788 : vector<2x1x128xf32> to vector<2x32x128xf32>
    %807 = vector.broadcast %797 : vector<1x32x128xf32> to vector<2x32x128xf32>
    %808 = arith.mulf %806, %807 : vector<2x32x128xf32>
    %809 = arith.addf %785, %808 : vector<2x32x128xf32>
    %810 = vector.broadcast %791 : vector<2x1x128xf32> to vector<2x32x128xf32>
    %811 = vector.broadcast %794 : vector<1x32x128xf32> to vector<2x32x128xf32>
    %812 = arith.mulf %810, %811 : vector<2x32x128xf32>
    %813 = arith.addf %809, %812 : vector<2x32x128xf32>
    %c29 = arith.constant 29 : index
    %c0_320 = arith.constant 0 : index
    %c0_321 = arith.constant 0 : index
    %814 = vector.load %arg1[%c29, %c0_320, %c0_321] : memref<32x2x128xf32, #tpu.memory_space<vmem>>, vector<1x2x128xf32>
    %815 = vector.shape_cast %814 : vector<1x2x128xf32> to vector<2x128xf32>
    %816 = vector.shape_cast %815 : vector<2x128xf32> to vector<2x1x128xf32>
    %c29_322 = arith.constant 29 : index
    %c0_323 = arith.constant 0 : index
    %c0_324 = arith.constant 0 : index
    %817 = vector.load %arg2[%c29_322, %c0_323, %c0_324] : memref<32x2x128xf32, #tpu.memory_space<vmem>>, vector<1x2x128xf32>
    %818 = vector.shape_cast %817 : vector<1x2x128xf32> to vector<2x128xf32>
    %819 = vector.shape_cast %818 : vector<2x128xf32> to vector<2x1x128xf32>
    %c29_325 = arith.constant 29 : index
    %c0_326 = arith.constant 0 : index
    %c0_327 = arith.constant 0 : index
    %820 = vector.load %arg3[%c29_325, %c0_326, %c0_327] : memref<32x32x128xf32, #tpu.memory_space<vmem>>, vector<1x32x128xf32>
    %821 = vector.shape_cast %820 : vector<1x32x128xf32> to vector<32x128xf32>
    %822 = vector.shape_cast %821 : vector<32x128xf32> to vector<1x32x128xf32>
    %c29_328 = arith.constant 29 : index
    %c0_329 = arith.constant 0 : index
    %c0_330 = arith.constant 0 : index
    %823 = vector.load %arg4[%c29_328, %c0_329, %c0_330] : memref<32x32x128xf32, #tpu.memory_space<vmem>>, vector<1x32x128xf32>
    %824 = vector.shape_cast %823 : vector<1x32x128xf32> to vector<32x128xf32>
    %825 = vector.shape_cast %824 : vector<32x128xf32> to vector<1x32x128xf32>
    %826 = vector.broadcast %816 : vector<2x1x128xf32> to vector<2x32x128xf32>
    %827 = vector.broadcast %822 : vector<1x32x128xf32> to vector<2x32x128xf32>
    %828 = arith.mulf %826, %827 : vector<2x32x128xf32>
    %829 = arith.addf %805, %828 : vector<2x32x128xf32>
    %830 = vector.broadcast %819 : vector<2x1x128xf32> to vector<2x32x128xf32>
    %831 = vector.broadcast %825 : vector<1x32x128xf32> to vector<2x32x128xf32>
    %832 = arith.mulf %830, %831 : vector<2x32x128xf32>
    %833 = arith.subf %829, %832 : vector<2x32x128xf32>
    %834 = vector.broadcast %816 : vector<2x1x128xf32> to vector<2x32x128xf32>
    %835 = vector.broadcast %825 : vector<1x32x128xf32> to vector<2x32x128xf32>
    %836 = arith.mulf %834, %835 : vector<2x32x128xf32>
    %837 = arith.addf %813, %836 : vector<2x32x128xf32>
    %838 = vector.broadcast %819 : vector<2x1x128xf32> to vector<2x32x128xf32>
    %839 = vector.broadcast %822 : vector<1x32x128xf32> to vector<2x32x128xf32>
    %840 = arith.mulf %838, %839 : vector<2x32x128xf32>
    %841 = arith.addf %837, %840 : vector<2x32x128xf32>
    %c30 = arith.constant 30 : index
    %c0_331 = arith.constant 0 : index
    %c0_332 = arith.constant 0 : index
    %842 = vector.load %arg1[%c30, %c0_331, %c0_332] : memref<32x2x128xf32, #tpu.memory_space<vmem>>, vector<1x2x128xf32>
    %843 = vector.shape_cast %842 : vector<1x2x128xf32> to vector<2x128xf32>
    %844 = vector.shape_cast %843 : vector<2x128xf32> to vector<2x1x128xf32>
    %c30_333 = arith.constant 30 : index
    %c0_334 = arith.constant 0 : index
    %c0_335 = arith.constant 0 : index
    %845 = vector.load %arg2[%c30_333, %c0_334, %c0_335] : memref<32x2x128xf32, #tpu.memory_space<vmem>>, vector<1x2x128xf32>
    %846 = vector.shape_cast %845 : vector<1x2x128xf32> to vector<2x128xf32>
    %847 = vector.shape_cast %846 : vector<2x128xf32> to vector<2x1x128xf32>
    %c30_336 = arith.constant 30 : index
    %c0_337 = arith.constant 0 : index
    %c0_338 = arith.constant 0 : index
    %848 = vector.load %arg3[%c30_336, %c0_337, %c0_338] : memref<32x32x128xf32, #tpu.memory_space<vmem>>, vector<1x32x128xf32>
    %849 = vector.shape_cast %848 : vector<1x32x128xf32> to vector<32x128xf32>
    %850 = vector.shape_cast %849 : vector<32x128xf32> to vector<1x32x128xf32>
    %c30_339 = arith.constant 30 : index
    %c0_340 = arith.constant 0 : index
    %c0_341 = arith.constant 0 : index
    %851 = vector.load %arg4[%c30_339, %c0_340, %c0_341] : memref<32x32x128xf32, #tpu.memory_space<vmem>>, vector<1x32x128xf32>
    %852 = vector.shape_cast %851 : vector<1x32x128xf32> to vector<32x128xf32>
    %853 = vector.shape_cast %852 : vector<32x128xf32> to vector<1x32x128xf32>
    %854 = vector.broadcast %844 : vector<2x1x128xf32> to vector<2x32x128xf32>
    %855 = vector.broadcast %850 : vector<1x32x128xf32> to vector<2x32x128xf32>
    %856 = arith.mulf %854, %855 : vector<2x32x128xf32>
    %857 = arith.addf %833, %856 : vector<2x32x128xf32>
    %858 = vector.broadcast %847 : vector<2x1x128xf32> to vector<2x32x128xf32>
    %859 = vector.broadcast %853 : vector<1x32x128xf32> to vector<2x32x128xf32>
    %860 = arith.mulf %858, %859 : vector<2x32x128xf32>
    %861 = arith.subf %857, %860 : vector<2x32x128xf32>
    %862 = vector.broadcast %844 : vector<2x1x128xf32> to vector<2x32x128xf32>
    %863 = vector.broadcast %853 : vector<1x32x128xf32> to vector<2x32x128xf32>
    %864 = arith.mulf %862, %863 : vector<2x32x128xf32>
    %865 = arith.addf %841, %864 : vector<2x32x128xf32>
    %866 = vector.broadcast %847 : vector<2x1x128xf32> to vector<2x32x128xf32>
    %867 = vector.broadcast %850 : vector<1x32x128xf32> to vector<2x32x128xf32>
    %868 = arith.mulf %866, %867 : vector<2x32x128xf32>
    %869 = arith.addf %865, %868 : vector<2x32x128xf32>
    %c31 = arith.constant 31 : index
    %c0_342 = arith.constant 0 : index
    %c0_343 = arith.constant 0 : index
    %870 = vector.load %arg1[%c31, %c0_342, %c0_343] : memref<32x2x128xf32, #tpu.memory_space<vmem>>, vector<1x2x128xf32>
    %871 = vector.shape_cast %870 : vector<1x2x128xf32> to vector<2x128xf32>
    %872 = vector.shape_cast %871 : vector<2x128xf32> to vector<2x1x128xf32>
    %c31_344 = arith.constant 31 : index
    %c0_345 = arith.constant 0 : index
    %c0_346 = arith.constant 0 : index
    %873 = vector.load %arg2[%c31_344, %c0_345, %c0_346] : memref<32x2x128xf32, #tpu.memory_space<vmem>>, vector<1x2x128xf32>
    %874 = vector.shape_cast %873 : vector<1x2x128xf32> to vector<2x128xf32>
    %875 = vector.shape_cast %874 : vector<2x128xf32> to vector<2x1x128xf32>
    %c31_347 = arith.constant 31 : index
    %c0_348 = arith.constant 0 : index
    %c0_349 = arith.constant 0 : index
    %876 = vector.load %arg3[%c31_347, %c0_348, %c0_349] : memref<32x32x128xf32, #tpu.memory_space<vmem>>, vector<1x32x128xf32>
    %877 = vector.shape_cast %876 : vector<1x32x128xf32> to vector<32x128xf32>
    %878 = vector.shape_cast %877 : vector<32x128xf32> to vector<1x32x128xf32>
    %c31_350 = arith.constant 31 : index
    %c0_351 = arith.constant 0 : index
    %c0_352 = arith.constant 0 : index
    %879 = vector.load %arg4[%c31_350, %c0_351, %c0_352] : memref<32x32x128xf32, #tpu.memory_space<vmem>>, vector<1x32x128xf32>
    %880 = vector.shape_cast %879 : vector<1x32x128xf32> to vector<32x128xf32>
    %881 = vector.shape_cast %880 : vector<32x128xf32> to vector<1x32x128xf32>
    %882 = vector.broadcast %872 : vector<2x1x128xf32> to vector<2x32x128xf32>
    %883 = vector.broadcast %878 : vector<1x32x128xf32> to vector<2x32x128xf32>
    %884 = arith.mulf %882, %883 : vector<2x32x128xf32>
    %885 = arith.addf %861, %884 : vector<2x32x128xf32>
    %886 = vector.broadcast %875 : vector<2x1x128xf32> to vector<2x32x128xf32>
    %887 = vector.broadcast %881 : vector<1x32x128xf32> to vector<2x32x128xf32>
    %888 = arith.mulf %886, %887 : vector<2x32x128xf32>
    %889 = arith.subf %885, %888 : vector<2x32x128xf32>
    %890 = vector.broadcast %872 : vector<2x1x128xf32> to vector<2x32x128xf32>
    %891 = vector.broadcast %881 : vector<1x32x128xf32> to vector<2x32x128xf32>
    %892 = arith.mulf %890, %891 : vector<2x32x128xf32>
    %893 = arith.addf %869, %892 : vector<2x32x128xf32>
    %894 = vector.broadcast %875 : vector<2x1x128xf32> to vector<2x32x128xf32>
    %895 = vector.broadcast %878 : vector<1x32x128xf32> to vector<2x32x128xf32>
    %896 = arith.mulf %894, %895 : vector<2x32x128xf32>
    %897 = arith.addf %893, %896 : vector<2x32x128xf32>
    %c0_353 = arith.constant 0 : index
    %c0_354 = arith.constant 0 : index
    %c0_355 = arith.constant 0 : index
    %898 = vector.load %arg5[%c0_353, %c0_354, %c0_355] : memref<2x32x128xf32, #tpu.memory_space<vmem>>, vector<2x32x128xf32>
    tpu.vector_store %arg5[%c0_353, %c0_354, %c0_355], %889 {strides = array<i32>} : memref<2x32x128xf32, #tpu.memory_space<vmem>>, vector<2x32x128xf32>,
    %c0_356 = arith.constant 0 : index
    %c0_357 = arith.constant 0 : index
    %c0_358 = arith.constant 0 : index
    %899 = vector.load %arg6[%c0_356, %c0_357, %c0_358] : memref<2x32x128xf32, #tpu.memory_space<vmem>>, vector<2x32x128xf32>
    tpu.vector_store %arg6[%c0_356, %c0_357, %c0_358], %897 {strides = array<i32>} : memref<2x32x128xf32, #tpu.memory_space<vmem>>, vector<2x32x128xf32>,
    return
  }
  func.func @transform_0(%arg0: i32) -> (i32, i32, i32) {
    %c0_i32 = arith.constant 0 : i32
    %c0_i32_0 = arith.constant 0 : i32
    %c0_i32_1 = arith.constant 0 : i32
    return %c0_i32, %c0_i32_0, %arg0 : i32, i32, i32
  }
  func.func @transform_1(%arg0: i32) -> (i32, i32, i32) {
    %c0_i32 = arith.constant 0 : i32
    %c0_i32_0 = arith.constant 0 : i32
    %c0_i32_1 = arith.constant 0 : i32
    return %c0_i32, %c0_i32_0, %arg0 : i32, i32, i32
  }
  func.func @transform_2(%arg0: i32) -> (i32, i32, i32) {
    %c0_i32 = arith.constant 0 : i32
    %c0_i32_0 = arith.constant 0 : i32
    %c0_i32_1 = arith.constant 0 : i32
    return %c0_i32, %c0_i32_0, %arg0 : i32, i32, i32
  }
  func.func @transform_3(%arg0: i32) -> (i32, i32, i32) {
    %c0_i32 = arith.constant 0 : i32
    %c0_i32_0 = arith.constant 0 : i32
    %c0_i32_1 = arith.constant 0 : i32
    return %c0_i32, %c0_i32_0, %arg0 : i32, i32, i32
  }
  func.func @transform_4(%arg0: i32) -> (i32, i32, i32) {
    %c0_i32 = arith.constant 0 : i32
    %c0_i32_0 = arith.constant 0 : i32
    %c0_i32_1 = arith.constant 0 : i32
    return %c0_i32, %c0_i32_0, %arg0 : i32, i32, i32
  }
  func.func @transform_5(%arg0: i32) -> (i32, i32, i32) {
    %c0_i32 = arith.constant 0 : i32
    %c0_i32_0 = arith.constant 0 : i32
    %c0_i32_1 = arith.constant 0 : i32
    return %c0_i32, %c0_i32_0, %arg0 : i32, i32, i32
  }
}

module attributes {stable_mosaic.version = 11 : i64} {
  func.func @_pw_residual_kernel(%arg0: i32, %arg1: memref<256x32xf32, #tpu.memory_space<vmem>>, %arg2: memref<256x32xf32, #tpu.memory_space<vmem>>, %arg3: memref<32x32xf32, #tpu.memory_space<vmem>>, %arg4: memref<1x32xf32, #tpu.memory_space<vmem>>, %arg5: memref<256x32xf32, #tpu.memory_space<vmem>>) attributes {dimension_semantics = [#tpu.dimension_semantics<parallel>], iteration_bounds = array<i64: 2>, scalar_prefetch = 0 : i64, scratch_operands = 0 : i64, tpu.core_type = #tpu.core_type<tc>, window_params = [{transform_indices = @transform_0, window_bounds = array<i64: 256, 32>}, {transform_indices = @transform_1, window_bounds = array<i64: 256, 32>}, {pipeline_mode = #tpu.pipeline_mode<synchronous>, transform_indices = @transform_2, window_bounds = array<i64: 32, 32>}, {pipeline_mode = #tpu.pipeline_mode<synchronous>, transform_indices = @transform_3, window_bounds = array<i64: 1, 32>}, {transform_indices = @transform_4, window_bounds = array<i64: 256, 32>}]} {
    %c0 = arith.constant 0 : index
    %c0_0 = arith.constant 0 : index
    %0 = vector.load %arg1[%c0, %c0_0] : memref<256x32xf32, #tpu.memory_space<vmem>>, vector<256x32xf32>
    %c0_1 = arith.constant 0 : index
    %c0_2 = arith.constant 0 : index
    %1 = vector.load %arg3[%c0_1, %c0_2] : memref<32x32xf32, #tpu.memory_space<vmem>>, vector<32x32xf32>
    %cst = arith.constant dense<0.000000e+00> : vector<256x32xf32>
    %2 = tpu.matmul %0, %1, %cst {dimension_numbers = #tpu.dot_dimension_numbers<[1], [0], [0], [1], [0, 0, 1, 1], [], []>} : vector<256x32xf32>, vector<32x32xf32>, vector<256x32xf32> -> vector<256x32xf32>
    %c0_3 = arith.constant 0 : index
    %c0_4 = arith.constant 0 : index
    %3 = vector.load %arg4[%c0_3, %c0_4] : memref<1x32xf32, #tpu.memory_space<vmem>>, vector<1x32xf32>
    %4 = vector.broadcast %3 : vector<1x32xf32> to vector<256x32xf32>
    %5 = arith.addf %2, %4 : vector<256x32xf32>
    %c0_5 = arith.constant 0 : index
    %c0_6 = arith.constant 0 : index
    %6 = vector.load %arg2[%c0_5, %c0_6] : memref<256x32xf32, #tpu.memory_space<vmem>>, vector<256x32xf32>
    %7 = arith.addf %5, %6 : vector<256x32xf32>
    %cst_7 = arith.constant 5.000000e-01 : f32
    %8 = vector.broadcast %cst_7 : f32 to vector<256x32xf32>
    %9 = arith.mulf %8, %7 : vector<256x32xf32>
    %cst_8 = arith.constant 1.41421354 : f32
    %10 = vector.broadcast %cst_8 : f32 to vector<256x32xf32>
    %11 = arith.divf %7, %10 : vector<256x32xf32>
    %12 = math.erf %11 : vector<256x32xf32>
    %cst_9 = arith.constant 1.000000e+00 : f32
    %13 = vector.broadcast %cst_9 : f32 to vector<256x32xf32>
    %14 = arith.addf %13, %12 : vector<256x32xf32>
    %15 = arith.mulf %9, %14 : vector<256x32xf32>
    %c0_10 = arith.constant 0 : index
    %c0_11 = arith.constant 0 : index
    %16 = vector.load %arg5[%c0_10, %c0_11] : memref<256x32xf32, #tpu.memory_space<vmem>>, vector<256x32xf32>
    tpu.vector_store %arg5[%c0_10, %c0_11], %15 {strides = array<i32>} : memref<256x32xf32, #tpu.memory_space<vmem>>, vector<256x32xf32>,
    return
  }
  func.func @transform_0(%arg0: i32) -> (i32, i32) {
    %c0_i32 = arith.constant 0 : i32
    %c0_i32_0 = arith.constant 0 : i32
    return %arg0, %c0_i32 : i32, i32
  }
  func.func @transform_1(%arg0: i32) -> (i32, i32) {
    %c0_i32 = arith.constant 0 : i32
    %c0_i32_0 = arith.constant 0 : i32
    return %arg0, %c0_i32 : i32, i32
  }
  func.func @transform_2(%arg0: i32) -> (i32, i32) {
    %c0_i32 = arith.constant 0 : i32
    %c0_i32_0 = arith.constant 0 : i32
    %c0_i32_1 = arith.constant 0 : i32
    return %c0_i32, %c0_i32_0 : i32, i32
  }
  func.func @transform_3(%arg0: i32) -> (i32, i32) {
    %c0_i32 = arith.constant 0 : i32
    %c0_i32_0 = arith.constant 0 : i32
    %c0_i32_1 = arith.constant 0 : i32
    return %c0_i32, %c0_i32_0 : i32, i32
  }
  func.func @transform_4(%arg0: i32) -> (i32, i32) {
    %c0_i32 = arith.constant 0 : i32
    %c0_i32_0 = arith.constant 0 : i32
    return %arg0, %c0_i32 : i32, i32
  }
}

module attributes {stable_mosaic.version = 11 : i64} {
  func.func @_pw_residual_kernel(%arg0: i32, %arg1: memref<256x32xf32, #tpu.memory_space<vmem>>, %arg2: memref<256x32xf32, #tpu.memory_space<vmem>>, %arg3: memref<32x32xf32, #tpu.memory_space<vmem>>, %arg4: memref<1x32xf32, #tpu.memory_space<vmem>>, %arg5: memref<256x32xf32, #tpu.memory_space<vmem>>) attributes {dimension_semantics = [#tpu.dimension_semantics<parallel>], iteration_bounds = array<i64: 2>, scalar_prefetch = 0 : i64, scratch_operands = 0 : i64, tpu.core_type = #tpu.core_type<tc>, window_params = [{transform_indices = @transform_0, window_bounds = array<i64: 256, 32>}, {transform_indices = @transform_1, window_bounds = array<i64: 256, 32>}, {pipeline_mode = #tpu.pipeline_mode<synchronous>, transform_indices = @transform_2, window_bounds = array<i64: 32, 32>}, {pipeline_mode = #tpu.pipeline_mode<synchronous>, transform_indices = @transform_3, window_bounds = array<i64: 1, 32>}, {transform_indices = @transform_4, window_bounds = array<i64: 256, 32>}]} {
    %c0 = arith.constant 0 : index
    %c0_0 = arith.constant 0 : index
    %0 = vector.load %arg1[%c0, %c0_0] : memref<256x32xf32, #tpu.memory_space<vmem>>, vector<256x32xf32>
    %c0_1 = arith.constant 0 : index
    %c0_2 = arith.constant 0 : index
    %1 = vector.load %arg3[%c0_1, %c0_2] : memref<32x32xf32, #tpu.memory_space<vmem>>, vector<32x32xf32>
    %cst = arith.constant dense<0.000000e+00> : vector<256x32xf32>
    %2 = tpu.matmul %0, %1, %cst {dimension_numbers = #tpu.dot_dimension_numbers<[1], [0], [0], [1], [0, 0, 1, 1], [], []>} : vector<256x32xf32>, vector<32x32xf32>, vector<256x32xf32> -> vector<256x32xf32>
    %c0_3 = arith.constant 0 : index
    %c0_4 = arith.constant 0 : index
    %3 = vector.load %arg4[%c0_3, %c0_4] : memref<1x32xf32, #tpu.memory_space<vmem>>, vector<1x32xf32>
    %4 = vector.broadcast %3 : vector<1x32xf32> to vector<256x32xf32>
    %5 = arith.addf %2, %4 : vector<256x32xf32>
    %c0_5 = arith.constant 0 : index
    %c0_6 = arith.constant 0 : index
    %6 = vector.load %arg2[%c0_5, %c0_6] : memref<256x32xf32, #tpu.memory_space<vmem>>, vector<256x32xf32>
    %7 = arith.addf %5, %6 : vector<256x32xf32>
    %c0_7 = arith.constant 0 : index
    %c0_8 = arith.constant 0 : index
    %8 = vector.load %arg5[%c0_7, %c0_8] : memref<256x32xf32, #tpu.memory_space<vmem>>, vector<256x32xf32>
    tpu.vector_store %arg5[%c0_7, %c0_8], %7 {strides = array<i32>} : memref<256x32xf32, #tpu.memory_space<vmem>>, vector<256x32xf32>,
    return
  }
  func.func @transform_0(%arg0: i32) -> (i32, i32) {
    %c0_i32 = arith.constant 0 : i32
    %c0_i32_0 = arith.constant 0 : i32
    return %arg0, %c0_i32 : i32, i32
  }
  func.func @transform_1(%arg0: i32) -> (i32, i32) {
    %c0_i32 = arith.constant 0 : i32
    %c0_i32_0 = arith.constant 0 : i32
    return %arg0, %c0_i32 : i32, i32
  }
  func.func @transform_2(%arg0: i32) -> (i32, i32) {
    %c0_i32 = arith.constant 0 : i32
    %c0_i32_0 = arith.constant 0 : i32
    %c0_i32_1 = arith.constant 0 : i32
    return %c0_i32, %c0_i32_0 : i32, i32
  }
  func.func @transform_3(%arg0: i32) -> (i32, i32) {
    %c0_i32 = arith.constant 0 : i32
    %c0_i32_0 = arith.constant 0 : i32
    %c0_i32_1 = arith.constant 0 : i32
    return %c0_i32, %c0_i32_0 : i32, i32
  }
  func.func @transform_4(%arg0: i32) -> (i32, i32) {
    %c0_i32 = arith.constant 0 : i32
    %c0_i32_0 = arith.constant 0 : i32
    return %arg0, %c0_i32 : i32, i32
  }
}

module attributes {stable_mosaic.version = 11 : i64} {
  func.func @_head_kernel(%arg0: i32, %arg1: memref<256x32xf32, #tpu.memory_space<vmem>>, %arg2: memref<32x128xf32, #tpu.memory_space<vmem>>, %arg3: memref<1x128xf32, #tpu.memory_space<vmem>>, %arg4: memref<1x128xf32, #tpu.memory_space<vmem>>, %arg5: memref<1x1xf32, #tpu.memory_space<vmem>>, %arg6: memref<256x1xf32, #tpu.memory_space<vmem>>) attributes {dimension_semantics = [#tpu.dimension_semantics<parallel>], iteration_bounds = array<i64: 2>, scalar_prefetch = 0 : i64, scratch_operands = 0 : i64, tpu.core_type = #tpu.core_type<tc>, window_params = [{transform_indices = @transform_0, window_bounds = array<i64: 256, 32>}, {pipeline_mode = #tpu.pipeline_mode<synchronous>, transform_indices = @transform_1, window_bounds = array<i64: 32, 128>}, {pipeline_mode = #tpu.pipeline_mode<synchronous>, transform_indices = @transform_2, window_bounds = array<i64: 1, 128>}, {pipeline_mode = #tpu.pipeline_mode<synchronous>, transform_indices = @transform_3, window_bounds = array<i64: 1, 128>}, {pipeline_mode = #tpu.pipeline_mode<synchronous>, transform_indices = @transform_4, window_bounds = array<i64: 1, 1>}, {transform_indices = @transform_5, window_bounds = array<i64: 256, 1>}]} {
    %c0 = arith.constant 0 : index
    %c0_0 = arith.constant 0 : index
    %0 = vector.load %arg1[%c0, %c0_0] : memref<256x32xf32, #tpu.memory_space<vmem>>, vector<256x32xf32>
    %c0_1 = arith.constant 0 : index
    %c0_2 = arith.constant 0 : index
    %1 = vector.load %arg2[%c0_1, %c0_2] : memref<32x128xf32, #tpu.memory_space<vmem>>, vector<32x128xf32>
    %cst = arith.constant dense<0.000000e+00> : vector<256x128xf32>
    %2 = tpu.matmul %0, %1, %cst {dimension_numbers = #tpu.dot_dimension_numbers<[1], [0], [0], [1], [0, 0, 1, 1], [], []>} : vector<256x32xf32>, vector<32x128xf32>, vector<256x128xf32> -> vector<256x128xf32>
    %c0_3 = arith.constant 0 : index
    %c0_4 = arith.constant 0 : index
    %3 = vector.load %arg3[%c0_3, %c0_4] : memref<1x128xf32, #tpu.memory_space<vmem>>, vector<1x128xf32>
    %4 = vector.broadcast %3 : vector<1x128xf32> to vector<256x128xf32>
    %5 = arith.addf %2, %4 : vector<256x128xf32>
    %cst_5 = arith.constant 5.000000e-01 : f32
    %6 = vector.broadcast %cst_5 : f32 to vector<256x128xf32>
    %7 = arith.mulf %6, %5 : vector<256x128xf32>
    %cst_6 = arith.constant 1.41421354 : f32
    %8 = vector.broadcast %cst_6 : f32 to vector<256x128xf32>
    %9 = arith.divf %5, %8 : vector<256x128xf32>
    %10 = math.erf %9 : vector<256x128xf32>
    %cst_7 = arith.constant 1.000000e+00 : f32
    %11 = vector.broadcast %cst_7 : f32 to vector<256x128xf32>
    %12 = arith.addf %11, %10 : vector<256x128xf32>
    %13 = arith.mulf %7, %12 : vector<256x128xf32>
    %c0_8 = arith.constant 0 : index
    %c0_9 = arith.constant 0 : index
    %14 = vector.load %arg4[%c0_8, %c0_9] : memref<1x128xf32, #tpu.memory_space<vmem>>, vector<1x128xf32>
    %15 = vector.broadcast %14 : vector<1x128xf32> to vector<256x128xf32>
    %16 = arith.mulf %13, %15 : vector<256x128xf32>
    %cst_10 = arith.constant dense<0.000000e+00> : vector<256xf32>
    %17 = vector.multi_reduction <add>, %16, %cst_10 [1] : vector<256x128xf32> to vector<256xf32>
    %18 = vector.shape_cast %17 : vector<256xf32> to vector<256x1xf32>
    %c0_11 = arith.constant 0 : index
    %c0_12 = arith.constant 0 : index
    %19 = vector.load %arg5[%c0_11, %c0_12] : memref<1x1xf32, #tpu.memory_space<vmem>>, vector<1x1xf32>
    %20 = vector.broadcast %19 : vector<1x1xf32> to vector<256x1xf32>
    %21 = arith.addf %18, %20 : vector<256x1xf32>
    %c0_13 = arith.constant 0 : index
    %c0_14 = arith.constant 0 : index
    %22 = vector.load %arg6[%c0_13, %c0_14] : memref<256x1xf32, #tpu.memory_space<vmem>>, vector<256x1xf32>
    tpu.vector_store %arg6[%c0_13, %c0_14], %21 {strides = array<i32>} : memref<256x1xf32, #tpu.memory_space<vmem>>, vector<256x1xf32>,
    return
  }
  func.func @transform_0(%arg0: i32) -> (i32, i32) {
    %c0_i32 = arith.constant 0 : i32
    %c0_i32_0 = arith.constant 0 : i32
    return %arg0, %c0_i32 : i32, i32
  }
  func.func @transform_1(%arg0: i32) -> (i32, i32) {
    %c0_i32 = arith.constant 0 : i32
    %c0_i32_0 = arith.constant 0 : i32
    %c0_i32_1 = arith.constant 0 : i32
    return %c0_i32, %c0_i32_0 : i32, i32
  }
  func.func @transform_2(%arg0: i32) -> (i32, i32) {
    %c0_i32 = arith.constant 0 : i32
    %c0_i32_0 = arith.constant 0 : i32
    %c0_i32_1 = arith.constant 0 : i32
    return %c0_i32, %c0_i32_0 : i32, i32
  }
  func.func @transform_3(%arg0: i32) -> (i32, i32) {
    %c0_i32 = arith.constant 0 : i32
    %c0_i32_0 = arith.constant 0 : i32
    %c0_i32_1 = arith.constant 0 : i32
    return %c0_i32, %c0_i32_0 : i32, i32
  }
  func.func @transform_4(%arg0: i32) -> (i32, i32) {
    %c0_i32 = arith.constant 0 : i32
    %c0_i32_0 = arith.constant 0 : i32
    %c0_i32_1 = arith.constant 0 : i32
    return %c0_i32, %c0_i32_0 : i32, i32
  }
  func.func @transform_5(%arg0: i32) -> (i32, i32) {
    %c0_i32 = arith.constant 0 : i32
    %c0_i32_0 = arith.constant 0 : i32
    return %arg0, %c0_i32 : i32, i32
  }
}

</mosaic_0001>

<bundles_post_ra>
// kernel: fno2d_forward.10
= control target key start
LH: loop header
LB: loop body
LE: loop exit
PB: predicated region body
PF: predicated region fallthrough
CT: control target
= control target key end

     0   :  { %s1360_s18 = smov 0   ;;  %s1832_s0 = inlined_call_operand.vmem [shape: f32[512,4], index: 0, kind: input, shape index: {}]   ;;  %s1833_s1 = inlined_call_operand.vmem [shape: f32[512,2], index: 1, kind: input, shape index: {}]   ;;  %s1834_s2 = inlined_call_operand.vmem [shape: f32[4,32], index: 2, kind: input, shape index: {}]   ;;  %s1835_s3 = inlined_call_operand.vmem [shape: f32[2,32], index: 3, kind: input, shape index: {}]   ;;  %s1836_s4 = inlined_call_operand.vmem [shape: f32[1,32], index: 4, kind: input, shape index: {}]   ;;  %s1837_s5 = inlined_call_operand.vmem [shape: f32[512,32], index: 5, kind: output, shape index: {}]  }
   0x1 LB: > { %s1174_s19 = sadd.s32 4294967295, %s1326_s18   ;;  %p1178_p0 = scmp.ge.s32.totalorder %s1326_s18, 1  ;;  %s1326_s18 = sphi %s1360_s18, %s15_s18  }
   0x2   : > { %p199_p1 = scmp.lt.s32.totalorder %s1326_s18, 3 }
   0x4   : > { %p200_p2 = pnand %p1178_p0, %p199_p1 }
   0x5   : > { %s1179_s22 = sshll.u32 (!%p200_p2), %s1174_s19, 5 }
   0x6   : > { %203 = sbr.rel (%p200_p2) target bundleno = 272 (0x110), region = 40  ;;  %p233_p3 = scmp.lt.s32.totalorder (!%p200_p2), %s1179_s22, 63 }
   0xb   : > { %v282_v0 = vld [vmem:[%s1834_s2] sm:$0xf]  ;;  %vm609_vm0 = vcmask 1043456   ;;  %v1328_v1 = vmov 0   ;;  %s1839_s22 = smov (!%p233_p3, %s1179_s22), 63  ;;  %vm512_vm1 = vcmask 31744  }
   0xc   : > { %1317 = vset.pattern.permute.xlu1 %v1328_v1  ;;  %1316 = vset.pattern.permute.xlu0 %v1328_v1  ;;  %s1371_s23 = sshll.u32 %s1839_s22, 3  ;;  %vm1073_vm2 = vcmask 261120  }
   0xd   : > { %1254 = vmatprep.subr.msk.mxu0 %vm609_vm0, %v282_v0  ;;  %1304 = vmatprep.subr.msk.mxu1 %vm609_vm0, %v282_v0  ;;  %s1377_s26 = scalar_lea.vmem %s1833_s1, %s1371_s23  ;;  %s1389_s29 = scalar_lea.vmem %s1832_s0, %s1371_s23 }
   0xe   : > { %1255 = vmatpush3.msk.msra.mxu0 %vm609_vm0, %v282_v0  ;;  %1305 = vmatpush3.msk.msra.mxu1 %vm609_vm0, %v282_v0  ;;  %v1380_v2 = vld [vmem:[%s1377_s26 + $0x10] sm:$0xff]  ;;  %v1383_v3 = vld [vmem:[%s1377_s26] sm:$0xff]  ;;  %v1392_v4 = vld [vmem:[%s1377_s26 + $0x18] sm:$0xff]  ;;  %s1618_s11 = scalar_lea.vmem %s1837_s5, %s1371_s23 }
   0xf   : > { %328 = vperm.xlu1 %1317, %v1380_v2   ;;  %318 = vperm.xlu0 %1316, %v1383_v3   ;;  %v250_v5 = vld [vmem:[%s1389_s29] sm:$0xff]  ;;  %v251_v7 = vld [vmem:[%s1389_s29 + $0x8] sm:$0xff]  ;;  %v252_v10 = vld [vmem:[%s1389_s29 + $0x10] sm:$0xff] }
  0x10   : > { %v266_v6 = vld [vmem:[%s1389_s29 + $0x80] sm:$0xff]  ;;  %1256 = vmatprep.mubr.msk.f32.mxu0 %vm512_vm1, %v250_v5  ;;  %v267_v8 = vld [vmem:[%s1389_s29 + $0x88] sm:$0xff]  ;;  %v268_v11 = vld [vmem:[%s1389_s29 + $0x90] sm:$0xff]  ;;  %v1329_v5 = vmov 1  }
  0x11   : > { %1280 = vmatprep.mubr.msk.f32.mxu1 %vm512_vm1, %v266_v6  ;;  %v1403_v9 = vld [vmem:[%s1377_s26 + $0x8] sm:$0xff]  ;;  %1257 = vmatmul.mubr.msk.f32.vlgmr.msra.gmra.mxu0 %vm512_vm1, %v251_v7  ;;  %v253_v12 = vld [vmem:[%s1389_s29 + $0x18] sm:$0xff]  ;;  %v254_v14 = vld [vmem:[%s1389_s29 + $0x20] sm:$0xff] }
  0x12   : > { %1281 = vmatmul.mubr.msk.f32.vlgmr.msra.gmra.mxu1 %vm512_vm1, %v267_v8  ;;  %1259 = vmatprep.mubr.msk.f32.mxu0 %vm512_vm1, %v252_v10  ;;  %v269_v13 = vld [vmem:[%s1389_s29 + $0x98] sm:$0xff]  ;;  %v270_v15 = vld [vmem:[%s1389_s29 + $0xa0] sm:$0xff]  ;;  %v1418_v16 = vld [vmem:[%s1377_s26 + $0x28] sm:$0xff] }
  0x13   : > { %1283 = vmatprep.mubr.msk.f32.mxu1 %vm512_vm1, %v268_v11  ;;  %333 = vperm.xlu1 %1317, %v1392_v4   ;;  %v1421_v17 = vld [vmem:[%s1377_s26 + $0x20] sm:$0xff]  ;;  %v255_v18 = vld [vmem:[%s1389_s29 + $0x28] sm:$0xff]  ;;  %v256_v20 = vld [vmem:[%s1389_s29 + $0x30] sm:$0xff] }
  0x14   : > { %323 = vperm.xlu0 %1316, %v1403_v9   ;;  %v271_v19 = vld [vmem:[%s1389_s29 + $0xa8] sm:$0xff]  ;;  %v272_v21 = vld [vmem:[%s1389_s29 + $0xb0] sm:$0xff]  ;;  %v1434_v22 = vld [vmem:[%s1377_s26 + $0x38] sm:$0xff] }
  0x15   : > { %1260 = vmatmul.mubr.msk.f32.gmra.mxu0 %vm512_vm1, %v253_v12  ;;  %v1437_v23 = vld [vmem:[%s1377_s26 + $0x30] sm:$0xff]  ;;  %v257_v24 = vld [vmem:[%s1389_s29 + $0x38] sm:$0xff]  ;;  %v258_v26 = vld [vmem:[%s1389_s29 + $0x40] sm:$0xff] }
  0x16   : > { %1284 = vmatmul.mubr.msk.f32.gmra.mxu1 %vm512_vm1, %v269_v13  ;;  %1262 = vmatprep.mubr.msk.f32.mxu0 %vm512_vm1, %v254_v14  ;;  %v273_v25 = vld [vmem:[%s1389_s29 + $0xb8] sm:$0xff]  ;;  %v274_v27 = vld [vmem:[%s1389_s29 + $0xc0] sm:$0xff]  ;;  %v1450_v28 = vld [vmem:[%s1377_s26 + $0x48] sm:$0xff] }
  0x17   : > { %1286 = vmatprep.mubr.msk.f32.mxu1 %vm512_vm1, %v270_v15  ;;  %343 = vperm.xlu1 %1317, %v1418_v16   ;;  %v1453_v29 = vld [vmem:[%s1377_s26 + $0x40] sm:$0xff]  ;;  %v259_v30 = vld [vmem:[%s1389_s29 + $0x48] sm:$0xff]  ;;  %v260_v32 = vld [vmem:[%s1389_s29 + $0x50] sm:$0xff] }
  0x18   : > { %338 = vperm.xlu0 %1316, %v1421_v17   ;;  %v275_v31 = vld [vmem:[%s1389_s29 + $0xc8] sm:$0xff]  ;;  %v276_v33 = vld [vmem:[%s1389_s29 + $0xd0] sm:$0xff]  ;;  %v1466_v34 = vld [vmem:[%s1377_s26 + $0x58] sm:$0xff] }
  0x19   : > { %1263 = vmatmul.mubr.msk.f32.gmra.mxu0 %vm512_vm1, %v255_v18  ;;  %v1469_v35 = vld [vmem:[%s1377_s26 + $0x50] sm:$0xff]  ;;  %v261_v36 = vld [vmem:[%s1389_s29 + $0x58] sm:$0xff]  ;;  %v262_v38 = vld [vmem:[%s1389_s29 + $0x60] sm:$0xff] }
  0x1a   : > { %1287 = vmatmul.mubr.msk.f32.gmra.mxu1 %vm512_vm1, %v271_v19  ;;  %1265 = vmatprep.mubr.msk.f32.mxu0 %vm512_vm1, %v256_v20  ;;  %v277_v37 = vld [vmem:[%s1389_s29 + $0xd8] sm:$0xff]  ;;  %v278_v39 = vld [vmem:[%s1389_s29 + $0xe0] sm:$0xff]  ;;  %v1482_v40 = vld [vmem:[%s1377_s26 + $0x68] sm:$0xff] }
  0x1b   : > { %1289 = vmatprep.mubr.msk.f32.mxu1 %vm512_vm1, %v272_v21  ;;  %353 = vperm.xlu1 %1317, %v1434_v22   ;;  %v1485_v41 = vld [vmem:[%s1377_s26 + $0x60] sm:$0xff]  ;;  %v263_v42 = vld [vmem:[%s1389_s29 + $0x68] sm:$0xff]  ;;  %v264_v44 = vld [vmem:[%s1389_s29 + $0x70] sm:$0xff] }
  0x1c   : > { %348 = vperm.xlu0 %1316, %v1437_v23   ;;  %v279_v43 = vld [vmem:[%s1389_s29 + $0xe8] sm:$0xff]  ;;  %v280_v45 = vld [vmem:[%s1389_s29 + $0xf0] sm:$0xff]  ;;  %v298_v46 = vld [vmem:[%s1377_s26 + $0x78] sm:$0xff] }
  0x1d   : > { %1266 = vmatmul.mubr.msk.f32.gmra.mxu0 %vm512_vm1, %v257_v24  ;;  %v297_v47 = vld [vmem:[%s1377_s26 + $0x70] sm:$0xff]  ;;  %v265_v48 = vld [vmem:[%s1389_s29 + $0x78] sm:$0xff]  ;;  %v300_v50 = vld [vmem:[%s1377_s26 + $0x88] sm:$0xff] }
  0x1e   : > { %1290 = vmatmul.mubr.msk.f32.gmra.mxu1 %vm512_vm1, %v273_v25  ;;  %1268 = vmatprep.mubr.msk.f32.mxu0 %vm512_vm1, %v258_v26  ;;  %v281_v49 = vld [vmem:[%s1389_s29 + $0xf8] sm:$0xff]  ;;  %v299_v51 = vld [vmem:[%s1377_s26 + $0x80] sm:$0xff]  ;;  %v301_v53 = vld [vmem:[%s1377_s26 + $0x90] sm:$0xff] }
  0x1f   : > { %1292 = vmatprep.mubr.msk.f32.mxu1 %vm512_vm1, %v274_v27  ;;  %363 = vperm.xlu1 %1317, %v1450_v28   ;;  %v302_v52 = vld [vmem:[%s1377_s26 + $0x98] sm:$0xff]  ;;  %v304_v54 = vld [vmem:[%s1377_s26 + $0xa8] sm:$0xff]  ;;  %v303_v55 = vld [vmem:[%s1377_s26 + $0xa0] sm:$0xff] }
  0x20   : > { %358 = vperm.xlu0 %1316, %v1453_v29   ;;  %v306_v56 = vld [vmem:[%s1377_s26 + $0xb8] sm:$0xff]  ;;  %v305_v57 = vld [vmem:[%s1377_s26 + $0xb0] sm:$0xff]  ;;  %v308_v58 = vld [vmem:[%s1377_s26 + $0xc8] sm:$0xff] }
  0x21   : > { %1269 = vmatmul.mubr.msk.f32.gmra.mxu0 %vm512_vm1, %v259_v30  ;;  %v307_v59 = vld [vmem:[%s1377_s26 + $0xc0] sm:$0xff]  ;;  %v310_v60 = vld [vmem:[%s1377_s26 + $0xd8] sm:$0xff]  ;;  %v309_v61 = vld [vmem:[%s1377_s26 + $0xd0] sm:$0xff] }
  0x22   : > { %1293 = vmatmul.mubr.msk.f32.gmra.mxu1 %vm512_vm1, %v275_v31  ;;  %1271 = vmatprep.mubr.msk.f32.mxu0 %vm512_vm1, %v260_v32  ;;  %v312_v62 = vld [vmem:[%s1377_s26 + $0xe8] sm:$0xff]  ;;  %v311_v63 = vld [vmem:[%s1377_s26 + $0xe0] sm:$0xff]  ;;  %v314_v0 = vld [vmem:[%s1377_s26 + $0xf8] sm:$0xff]  ;;  %v476_v31 = vlaneseq }
  0x23   : > { %1295 = vmatprep.mubr.msk.f32.mxu1 %vm512_vm1, %v276_v33  ;;  %373 = vperm.xlu1 %1317, %v1466_v34   ;;  %v313_v1 = vld [vmem:[%s1377_s26 + $0xf0] sm:$0xff] }
  0x24   : > { %368 = vperm.xlu0 %1316, %v1469_v35  }
  0x25   : > { %1272 = vmatmul.mubr.msk.f32.gmra.mxu0 %vm512_vm1, %v261_v36 }
  0x26   : > { %1296 = vmatmul.mubr.msk.f32.gmra.mxu1 %vm512_vm1, %v277_v37  ;;  %1274 = vmatprep.mubr.msk.f32.mxu0 %vm512_vm1, %v262_v38 }
  0x27   : > { %1298 = vmatprep.mubr.msk.f32.mxu1 %vm512_vm1, %v278_v39  ;;  %383 = vperm.xlu1 %1317, %v1482_v40   ;;  %v315_v39 = vld [vmem:[%s1835_s3] sm:$0x3] }
  0x28   : > { %378 = vperm.xlu0 %1316, %v1485_v41  }
  0x29   : > { %1275 = vmatmul.mubr.msk.f32.gmra.mxu0 %vm512_vm1, %v263_v42 }
  0x2a   : > { %1299 = vmatmul.mubr.msk.f32.gmra.mxu1 %vm512_vm1, %v279_v43  ;;  %1277 = vmatprep.mubr.msk.f32.mxu0 %vm512_vm1, %v264_v44 }
  0x2b   : > { %1301 = vmatprep.mubr.msk.f32.mxu1 %vm512_vm1, %v280_v45  ;;  %393 = vperm.xlu1 %1317, %v298_v46  }
  0x2c   : > { %388 = vperm.xlu0 %1316, %v297_v47  }
  0x2d   : > { %1278 = vmatmul.mubr.msk.f32.gmra.mxu0 %vm512_vm1, %v265_v48 }
  0x2e   : > { %1302 = vmatmul.mubr.msk.f32.gmra.mxu1 %vm512_vm1, %v281_v49 }
  0x2f   : > { %403 = vperm.xlu1 %1317, %v300_v50  }
  0x30   : > { %398 = vperm.xlu0 %1316, %v299_v51  }
  0x33   : > { %413 = vperm.xlu1 %1317, %v302_v52  }
  0x34   : > { %408 = vperm.xlu0 %1316, %v301_v53  }
  0x37   : > { %423 = vperm.xlu1 %1317, %v304_v54  }
  0x38   : > { %418 = vperm.xlu0 %1316, %v303_v55  }
  0x3b   : > { %433 = vperm.xlu1 %1317, %v306_v56  }
  0x3c   : > { %428 = vperm.xlu0 %1316, %v305_v57  }
  0x3f   : > { %443 = vperm.xlu1 %1317, %v308_v58  }
  0x40   : > { %438 = vperm.xlu0 %1316, %v307_v59  }
  0x43   : > { %453 = vperm.xlu1 %1317, %v310_v60  }
  0x44   : > { %448 = vperm.xlu0 %1316, %v309_v61  }
  0x47   : > { %463 = vperm.xlu1 %1317, %v312_v62  }
  0x48   : > { %458 = vperm.xlu0 %1316, %v311_v63  }
  0x4b   : > { %473 = vperm.xlu1 %1317, %v314_v0  }
  0x4c   : > { %468 = vperm.xlu0 %1316, %v313_v1  }
  0x4f   : > { %1319 = vset.pattern.permute.xlu1 %v1329_v5 }
  0x50   : > { %1318 = vset.pattern.permute.xlu0 %v1329_v5  ;;  %843 = vperm.xlu1 %1319, %v1403_v9  }
  0x51   : > { %839 = vperm.xlu0 %1318, %v1383_v3  }
  0x54   : > { %847 = vperm.xlu1 %1319, %v1380_v2  }
  0x55   : > { %851 = vperm.xlu0 %1318, %v1392_v4  }
  0x58   : > { %855 = vperm.xlu1 %1319, %v1421_v17  }
  0x59   : > { %859 = vperm.xlu0 %1318, %v1418_v16  }
  0x5c   : > { %863 = vperm.xlu1 %1319, %v1437_v23  }
  0x5d   : > { %867 = vperm.xlu0 %1318, %v1434_v22  }
  0x60   : > { %871 = vperm.xlu1 %1319, %v1453_v29  }
  0x61   : > { %875 = vperm.xlu0 %1318, %v1450_v28  }
  0x64   : > { %879 = vperm.xlu1 %1319, %v1469_v35  }
  0x65   : > { %883 = vperm.xlu0 %1318, %v1466_v34   ;;  %v477_v34 = vshrl.u32 %v476_v31, 7 }
  0x67   : > { %v478_v37 = vsub.s32 0, %v477_v34  ;;  %v968_v38 = vsub.s32 1, %v477_v34 }
  0x68   : > { %887 = vperm.xlu1 %1319, %v1485_v41  }
  0x69   : > { %891 = vperm.xlu0 %1318, %v1482_v40   ;;  %v1596_v42 = vrot.slane %v315_v39, %v478_v37  ;;  %v1598_v43 = vrot.slane %v315_v39, %v968_v38 }
  0x6c   : > { %895 = vperm.xlu1 %1319, %v297_v47  }
  0x6d   : > { %899 = vperm.xlu0 %1318, %v298_v46  }
  0x70   : > { %903 = vperm.xlu1 %1319, %v299_v51  }
  0x71   : > { %907 = vperm.xlu0 %1318, %v300_v50  }
  0x74   : > { %911 = vperm.xlu1 %1319, %v301_v53  }
  0x75   : > { %915 = vperm.xlu0 %1318, %v302_v52   ;;  %v1608_v52 = vld [vmem:[%s1836_s4] ss:$0 sm:$0xff] }
  0x78   : > { %919 = vperm.xlu1 %1319, %v303_v55  }
  0x79   : > { %923 = vperm.xlu0 %1318, %v304_v54  }
  0x7c   : > { %927 = vperm.xlu1 %1319, %v305_v57  }
  0x7d   : > { %931 = vperm.xlu0 %1318, %v306_v56  }
  0x80   : > { %935 = vperm.xlu1 %1319, %v307_v59  }
  0x81   : > { %939 = vperm.xlu0 %1318, %v308_v58  }
  0x84   : > { %943 = vperm.xlu1 %1319, %v309_v61  }
  0x85   : > { %947 = vperm.xlu0 %1318, %v310_v60  }
  0x88   : > { %951 = vperm.xlu1 %1319, %v311_v63  }
  0x89   : > { %955 = vperm.xlu0 %1318, %v312_v62  }
  0x8a   : > { %v329_v2 = vpop.permute.xlu1 %328  ;;  %v319_v3 = vpop.permute.xlu0 %318 }
  0x8b   : > { %v480_v49 = vmul.f32 %v1596_v42, %v319_v3  ;;  %v482_v61 = vmul.f32 %v1596_v42, %v329_v2 }
  0x8c   : > { %959 = vperm.xlu1 %1319, %v313_v1  }
  0x8d   : > { %963 = vperm.xlu0 %1318, %v314_v0  }
  0x8e   : > { %v334_v4 = vpop.permute.xlu1 %333 }
  0x8f   : > { %v324_v6 = vpop.permute.xlu0 %323  ;;  %v483_v55 = vmul.f32 %v1596_v42, %v334_v4 }
  0x90   : > { %v481_v46 = vmul.f32 %v1596_v42, %v324_v6 }
  0x92   : > { %v1537_v7 = vpop.permute.xlu1 %343 }
  0x93   : > { %v1539_v8 = vpop.permute.xlu0 %338  ;;  %v485_v4 = vmul.f32 %v1596_v42, %v1537_v7 }
  0x96   : > { %v1541_v9 = vpop.permute.xlu1 %353 }
  0x97   : > { %v1543_v10 = vpop.permute.xlu0 %348 }
  0x9a   : > { %v1545_v11 = vpop.permute.xlu1 %363 }
  0x9b   : > { %v1547_v12 = vpop.permute.xlu0 %358 }
  0x9e   : > { %v1549_v13 = vpop.permute.xlu1 %373 }
  0x9f   : > { %v1551_v14 = vpop.permute.xlu0 %368 }
  0xa2   : > { %v1553_v15 = vpop.permute.xlu1 %383 }
  0xa3   : > { %v1555_v16 = vpop.permute.xlu0 %378 }
  0xa6   : > { %v1557_v17 = vpop.permute.xlu1 %393 }
  0xa7   : > { %v1559_v18 = vpop.permute.xlu0 %388 }
  0xaa   : > { %v1561_v19 = vpop.permute.xlu1 %403 }
  0xab   : > { %v1563_v20 = vpop.permute.xlu0 %398 }
  0xae   : > { %v1565_v21 = vpop.permute.xlu1 %413 }
  0xaf   : > { %v1567_v22 = vpop.permute.xlu0 %408 }
  0xb2   : > { %v1569_v23 = vpop.permute.xlu1 %423 }
  0xb3   : > { %v1571_v24 = vpop.permute.xlu0 %418 }
  0xb6   : > { %v1573_v25 = vpop.permute.xlu1 %433 }
  0xb7   : > { %v1575_v26 = vpop.permute.xlu0 %428 }
  0xba   : > { %v1577_v27 = vpop.permute.xlu1 %443 }
  0xbb   : > { %v1579_v28 = vpop.permute.xlu0 %438 }
  0xbe   : > { %v1581_v29 = vpop.permute.xlu1 %453 }
  0xbf   : > { %v1583_v30 = vpop.permute.xlu0 %448 }
  0xc2   : > { %v1585_v32 = vpop.permute.xlu1 %463 }
  0xc3   : > { %v1587_v33 = vpop.permute.xlu0 %458 }
  0xc6   : > { %v1589_v35 = vpop.permute.xlu1 %473 }
  0xc7   : > { %v1591_v36 = vpop.permute.xlu0 %468 }
  0xcb   : > { %v844_v40 = vpop.permute.xlu1 %843 }
  0xcc   : > { %v840_v41 = vpop.permute.xlu0 %839  ;;  %v971_v50 = vmul.f32 %v1598_v43, %v844_v40 }
  0xcd   : > { %v970_v56 = vmul.f32 %v1598_v43, %v840_v41  ;;  %v484_v41 = vmul.f32 %v1596_v42, %v1539_v8 }
  0xcf   : > { %v848_v44 = vpop.permute.xlu1 %847 }
  0xd0   : > { %v852_v45 = vpop.permute.xlu0 %851  ;;  %v972_v34 = vmul.f32 %v1598_v43, %v848_v44 }
  0xd1   : > { %v1258_v47 = vpop.f32.mrf.mxu0  ;;  %v973_v0 = vmul.f32 %v1598_v43, %v852_v45 }
  0xd2   : > { %v1601_v48 = vpop.f32.mrf.mxu1  ;;  %v685_v51 = vadd.f32 %v1258_v47, %v481_v46 }
  0xd3   : > { %v679_v53 = vpop.f32.mrf.mxu0  ;;  %v856_v59 = vpop.permute.xlu1 %855 }
  0xd4   : > { %v1610_v54 = vpop.f32.mrf.mxu1  ;;  %v1003_v57 = vadd.f32 %v971_v50, %v685_v51  ;;  %v680_v58 = vadd.f32 %v679_v53, %v480_v49  ;;  %v860_v60 = vpop.permute.xlu0 %859  ;;  %v487_v50 = vmul.f32 %v1596_v42, %v1541_v9  ;;  %v974_v53 = vmul.f32 %v1598_v43, %v856_v59 }
  0xd5   : > { %v1261_v62 = vpop.f32.mrf.mxu0  ;;  %v975_v7 = vmul.f32 %v1598_v43, %v860_v60  ;;  %v486_v60 = vmul.f32 %v1596_v42, %v1543_v10 }
  0xd6   : > { %v1621_v63 = vpop.f32.mrf.mxu1  ;;  %v1042_v1 = vadd.f32 %v1608_v52, %v1003_v57  ;;  %v1002_v5 = vadd.f32 %v970_v56, %v680_v58  ;;  %v695_v3 = vadd.f32 %v1261_v62, %v483_v55 }
  0xd7   : > { %v689_v6 = vpop.f32.mrf.mxu0  ;;  %v864_v39 = vpop.permute.xlu1 %863 }
  0xd8   : > { %v1627_v31 = vpop.f32.mrf.mxu1  ;;  %1075 = vst.msk [vmem:[%s1618_s11 + $0x8] sm:$0xff] %vm1073_vm2, %v1042_v1  ;;  %v1041_v2 = vadd.f32 %v1608_v52, %v1002_v5  ;;  %v1005_v37 = vadd.f32 %v973_v0, %v695_v3  ;;  %v690_v38 = vadd.f32 %v689_v6, %v482_v61  ;;  %v868_v40 = vpop.permute.xlu0 %867  ;;  %v489_v5 = vmul.f32 %v1596_v42, %v1545_v11 }
  0xd9   : > { %v1264_v45 = vpop.f32.mrf.mxu0  ;;  %v977_v9 = vmul.f32 %v1598_v43, %v868_v40 }
  0xda   : > { %v1635_v46 = vpop.f32.mrf.mxu1  ;;  %1074 = vst.msk [vmem:[%s1618_s11] sm:$0xff] %vm1073_vm2, %v1041_v2  ;;  %v1044_v44 = vadd.f32 %v1608_v52, %v1005_v37  ;;  %v1004_v47 = vadd.f32 %v972_v34, %v690_v38  ;;  %v705_v49 = vadd.f32 %v1264_v45, %v485_v4  ;;  %v976_v4 = vmul.f32 %v1598_v43, %v864_v39 }
  0xdb   : > { %v699_v51 = vpop.f32.mrf.mxu0  ;;  %v872_v57 = vpop.permute.xlu1 %871  ;;  %v488_v38 = vmul.f32 %v1596_v42, %v1547_v12 }
  0xdc   : > { %1077 = vst.msk [vmem:[%s1618_s11 + $0x18] sm:$0xff] %vm1073_vm2, %v1044_v44  ;;  %v1043_v8 = vadd.f32 %v1608_v52, %v1004_v47  ;;  %v1007_v55 = vadd.f32 %v975_v7, %v705_v49  ;;  %v700_v56 = vadd.f32 %v699_v51, %v484_v41  ;;  %v876_v58 = vpop.permute.xlu0 %875  ;;  %v1649_v61 = vpop.f32.mrf.mxu1  ;;  %v491_v44 = vmul.f32 %v1596_v42, %v1549_v13 }
  0xdd   : > { %v1267_v62 = vpop.f32.mrf.mxu0  ;;  %v979_v11 = vmul.f32 %v1598_v43, %v876_v58  ;;  %v978_v49 = vmul.f32 %v1598_v43, %v872_v57 }
  0xde   : > { %1076 = vst.msk [vmem:[%s1618_s11 + $0x10] sm:$0xff] %vm1073_vm2, %v1043_v8  ;;  %v1046_v59 = vadd.f32 %v1608_v52, %v1007_v55  ;;  %v1006_v0 = vadd.f32 %v974_v53, %v700_v56  ;;  %v715_v1 = vadd.f32 %v1267_v62, %v487_v50  ;;  %v1663_v40 = vpop.f32.mrf.mxu1  ;;  %v490_v55 = vmul.f32 %v1596_v42, %v1551_v14 }
  0xdf   : > { %v709_v3 = vpop.f32.mrf.mxu0  ;;  %v880_v2 = vpop.permute.xlu1 %879 }
  0xe0   : > { %1079 = vst.msk [vmem:[%s1618_s11 + $0x28] sm:$0xff] %vm1073_vm2, %v1046_v59  ;;  %v1045_v10 = vadd.f32 %v1608_v52, %v1006_v0  ;;  %v1009_v6 = vadd.f32 %v977_v9, %v715_v1  ;;  %v710_v34 = vadd.f32 %v709_v3, %v486_v60  ;;  %v884_v37 = vpop.permute.xlu0 %883  ;;  %v1677_v56 = vpop.f32.mrf.mxu1  ;;  %v493_v9 = vmul.f32 %v1596_v42, %v1553_v15 }
  0xe1   : > { %v1270_v41 = vpop.f32.mrf.mxu0  ;;  %v981_v13 = vmul.f32 %v1598_v43, %v884_v37  ;;  %v980_v0 = vmul.f32 %v1598_v43, %v880_v2  ;;  %v494_v15 = vmul.f32 %v1596_v42, %v1559_v18  ;;  %v499_v18 = vmul.f32 %v1596_v42, %v1565_v21 }
  0xe2   : > { %1078 = vst.msk [vmem:[%s1618_s11 + $0x20] sm:$0xff] %vm1073_vm2, %v1045_v10  ;;  %v1048_v39 = vadd.f32 %v1608_v52, %v1009_v6  ;;  %v1008_v45 = vadd.f32 %v976_v4, %v710_v34  ;;  %v725_v7 = vadd.f32 %v1270_v41, %v489_v5  ;;  %v492_v10 = vmul.f32 %v1596_v42, %v1555_v16  ;;  %v1695_v34 = vpop.f32.mrf.mxu1 }
  0xe3   : > { %v719_v47 = vpop.f32.mrf.mxu0  ;;  %v888_v53 = vpop.permute.xlu1 %887  ;;  %v495_v6 = vmul.f32 %v1596_v42, %v1557_v17  ;;  %v497_v16 = vmul.f32 %v1596_v42, %v1561_v19  ;;  %v496_v17 = vmul.f32 %v1596_v42, %v1563_v20 }
  0xe4   : > { %1081 = vst.msk [vmem:[%s1618_s11 + $0x38] sm:$0xff] %vm1073_vm2, %v1048_v39  ;;  %v1047_v12 = vadd.f32 %v1608_v52, %v1008_v45  ;;  %v1011_v50 = vadd.f32 %v979_v11, %v725_v7  ;;  %v720_v51 = vadd.f32 %v719_v47, %v488_v38  ;;  %v892_v8 = vpop.permute.xlu0 %891  ;;  %v498_v39 = vmul.f32 %v1596_v42, %v1567_v22  ;;  %v1715_v21 = vpop.f32.mrf.mxu1 }
  0xe5   : > { %v1273_v58 = vpop.f32.mrf.mxu0  ;;  %v983_v37 = vmul.f32 %v1598_v43, %v892_v8  ;;  %v982_v7 = vmul.f32 %v1598_v43, %v888_v53  ;;  %v765_v20 = vadd.f32 %v1601_v48, %v497_v16  ;;  %v775_v48 = vadd.f32 %v1621_v63, %v499_v18 }
  0xe6   : > { %1080 = vst.msk [vmem:[%s1618_s11 + $0x30] sm:$0xff] %vm1073_vm2, %v1047_v12  ;;  %v1050_v57 = vadd.f32 %v1608_v52, %v1011_v50  ;;  %v1010_v60 = vadd.f32 %v978_v49, %v720_v51  ;;  %v735_v62 = vadd.f32 %v1273_v58, %v491_v44  ;;  %v760_v50 = vadd.f32 %v1610_v54, %v496_v17 }
  0xe7   : > { %v729_v59 = vpop.f32.mrf.mxu0  ;;  %v896_v3 = vpop.permute.xlu1 %895  ;;  %v770_v54 = vadd.f32 %v1627_v31, %v498_v39 }
  0xe8   : > { %1083 = vst.msk [vmem:[%s1618_s11 + $0x48] sm:$0xff] %vm1073_vm2, %v1050_v57  ;;  %v1049_v14 = vadd.f32 %v1608_v52, %v1010_v60  ;;  %v1013_v1 = vadd.f32 %v981_v13, %v735_v62  ;;  %v730_v5 = vadd.f32 %v729_v59, %v490_v55  ;;  %v900_v4 = vpop.permute.xlu0 %899 }
  0xe9   : > { %v1276_v2 = vpop.f32.mrf.mxu0  ;;  %v985_v8 = vmul.f32 %v1598_v43, %v900_v4  ;;  %v1297_v4 = vpop.f32.mrf.mxu1 }
  0xea   : > { %1082 = vst.msk [vmem:[%s1618_s11 + $0x40] sm:$0xff] %vm1073_vm2, %v1049_v14  ;;  %v1052_v38 = vadd.f32 %v1608_v52, %v1013_v1  ;;  %v1012_v41 = vadd.f32 %v980_v0, %v730_v5  ;;  %v745_v11 = vadd.f32 %v1276_v2, %v493_v9  ;;  %v984_v9 = vmul.f32 %v1598_v43, %v896_v3 }
  0xeb   : > { %v739_v45 = vpop.f32.mrf.mxu0  ;;  %v904_v19 = vpop.permute.xlu1 %903  ;;  %v500_v2 = vmul.f32 %v1596_v42, %v1571_v24 }
  0xec   : > { %1085 = vst.msk [vmem:[%s1618_s11 + $0x58] sm:$0xff] %vm1073_vm2, %v1052_v38  ;;  %v1051_v44 = vadd.f32 %v1608_v52, %v1012_v41  ;;  %v1015_v47 = vadd.f32 %v983_v37, %v745_v11  ;;  %v740_v49 = vadd.f32 %v739_v45, %v492_v10  ;;  %v908_v12 = vpop.permute.xlu0 %907  ;;  %v986_v22 = vmul.f32 %v1598_v43, %v904_v19  ;;  %v809_v18 = vpop.f32.mrf.mxu1 }
  0xed   : > { %v987_v51 = vmul.f32 %v1598_v43, %v908_v12  ;;  %v1279_v53 = vpop.f32.mrf.mxu0 }
  0xee   : > { %1084 = vst.msk [vmem:[%s1618_s11 + $0x50] sm:$0xff] %vm1073_vm2, %v1051_v44  ;;  %v1054_v55 = vadd.f32 %v1608_v52, %v1015_v47  ;;  %v1014_v58 = vadd.f32 %v982_v7, %v740_v49  ;;  %v755_v13 = vadd.f32 %v1279_v53, %v495_v6  ;;  %v1018_v57 = vadd.f32 %v986_v22, %v760_v50 }
  0xef   : > { %v1019_v60 = vadd.f32 %v987_v51, %v765_v20  ;;  %v749_v62 = vpop.f32.mrf.mxu0  ;;  %v912_v1 = vpop.permute.xlu1 %911  ;;  %v501_v6 = vmul.f32 %v1596_v42, %v1569_v23  ;;  %v780_v23 = vadd.f32 %v1649_v61, %v500_v2  ;;  %v502_v61 = vmul.f32 %v1596_v42, %v1575_v26 }
  0xf0   : > { %1087 = vst.msk [vmem:[%s1618_s11 + $0x68] sm:$0xff] %vm1073_vm2, %v1054_v55  ;;  %v1053_v59 = vadd.f32 %v1608_v52, %v1014_v58  ;;  %v1017_v0 = vadd.f32 %v985_v8, %v755_v13  ;;  %v750_v14 = vadd.f32 %v749_v62, %v494_v15  ;;  %v916_v5 = vpop.permute.xlu0 %915  ;;  %v1057_v63 = vadd.f32 %v1608_v52, %v1018_v57 }
  0xf1   : > { %v1058_v31 = vadd.f32 %v1608_v52, %v1019_v60  ;;  %v988_v10 = vmul.f32 %v1598_v43, %v912_v1  ;;  %v989_v3 = vmul.f32 %v1598_v43, %v916_v5  ;;  %v785_v11 = vadd.f32 %v1635_v46, %v501_v6 }
  0xf2   : > { %1086 = vst.msk [vmem:[%s1618_s11 + $0x60] sm:$0xff] %vm1073_vm2, %v1053_v59  ;;  %v1056_v15 = vadd.f32 %v1608_v52, %v1017_v0  ;;  %v1016_v37 = vadd.f32 %v984_v9, %v750_v14  ;;  %1090 = vst.msk [vmem:[%s1618_s11 + $0x80] sm:$0xff] %vm1073_vm2, %v1057_v63  ;;  %v503_v46 = vmul.f32 %v1596_v42, %v1573_v25  ;;  %v1300_v25 = vpop.f32.mrf.mxu1 }
  0xf3   : > { %1091 = vst.msk [vmem:[%s1618_s11 + $0x88] sm:$0xff] %vm1073_vm2, %v1058_v31  ;;  %v1020_v38 = vadd.f32 %v988_v10, %v770_v54  ;;  %v1021_v41 = vadd.f32 %v989_v3, %v775_v48  ;;  %v920_v16 = vpop.permute.xlu1 %919  ;;  %v790_v12 = vadd.f32 %v1677_v56, %v502_v61  ;;  %v505_v8 = vmul.f32 %v1596_v42, %v1577_v27 }
  0xf4   : > { %1089 = vst.msk [vmem:[%s1618_s11 + $0x78] sm:$0xff] %vm1073_vm2, %v1056_v15  ;;  %v1055_v24 = vadd.f32 %v1608_v52, %v1016_v37  ;;  %v924_v17 = vpop.permute.xlu0 %923  ;;  %v990_v7 = vmul.f32 %v1598_v43, %v920_v16  ;;  %v795_v19 = vadd.f32 %v1663_v40, %v503_v46  ;;  %v504_v55 = vmul.f32 %v1596_v42, %v1579_v28  ;;  %v819_v57 = vpop.f32.mrf.mxu1 }
  0xf5   : > { %v1059_v39 = vadd.f32 %v1608_v52, %v1020_v38  ;;  %v1060_v45 = vadd.f32 %v1608_v52, %v1021_v41  ;;  %v991_v44 = vmul.f32 %v1598_v43, %v924_v17  ;;  %v805_v58 = vadd.f32 %v1695_v34, %v505_v8 }
  0xf6   : > { %1088 = vst.msk [vmem:[%s1618_s11 + $0x70] sm:$0xff] %vm1073_vm2, %v1055_v24  ;;  %v1022_v47 = vadd.f32 %v990_v7, %v780_v23  ;;  %v800_v13 = vadd.f32 %v1715_v21, %v504_v55  ;;  %v507_v9 = vmul.f32 %v1596_v42, %v1581_v29  ;;  %v506_v59 = vmul.f32 %v1596_v42, %v1583_v30  ;;  %v1303_v63 = vpop.f32.mrf.mxu1 }
  0xf7   : > { %1092 = vst.msk [vmem:[%s1618_s11 + $0x90] sm:$0xff] %vm1073_vm2, %v1059_v39  ;;  %1093 = vst.msk [vmem:[%s1618_s11 + $0x98] sm:$0xff] %vm1073_vm2, %v1060_v45  ;;  %v1023_v49 = vadd.f32 %v991_v44, %v785_v11  ;;  %v928_v20 = vpop.permute.xlu1 %927  ;;  %v509_v3 = vmul.f32 %v1596_v42, %v1585_v32  ;;  %v508_v6 = vmul.f32 %v1596_v42, %v1587_v33 }
  0xf8   : > { %v932_v50 = vpop.permute.xlu0 %931  ;;  %v1061_v22 = vadd.f32 %v1608_v52, %v1022_v47  ;;  %v992_v51 = vmul.f32 %v1598_v43, %v928_v20  ;;  %v815_v0 = vadd.f32 %v1297_v4, %v507_v9  ;;  %v810_v14 = vadd.f32 %v809_v18, %v506_v59  ;;  %v829_v11 = vpop.f32.mrf.mxu1 }
  0xf9   : > { %v1062_v26 = vadd.f32 %v1608_v52, %v1023_v49  ;;  %v993_v53 = vmul.f32 %v1598_v43, %v932_v50  ;;  %v825_v15 = vadd.f32 %v1300_v25, %v509_v3  ;;  %v820_v37 = vadd.f32 %v819_v57, %v508_v6 }
  0xfa   : > { %1094 = vst.msk [vmem:[%s1618_s11 + $0xa0] sm:$0xff] %vm1073_vm2, %v1061_v22  ;;  %v1024_v40 = vadd.f32 %v992_v51, %v790_v12  ;;  %v511_v16 = vmul.f32 %v1596_v42, %v1589_v35  ;;  %v510_v17 = vmul.f32 %v1596_v42, %v1591_v36 }
  0xfb   : > { %1095 = vst.msk [vmem:[%s1618_s11 + $0xa8] sm:$0xff] %vm1073_vm2, %v1062_v26  ;;  %v1025_v56 = vadd.f32 %v993_v53, %v795_v19  ;;  %v936_v48 = vpop.permute.xlu1 %935 }
  0xfc   : > { %v940_v54 = vpop.permute.xlu0 %939  ;;  %v1063_v27 = vadd.f32 %v1608_v52, %v1024_v40  ;;  %v994_v28 = vmul.f32 %v1598_v43, %v936_v48  ;;  %v835_v45 = vadd.f32 %v1303_v63, %v511_v16  ;;  %v830_v7 = vadd.f32 %v829_v11, %v510_v17 }
  0xfd   : > { %v1064_v60 = vadd.f32 %v1608_v52, %v1025_v56  ;;  %v995_v62 = vmul.f32 %v1598_v43, %v940_v54 }
  0xfe   : > { %1096 = vst.msk [vmem:[%s1618_s11 + $0xb0] sm:$0xff] %vm1073_vm2, %v1063_v27  ;;  %v1026_v34 = vadd.f32 %v994_v28, %v800_v13 }
  0xff   : > { %1097 = vst.msk [vmem:[%s1618_s11 + $0xb8] sm:$0xff] %vm1073_vm2, %v1064_v60  ;;  %v1027_v21 = vadd.f32 %v995_v62, %v805_v58  ;;  %v944_v1 = vpop.permute.xlu1 %943 }
 0x100   : > { %v948_v5 = vpop.permute.xlu0 %947  ;;  %v1065_v31 = vadd.f32 %v1608_v52, %v1026_v34  ;;  %v996_v10 = vmul.f32 %v1598_v43, %v944_v1 }
 0x101   : > { %v1066_v29 = vadd.f32 %v1608_v52, %v1027_v21  ;;  %v997_v30 = vmul.f32 %v1598_v43, %v948_v5 }
 0x102   : > { %1098 = vst.msk [vmem:[%s1618_s11 + $0xc0] sm:$0xff] %vm1073_vm2, %v1065_v31  ;;  %v1028_v4 = vadd.f32 %v996_v10, %v810_v14 }
 0x103   : > { %1099 = vst.msk [vmem:[%s1618_s11 + $0xc8] sm:$0xff] %vm1073_vm2, %v1066_v29  ;;  %v1029_v2 = vadd.f32 %v997_v30, %v815_v0  ;;  %v952_v38 = vpop.permute.xlu1 %951 }
 0x104   : > { %v956_v41 = vpop.permute.xlu0 %955  ;;  %v1067_v23 = vadd.f32 %v1608_v52, %v1028_v4  ;;  %v998_v24 = vmul.f32 %v1598_v43, %v952_v38 }
 0x105   : > { %v1068_v32 = vadd.f32 %v1608_v52, %v1029_v2  ;;  %v999_v33 = vmul.f32 %v1598_v43, %v956_v41 }
 0x106   : > { %1100 = vst.msk [vmem:[%s1618_s11 + $0xd0] sm:$0xff] %vm1073_vm2, %v1067_v23  ;;  %v1030_v18 = vadd.f32 %v998_v24, %v820_v37 }
 0x107   : > { %1101 = vst.msk [vmem:[%s1618_s11 + $0xd8] sm:$0xff] %vm1073_vm2, %v1068_v32  ;;  %v1031_v39 = vadd.f32 %v999_v33, %v825_v15  ;;  %v960_v44 = vpop.permute.xlu1 %959 }
 0x108   : > { %v964_v46 = vpop.permute.xlu0 %963  ;;  %v1069_v61 = vadd.f32 %v1608_v52, %v1030_v18  ;;  %v1000_v35 = vmul.f32 %v1598_v43, %v960_v44 }
 0x109   : > { %v1070_v47 = vadd.f32 %v1608_v52, %v1031_v39  ;;  %v1001_v36 = vmul.f32 %v1598_v43, %v964_v46 }
 0x10a   : > { %1102 = vst.msk [vmem:[%s1618_s11 + $0xe0] sm:$0xff] %vm1073_vm2, %v1069_v61  ;;  %v1032_v42 = vadd.f32 %v1000_v35, %v830_v7 }
 0x10b   : > { %1103 = vst.msk [vmem:[%s1618_s11 + $0xe8] sm:$0xff] %vm1073_vm2, %v1070_v47  ;;  %v1033_v49 = vadd.f32 %v1001_v36, %v835_v45 }
 0x10c   : > { %v1071_v19 = vadd.f32 %v1608_v52, %v1032_v42 }
 0x10d   : > { %v1072_v12 = vadd.f32 %v1608_v52, %v1033_v49 }
 0x10e   : > { %1104 = vst.msk [vmem:[%s1618_s11 + $0xf0] sm:$0xff] %vm1073_vm2, %v1071_v19 }
 0x10f   : > { %1105 = vst.msk [vmem:[%s1618_s11 + $0xf8] sm:$0xff] %vm1073_vm2, %v1072_v12 }
 0x110 PF: > { %s15_s18 = sadd.s32 1, %s1326_s18  }
 0x111   : > { %p12_p4 = scmp.ge.s32.totalorder %s15_s18, 4  }
 0x113   :  { %14 = sbr.rel (!%p12_p4) target bundleno = 1 (0x1), region = 73 }

// kernel: reverse.8
= control target key start
LH: loop header
LB: loop body
LE: loop exit
PB: predicated region body
PF: predicated region fallthrough
CT: control target
= control target key end

     0   :  { %s344_s0 = inlined_call_operand.vmem [shape: f32[2,32,16,7], index: 0, kind: input, shape index: {}]   ;;  %s345_s1 = inlined_call_operand.vmem [shape: f32[2,32,16,7], index: 1, kind: output, shape index: {}]  }
   0x1   :  { %v112_v0 = vld [vmem:[%s344_s0 + $0x60] sm:$0xff]  ;;  %v113_v1 = vld [vmem:[%s344_s0 + $0xd0] sm:$0xff]  ;;  %v138_v14 = vld [vmem:[%s344_s0 + $0x68] sm:$0xff] }
   0x2   :  { %v115_v2 = vld [vmem:[%s344_s0 + $0x50] sm:$0xff]  ;;  %4 = vst [vmem:[%s345_s1] sm:$0xff] %v112_v0  ;;  %114 = vst [vmem:[%s345_s1 + $0x70] sm:$0xff] %v113_v1  ;;  %v117_v3 = vld [vmem:[%s344_s0 + $0xc0] sm:$0xff] }
   0x3   :  { %116 = vst [vmem:[%s345_s1 + $0x10] sm:$0xff] %v115_v2  ;;  %v119_v4 = vld [vmem:[%s344_s0 + $0x40] sm:$0xff]  ;;  %v121_v5 = vld [vmem:[%s344_s0 + $0xb0] sm:$0xff]  ;;  %118 = vst [vmem:[%s345_s1 + $0x80] sm:$0xff] %v117_v3 }
   0x4   :  { %120 = vst [vmem:[%s345_s1 + $0x20] sm:$0xff] %v119_v4  ;;  %122 = vst [vmem:[%s345_s1 + $0x90] sm:$0xff] %v121_v5  ;;  %v123_v6 = vld [vmem:[%s344_s0 + $0x30] sm:$0xff]  ;;  %v125_v7 = vld [vmem:[%s344_s0 + $0xa0] sm:$0xff] }
   0x5   :  { %v127_v8 = vld [vmem:[%s344_s0 + $0x20] sm:$0xff]  ;;  %124 = vst [vmem:[%s345_s1 + $0x30] sm:$0xff] %v123_v6  ;;  %126 = vst [vmem:[%s345_s1 + $0xa0] sm:$0xff] %v125_v7  ;;  %v129_v9 = vld [vmem:[%s344_s0 + $0x90] sm:$0xff] }
   0x6   :  { %128 = vst [vmem:[%s345_s1 + $0x40] sm:$0xff] %v127_v8  ;;  %v131_v10 = vld [vmem:[%s344_s0 + $0x10] sm:$0xff]  ;;  %v133_v11 = vld [vmem:[%s344_s0 + $0x80] sm:$0xff]  ;;  %130 = vst [vmem:[%s345_s1 + $0xb0] sm:$0xff] %v129_v9 }
   0x7   :  { %132 = vst [vmem:[%s345_s1 + $0x50] sm:$0xff] %v131_v10  ;;  %134 = vst [vmem:[%s345_s1 + $0xc0] sm:$0xff] %v133_v11  ;;  %v49_v12 = vld [vmem:[%s344_s0] sm:$0xff]  ;;  %v136_v13 = vld [vmem:[%s344_s0 + $0x70] sm:$0xff] }
   0x8   :  { %135 = vst [vmem:[%s345_s1 + $0x60] sm:$0xff] %v49_v12  ;;  %137 = vst [vmem:[%s345_s1 + $0xd0] sm:$0xff] %v136_v13  ;;  %v140_v15 = vld [vmem:[%s344_s0 + $0xd8] sm:$0xff]  ;;  %v144_v17 = vld [vmem:[%s344_s0 + $0xc8] sm:$0xff] }
   0x9   :  { %139 = vst [vmem:[%s345_s1 + $0x8] sm:$0xff] %v138_v14  ;;  %v142_v16 = vld [vmem:[%s344_s0 + $0x58] sm:$0xff]  ;;  %141 = vst [vmem:[%s345_s1 + $0x78] sm:$0xff] %v140_v15  ;;  %v146_v18 = vld [vmem:[%s344_s0 + $0x48] sm:$0xff] }
   0xa   :  { %143 = vst [vmem:[%s345_s1 + $0x18] sm:$0xff] %v142_v16  ;;  %145 = vst [vmem:[%s345_s1 + $0x88] sm:$0xff] %v144_v17  ;;  %v148_v19 = vld [vmem:[%s344_s0 + $0xb8] sm:$0xff]  ;;  %v152_v21 = vld [vmem:[%s344_s0 + $0xa8] sm:$0xff] }
   0xb   :  { %v150_v20 = vld [vmem:[%s344_s0 + $0x38] sm:$0xff]  ;;  %147 = vst [vmem:[%s345_s1 + $0x28] sm:$0xff] %v146_v18  ;;  %149 = vst [vmem:[%s345_s1 + $0x98] sm:$0xff] %v148_v19  ;;  %v154_v22 = vld [vmem:[%s344_s0 + $0x28] sm:$0xff] }
   0xc   :  { %151 = vst [vmem:[%s345_s1 + $0x38] sm:$0xff] %v150_v20  ;;  %v156_v23 = vld [vmem:[%s344_s0 + $0x98] sm:$0xff]  ;;  %153 = vst [vmem:[%s345_s1 + $0xa8] sm:$0xff] %v152_v21  ;;  %v160_v25 = vld [vmem:[%s344_s0 + $0x88] sm:$0xff] }
   0xd   :  { %155 = vst [vmem:[%s345_s1 + $0x48] sm:$0xff] %v154_v22  ;;  %157 = vst [vmem:[%s345_s1 + $0xb8] sm:$0xff] %v156_v23  ;;  %v158_v24 = vld [vmem:[%s344_s0 + $0x18] sm:$0xff]  ;;  %v162_v26 = vld [vmem:[%s344_s0 + $0x8] sm:$0xff] }
   0xe   :  { %159 = vst [vmem:[%s345_s1 + $0x58] sm:$0xff] %v158_v24  ;;  %161 = vst [vmem:[%s345_s1 + $0xc8] sm:$0xff] %v160_v25  ;;  %v164_v27 = vld [vmem:[%s344_s0 + $0x78] sm:$0xff] }
   0xf   :  { %163 = vst [vmem:[%s345_s1 + $0x68] sm:$0xff] %v162_v26  ;;  %165 = vst [vmem:[%s345_s1 + $0xd8] sm:$0xff] %v164_v27 }

// kernel: fno2d_forward.11
= control target key start
LH: loop header
LB: loop body
LE: loop exit
PB: predicated region body
PF: predicated region fallthrough
CT: control target
= control target key end

     0   :  { %v32_v0 = vlaneseq  ;;  %v5022_v2 = vmov 1966171168   ;;  %s9673_s0 = inlined_call_operand.vmem [shape: f32[32,2,128], index: 0, kind: input, shape index: {}]   ;;  %s9674_s1 = inlined_call_operand.vmem [shape: f32[32,2,128], index: 1, kind: input, shape index: {}]   ;;  %s9675_s2 = inlined_call_operand.vmem [shape: f32[32,32,128], index: 2, kind: input, shape index: {}]   ;;  %s9676_s3 = inlined_call_operand.vmem [shape: f32[32,32,128], index: 3, kind: input, shape index: {}]   ;;  %s9677_s4 = inlined_call_operand.vmem [shape: f32[2,32,128], index: 4, kind: output, shape index: {0}]   ;;  %s9678_s5 = inlined_call_operand.vmem [shape: f32[2,32,128], index: 5, kind: output, shape index: {1}]  }
   0x1   :  { %v4647_v1 = vld.sshfl [vmem:[%s9673_s0] sm:$0x11 pattern:$0x75316420]  ;;  %v30_v3 = vunpack.c.l.s4 %v5022_v2  ;;  %v68_v19 = vld [vmem:[%s9675_s2 + $0x8] sm:$0xff]  ;;  %v69_v20 = vld [vmem:[%s9675_s2 + $0x10] sm:$0xff] }
   0x2   :  { %v33_v4 = vshrl.u32 %v32_v0, 7  ;;  %v4648_v5 = vld.sshfl [vmem:[%s9674_s1] sm:$0x11 pattern:$0x75316420]  ;;  %v28_v6 = vcombine.high %v4647_v1, %v4647_v1  ;;  %v70_v21 = vld [vmem:[%s9675_s2 + $0x18] sm:$0xff] }
   0x3   :  { %v31_v7 = vunpack.c.0.s8 %v30_v3  ;;  %v52_v8 = vcombine.high %v4648_v5, %v4648_v5  ;;  %v4650_v11 = vld.sshfl [vmem:[%s9673_s0 + $0x2] sm:$0x11 pattern:$0x75316420]  ;;  %v72_v31 = vld [vmem:[%s9676_s3 + $0x8] sm:$0xff]  ;;  %v73_v32 = vld [vmem:[%s9676_s3 + $0x10] sm:$0xff] }
   0x4   :  { %v5061_v10 = vsub.s32 0, %v33_v4  ;;  %v169_v12 = vcombine.high %v4650_v11, %v4650_v11  ;;  %v4652_v13 = vld.sshfl [vmem:[%s9674_s1 + $0x2] sm:$0x11 pattern:$0x75316420]  ;;  %v74_v33 = vld [vmem:[%s9676_s3 + $0x18] sm:$0xff] }
   0x5   :  { %v5059_v9 = vsub.s32 %v31_v7, %v33_v4  ;;  %v67_v18 = vld [vmem:[%s9675_s2] sm:$0xff]  ;;  %v194_v24 = vcombine.high %v4652_v13, %v4652_v13 }
   0x6   :  { %v71_v26 = vld [vmem:[%s9676_s3] sm:$0xff] }
   0x7   :  { %v35_v14 = vrot.slane %v4647_v1, %v5059_v9  ;;  %v42_v15 = vrot.slane %v28_v6, %v5059_v9  ;;  %v59_v16 = vrot.slane %v4648_v5, %v5059_v9  ;;  %v66_v17 = vrot.slane %v52_v8, %v5059_v9 }
   0x8   :  { %v176_v22 = vrot.slane %v4650_v11, %v5059_v9  ;;  %v183_v23 = vrot.slane %v169_v12, %v5059_v9  ;;  %v201_v25 = vrot.slane %v4652_v13, %v5059_v9  ;;  %v5105_v34 = vrot.slane %v194_v24, %v5059_v9  ;;  %v5143_v12 = vld [vmem:[%s9675_s2 + $0x20] sm:$0xff] }
   0x9   :  { %v78_v27 = vrot.slane %v35_v14, %v5061_v10  ;;  %v82_v28 = vrot.slane %v42_v15, %v5061_v10  ;;  %v104_v29 = vrot.slane %v59_v16, %v5061_v10  ;;  %v108_v30 = vrot.slane %v66_v17, %v5061_v10  ;;  %v5148_v17 = vld [vmem:[%s9675_s2 + $0x28] sm:$0xff] }
   0xa   :  { %v5108_v35 = vrot.slane %v176_v22, %v5061_v10  ;;  %v5111_v36 = vrot.slane %v183_v23, %v5061_v10  ;;  %v5114_v37 = vrot.slane %v201_v25, %v5061_v10  ;;  %v5153_v22 = vld [vmem:[%s9675_s2 + $0x30] sm:$0xff]  ;;  %v5158_v23 = vld [vmem:[%s9675_s2 + $0x38] sm:$0xff] }
   0xb   :  { %v5116_v38 = vmul.f32 %v78_v27, %v67_v18  ;;  %v5118_v39 = vmul.f32 %v78_v27, %v68_v19  ;;  %v5120_v40 = vmul.f32 %v78_v27, %v69_v20  ;;  %v5122_v41 = vmul.f32 %v78_v27, %v70_v21 }
   0xc   :  { %v5124_v42 = vmul.f32 %v82_v28, %v67_v18  ;;  %v5126_v43 = vmul.f32 %v82_v28, %v68_v19  ;;  %v5128_v44 = vmul.f32 %v82_v28, %v69_v20  ;;  %v5130_v45 = vmul.f32 %v82_v28, %v70_v21 }
   0xd   :  { %v111_v46 = vmul.f32 %v104_v29, %v71_v26  ;;  %v112_v47 = vmul.f32 %v104_v29, %v72_v31  ;;  %v113_v48 = vmul.f32 %v104_v29, %v73_v32  ;;  %v114_v49 = vmul.f32 %v104_v29, %v74_v33 }
   0xe   :  { %v115_v50 = vmul.f32 %v108_v30, %v71_v26  ;;  %v116_v51 = vmul.f32 %v108_v30, %v72_v31  ;;  %v117_v52 = vmul.f32 %v108_v30, %v73_v32  ;;  %v118_v53 = vmul.f32 %v108_v30, %v74_v33 }
   0xf   :  { %v119_v54 = vsub.f32 %v5116_v38, %v111_v46  ;;  %v120_v55 = vsub.f32 %v5118_v39, %v112_v47  ;;  %v121_v56 = vsub.f32 %v5120_v40, %v113_v48  ;;  %v122_v57 = vsub.f32 %v5122_v41, %v114_v49  ;;  %v4657_v40 = vld [vmem:[%s9676_s3 + $0x20] sm:$0xff]  ;;  %v4658_v41 = vld [vmem:[%s9676_s3 + $0x28] sm:$0xff] }
  0x10   :  { %v123_v58 = vsub.f32 %v5124_v42, %v115_v50  ;;  %v124_v59 = vsub.f32 %v5126_v43, %v116_v51  ;;  %v125_v60 = vsub.f32 %v5128_v44, %v117_v52  ;;  %v126_v61 = vsub.f32 %v5130_v45, %v118_v53  ;;  %v4659_v42 = vld [vmem:[%s9676_s3 + $0x30] sm:$0xff]  ;;  %v4660_v51 = vld [vmem:[%s9676_s3 + $0x38] sm:$0xff] }
  0x11   :  { %v127_v62 = vmul.f32 %v78_v27, %v71_v26  ;;  %v128_v63 = vmul.f32 %v78_v27, %v72_v31  ;;  %v129_v0 = vmul.f32 %v78_v27, %v73_v32  ;;  %v130_v1 = vmul.f32 %v78_v27, %v74_v33 }
  0x12   :  { %v131_v2 = vmul.f32 %v82_v28, %v71_v26  ;;  %v132_v3 = vmul.f32 %v82_v28, %v72_v31  ;;  %v133_v4 = vmul.f32 %v82_v28, %v73_v32  ;;  %v134_v5 = vmul.f32 %v82_v28, %v74_v33 }
  0x13   :  { %v143_v6 = vmul.f32 %v104_v29, %v67_v18  ;;  %v144_v7 = vmul.f32 %v104_v29, %v68_v19  ;;  %v145_v8 = vmul.f32 %v104_v29, %v69_v20  ;;  %v146_v11 = vmul.f32 %v104_v29, %v70_v21 }
  0x14   :  { %v147_v13 = vmul.f32 %v108_v30, %v67_v18  ;;  %v148_v14 = vmul.f32 %v108_v30, %v68_v19  ;;  %v149_v15 = vmul.f32 %v108_v30, %v69_v20  ;;  %v150_v16 = vmul.f32 %v108_v30, %v70_v21 }
  0x15   :  { %v151_v24 = vadd.f32 %v143_v6, %v127_v62  ;;  %v152_v18 = vadd.f32 %v144_v7, %v128_v63  ;;  %v153_v19 = vadd.f32 %v145_v8, %v129_v0  ;;  %v154_v20 = vadd.f32 %v146_v11, %v130_v1 }
  0x16   :  { %v155_v21 = vadd.f32 %v147_v13, %v131_v2  ;;  %v156_v25 = vadd.f32 %v148_v14, %v132_v3  ;;  %v157_v26 = vadd.f32 %v149_v15, %v133_v4  ;;  %v158_v27 = vadd.f32 %v150_v16, %v134_v5 }
  0x17   :  { %v229_v28 = vmul.f32 %v5143_v12, %v5108_v35  ;;  %v230_v29 = vmul.f32 %v5148_v17, %v5108_v35  ;;  %v231_v30 = vmul.f32 %v5153_v22, %v5108_v35  ;;  %v232_v31 = vmul.f32 %v5158_v23, %v5108_v35 }
  0x18   :  { %v233_v32 = vmul.f32 %v5143_v12, %v5111_v36  ;;  %v234_v33 = vmul.f32 %v5148_v17, %v5111_v36  ;;  %v235_v38 = vmul.f32 %v5153_v22, %v5111_v36  ;;  %v236_v39 = vmul.f32 %v5158_v23, %v5111_v36 }
  0x19   :  { %v5185_v43 = vadd.f32 %v229_v28, %v119_v54  ;;  %v5187_v44 = vadd.f32 %v230_v29, %v120_v55  ;;  %v5189_v45 = vadd.f32 %v231_v30, %v121_v56  ;;  %v5191_v46 = vadd.f32 %v232_v31, %v122_v57 }
  0x1a   :  { %v5193_v47 = vadd.f32 %v233_v32, %v123_v58  ;;  %v5195_v48 = vadd.f32 %v234_v33, %v124_v59  ;;  %v5197_v49 = vadd.f32 %v235_v38, %v125_v60  ;;  %v5199_v50 = vadd.f32 %v236_v39, %v126_v61  ;;  %v4662_v33 = vld.sshfl [vmem:[%s9673_s0 + $0x4] sm:$0x11 pattern:$0x75316420] }
  0x1b   :  { %v252_v52 = vrot.slane %v5105_v34, %v5061_v10  ;;  %v5207_v53 = vmul.f32 %v4657_v40, %v5114_v37  ;;  %v5210_v54 = vmul.f32 %v4658_v41, %v5114_v37  ;;  %v5213_v55 = vmul.f32 %v4659_v42, %v5114_v37 }
  0x1c   :  { %v5216_v56 = vmul.f32 %v4660_v51, %v5114_v37  ;;  %v271_v57 = vmul.f32 %v4657_v40, %v5108_v35  ;;  %v272_v58 = vmul.f32 %v4658_v41, %v5108_v35  ;;  %v273_v59 = vmul.f32 %v4659_v42, %v5108_v35 }
  0x1d   :  { %v5221_v60 = vmul.f32 %v4657_v40, %v252_v52  ;;  %v5223_v34 = vmul.f32 %v4658_v41, %v252_v52  ;;  %v5225_v61 = vmul.f32 %v4659_v42, %v252_v52  ;;  %v5227_v62 = vmul.f32 %v4660_v51, %v252_v52 }
  0x1e   :  { %v263_v63 = vsub.f32 %v5185_v43, %v5207_v53  ;;  %v264_v0 = vsub.f32 %v5187_v44, %v5210_v54  ;;  %v265_v1 = vsub.f32 %v5189_v45, %v5213_v55  ;;  %v266_v2 = vsub.f32 %v5191_v46, %v5216_v56  ;;  %v4671_v43 = vld [vmem:[%s9676_s3 + $0x50] sm:$0xff]  ;;  %v4672_v44 = vld [vmem:[%s9676_s3 + $0x58] sm:$0xff] }
  0x1f   :  { %v267_v3 = vsub.f32 %v5193_v47, %v5221_v60  ;;  %v268_v4 = vsub.f32 %v5195_v48, %v5223_v34  ;;  %v269_v5 = vsub.f32 %v5197_v49, %v5225_v61  ;;  %v270_v6 = vsub.f32 %v5199_v50, %v5227_v62 }
  0x20   :  { %v274_v7 = vmul.f32 %v4660_v51, %v5108_v35  ;;  %v275_v8 = vmul.f32 %v4657_v40, %v5111_v36  ;;  %v276_v11 = vmul.f32 %v4658_v41, %v5111_v36  ;;  %v277_v13 = vmul.f32 %v4659_v42, %v5111_v36 }
  0x21   :  { %v278_v14 = vmul.f32 %v4660_v51, %v5111_v36  ;;  %v279_v15 = vadd.f32 %v271_v57, %v151_v24  ;;  %v280_v16 = vadd.f32 %v272_v58, %v152_v18  ;;  %v281_v28 = vadd.f32 %v273_v59, %v153_v19  ;;  %v4664_v24 = vld.sshfl [vmem:[%s9674_s1 + $0x4] sm:$0x11 pattern:$0x75316420] }
  0x22   :  { %v282_v29 = vadd.f32 %v274_v7, %v154_v20  ;;  %v283_v30 = vadd.f32 %v275_v8, %v155_v21  ;;  %v284_v31 = vadd.f32 %v276_v11, %v156_v25  ;;  %v285_v32 = vadd.f32 %v277_v13, %v157_v26  ;;  %v4674_v25 = vld.sshfl [vmem:[%s9673_s0 + $0x6] sm:$0x11 pattern:$0x75316420]  ;;  %v5302_v7 = vld [vmem:[%s9675_s2 + $0x48] sm:$0xff]  ;;  %v5307_v8 = vld [vmem:[%s9675_s2 + $0x50] sm:$0xff] }
  0x23   :  { %v286_v35 = vadd.f32 %v278_v14, %v158_v27  ;;  %v287_v38 = vmul.f32 %v5143_v12, %v5114_v37  ;;  %v288_v39 = vmul.f32 %v5148_v17, %v5114_v37  ;;  %v289_v36 = vmul.f32 %v5153_v22, %v5114_v37  ;;  %v5297_v59 = vld [vmem:[%s9675_s2 + $0x40] sm:$0xff] }
  0x24   :  { %v290_v18 = vmul.f32 %v5158_v23, %v5114_v37  ;;  %v291_v19 = vmul.f32 %v5143_v12, %v252_v52  ;;  %v292_v20 = vmul.f32 %v5148_v17, %v252_v52  ;;  %v293_v21 = vmul.f32 %v5153_v22, %v252_v52  ;;  %v5280_v37 = vld.sshfl [vmem:[%s9674_s1 + $0x6] sm:$0x11 pattern:$0x75316420] }
  0x25   :  { %v294_v26 = vmul.f32 %v5158_v23, %v252_v52  ;;  %v5271_v27 = vadd.f32 %v287_v38, %v279_v15  ;;  %v5273_v40 = vadd.f32 %v288_v39, %v280_v16  ;;  %v5275_v41 = vadd.f32 %v289_v36, %v281_v28  ;;  %v5317_v28 = vld [vmem:[%s9675_s2 + $0x58] sm:$0xff]  ;;  %v4669_v38 = vld [vmem:[%s9676_s3 + $0x40] sm:$0xff]  ;;  %v4670_v39 = vld [vmem:[%s9676_s3 + $0x48] sm:$0xff] }
  0x26   :  { %v5282_v12 = vadd.f32 %v290_v18, %v282_v29  ;;  %v5284_v17 = vadd.f32 %v291_v19, %v283_v30  ;;  %v5286_v22 = vadd.f32 %v292_v20, %v284_v31  ;;  %v5288_v42 = vadd.f32 %v293_v21, %v285_v32 }
  0x27   :  { %v5290_v23 = vadd.f32 %v294_v26, %v286_v35  ;;  %v313_v51 = vcombine.high %v4662_v33, %v4662_v33  ;;  %v320_v52 = vrot.slane %v4662_v33, %v5059_v9  ;;  %v338_v57 = vcombine.high %v4664_v24, %v4664_v24 }
  0x28   :  { %v345_v58 = vrot.slane %v4664_v24, %v5059_v9  ;;  %v457_v11 = vcombine.high %v4674_v25, %v4674_v25  ;;  %v464_v13 = vrot.slane %v4674_v25, %v5059_v9  ;;  %v482_v14 = vcombine.high %v5280_v37, %v5280_v37 }
  0x29   :  { %v327_v15 = vrot.slane %v313_v51, %v5059_v9  ;;  %v352_v16 = vrot.slane %v338_v57, %v5059_v9  ;;  %v366_v29 = vrot.slane %v320_v52, %v5061_v10  ;;  %v489_v30 = vrot.slane %v5280_v37, %v5059_v9  ;;  %v4683_v37 = vld [vmem:[%s9676_s3 + $0x70] sm:$0xff] }
  0x2a   :  { %v392_v31 = vrot.slane %v345_v58, %v5061_v10  ;;  %v5324_v32 = vrot.slane %v457_v11, %v5059_v9  ;;  %v5327_v33 = vrot.slane %v482_v14, %v5059_v9  ;;  %v5330_v35 = vrot.slane %v464_v13, %v5061_v10 }
  0x2b   :  { %v370_v36 = vrot.slane %v327_v15, %v5061_v10  ;;  %v373_v24 = vmul.f32 %v5297_v59, %v366_v29  ;;  %v374_v18 = vmul.f32 %v5302_v7, %v366_v29  ;;  %v375_v19 = vmul.f32 %v5307_v8, %v366_v29 }
  0x2c   :  { %v376_v20 = vmul.f32 %v5317_v28, %v366_v29  ;;  %v396_v21 = vrot.slane %v352_v16, %v5061_v10  ;;  %v5344_v25 = vmul.f32 %v4669_v38, %v392_v31  ;;  %v5346_v26 = vmul.f32 %v4670_v39, %v392_v31 }
  0x2d   :  { %v377_v51 = vmul.f32 %v5297_v59, %v370_v36  ;;  %v378_v52 = vmul.f32 %v5302_v7, %v370_v36  ;;  %v379_v57 = vmul.f32 %v5307_v8, %v370_v36  ;;  %v380_v58 = vmul.f32 %v5317_v28, %v370_v36 }
  0x2e   :  { %v5355_v11 = vadd.f32 %v373_v24, %v263_v63  ;;  %v5360_v13 = vadd.f32 %v374_v18, %v264_v0  ;;  %v5365_v14 = vadd.f32 %v375_v19, %v265_v1  ;;  %v5370_v15 = vadd.f32 %v376_v20, %v266_v2 }
  0x2f   :  { %v5381_v53 = vadd.f32 %v377_v51, %v267_v3  ;;  %v5386_v45 = vadd.f32 %v378_v52, %v268_v4  ;;  %v5391_v46 = vadd.f32 %v379_v57, %v269_v5  ;;  %v5396_v54 = vadd.f32 %v380_v58, %v270_v6 }
  0x30   :  { %v5398_v55 = vmul.f32 %v4671_v43, %v392_v31  ;;  %v5400_v47 = vmul.f32 %v4672_v44, %v392_v31  ;;  %v5402_v56 = vmul.f32 %v4669_v38, %v396_v21  ;;  %v5404_v60 = vmul.f32 %v4670_v39, %v396_v21 }
  0x31   :  { %v5406_v48 = vmul.f32 %v4671_v43, %v396_v21  ;;  %v5408_v34 = vmul.f32 %v4672_v44, %v396_v21  ;;  %v407_v49 = vsub.f32 %v5355_v11, %v5344_v25  ;;  %v408_v50 = vsub.f32 %v5360_v13, %v5346_v26  ;;  %v5450_v11 = vld [vmem:[%s9675_s2 + $0x68] sm:$0xff] }
  0x32   :  { %v409_v61 = vsub.f32 %v5365_v14, %v5398_v55  ;;  %v410_v62 = vsub.f32 %v5370_v15, %v5400_v47  ;;  %v411_v63 = vsub.f32 %v5381_v53, %v5402_v56  ;;  %v412_v0 = vsub.f32 %v5386_v45, %v5404_v60  ;;  %v4681_v56 = vld [vmem:[%s9676_s3 + $0x60] sm:$0xff]  ;;  %v4682_v60 = vld [vmem:[%s9676_s3 + $0x68] sm:$0xff] }
  0x33   :  { %v413_v1 = vsub.f32 %v5391_v46, %v5406_v48  ;;  %v414_v2 = vsub.f32 %v5396_v54, %v5408_v34  ;;  %v415_v3 = vmul.f32 %v4669_v38, %v366_v29  ;;  %v416_v4 = vmul.f32 %v4670_v39, %v366_v29 }
  0x34   :  { %v417_v5 = vmul.f32 %v4671_v43, %v366_v29  ;;  %v418_v6 = vmul.f32 %v4672_v44, %v366_v29  ;;  %v419_v16 = vmul.f32 %v4669_v38, %v370_v36  ;;  %v420_v24 = vmul.f32 %v4670_v39, %v370_v36 }
  0x35   :  { %v421_v18 = vmul.f32 %v4671_v43, %v370_v36  ;;  %v422_v19 = vmul.f32 %v4672_v44, %v370_v36  ;;  %v423_v20 = vadd.f32 %v415_v3, %v5271_v27  ;;  %v424_v25 = vadd.f32 %v416_v4, %v5273_v40 }
  0x36   :  { %v425_v26 = vadd.f32 %v417_v5, %v5275_v41  ;;  %v426_v51 = vadd.f32 %v418_v6, %v5282_v12  ;;  %v427_v52 = vadd.f32 %v419_v16, %v5284_v17  ;;  %v428_v57 = vadd.f32 %v420_v24, %v5286_v22  ;;  %v5443_v17 = vld [vmem:[%s9675_s2 + $0x60] sm:$0xff]  ;;  %v4684_v24 = vld [vmem:[%s9676_s3 + $0x78] sm:$0xff] }
  0x37   :  { %v429_v58 = vadd.f32 %v421_v18, %v5288_v42  ;;  %v430_v29 = vadd.f32 %v422_v19, %v5290_v23  ;;  %v431_v38 = vmul.f32 %v5297_v59, %v392_v31  ;;  %v432_v39 = vmul.f32 %v5302_v7, %v392_v31 }
  0x38   :  { %v433_v27 = vmul.f32 %v5307_v8, %v392_v31  ;;  %v434_v40 = vmul.f32 %v5317_v28, %v392_v31  ;;  %v435_v41 = vmul.f32 %v5297_v59, %v396_v21  ;;  %v436_v12 = vmul.f32 %v5302_v7, %v396_v21  ;;  %v5455_v59 = vld [vmem:[%s9675_s2 + $0x70] sm:$0xff]  ;;  %v5460_v7 = vld [vmem:[%s9675_s2 + $0x78] sm:$0xff] }
  0x39   :  { %v437_v22 = vmul.f32 %v5307_v8, %v396_v21  ;;  %v438_v42 = vmul.f32 %v5317_v28, %v396_v21  ;;  %v439_v23 = vadd.f32 %v431_v38, %v423_v20  ;;  %v440_v36 = vadd.f32 %v432_v39, %v424_v25 }
  0x3a   :  { %v441_v8 = vadd.f32 %v433_v27, %v425_v26  ;;  %v442_v31 = vadd.f32 %v434_v40, %v426_v51  ;;  %v443_v28 = vadd.f32 %v435_v41, %v427_v52  ;;  %v444_v21 = vadd.f32 %v436_v12, %v428_v57 }
  0x3b   :  { %v445_v13 = vadd.f32 %v437_v22, %v429_v58  ;;  %v446_v14 = vadd.f32 %v438_v42, %v430_v29  ;;  %v514_v15 = vrot.slane %v5324_v32, %v5061_v10  ;;  %v517_v43 = vmul.f32 %v5443_v17, %v5330_v35 }
  0x3c   :  { %v518_v44 = vmul.f32 %v5450_v11, %v5330_v35  ;;  %v519_v53 = vmul.f32 %v5455_v59, %v5330_v35  ;;  %v520_v45 = vmul.f32 %v5460_v7, %v5330_v35  ;;  %v536_v46 = vrot.slane %v489_v30, %v5061_v10 }
  0x3d   :  { %v521_v54 = vmul.f32 %v5443_v17, %v514_v15  ;;  %v522_v32 = vmul.f32 %v5450_v11, %v514_v15  ;;  %v523_v55 = vmul.f32 %v5455_v59, %v514_v15  ;;  %v524_v47 = vmul.f32 %v5460_v7, %v514_v15 }
  0x3e   :  { %v5489_v30 = vadd.f32 %v517_v43, %v407_v49  ;;  %v5491_v48 = vadd.f32 %v518_v44, %v408_v50  ;;  %v5493_v34 = vadd.f32 %v519_v53, %v409_v61  ;;  %v5495_v3 = vadd.f32 %v520_v45, %v410_v62 }
  0x3f   :  { %v5497_v4 = vadd.f32 %v521_v54, %v411_v63  ;;  %v5499_v5 = vadd.f32 %v522_v32, %v412_v0  ;;  %v5501_v6 = vadd.f32 %v523_v55, %v413_v1  ;;  %v5503_v16 = vadd.f32 %v524_v47, %v414_v2  ;;  %v4686_v32 = vld.sshfl [vmem:[%s9673_s0 + $0x8] sm:$0x11 pattern:$0x75316420] }
  0x40   :  { %v540_v49 = vrot.slane %v5327_v33, %v5061_v10  ;;  %v5510_v50 = vmul.f32 %v4681_v56, %v536_v46  ;;  %v5512_v61 = vmul.f32 %v4682_v60, %v536_v46  ;;  %v5514_v62 = vmul.f32 %v4683_v37, %v536_v46 }
  0x41   :  { %v5516_v63 = vmul.f32 %v4684_v24, %v536_v46  ;;  %v559_v0 = vmul.f32 %v4681_v56, %v5330_v35  ;;  %v560_v1 = vmul.f32 %v4682_v60, %v5330_v35  ;;  %v561_v2 = vmul.f32 %v4683_v37, %v5330_v35 }
  0x42   :  { %v5521_v18 = vmul.f32 %v4681_v56, %v540_v49  ;;  %v5523_v19 = vmul.f32 %v4682_v60, %v540_v49  ;;  %v5525_v20 = vmul.f32 %v4683_v37, %v540_v49  ;;  %v5527_v33 = vmul.f32 %v4684_v24, %v540_v49 }
  0x43   :  { %v551_v25 = vsub.f32 %v5489_v30, %v5510_v50  ;;  %v552_v26 = vsub.f32 %v5491_v48, %v5512_v61  ;;  %v553_v51 = vsub.f32 %v5493_v34, %v5514_v62  ;;  %v554_v52 = vsub.f32 %v5495_v3, %v5516_v63  ;;  %v4695_v30 = vld [vmem:[%s9676_s3 + $0x90] sm:$0xff]  ;;  %v4696_v48 = vld [vmem:[%s9676_s3 + $0x98] sm:$0xff] }
  0x44   :  { %v555_v57 = vsub.f32 %v5497_v4, %v5521_v18  ;;  %v556_v58 = vsub.f32 %v5499_v5, %v5523_v19  ;;  %v557_v29 = vsub.f32 %v5501_v6, %v5525_v20  ;;  %v558_v38 = vsub.f32 %v5503_v16, %v5527_v33 }
  0x45   :  { %v562_v39 = vmul.f32 %v4684_v24, %v5330_v35  ;;  %v563_v27 = vmul.f32 %v4681_v56, %v514_v15  ;;  %v564_v40 = vmul.f32 %v4682_v60, %v514_v15  ;;  %v565_v41 = vmul.f32 %v4683_v37, %v514_v15 }
  0x46   :  { %v566_v12 = vmul.f32 %v4684_v24, %v514_v15  ;;  %v567_v22 = vadd.f32 %v559_v0, %v439_v23  ;;  %v568_v42 = vadd.f32 %v560_v1, %v440_v36  ;;  %v569_v43 = vadd.f32 %v561_v2, %v441_v8  ;;  %v4688_v23 = vld.sshfl [vmem:[%s9674_s1 + $0x8] sm:$0x11 pattern:$0x75316420]  ;;  %v5589_v2 = vld [vmem:[%s9675_s2 + $0x80] sm:$0xff] }
  0x47   :  { %v570_v44 = vadd.f32 %v562_v39, %v442_v31  ;;  %v571_v53 = vadd.f32 %v563_v27, %v443_v28  ;;  %v572_v45 = vadd.f32 %v564_v40, %v444_v21  ;;  %v573_v54 = vadd.f32 %v565_v41, %v445_v13  ;;  %v4698_v21 = vld.sshfl [vmem:[%s9673_s0 + $0xa] sm:$0x11 pattern:$0x75316420]  ;;  %v5599_v27 = vld [vmem:[%s9675_s2 + $0x90] sm:$0xff] }
  0x48   :  { %v574_v55 = vadd.f32 %v566_v12, %v446_v14  ;;  %v575_v47 = vmul.f32 %v5443_v17, %v536_v46  ;;  %v576_v35 = vmul.f32 %v5450_v11, %v536_v46  ;;  %v577_v56 = vmul.f32 %v5455_v59, %v536_v46  ;;  %v5594_v39 = vld [vmem:[%s9675_s2 + $0x88] sm:$0xff] }
  0x49   :  { %v578_v36 = vmul.f32 %v5460_v7, %v536_v46  ;;  %v579_v8 = vmul.f32 %v5443_v17, %v540_v49  ;;  %v580_v31 = vmul.f32 %v5450_v11, %v540_v49  ;;  %v581_v28 = vmul.f32 %v5455_v59, %v540_v49  ;;  %v5572_v17 = vld.sshfl [vmem:[%s9674_s1 + $0xa] sm:$0x11 pattern:$0x75316420] }
  0x4a   :  { %v582_v13 = vmul.f32 %v5460_v7, %v540_v49  ;;  %v5563_v14 = vadd.f32 %v575_v47, %v567_v22  ;;  %v5565_v15 = vadd.f32 %v576_v35, %v568_v42  ;;  %v5567_v60 = vadd.f32 %v577_v56, %v569_v43  ;;  %v5609_v43 = vld [vmem:[%s9675_s2 + $0x98] sm:$0xff]  ;;  %v4693_v47 = vld [vmem:[%s9676_s3 + $0x80] sm:$0xff]  ;;  %v4694_v35 = vld [vmem:[%s9676_s3 + $0x88] sm:$0xff] }
  0x4b   :  { %v5574_v11 = vadd.f32 %v578_v36, %v570_v44  ;;  %v5576_v59 = vadd.f32 %v579_v8, %v571_v53  ;;  %v5578_v46 = vadd.f32 %v580_v31, %v572_v45  ;;  %v5580_v37 = vadd.f32 %v581_v28, %v573_v54 }
  0x4c   :  { %v5582_v7 = vadd.f32 %v582_v13, %v574_v55  ;;  %v601_v24 = vcombine.high %v4686_v32, %v4686_v32  ;;  %v608_v49 = vrot.slane %v4686_v32, %v5059_v9  ;;  %v626_v0 = vcombine.high %v4688_v23, %v4688_v23 }
  0x4d   :  { %v633_v1 = vrot.slane %v4688_v23, %v5059_v9  ;;  %v745_v40 = vcombine.high %v4698_v21, %v4698_v21  ;;  %v752_v41 = vrot.slane %v4698_v21, %v5059_v9  ;;  %v770_v12 = vcombine.high %v5572_v17, %v5572_v17 }
  0x4e   :  { %v615_v22 = vrot.slane %v601_v24, %v5059_v9  ;;  %v640_v42 = vrot.slane %v626_v0, %v5059_v9  ;;  %v654_v44 = vrot.slane %v608_v49, %v5061_v10  ;;  %v777_v53 = vrot.slane %v5572_v17, %v5059_v9  ;;  %v4707_v17 = vld [vmem:[%s9676_s3 + $0xb0] sm:$0xff] }
  0x4f   :  { %v680_v45 = vrot.slane %v633_v1, %v5061_v10  ;;  %v5616_v54 = vrot.slane %v745_v40, %v5059_v9  ;;  %v5619_v32 = vrot.slane %v770_v12, %v5059_v9  ;;  %v5622_v55 = vrot.slane %v752_v41, %v5061_v10 }
  0x50   :  { %v658_v56 = vrot.slane %v615_v22, %v5061_v10  ;;  %v661_v23 = vmul.f32 %v5589_v2, %v654_v44  ;;  %v662_v36 = vmul.f32 %v5594_v39, %v654_v44  ;;  %v663_v8 = vmul.f32 %v5599_v27, %v654_v44 }
  0x51   :  { %v664_v31 = vmul.f32 %v5609_v43, %v654_v44  ;;  %v684_v28 = vrot.slane %v640_v42, %v5061_v10  ;;  %v5636_v21 = vmul.f32 %v4693_v47, %v680_v45  ;;  %v5638_v13 = vmul.f32 %v4694_v35, %v680_v45 }
  0x52   :  { %v665_v24 = vmul.f32 %v5589_v2, %v658_v56  ;;  %v666_v49 = vmul.f32 %v5594_v39, %v658_v56  ;;  %v667_v0 = vmul.f32 %v5599_v27, %v658_v56  ;;  %v668_v1 = vmul.f32 %v5609_v43, %v658_v56 }
  0x53   :  { %v5647_v40 = vadd.f32 %v661_v23, %v551_v25  ;;  %v5652_v41 = vadd.f32 %v662_v36, %v552_v26  ;;  %v5657_v12 = vadd.f32 %v663_v8, %v553_v51  ;;  %v5662_v22 = vadd.f32 %v664_v31, %v554_v52 }
  0x54   :  { %v5673_v50 = vadd.f32 %v665_v24, %v555_v57  ;;  %v5678_v34 = vadd.f32 %v666_v49, %v556_v58  ;;  %v5683_v3 = vadd.f32 %v667_v0, %v557_v29  ;;  %v5688_v61 = vadd.f32 %v668_v1, %v558_v38 }
  0x55   :  { %v5690_v62 = vmul.f32 %v4695_v30, %v680_v45  ;;  %v5692_v4 = vmul.f32 %v4696_v48, %v680_v45  ;;  %v5694_v63 = vmul.f32 %v4693_v47, %v684_v28  ;;  %v5696_v18 = vmul.f32 %v4694_v35, %v684_v28 }
  0x56   :  { %v5698_v5 = vmul.f32 %v4695_v30, %v684_v28  ;;  %v5700_v19 = vmul.f32 %v4696_v48, %v684_v28  ;;  %v695_v6 = vsub.f32 %v5647_v40, %v5636_v21  ;;  %v696_v16 = vsub.f32 %v5652_v41, %v5638_v13  ;;  %v5742_v40 = vld [vmem:[%s9675_s2 + $0xa8] sm:$0xff] }
  0x57   :  { %v697_v20 = vsub.f32 %v5657_v12, %v5690_v62  ;;  %v698_v33 = vsub.f32 %v5662_v22, %v5692_v4  ;;  %v699_v25 = vsub.f32 %v5673_v50, %v5694_v63  ;;  %v700_v26 = vsub.f32 %v5678_v34, %v5696_v18  ;;  %v4705_v63 = vld [vmem:[%s9676_s3 + $0xa0] sm:$0xff]  ;;  %v4706_v18 = vld [vmem:[%s9676_s3 + $0xa8] sm:$0xff] }
  0x58   :  { %v701_v51 = vsub.f32 %v5683_v3, %v5698_v5  ;;  %v702_v52 = vsub.f32 %v5688_v61, %v5700_v19  ;;  %v703_v57 = vmul.f32 %v4693_v47, %v654_v44  ;;  %v704_v58 = vmul.f32 %v4694_v35, %v654_v44 }
  0x59   :  { %v705_v29 = vmul.f32 %v4695_v30, %v654_v44  ;;  %v706_v38 = vmul.f32 %v4696_v48, %v654_v44  ;;  %v707_v42 = vmul.f32 %v4693_v47, %v658_v56  ;;  %v708_v23 = vmul.f32 %v4694_v35, %v658_v56 }
  0x5a   :  { %v709_v36 = vmul.f32 %v4695_v30, %v658_v56  ;;  %v710_v8 = vmul.f32 %v4696_v48, %v658_v56  ;;  %v711_v31 = vadd.f32 %v703_v57, %v5563_v14  ;;  %v712_v21 = vadd.f32 %v704_v58, %v5565_v15 }
  0x5b   :  { %v713_v13 = vadd.f32 %v705_v29, %v5567_v60  ;;  %v714_v24 = vadd.f32 %v706_v38, %v5574_v11  ;;  %v715_v49 = vadd.f32 %v707_v42, %v5576_v59  ;;  %v716_v0 = vadd.f32 %v708_v23, %v5578_v46  ;;  %v5735_v59 = vld [vmem:[%s9675_s2 + $0xa0] sm:$0xff]  ;;  %v4708_v23 = vld [vmem:[%s9676_s3 + $0xb8] sm:$0xff] }
  0x5c   :  { %v717_v1 = vadd.f32 %v709_v36, %v5580_v37  ;;  %v718_v44 = vadd.f32 %v710_v8, %v5582_v7  ;;  %v719_v47 = vmul.f32 %v5589_v2, %v680_v45  ;;  %v720_v35 = vmul.f32 %v5594_v39, %v680_v45 }
  0x5d   :  { %v721_v14 = vmul.f32 %v5599_v27, %v680_v45  ;;  %v722_v15 = vmul.f32 %v5609_v43, %v680_v45  ;;  %v723_v60 = vmul.f32 %v5589_v2, %v684_v28  ;;  %v724_v11 = vmul.f32 %v5594_v39, %v684_v28  ;;  %v5747_v2 = vld [vmem:[%s9675_s2 + $0xb0] sm:$0xff]  ;;  %v5752_v39 = vld [vmem:[%s9675_s2 + $0xb8] sm:$0xff] }
  0x5e   :  { %v725_v46 = vmul.f32 %v5599_v27, %v684_v28  ;;  %v726_v37 = vmul.f32 %v5609_v43, %v684_v28  ;;  %v727_v7 = vadd.f32 %v719_v47, %v711_v31  ;;  %v728_v56 = vadd.f32 %v720_v35, %v712_v21 }
  0x5f   :  { %v729_v27 = vadd.f32 %v721_v14, %v713_v13  ;;  %v730_v45 = vadd.f32 %v722_v15, %v714_v24  ;;  %v731_v43 = vadd.f32 %v723_v60, %v715_v49  ;;  %v732_v28 = vadd.f32 %v724_v11, %v716_v0 }
  0x60   :  { %v733_v41 = vadd.f32 %v725_v46, %v717_v1  ;;  %v734_v12 = vadd.f32 %v726_v37, %v718_v44  ;;  %v802_v22 = vrot.slane %v5616_v54, %v5061_v10  ;;  %v805_v30 = vmul.f32 %v5735_v59, %v5622_v55 }
  0x61   :  { %v806_v48 = vmul.f32 %v5742_v40, %v5622_v55  ;;  %v807_v50 = vmul.f32 %v5747_v2, %v5622_v55  ;;  %v808_v34 = vmul.f32 %v5752_v39, %v5622_v55  ;;  %v824_v3 = vrot.slane %v777_v53, %v5061_v10 }
  0x62   :  { %v809_v61 = vmul.f32 %v5735_v59, %v802_v22  ;;  %v810_v54 = vmul.f32 %v5742_v40, %v802_v22  ;;  %v811_v62 = vmul.f32 %v5747_v2, %v802_v22  ;;  %v812_v4 = vmul.f32 %v5752_v39, %v802_v22 }
  0x63   :  { %v5781_v53 = vadd.f32 %v805_v30, %v695_v6  ;;  %v5783_v5 = vadd.f32 %v806_v48, %v696_v16  ;;  %v5785_v19 = vadd.f32 %v807_v50, %v697_v20  ;;  %v5787_v57 = vadd.f32 %v808_v34, %v698_v33 }
  0x64   :  { %v5789_v58 = vadd.f32 %v809_v61, %v699_v25  ;;  %v5791_v29 = vadd.f32 %v810_v54, %v700_v26  ;;  %v5793_v38 = vadd.f32 %v811_v62, %v701_v51  ;;  %v5795_v42 = vadd.f32 %v812_v4, %v702_v52  ;;  %v4710_v54 = vld.sshfl [vmem:[%s9673_s0 + $0xc] sm:$0x11 pattern:$0x75316420] }
  0x65   :  { %v828_v6 = vrot.slane %v5619_v32, %v5061_v10  ;;  %v5802_v16 = vmul.f32 %v4705_v63, %v824_v3  ;;  %v5804_v20 = vmul.f32 %v4706_v18, %v824_v3  ;;  %v5806_v33 = vmul.f32 %v4707_v17, %v824_v3 }
  0x66   :  { %v5808_v25 = vmul.f32 %v4708_v23, %v824_v3  ;;  %v847_v26 = vmul.f32 %v4705_v63, %v5622_v55  ;;  %v848_v51 = vmul.f32 %v4706_v18, %v5622_v55  ;;  %v849_v52 = vmul.f32 %v4707_v17, %v5622_v55 }
  0x67   :  { %v5813_v36 = vmul.f32 %v4705_v63, %v828_v6  ;;  %v5815_v8 = vmul.f32 %v4706_v18, %v828_v6  ;;  %v5817_v31 = vmul.f32 %v4707_v17, %v828_v6  ;;  %v5819_v32 = vmul.f32 %v4708_v23, %v828_v6 }
  0x68   :  { %v839_v21 = vsub.f32 %v5781_v53, %v5802_v16  ;;  %v840_v13 = vsub.f32 %v5783_v5, %v5804_v20  ;;  %v841_v24 = vsub.f32 %v5785_v19, %v5806_v33  ;;  %v842_v49 = vsub.f32 %v5787_v57, %v5808_v25  ;;  %v4719_v53 = vld [vmem:[%s9676_s3 + $0xd0] sm:$0xff]  ;;  %v4720_v5 = vld [vmem:[%s9676_s3 + $0xd8] sm:$0xff] }
  0x69   :  { %v843_v0 = vsub.f32 %v5789_v58, %v5813_v36  ;;  %v844_v1 = vsub.f32 %v5791_v29, %v5815_v8  ;;  %v845_v44 = vsub.f32 %v5793_v38, %v5817_v31  ;;  %v846_v47 = vsub.f32 %v5795_v42, %v5819_v32 }
  0x6a   :  { %v850_v35 = vmul.f32 %v4708_v23, %v5622_v55  ;;  %v851_v14 = vmul.f32 %v4705_v63, %v802_v22  ;;  %v852_v15 = vmul.f32 %v4706_v18, %v802_v22  ;;  %v853_v60 = vmul.f32 %v4707_v17, %v802_v22 }
  0x6b   :  { %v854_v11 = vmul.f32 %v4708_v23, %v802_v22  ;;  %v855_v46 = vadd.f32 %v847_v26, %v727_v7  ;;  %v856_v37 = vadd.f32 %v848_v51, %v728_v56  ;;  %v857_v30 = vadd.f32 %v849_v52, %v729_v27  ;;  %v4712_v7 = vld.sshfl [vmem:[%s9674_s1 + $0xc] sm:$0x11 pattern:$0x75316420]  ;;  %v5881_v52 = vld [vmem:[%s9675_s2 + $0xc0] sm:$0xff] }
  0x6c   :  { %v858_v48 = vadd.f32 %v850_v35, %v730_v45  ;;  %v859_v50 = vadd.f32 %v851_v14, %v731_v43  ;;  %v860_v34 = vadd.f32 %v852_v15, %v732_v28  ;;  %v861_v61 = vadd.f32 %v853_v60, %v733_v41  ;;  %v4722_v28 = vld.sshfl [vmem:[%s9673_s0 + $0xe] sm:$0x11 pattern:$0x75316420]  ;;  %v5891_v14 = vld [vmem:[%s9675_s2 + $0xd0] sm:$0xff] }
  0x6d   :  { %v862_v62 = vadd.f32 %v854_v11, %v734_v12  ;;  %v863_v4 = vmul.f32 %v5735_v59, %v824_v3  ;;  %v864_v55 = vmul.f32 %v5742_v40, %v824_v3  ;;  %v865_v63 = vmul.f32 %v5747_v2, %v824_v3  ;;  %v5886_v35 = vld [vmem:[%s9675_s2 + $0xc8] sm:$0xff] }
  0x6e   :  { %v866_v56 = vmul.f32 %v5752_v39, %v824_v3  ;;  %v867_v27 = vmul.f32 %v5735_v59, %v828_v6  ;;  %v868_v45 = vmul.f32 %v5742_v40, %v828_v6  ;;  %v869_v43 = vmul.f32 %v5747_v2, %v828_v6  ;;  %v5864_v59 = vld.sshfl [vmem:[%s9674_s1 + $0xe] sm:$0x11 pattern:$0x75316420] }
  0x6f   :  { %v870_v41 = vmul.f32 %v5752_v39, %v828_v6  ;;  %v5855_v12 = vadd.f32 %v863_v4, %v855_v46  ;;  %v5857_v22 = vadd.f32 %v864_v55, %v856_v37  ;;  %v5859_v18 = vadd.f32 %v865_v63, %v857_v30  ;;  %v5901_v30 = vld [vmem:[%s9675_s2 + $0xd8] sm:$0xff]  ;;  %v4717_v4 = vld [vmem:[%s9676_s3 + $0xc0] sm:$0xff]  ;;  %v4718_v55 = vld [vmem:[%s9676_s3 + $0xc8] sm:$0xff] }
  0x70   :  { %v5866_v40 = vadd.f32 %v866_v56, %v858_v48  ;;  %v5868_v2 = vadd.f32 %v867_v27, %v859_v50  ;;  %v5870_v3 = vadd.f32 %v868_v45, %v860_v34  ;;  %v5872_v17 = vadd.f32 %v869_v43, %v861_v61 }
  0x71   :  { %v5874_v39 = vadd.f32 %v870_v41, %v862_v62  ;;  %v889_v23 = vcombine.high %v4710_v54, %v4710_v54  ;;  %v896_v6 = vrot.slane %v4710_v54, %v5059_v9  ;;  %v914_v26 = vcombine.high %v4712_v7, %v4712_v7 }
  0x72   :  { %v921_v51 = vrot.slane %v4712_v7, %v5059_v9  ;;  %v1033_v15 = vcombine.high %v4722_v28, %v4722_v28  ;;  %v1040_v60 = vrot.slane %v4722_v28, %v5059_v9  ;;  %v1058_v11 = vcombine.high %v5864_v59, %v5864_v59 }
  0x73   :  { %v903_v46 = vrot.slane %v889_v23, %v5059_v9  ;;  %v928_v37 = vrot.slane %v914_v26, %v5059_v9  ;;  %v942_v48 = vrot.slane %v896_v6, %v5061_v10  ;;  %v1065_v50 = vrot.slane %v5864_v59, %v5059_v9  ;;  %v4731_v59 = vld [vmem:[%s9676_s3 + $0xf0] sm:$0xff] }
  0x74   :  { %v968_v34 = vrot.slane %v921_v51, %v5061_v10  ;;  %v5908_v61 = vrot.slane %v1033_v15, %v5059_v9  ;;  %v5911_v54 = vrot.slane %v1058_v11, %v5059_v9  ;;  %v5914_v62 = vrot.slane %v1040_v60, %v5061_v10 }
  0x75   :  { %v946_v63 = vrot.slane %v903_v46, %v5061_v10  ;;  %v949_v7 = vmul.f32 %v5881_v52, %v942_v48  ;;  %v950_v56 = vmul.f32 %v5886_v35, %v942_v48  ;;  %v951_v27 = vmul.f32 %v5891_v14, %v942_v48 }
  0x76   :  { %v952_v45 = vmul.f32 %v5901_v30, %v942_v48  ;;  %v972_v43 = vrot.slane %v928_v37, %v5061_v10  ;;  %v5928_v28 = vmul.f32 %v4717_v4, %v968_v34  ;;  %v5930_v41 = vmul.f32 %v4718_v55, %v968_v34 }
  0x77   :  { %v953_v23 = vmul.f32 %v5881_v52, %v946_v63  ;;  %v954_v6 = vmul.f32 %v5886_v35, %v946_v63  ;;  %v955_v26 = vmul.f32 %v5891_v14, %v946_v63  ;;  %v956_v51 = vmul.f32 %v5901_v30, %v946_v63 }
  0x78   :  { %v5939_v15 = vadd.f32 %v949_v7, %v839_v21  ;;  %v5944_v60 = vadd.f32 %v950_v56, %v840_v13  ;;  %v5949_v11 = vadd.f32 %v951_v27, %v841_v24  ;;  %v5954_v46 = vadd.f32 %v952_v45, %v842_v49 }
  0x79   :  { %v5965_v16 = vadd.f32 %v953_v23, %v843_v0  ;;  %v5970_v19 = vadd.f32 %v954_v6, %v844_v1  ;;  %v5975_v57 = vadd.f32 %v955_v26, %v845_v44  ;;  %v5980_v20 = vadd.f32 %v956_v51, %v846_v47 }
  0x7a   :  { %v5982_v33 = vmul.f32 %v4719_v53, %v968_v34  ;;  %v5984_v58 = vmul.f32 %v4720_v5, %v968_v34  ;;  %v5986_v25 = vmul.f32 %v4717_v4, %v972_v43  ;;  %v5988_v36 = vmul.f32 %v4718_v55, %v972_v43 }
  0x7b   :  { %v5990_v29 = vmul.f32 %v4719_v53, %v972_v43  ;;  %v5992_v8 = vmul.f32 %v4720_v5, %v972_v43  ;;  %v983_v38 = vsub.f32 %v5939_v15, %v5928_v28  ;;  %v984_v42 = vsub.f32 %v5944_v60, %v5930_v41  ;;  %v6034_v15 = vld [vmem:[%s9675_s2 + $0xe8] sm:$0xff] }
  0x7c   :  { %v985_v31 = vsub.f32 %v5949_v11, %v5982_v33  ;;  %v986_v32 = vsub.f32 %v5954_v46, %v5984_v58  ;;  %v987_v21 = vsub.f32 %v5965_v16, %v5986_v25  ;;  %v988_v13 = vsub.f32 %v5970_v19, %v5988_v36  ;;  %v4729_v25 = vld [vmem:[%s9676_s3 + $0xe0] sm:$0xff]  ;;  %v4730_v36 = vld [vmem:[%s9676_s3 + $0xe8] sm:$0xff] }
  0x7d   :  { %v989_v24 = vsub.f32 %v5975_v57, %v5990_v29  ;;  %v990_v49 = vsub.f32 %v5980_v20, %v5992_v8  ;;  %v991_v0 = vmul.f32 %v4717_v4, %v942_v48  ;;  %v992_v1 = vmul.f32 %v4718_v55, %v942_v48 }
  0x7e   :  { %v993_v44 = vmul.f32 %v4719_v53, %v942_v48  ;;  %v994_v47 = vmul.f32 %v4720_v5, %v942_v48  ;;  %v995_v37 = vmul.f32 %v4717_v4, %v946_v63  ;;  %v996_v7 = vmul.f32 %v4718_v55, %v946_v63 }
  0x7f   :  { %v997_v56 = vmul.f32 %v4719_v53, %v946_v63  ;;  %v998_v27 = vmul.f32 %v4720_v5, %v946_v63  ;;  %v999_v45 = vadd.f32 %v991_v0, %v5855_v12  ;;  %v1000_v28 = vadd.f32 %v992_v1, %v5857_v22 }
  0x80   :  { %v1001_v41 = vadd.f32 %v993_v44, %v5859_v18  ;;  %v1002_v23 = vadd.f32 %v994_v47, %v5866_v40  ;;  %v1003_v6 = vadd.f32 %v995_v37, %v5868_v2  ;;  %v1004_v26 = vadd.f32 %v996_v7, %v5870_v3  ;;  %v6027_v2 = vld [vmem:[%s9675_s2 + $0xe0] sm:$0xff]  ;;  %v4732_v7 = vld [vmem:[%s9676_s3 + $0xf8] sm:$0xff] }
  0x81   :  { %v1005_v51 = vadd.f32 %v997_v56, %v5872_v17  ;;  %v1006_v48 = vadd.f32 %v998_v27, %v5874_v39  ;;  %v1007_v4 = vmul.f32 %v5881_v52, %v968_v34  ;;  %v1008_v55 = vmul.f32 %v5886_v35, %v968_v34 }
  0x82   :  { %v1009_v12 = vmul.f32 %v5891_v14, %v968_v34  ;;  %v1010_v22 = vmul.f32 %v5901_v30, %v968_v34  ;;  %v1011_v18 = vmul.f32 %v5881_v52, %v972_v43  ;;  %v1012_v40 = vmul.f32 %v5886_v35, %v972_v43  ;;  %v6039_v52 = vld [vmem:[%s9675_s2 + $0xf0] sm:$0xff]  ;;  %v6044_v35 = vld [vmem:[%s9675_s2 + $0xf8] sm:$0xff] }
  0x83   :  { %v1013_v3 = vmul.f32 %v5891_v14, %v972_v43  ;;  %v1014_v17 = vmul.f32 %v5901_v30, %v972_v43  ;;  %v1015_v39 = vadd.f32 %v1007_v4, %v999_v45  ;;  %v1016_v63 = vadd.f32 %v1008_v55, %v1000_v28 }
  0x84   :  { %v1017_v14 = vadd.f32 %v1009_v12, %v1001_v41  ;;  %v1018_v34 = vadd.f32 %v1010_v22, %v1002_v23  ;;  %v1019_v30 = vadd.f32 %v1011_v18, %v1003_v6  ;;  %v1020_v43 = vadd.f32 %v1012_v40, %v1004_v26 }
  0x85   :  { %v1021_v60 = vadd.f32 %v1013_v3, %v1005_v51  ;;  %v1022_v11 = vadd.f32 %v1014_v17, %v1006_v48  ;;  %v1090_v46 = vrot.slane %v5908_v61, %v5061_v10  ;;  %v1093_v53 = vmul.f32 %v6027_v2, %v5914_v62 }
  0x86   :  { %v1094_v5 = vmul.f32 %v6034_v15, %v5914_v62  ;;  %v1095_v16 = vmul.f32 %v6039_v52, %v5914_v62  ;;  %v1096_v19 = vmul.f32 %v6044_v35, %v5914_v62  ;;  %v1112_v57 = vrot.slane %v1065_v50, %v5061_v10 }
  0x87   :  { %v1097_v20 = vmul.f32 %v6027_v2, %v1090_v46  ;;  %v1098_v61 = vmul.f32 %v6034_v15, %v1090_v46  ;;  %v1099_v33 = vmul.f32 %v6039_v52, %v1090_v46  ;;  %v1100_v58 = vmul.f32 %v6044_v35, %v1090_v46 }
  0x88   :  { %v6073_v50 = vadd.f32 %v1093_v53, %v983_v38  ;;  %v6075_v29 = vadd.f32 %v1094_v5, %v984_v42  ;;  %v6077_v8 = vadd.f32 %v1095_v16, %v985_v31  ;;  %v6079_v0 = vadd.f32 %v1096_v19, %v986_v32 }
  0x89   :  { %v6081_v1 = vadd.f32 %v1097_v20, %v987_v21  ;;  %v6083_v44 = vadd.f32 %v1098_v61, %v988_v13  ;;  %v6085_v47 = vadd.f32 %v1099_v33, %v989_v24  ;;  %v6087_v37 = vadd.f32 %v1100_v58, %v990_v49  ;;  %v4734_v61 = vld.sshfl [vmem:[%s9673_s0 + $0x10] sm:$0x11 pattern:$0x75316420] }
  0x8a   :  { %v1116_v38 = vrot.slane %v5911_v54, %v5061_v10  ;;  %v6094_v42 = vmul.f32 %v4729_v25, %v1112_v57  ;;  %v6096_v31 = vmul.f32 %v4730_v36, %v1112_v57  ;;  %v6098_v32 = vmul.f32 %v4731_v59, %v1112_v57 }
  0x8b   :  { %v6100_v21 = vmul.f32 %v4732_v7, %v1112_v57  ;;  %v1135_v13 = vmul.f32 %v4729_v25, %v5914_v62  ;;  %v1136_v24 = vmul.f32 %v4730_v36, %v5914_v62  ;;  %v1137_v49 = vmul.f32 %v4731_v59, %v5914_v62 }
  0x8c   :  { %v6105_v56 = vmul.f32 %v4729_v25, %v1116_v38  ;;  %v6107_v27 = vmul.f32 %v4730_v36, %v1116_v38  ;;  %v6109_v45 = vmul.f32 %v4731_v59, %v1116_v38  ;;  %v6111_v54 = vmul.f32 %v4732_v7, %v1116_v38 }
  0x8d   :  { %v1127_v28 = vsub.f32 %v6073_v50, %v6094_v42  ;;  %v1128_v41 = vsub.f32 %v6075_v29, %v6096_v31  ;;  %v1129_v23 = vsub.f32 %v6077_v8, %v6098_v32  ;;  %v1130_v6 = vsub.f32 %v6079_v0, %v6100_v21  ;;  %v4743_v50 = vld [vmem:[%s9676_s3 + $0x110] sm:$0xff]  ;;  %v4744_v29 = vld [vmem:[%s9676_s3 + $0x118] sm:$0xff] }
  0x8e   :  { %v1131_v26 = vsub.f32 %v6081_v1, %v6105_v56  ;;  %v1132_v51 = vsub.f32 %v6083_v44, %v6107_v27  ;;  %v1133_v48 = vsub.f32 %v6085_v47, %v6109_v45  ;;  %v1134_v4 = vsub.f32 %v6087_v37, %v6111_v54 }
  0x8f   :  { %v1138_v55 = vmul.f32 %v4732_v7, %v5914_v62  ;;  %v1139_v12 = vmul.f32 %v4729_v25, %v1090_v46  ;;  %v1140_v22 = vmul.f32 %v4730_v36, %v1090_v46  ;;  %v1141_v18 = vmul.f32 %v4731_v59, %v1090_v46 }
  0x90   :  { %v1142_v40 = vmul.f32 %v4732_v7, %v1090_v46  ;;  %v1143_v3 = vadd.f32 %v1135_v13, %v1015_v39  ;;  %v1144_v17 = vadd.f32 %v1136_v24, %v1016_v63  ;;  %v1145_v53 = vadd.f32 %v1137_v49, %v1017_v14  ;;  %v4736_v39 = vld.sshfl [vmem:[%s9674_s1 + $0x10] sm:$0x11 pattern:$0x75316420]  ;;  %v6173_v49 = vld [vmem:[%s9675_s2 + $0x100] sm:$0xff] }
  0x91   :  { %v1146_v5 = vadd.f32 %v1138_v55, %v1018_v34  ;;  %v1147_v16 = vadd.f32 %v1139_v12, %v1019_v30  ;;  %v1148_v19 = vadd.f32 %v1140_v22, %v1020_v43  ;;  %v1149_v20 = vadd.f32 %v1141_v18, %v1021_v60  ;;  %v4746_v43 = vld.sshfl [vmem:[%s9673_s0 + $0x12] sm:$0x11 pattern:$0x75316420]  ;;  %v6178_v55 = vld [vmem:[%s9675_s2 + $0x108] sm:$0xff] }
  0x92   :  { %v1150_v33 = vadd.f32 %v1142_v40, %v1022_v11  ;;  %v1151_v58 = vmul.f32 %v6027_v2, %v1112_v57  ;;  %v1152_v62 = vmul.f32 %v6034_v15, %v1112_v57  ;;  %v1153_v25 = vmul.f32 %v6039_v52, %v1112_v57  ;;  %v6183_v12 = vld [vmem:[%s9675_s2 + $0x110] sm:$0xff] }
  0x93   :  { %v1154_v63 = vmul.f32 %v6044_v35, %v1112_v57  ;;  %v1155_v14 = vmul.f32 %v6027_v2, %v1116_v38  ;;  %v1156_v34 = vmul.f32 %v6034_v15, %v1116_v38  ;;  %v1157_v30 = vmul.f32 %v6039_v52, %v1116_v38  ;;  %v6156_v2 = vld.sshfl [vmem:[%s9674_s1 + $0x12] sm:$0x11 pattern:$0x75316420] }
  0x94   :  { %v1158_v60 = vmul.f32 %v6044_v35, %v1116_v38  ;;  %v6147_v11 = vadd.f32 %v1151_v58, %v1143_v3  ;;  %v6149_v46 = vadd.f32 %v1152_v62, %v1144_v17  ;;  %v6151_v36 = vadd.f32 %v1153_v25, %v1145_v53  ;;  %v6193_v53 = vld [vmem:[%s9675_s2 + $0x118] sm:$0xff]  ;;  %v4741_v58 = vld [vmem:[%s9676_s3 + $0x100] sm:$0xff]  ;;  %v4742_v62 = vld [vmem:[%s9676_s3 + $0x108] sm:$0xff] }
  0x95   :  { %v6158_v15 = vadd.f32 %v1154_v63, %v1146_v5  ;;  %v6160_v52 = vadd.f32 %v1155_v14, %v1147_v16  ;;  %v6162_v57 = vadd.f32 %v1156_v34, %v1148_v19  ;;  %v6164_v59 = vadd.f32 %v1157_v30, %v1149_v20 }
  0x96   :  { %v6166_v35 = vadd.f32 %v1158_v60, %v1150_v33  ;;  %v1177_v7 = vcombine.high %v4734_v61, %v4734_v61  ;;  %v1184_v38 = vrot.slane %v4734_v61, %v5059_v9  ;;  %v1202_v13 = vcombine.high %v4736_v39, %v4736_v39 }
  0x97   :  { %v1209_v24 = vrot.slane %v4736_v39, %v5059_v9  ;;  %v1321_v22 = vcombine.high %v4746_v43, %v4746_v43  ;;  %v1328_v18 = vrot.slane %v4746_v43, %v5059_v9  ;;  %v1346_v40 = vcombine.high %v6156_v2, %v6156_v2 }
  0x98   :  { %v1191_v3 = vrot.slane %v1177_v7, %v5059_v9  ;;  %v1216_v17 = vrot.slane %v1202_v13, %v5059_v9  ;;  %v1230_v5 = vrot.slane %v1184_v38, %v5061_v10  ;;  %v1353_v16 = vrot.slane %v6156_v2, %v5059_v9  ;;  %v4755_v2 = vld [vmem:[%s9676_s3 + $0x130] sm:$0xff] }
  0x99   :  { %v1256_v19 = vrot.slane %v1209_v24, %v5061_v10  ;;  %v6200_v20 = vrot.slane %v1321_v22, %v5059_v9  ;;  %v6203_v61 = vrot.slane %v1346_v40, %v5059_v9  ;;  %v6206_v33 = vrot.slane %v1328_v18, %v5061_v10 }
  0x9a   :  { %v1234_v25 = vrot.slane %v1191_v3, %v5061_v10  ;;  %v1237_v39 = vmul.f32 %v6173_v49, %v1230_v5  ;;  %v1238_v63 = vmul.f32 %v6178_v55, %v1230_v5  ;;  %v1239_v14 = vmul.f32 %v6183_v12, %v1230_v5 }
  0x9b   :  { %v1240_v34 = vmul.f32 %v6193_v53, %v1230_v5  ;;  %v1260_v30 = vrot.slane %v1216_v17, %v5061_v10  ;;  %v6220_v43 = vmul.f32 %v4741_v58, %v1256_v19  ;;  %v6222_v60 = vmul.f32 %v4742_v62, %v1256_v19 }
  0x9c   :  { %v1241_v7 = vmul.f32 %v6173_v49, %v1234_v25  ;;  %v1242_v38 = vmul.f32 %v6178_v55, %v1234_v25  ;;  %v1243_v13 = vmul.f32 %v6183_v12, %v1234_v25  ;;  %v1244_v24 = vmul.f32 %v6193_v53, %v1234_v25 }
  0x9d   :  { %v6231_v22 = vadd.f32 %v1237_v39, %v1127_v28  ;;  %v6236_v18 = vadd.f32 %v1238_v63, %v1128_v41  ;;  %v6241_v40 = vadd.f32 %v1239_v14, %v1129_v23  ;;  %v6246_v3 = vadd.f32 %v1240_v34, %v1130_v6 }
  0x9e   :  { %v6257_v42 = vadd.f32 %v1241_v7, %v1131_v26  ;;  %v6262_v8 = vadd.f32 %v1242_v38, %v1132_v51  ;;  %v6267_v0 = vadd.f32 %v1243_v13, %v1133_v48  ;;  %v6272_v31 = vadd.f32 %v1244_v24, %v1134_v4 }
  0x9f   :  { %v6274_v32 = vmul.f32 %v4743_v50, %v1256_v19  ;;  %v6276_v1 = vmul.f32 %v4744_v29, %v1256_v19  ;;  %v6278_v21 = vmul.f32 %v4741_v58, %v1260_v30  ;;  %v6280_v56 = vmul.f32 %v4742_v62, %v1260_v30 }
  0xa0   :  { %v6282_v44 = vmul.f32 %v4743_v50, %v1260_v30  ;;  %v6284_v27 = vmul.f32 %v4744_v29, %v1260_v30  ;;  %v1271_v47 = vsub.f32 %v6231_v22, %v6220_v43  ;;  %v1272_v37 = vsub.f32 %v6236_v18, %v6222_v60  ;;  %v6326_v22 = vld [vmem:[%s9675_s2 + $0x128] sm:$0xff] }
  0xa1   :  { %v1273_v45 = vsub.f32 %v6241_v40, %v6274_v32  ;;  %v1274_v54 = vsub.f32 %v6246_v3, %v6276_v1  ;;  %v1275_v28 = vsub.f32 %v6257_v42, %v6278_v21  ;;  %v1276_v41 = vsub.f32 %v6262_v8, %v6280_v56  ;;  %v4753_v21 = vld [vmem:[%s9676_s3 + $0x120] sm:$0xff]  ;;  %v4754_v56 = vld [vmem:[%s9676_s3 + $0x128] sm:$0xff] }
  0xa2   :  { %v1277_v23 = vsub.f32 %v6267_v0, %v6282_v44  ;;  %v1278_v6 = vsub.f32 %v6272_v31, %v6284_v27  ;;  %v1279_v26 = vmul.f32 %v4741_v58, %v1230_v5  ;;  %v1280_v51 = vmul.f32 %v4742_v62, %v1230_v5 }
  0xa3   :  { %v1281_v48 = vmul.f32 %v4743_v50, %v1230_v5  ;;  %v1282_v4 = vmul.f32 %v4744_v29, %v1230_v5  ;;  %v1283_v17 = vmul.f32 %v4741_v58, %v1234_v25  ;;  %v1284_v39 = vmul.f32 %v4742_v62, %v1234_v25 }
  0xa4   :  { %v1285_v63 = vmul.f32 %v4743_v50, %v1234_v25  ;;  %v1286_v14 = vmul.f32 %v4744_v29, %v1234_v25  ;;  %v1287_v34 = vadd.f32 %v1279_v26, %v6147_v11  ;;  %v1288_v43 = vadd.f32 %v1280_v51, %v6149_v46 }
  0xa5   :  { %v1289_v60 = vadd.f32 %v1281_v48, %v6151_v36  ;;  %v1290_v7 = vadd.f32 %v1282_v4, %v6158_v15  ;;  %v1291_v38 = vadd.f32 %v1283_v17, %v6160_v52  ;;  %v1292_v13 = vadd.f32 %v1284_v39, %v6162_v57  ;;  %v6319_v52 = vld [vmem:[%s9675_s2 + $0x120] sm:$0xff]  ;;  %v4756_v39 = vld [vmem:[%s9676_s3 + $0x138] sm:$0xff] }
  0xa6   :  { %v1293_v24 = vadd.f32 %v1285_v63, %v6164_v59  ;;  %v1294_v5 = vadd.f32 %v1286_v14, %v6166_v35  ;;  %v1295_v58 = vmul.f32 %v6173_v49, %v1256_v19  ;;  %v1296_v62 = vmul.f32 %v6178_v55, %v1256_v19 }
  0xa7   :  { %v1297_v11 = vmul.f32 %v6183_v12, %v1256_v19  ;;  %v1298_v46 = vmul.f32 %v6193_v53, %v1256_v19  ;;  %v1299_v36 = vmul.f32 %v6173_v49, %v1260_v30  ;;  %v1300_v15 = vmul.f32 %v6178_v55, %v1260_v30  ;;  %v6331_v49 = vld [vmem:[%s9675_s2 + $0x130] sm:$0xff]  ;;  %v6336_v55 = vld [vmem:[%s9675_s2 + $0x138] sm:$0xff] }
  0xa8   :  { %v1301_v57 = vmul.f32 %v6183_v12, %v1260_v30  ;;  %v1302_v59 = vmul.f32 %v6193_v53, %v1260_v30  ;;  %v1303_v35 = vadd.f32 %v1295_v58, %v1287_v34  ;;  %v1304_v25 = vadd.f32 %v1296_v62, %v1288_v43 }
  0xa9   :  { %v1305_v12 = vadd.f32 %v1297_v11, %v1289_v60  ;;  %v1306_v19 = vadd.f32 %v1298_v46, %v1290_v7  ;;  %v1307_v53 = vadd.f32 %v1299_v36, %v1291_v38  ;;  %v1308_v30 = vadd.f32 %v1300_v15, %v1292_v13 }
  0xaa   :  { %v1309_v18 = vadd.f32 %v1301_v57, %v1293_v24  ;;  %v1310_v40 = vadd.f32 %v1302_v59, %v1294_v5  ;;  %v1378_v3 = vrot.slane %v6200_v20, %v5061_v10  ;;  %v1381_v50 = vmul.f32 %v6319_v52, %v6206_v33 }
  0xab   :  { %v1382_v29 = vmul.f32 %v6326_v22, %v6206_v33  ;;  %v1383_v42 = vmul.f32 %v6331_v49, %v6206_v33  ;;  %v1384_v8 = vmul.f32 %v6336_v55, %v6206_v33  ;;  %v1400_v0 = vrot.slane %v1353_v16, %v5061_v10 }
  0xac   :  { %v1385_v31 = vmul.f32 %v6319_v52, %v1378_v3  ;;  %v1386_v20 = vmul.f32 %v6326_v22, %v1378_v3  ;;  %v1387_v32 = vmul.f32 %v6331_v49, %v1378_v3  ;;  %v1388_v1 = vmul.f32 %v6336_v55, %v1378_v3 }
  0xad   :  { %v6365_v16 = vadd.f32 %v1381_v50, %v1271_v47  ;;  %v6367_v44 = vadd.f32 %v1382_v29, %v1272_v37  ;;  %v6369_v27 = vadd.f32 %v1383_v42, %v1273_v45  ;;  %v6371_v26 = vadd.f32 %v1384_v8, %v1274_v54 }
  0xae   :  { %v6373_v51 = vadd.f32 %v1385_v31, %v1275_v28  ;;  %v6375_v48 = vadd.f32 %v1386_v20, %v1276_v41  ;;  %v6377_v4 = vadd.f32 %v1387_v32, %v1277_v23  ;;  %v6379_v17 = vadd.f32 %v1388_v1, %v1278_v6  ;;  %v4758_v20 = vld.sshfl [vmem:[%s9673_s0 + $0x14] sm:$0x11 pattern:$0x75316420] }
  0xaf   :  { %v1404_v47 = vrot.slane %v6203_v61, %v5061_v10  ;;  %v6386_v37 = vmul.f32 %v4753_v21, %v1400_v0  ;;  %v6388_v45 = vmul.f32 %v4754_v56, %v1400_v0  ;;  %v6390_v54 = vmul.f32 %v4755_v2, %v1400_v0 }
  0xb0   :  { %v6392_v28 = vmul.f32 %v4756_v39, %v1400_v0  ;;  %v1423_v41 = vmul.f32 %v4753_v21, %v6206_v33  ;;  %v1424_v23 = vmul.f32 %v4754_v56, %v6206_v33  ;;  %v1425_v6 = vmul.f32 %v4755_v2, %v6206_v33 }
  0xb1   :  { %v6397_v63 = vmul.f32 %v4753_v21, %v1404_v47  ;;  %v6399_v14 = vmul.f32 %v4754_v56, %v1404_v47  ;;  %v6401_v34 = vmul.f32 %v4755_v2, %v1404_v47  ;;  %v6403_v61 = vmul.f32 %v4756_v39, %v1404_v47 }
  0xb2   :  { %v1415_v43 = vsub.f32 %v6365_v16, %v6386_v37  ;;  %v1416_v60 = vsub.f32 %v6367_v44, %v6388_v45  ;;  %v1417_v7 = vsub.f32 %v6369_v27, %v6390_v54  ;;  %v1418_v38 = vsub.f32 %v6371_v26, %v6392_v28  ;;  %v4767_v16 = vld [vmem:[%s9676_s3 + $0x150] sm:$0xff]  ;;  %v4768_v44 = vld [vmem:[%s9676_s3 + $0x158] sm:$0xff] }
  0xb3   :  { %v1419_v13 = vsub.f32 %v6373_v51, %v6397_v63  ;;  %v1420_v24 = vsub.f32 %v6375_v48, %v6399_v14  ;;  %v1421_v5 = vsub.f32 %v6377_v4, %v6401_v34  ;;  %v1422_v58 = vsub.f32 %v6379_v17, %v6403_v61 }
  0xb4   :  { %v1426_v62 = vmul.f32 %v4756_v39, %v6206_v33  ;;  %v1427_v11 = vmul.f32 %v4753_v21, %v1378_v3  ;;  %v1428_v46 = vmul.f32 %v4754_v56, %v1378_v3  ;;  %v1429_v36 = vmul.f32 %v4755_v2, %v1378_v3 }
  0xb5   :  { %v1430_v15 = vmul.f32 %v4756_v39, %v1378_v3  ;;  %v1431_v57 = vadd.f32 %v1423_v41, %v1303_v35  ;;  %v1432_v59 = vadd.f32 %v1424_v23, %v1304_v25  ;;  %v1433_v50 = vadd.f32 %v1425_v6, %v1305_v12  ;;  %v4760_v35 = vld.sshfl [vmem:[%s9674_s1 + $0x14] sm:$0x11 pattern:$0x75316420]  ;;  %v6465_v6 = vld [vmem:[%s9675_s2 + $0x140] sm:$0xff] }
  0xb6   :  { %v1434_v29 = vadd.f32 %v1426_v62, %v1306_v19  ;;  %v1435_v42 = vadd.f32 %v1427_v11, %v1307_v53  ;;  %v1436_v8 = vadd.f32 %v1428_v46, %v1308_v30  ;;  %v1437_v31 = vadd.f32 %v1429_v36, %v1309_v18  ;;  %v4770_v30 = vld.sshfl [vmem:[%s9673_s0 + $0x16] sm:$0x11 pattern:$0x75316420]  ;;  %v6470_v62 = vld [vmem:[%s9675_s2 + $0x148] sm:$0xff] }
  0xb7   :  { %v1438_v32 = vadd.f32 %v1430_v15, %v1310_v40  ;;  %v1439_v1 = vmul.f32 %v6319_v52, %v1400_v0  ;;  %v1440_v33 = vmul.f32 %v6326_v22, %v1400_v0  ;;  %v1441_v21 = vmul.f32 %v6331_v49, %v1400_v0  ;;  %v6475_v11 = vld [vmem:[%s9675_s2 + $0x150] sm:$0xff] }
  0xb8   :  { %v1442_v25 = vmul.f32 %v6336_v55, %v1400_v0  ;;  %v1443_v12 = vmul.f32 %v6319_v52, %v1404_v47  ;;  %v1444_v19 = vmul.f32 %v6326_v22, %v1404_v47  ;;  %v1445_v53 = vmul.f32 %v6331_v49, %v1404_v47  ;;  %v6448_v52 = vld.sshfl [vmem:[%s9674_s1 + $0x16] sm:$0x11 pattern:$0x75316420] }
  0xb9   :  { %v1446_v18 = vmul.f32 %v6336_v55, %v1404_v47  ;;  %v6439_v40 = vadd.f32 %v1439_v1, %v1431_v57  ;;  %v6441_v3 = vadd.f32 %v1440_v33, %v1432_v59  ;;  %v6443_v56 = vadd.f32 %v1441_v21, %v1433_v50  ;;  %v6485_v50 = vld [vmem:[%s9675_s2 + $0x158] sm:$0xff]  ;;  %v4765_v1 = vld [vmem:[%s9676_s3 + $0x140] sm:$0xff]  ;;  %v4766_v33 = vld [vmem:[%s9676_s3 + $0x148] sm:$0xff] }
  0xba   :  { %v6450_v22 = vadd.f32 %v1442_v25, %v1434_v29  ;;  %v6452_v49 = vadd.f32 %v1443_v12, %v1435_v42  ;;  %v6454_v0 = vadd.f32 %v1444_v19, %v1436_v8  ;;  %v6456_v2 = vadd.f32 %v1445_v53, %v1437_v31 }
  0xbb   :  { %v6458_v55 = vadd.f32 %v1446_v18, %v1438_v32  ;;  %v1465_v39 = vcombine.high %v4758_v20, %v4758_v20  ;;  %v1472_v47 = vrot.slane %v4758_v20, %v5059_v9  ;;  %v1490_v41 = vcombine.high %v4760_v35, %v4760_v35 }
  0xbc   :  { %v1497_v23 = vrot.slane %v4760_v35, %v5059_v9  ;;  %v1609_v46 = vcombine.high %v4770_v30, %v4770_v30  ;;  %v1616_v36 = vrot.slane %v4770_v30, %v5059_v9  ;;  %v1634_v15 = vcombine.high %v6448_v52, %v6448_v52 }
  0xbd   :  { %v1479_v57 = vrot.slane %v1465_v39, %v5059_v9  ;;  %v1504_v59 = vrot.slane %v1490_v41, %v5059_v9  ;;  %v1518_v29 = vrot.slane %v1472_v47, %v5061_v10  ;;  %v1641_v42 = vrot.slane %v6448_v52, %v5059_v9  ;;  %v4779_v52 = vld [vmem:[%s9676_s3 + $0x170] sm:$0xff] }
  0xbe   :  { %v1544_v8 = vrot.slane %v1497_v23, %v5061_v10  ;;  %v6492_v31 = vrot.slane %v1609_v46, %v5059_v9  ;;  %v6495_v20 = vrot.slane %v1634_v15, %v5059_v9  ;;  %v6498_v32 = vrot.slane %v1616_v36, %v5061_v10 }
  0xbf   :  { %v1522_v21 = vrot.slane %v1479_v57, %v5061_v10  ;;  %v1525_v35 = vmul.f32 %v6465_v6, %v1518_v29  ;;  %v1526_v25 = vmul.f32 %v6470_v62, %v1518_v29  ;;  %v1527_v12 = vmul.f32 %v6475_v11, %v1518_v29 }
  0xc0   :  { %v1528_v19 = vmul.f32 %v6485_v50, %v1518_v29  ;;  %v1548_v53 = vrot.slane %v1504_v59, %v5061_v10  ;;  %v6512_v30 = vmul.f32 %v4765_v1, %v1544_v8  ;;  %v6514_v18 = vmul.f32 %v4766_v33, %v1544_v8 }
  0xc1   :  { %v1529_v39 = vmul.f32 %v6465_v6, %v1522_v21  ;;  %v1530_v47 = vmul.f32 %v6470_v62, %v1522_v21  ;;  %v1531_v41 = vmul.f32 %v6475_v11, %v1522_v21  ;;  %v1532_v23 = vmul.f32 %v6485_v50, %v1522_v21 }
  0xc2   :  { %v6523_v46 = vadd.f32 %v1525_v35, %v1415_v43  ;;  %v6528_v36 = vadd.f32 %v1526_v25, %v1416_v60  ;;  %v6533_v15 = vadd.f32 %v1527_v12, %v1417_v7  ;;  %v6538_v57 = vadd.f32 %v1528_v19, %v1418_v38 }
  0xc3   :  { %v6549_v37 = vadd.f32 %v1529_v39, %v1419_v13  ;;  %v6554_v27 = vadd.f32 %v1530_v47, %v1420_v24  ;;  %v6559_v26 = vadd.f32 %v1531_v41, %v1421_v5  ;;  %v6564_v45 = vadd.f32 %v1532_v23, %v1422_v58 }
  0xc4   :  { %v6566_v54 = vmul.f32 %v4767_v16, %v1544_v8  ;;  %v6568_v51 = vmul.f32 %v4768_v44, %v1544_v8  ;;  %v6570_v28 = vmul.f32 %v4765_v1, %v1548_v53  ;;  %v6572_v63 = vmul.f32 %v4766_v33, %v1548_v53 }
  0xc5   :  { %v6574_v48 = vmul.f32 %v4767_v16, %v1548_v53  ;;  %v6576_v14 = vmul.f32 %v4768_v44, %v1548_v53  ;;  %v1559_v4 = vsub.f32 %v6523_v46, %v6512_v30  ;;  %v1560_v17 = vsub.f32 %v6528_v36, %v6514_v18  ;;  %v6618_v46 = vld [vmem:[%s9675_s2 + $0x168] sm:$0xff] }
  0xc6   :  { %v1561_v34 = vsub.f32 %v6533_v15, %v6566_v54  ;;  %v1562_v61 = vsub.f32 %v6538_v57, %v6568_v51  ;;  %v1563_v43 = vsub.f32 %v6549_v37, %v6570_v28  ;;  %v1564_v60 = vsub.f32 %v6554_v27, %v6572_v63  ;;  %v4777_v28 = vld [vmem:[%s9676_s3 + $0x160] sm:$0xff]  ;;  %v4778_v63 = vld [vmem:[%s9676_s3 + $0x168] sm:$0xff] }
  0xc7   :  { %v1565_v7 = vsub.f32 %v6559_v26, %v6574_v48  ;;  %v1566_v38 = vsub.f32 %v6564_v45, %v6576_v14  ;;  %v1567_v13 = vmul.f32 %v4765_v1, %v1518_v29  ;;  %v1568_v24 = vmul.f32 %v4766_v33, %v1518_v29 }
  0xc8   :  { %v1569_v5 = vmul.f32 %v4767_v16, %v1518_v29  ;;  %v1570_v58 = vmul.f32 %v4768_v44, %v1518_v29  ;;  %v1571_v59 = vmul.f32 %v4765_v1, %v1522_v21  ;;  %v1572_v35 = vmul.f32 %v4766_v33, %v1522_v21 }
  0xc9   :  { %v1573_v25 = vmul.f32 %v4767_v16, %v1522_v21  ;;  %v1574_v12 = vmul.f32 %v4768_v44, %v1522_v21  ;;  %v1575_v19 = vadd.f32 %v1567_v13, %v6439_v40  ;;  %v1576_v30 = vadd.f32 %v1568_v24, %v6441_v3 }
  0xca   :  { %v1577_v18 = vadd.f32 %v1569_v5, %v6443_v56  ;;  %v1578_v39 = vadd.f32 %v1570_v58, %v6450_v22  ;;  %v1579_v47 = vadd.f32 %v1571_v59, %v6452_v49  ;;  %v1580_v41 = vadd.f32 %v1572_v35, %v6454_v0  ;;  %v6611_v49 = vld [vmem:[%s9675_s2 + $0x160] sm:$0xff]  ;;  %v4780_v35 = vld [vmem:[%s9676_s3 + $0x178] sm:$0xff] }
  0xcb   :  { %v1581_v23 = vadd.f32 %v1573_v25, %v6456_v2  ;;  %v1582_v29 = vadd.f32 %v1574_v12, %v6458_v55  ;;  %v1583_v1 = vmul.f32 %v6465_v6, %v1544_v8  ;;  %v1584_v33 = vmul.f32 %v6470_v62, %v1544_v8 }
  0xcc   :  { %v1585_v40 = vmul.f32 %v6475_v11, %v1544_v8  ;;  %v1586_v3 = vmul.f32 %v6485_v50, %v1544_v8  ;;  %v1587_v56 = vmul.f32 %v6465_v6, %v1548_v53  ;;  %v1588_v22 = vmul.f32 %v6470_v62, %v1548_v53  ;;  %v6623_v6 = vld [vmem:[%s9675_s2 + $0x170] sm:$0xff]  ;;  %v6628_v62 = vld [vmem:[%s9675_s2 + $0x178] sm:$0xff] }
  0xcd   :  { %v1589_v0 = vmul.f32 %v6475_v11, %v1548_v53  ;;  %v1590_v2 = vmul.f32 %v6485_v50, %v1548_v53  ;;  %v1591_v55 = vadd.f32 %v1583_v1, %v1575_v19  ;;  %v1592_v21 = vadd.f32 %v1584_v33, %v1576_v30 }
  0xce   :  { %v1593_v11 = vadd.f32 %v1585_v40, %v1577_v18  ;;  %v1594_v8 = vadd.f32 %v1586_v3, %v1578_v39  ;;  %v1595_v50 = vadd.f32 %v1587_v56, %v1579_v47  ;;  %v1596_v53 = vadd.f32 %v1588_v22, %v1580_v41 }
  0xcf   :  { %v1597_v36 = vadd.f32 %v1589_v0, %v1581_v23  ;;  %v1598_v15 = vadd.f32 %v1590_v2, %v1582_v29  ;;  %v1666_v57 = vrot.slane %v6492_v31, %v5061_v10  ;;  %v1669_v16 = vmul.f32 %v6611_v49, %v6498_v32 }
  0xd0   :  { %v1670_v44 = vmul.f32 %v6618_v46, %v6498_v32  ;;  %v1671_v37 = vmul.f32 %v6623_v6, %v6498_v32  ;;  %v1672_v27 = vmul.f32 %v6628_v62, %v6498_v32  ;;  %v1688_v26 = vrot.slane %v1641_v42, %v5061_v10 }
  0xd1   :  { %v1673_v45 = vmul.f32 %v6611_v49, %v1666_v57  ;;  %v1674_v31 = vmul.f32 %v6618_v46, %v1666_v57  ;;  %v1675_v54 = vmul.f32 %v6623_v6, %v1666_v57  ;;  %v1676_v51 = vmul.f32 %v6628_v62, %v1666_v57 }
  0xd2   :  { %v6657_v42 = vadd.f32 %v1669_v16, %v1559_v4  ;;  %v6659_v48 = vadd.f32 %v1670_v44, %v1560_v17  ;;  %v6661_v14 = vadd.f32 %v1671_v37, %v1561_v34  ;;  %v6663_v13 = vadd.f32 %v1672_v27, %v1562_v61 }
  0xd3   :  { %v6665_v24 = vadd.f32 %v1673_v45, %v1563_v43  ;;  %v6667_v5 = vadd.f32 %v1674_v31, %v1564_v60  ;;  %v6669_v58 = vadd.f32 %v1675_v54, %v1565_v7  ;;  %v6671_v59 = vadd.f32 %v1676_v51, %v1566_v38  ;;  %v4782_v31 = vld.sshfl [vmem:[%s9673_s0 + $0x18] sm:$0x11 pattern:$0x75316420] }
  0xd4   :  { %v1692_v4 = vrot.slane %v6495_v20, %v5061_v10  ;;  %v6678_v17 = vmul.f32 %v4777_v28, %v1688_v26  ;;  %v6680_v34 = vmul.f32 %v4778_v63, %v1688_v26  ;;  %v6682_v61 = vmul.f32 %v4779_v52, %v1688_v26 }
  0xd5   :  { %v6684_v43 = vmul.f32 %v4780_v35, %v1688_v26  ;;  %v1711_v60 = vmul.f32 %v4777_v28, %v6498_v32  ;;  %v1712_v7 = vmul.f32 %v4778_v63, %v6498_v32  ;;  %v1713_v38 = vmul.f32 %v4779_v52, %v6498_v32 }
  0xd6   :  { %v6689_v25 = vmul.f32 %v4777_v28, %v1692_v4  ;;  %v6691_v12 = vmul.f32 %v4778_v63, %v1692_v4  ;;  %v6693_v19 = vmul.f32 %v4779_v52, %v1692_v4  ;;  %v6695_v20 = vmul.f32 %v4780_v35, %v1692_v4 }
  0xd7   :  { %v1703_v30 = vsub.f32 %v6657_v42, %v6678_v17  ;;  %v1704_v18 = vsub.f32 %v6659_v48, %v6680_v34  ;;  %v1705_v39 = vsub.f32 %v6661_v14, %v6682_v61  ;;  %v1706_v47 = vsub.f32 %v6663_v13, %v6684_v43  ;;  %v4791_v42 = vld [vmem:[%s9676_s3 + $0x190] sm:$0xff]  ;;  %v4792_v48 = vld [vmem:[%s9676_s3 + $0x198] sm:$0xff] }
  0xd8   :  { %v1707_v41 = vsub.f32 %v6665_v24, %v6689_v25  ;;  %v1708_v23 = vsub.f32 %v6667_v5, %v6691_v12  ;;  %v1709_v29 = vsub.f32 %v6669_v58, %v6693_v19  ;;  %v1710_v1 = vsub.f32 %v6671_v59, %v6695_v20 }
  0xd9   :  { %v1714_v33 = vmul.f32 %v4780_v35, %v6498_v32  ;;  %v1715_v40 = vmul.f32 %v4777_v28, %v1666_v57  ;;  %v1716_v3 = vmul.f32 %v4778_v63, %v1666_v57  ;;  %v1717_v56 = vmul.f32 %v4779_v52, %v1666_v57 }
  0xda   :  { %v1718_v22 = vmul.f32 %v4780_v35, %v1666_v57  ;;  %v1719_v0 = vadd.f32 %v1711_v60, %v1591_v55  ;;  %v1720_v2 = vadd.f32 %v1712_v7, %v1592_v21  ;;  %v1721_v16 = vadd.f32 %v1713_v38, %v1593_v11  ;;  %v4784_v55 = vld.sshfl [vmem:[%s9674_s1 + $0x18] sm:$0x11 pattern:$0x75316420]  ;;  %v6757_v38 = vld [vmem:[%s9675_s2 + $0x180] sm:$0xff] }
  0xdb   :  { %v1722_v44 = vadd.f32 %v1714_v33, %v1594_v8  ;;  %v1723_v37 = vadd.f32 %v1715_v40, %v1595_v50  ;;  %v1724_v27 = vadd.f32 %v1716_v3, %v1596_v53  ;;  %v1725_v45 = vadd.f32 %v1717_v56, %v1597_v36  ;;  %v4794_v53 = vld.sshfl [vmem:[%s9673_s0 + $0x1a] sm:$0x11 pattern:$0x75316420]  ;;  %v6762_v33 = vld [vmem:[%s9675_s2 + $0x188] sm:$0xff]  ;;  %v6767_v40 = vld [vmem:[%s9675_s2 + $0x190] sm:$0xff] }
  0xdc   :  { %v1726_v54 = vadd.f32 %v1718_v22, %v1598_v15  ;;  %v1727_v51 = vmul.f32 %v6611_v49, %v1688_v26  ;;  %v1728_v32 = vmul.f32 %v6618_v46, %v1688_v26  ;;  %v1729_v28 = vmul.f32 %v6623_v6, %v1688_v26 }
  0xdd   :  { %v1730_v21 = vmul.f32 %v6628_v62, %v1688_v26  ;;  %v1731_v11 = vmul.f32 %v6611_v49, %v1692_v4  ;;  %v1732_v8 = vmul.f32 %v6618_v46, %v1692_v4  ;;  %v1733_v50 = vmul.f32 %v6623_v6, %v1692_v4  ;;  %v6740_v49 = vld.sshfl [vmem:[%s9674_s1 + $0x1a] sm:$0x11 pattern:$0x75316420] }
  0xde   :  { %v1734_v36 = vmul.f32 %v6628_v62, %v1692_v4  ;;  %v6731_v15 = vadd.f32 %v1727_v51, %v1719_v0  ;;  %v6733_v57 = vadd.f32 %v1728_v32, %v1720_v2  ;;  %v6735_v63 = vadd.f32 %v1729_v28, %v1721_v16  ;;  %v6777_v16 = vld [vmem:[%s9675_s2 + $0x198] sm:$0xff]  ;;  %v4789_v51 = vld [vmem:[%s9676_s3 + $0x180] sm:$0xff]  ;;  %v4790_v32 = vld [vmem:[%s9676_s3 + $0x188] sm:$0xff] }
  0xdf   :  { %v6742_v46 = vadd.f32 %v1730_v21, %v1722_v44  ;;  %v6744_v6 = vadd.f32 %v1731_v11, %v1723_v37  ;;  %v6746_v26 = vadd.f32 %v1732_v8, %v1724_v27  ;;  %v6748_v52 = vadd.f32 %v1733_v50, %v1725_v45 }
  0xe0   :  { %v6750_v62 = vadd.f32 %v1734_v36, %v1726_v54  ;;  %v1753_v35 = vcombine.high %v4782_v31, %v4782_v31  ;;  %v1760_v4 = vrot.slane %v4782_v31, %v5059_v9  ;;  %v1778_v60 = vcombine.high %v4784_v55, %v4784_v55 }
  0xe1   :  { %v1785_v7 = vrot.slane %v4784_v55, %v5059_v9  ;;  %v1897_v3 = vcombine.high %v4794_v53, %v4794_v53  ;;  %v1904_v56 = vrot.slane %v4794_v53, %v5059_v9  ;;  %v1922_v22 = vcombine.high %v6740_v49, %v6740_v49 }
  0xe2   :  { %v1767_v0 = vrot.slane %v1753_v35, %v5059_v9  ;;  %v1792_v2 = vrot.slane %v1778_v60, %v5059_v9  ;;  %v1806_v44 = vrot.slane %v1760_v4, %v5061_v10  ;;  %v1929_v37 = vrot.slane %v6740_v49, %v5059_v9  ;;  %v4803_v49 = vld [vmem:[%s9676_s3 + $0x1b0] sm:$0xff] }
  0xe3   :  { %v1832_v27 = vrot.slane %v1785_v7, %v5061_v10  ;;  %v6784_v45 = vrot.slane %v1897_v3, %v5059_v9  ;;  %v6787_v31 = vrot.slane %v1922_v22, %v5059_v9  ;;  %v6790_v54 = vrot.slane %v1904_v56, %v5061_v10 }
  0xe4   :  { %v1810_v28 = vrot.slane %v1767_v0, %v5061_v10  ;;  %v1813_v55 = vmul.f32 %v6757_v38, %v1806_v44  ;;  %v1814_v21 = vmul.f32 %v6762_v33, %v1806_v44  ;;  %v1815_v11 = vmul.f32 %v6767_v40, %v1806_v44 }
  0xe5   :  { %v1816_v8 = vmul.f32 %v6777_v16, %v1806_v44  ;;  %v1836_v50 = vrot.slane %v1792_v2, %v5061_v10  ;;  %v6804_v53 = vmul.f32 %v4789_v51, %v1832_v27  ;;  %v6806_v36 = vmul.f32 %v4790_v32, %v1832_v27 }
  0xe6   :  { %v1817_v35 = vmul.f32 %v6757_v38, %v1810_v28  ;;  %v1818_v4 = vmul.f32 %v6762_v33, %v1810_v28  ;;  %v1819_v60 = vmul.f32 %v6767_v40, %v1810_v28  ;;  %v1820_v7 = vmul.f32 %v6777_v16, %v1810_v28 }
  0xe7   :  { %v6815_v3 = vadd.f32 %v1813_v55, %v1703_v30  ;;  %v6820_v56 = vadd.f32 %v1814_v21, %v1704_v18  ;;  %v6825_v22 = vadd.f32 %v1815_v11, %v1705_v39  ;;  %v6830_v0 = vadd.f32 %v1816_v8, %v1706_v47 }
  0xe8   :  { %v6841_v17 = vadd.f32 %v1817_v35, %v1707_v41  ;;  %v6846_v14 = vadd.f32 %v1818_v4, %v1708_v23  ;;  %v6851_v13 = vadd.f32 %v1819_v60, %v1709_v29  ;;  %v6856_v34 = vadd.f32 %v1820_v7, %v1710_v1 }
  0xe9   :  { %v6858_v61 = vmul.f32 %v4791_v42, %v1832_v27  ;;  %v6860_v24 = vmul.f32 %v4792_v48, %v1832_v27  ;;  %v6862_v43 = vmul.f32 %v4789_v51, %v1836_v50  ;;  %v6864_v25 = vmul.f32 %v4790_v32, %v1836_v50 }
  0xea   :  { %v6866_v5 = vmul.f32 %v4791_v42, %v1836_v50  ;;  %v6868_v12 = vmul.f32 %v4792_v48, %v1836_v50  ;;  %v1847_v58 = vsub.f32 %v6815_v3, %v6804_v53  ;;  %v1848_v59 = vsub.f32 %v6820_v56, %v6806_v36  ;;  %v6910_v3 = vld [vmem:[%s9675_s2 + $0x1a8] sm:$0xff] }
  0xeb   :  { %v1849_v19 = vsub.f32 %v6825_v22, %v6858_v61  ;;  %v1850_v20 = vsub.f32 %v6830_v0, %v6860_v24  ;;  %v1851_v30 = vsub.f32 %v6841_v17, %v6862_v43  ;;  %v1852_v18 = vsub.f32 %v6846_v14, %v6864_v25  ;;  %v4801_v43 = vld [vmem:[%s9676_s3 + $0x1a0] sm:$0xff]  ;;  %v4802_v25 = vld [vmem:[%s9676_s3 + $0x1a8] sm:$0xff] }
  0xec   :  { %v1853_v39 = vsub.f32 %v6851_v13, %v6866_v5  ;;  %v1854_v47 = vsub.f32 %v6856_v34, %v6868_v12  ;;  %v1855_v41 = vmul.f32 %v4789_v51, %v1806_v44  ;;  %v1856_v23 = vmul.f32 %v4790_v32, %v1806_v44 }
  0xed   :  { %v1857_v29 = vmul.f32 %v4791_v42, %v1806_v44  ;;  %v1858_v1 = vmul.f32 %v4792_v48, %v1806_v44  ;;  %v1859_v2 = vmul.f32 %v4789_v51, %v1810_v28  ;;  %v1860_v55 = vmul.f32 %v4790_v32, %v1810_v28 }
  0xee   :  { %v1861_v21 = vmul.f32 %v4791_v42, %v1810_v28  ;;  %v1862_v11 = vmul.f32 %v4792_v48, %v1810_v28  ;;  %v1863_v8 = vadd.f32 %v1855_v41, %v6731_v15  ;;  %v1864_v53 = vadd.f32 %v1856_v23, %v6733_v57 }
  0xef   :  { %v1865_v36 = vadd.f32 %v1857_v29, %v6735_v63  ;;  %v1866_v35 = vadd.f32 %v1858_v1, %v6742_v46  ;;  %v1867_v4 = vadd.f32 %v1859_v2, %v6744_v6  ;;  %v1868_v60 = vadd.f32 %v1860_v55, %v6746_v26  ;;  %v6903_v6 = vld [vmem:[%s9675_s2 + $0x1a0] sm:$0xff]  ;;  %v4804_v55 = vld [vmem:[%s9676_s3 + $0x1b8] sm:$0xff] }
  0xf0   :  { %v1869_v7 = vadd.f32 %v1861_v21, %v6748_v52  ;;  %v1870_v44 = vadd.f32 %v1862_v11, %v6750_v62  ;;  %v1871_v51 = vmul.f32 %v6757_v38, %v1832_v27  ;;  %v1872_v32 = vmul.f32 %v6762_v33, %v1832_v27 }
  0xf1   :  { %v1873_v15 = vmul.f32 %v6767_v40, %v1832_v27  ;;  %v1874_v57 = vmul.f32 %v6777_v16, %v1832_v27  ;;  %v1875_v63 = vmul.f32 %v6757_v38, %v1836_v50  ;;  %v1876_v46 = vmul.f32 %v6762_v33, %v1836_v50  ;;  %v6915_v38 = vld [vmem:[%s9675_s2 + $0x1b0] sm:$0xff]  ;;  %v6920_v33 = vld [vmem:[%s9675_s2 + $0x1b8] sm:$0xff] }
  0xf2   :  { %v1877_v26 = vmul.f32 %v6767_v40, %v1836_v50  ;;  %v1878_v52 = vmul.f32 %v6777_v16, %v1836_v50  ;;  %v1879_v62 = vadd.f32 %v1871_v51, %v1863_v8  ;;  %v1880_v28 = vadd.f32 %v1872_v32, %v1864_v53 }
  0xf3   :  { %v1881_v40 = vadd.f32 %v1873_v15, %v1865_v36  ;;  %v1882_v27 = vadd.f32 %v1874_v57, %v1866_v35  ;;  %v1883_v16 = vadd.f32 %v1875_v63, %v1867_v4  ;;  %v1884_v50 = vadd.f32 %v1876_v46, %v1868_v60 }
  0xf4   :  { %v1885_v56 = vadd.f32 %v1877_v26, %v1869_v7  ;;  %v1886_v22 = vadd.f32 %v1878_v52, %v1870_v44  ;;  %v1954_v0 = vrot.slane %v6784_v45, %v5061_v10  ;;  %v1957_v42 = vmul.f32 %v6903_v6, %v6790_v54 }
  0xf5   :  { %v1958_v48 = vmul.f32 %v6910_v3, %v6790_v54  ;;  %v1959_v17 = vmul.f32 %v6915_v38, %v6790_v54  ;;  %v1960_v14 = vmul.f32 %v6920_v33, %v6790_v54  ;;  %v1976_v13 = vrot.slane %v1929_v37, %v5061_v10 }
  0xf6   :  { %v1961_v34 = vmul.f32 %v6903_v6, %v1954_v0  ;;  %v1962_v45 = vmul.f32 %v6910_v3, %v1954_v0  ;;  %v1963_v61 = vmul.f32 %v6915_v38, %v1954_v0  ;;  %v1964_v24 = vmul.f32 %v6920_v33, %v1954_v0 }
  0xf7   :  { %v6949_v37 = vadd.f32 %v1957_v42, %v1847_v58  ;;  %v6951_v5 = vadd.f32 %v1958_v48, %v1848_v59  ;;  %v6953_v12 = vadd.f32 %v1959_v17, %v1849_v19  ;;  %v6955_v41 = vadd.f32 %v1960_v14, %v1850_v20 }
  0xf8   :  { %v6957_v23 = vadd.f32 %v1961_v34, %v1851_v30  ;;  %v6959_v29 = vadd.f32 %v1962_v45, %v1852_v18  ;;  %v6961_v1 = vadd.f32 %v1963_v61, %v1853_v39  ;;  %v6963_v2 = vadd.f32 %v1964_v24, %v1854_v47  ;;  %v4806_v45 = vld.sshfl [vmem:[%s9673_s0 + $0x1c] sm:$0x11 pattern:$0x75316420] }
  0xf9   :  { %v1980_v58 = vrot.slane %v6787_v31, %v5061_v10  ;;  %v6970_v59 = vmul.f32 %v4801_v43, %v1976_v13  ;;  %v6972_v19 = vmul.f32 %v4802_v25, %v1976_v13  ;;  %v6974_v20 = vmul.f32 %v4803_v49, %v1976_v13 }
  0xfa   :  { %v6976_v30 = vmul.f32 %v4804_v55, %v1976_v13  ;;  %v1999_v18 = vmul.f32 %v4801_v43, %v6790_v54  ;;  %v2000_v39 = vmul.f32 %v4802_v25, %v6790_v54  ;;  %v2001_v47 = vmul.f32 %v4803_v49, %v6790_v54 }
  0xfb   :  { %v6981_v21 = vmul.f32 %v4801_v43, %v1980_v58  ;;  %v6983_v11 = vmul.f32 %v4802_v25, %v1980_v58  ;;  %v6985_v8 = vmul.f32 %v4803_v49, %v1980_v58  ;;  %v6987_v31 = vmul.f32 %v4804_v55, %v1980_v58 }
  0xfc   :  { %v1991_v53 = vsub.f32 %v6949_v37, %v6970_v59  ;;  %v1992_v36 = vsub.f32 %v6951_v5, %v6972_v19  ;;  %v1993_v35 = vsub.f32 %v6953_v12, %v6974_v20  ;;  %v1994_v4 = vsub.f32 %v6955_v41, %v6976_v30  ;;  %v4815_v37 = vld [vmem:[%s9676_s3 + $0x1d0] sm:$0xff]  ;;  %v4816_v5 = vld [vmem:[%s9676_s3 + $0x1d8] sm:$0xff] }
  0xfd   :  { %v1995_v60 = vsub.f32 %v6957_v23, %v6981_v21  ;;  %v1996_v7 = vsub.f32 %v6959_v29, %v6983_v11  ;;  %v1997_v44 = vsub.f32 %v6961_v1, %v6985_v8  ;;  %v1998_v51 = vsub.f32 %v6963_v2, %v6987_v31 }
  0xfe   :  { %v2002_v32 = vmul.f32 %v4804_v55, %v6790_v54  ;;  %v2003_v15 = vmul.f32 %v4801_v43, %v1954_v0  ;;  %v2004_v57 = vmul.f32 %v4802_v25, %v1954_v0  ;;  %v2005_v63 = vmul.f32 %v4803_v49, %v1954_v0 }
  0xff   :  { %v2006_v46 = vmul.f32 %v4804_v55, %v1954_v0  ;;  %v2007_v26 = vadd.f32 %v1999_v18, %v1879_v62  ;;  %v2008_v52 = vadd.f32 %v2000_v39, %v1880_v28  ;;  %v2009_v42 = vadd.f32 %v2001_v47, %v1881_v40  ;;  %v4808_v62 = vld.sshfl [vmem:[%s9674_s1 + $0x1c] sm:$0x11 pattern:$0x75316420]  ;;  %v7049_v47 = vld [vmem:[%s9675_s2 + $0x1c0] sm:$0xff] }
 0x100   :  { %v2010_v48 = vadd.f32 %v2002_v32, %v1882_v27  ;;  %v2011_v17 = vadd.f32 %v2003_v15, %v1883_v16  ;;  %v2012_v14 = vadd.f32 %v2004_v57, %v1884_v50  ;;  %v2013_v34 = vadd.f32 %v2005_v63, %v1885_v56  ;;  %v4818_v50 = vld.sshfl [vmem:[%s9673_s0 + $0x1e] sm:$0x11 pattern:$0x75316420]  ;;  %v7054_v32 = vld [vmem:[%s9675_s2 + $0x1c8] sm:$0xff]  ;;  %v7059_v15 = vld [vmem:[%s9675_s2 + $0x1d0] sm:$0xff] }
 0x101   :  { %v2014_v61 = vadd.f32 %v2006_v46, %v1886_v22  ;;  %v2015_v24 = vmul.f32 %v6903_v6, %v1976_v13  ;;  %v2016_v54 = vmul.f32 %v6910_v3, %v1976_v13  ;;  %v2017_v43 = vmul.f32 %v6915_v38, %v1976_v13 }
 0x102   :  { %v2018_v28 = vmul.f32 %v6920_v33, %v1976_v13  ;;  %v2019_v40 = vmul.f32 %v6903_v6, %v1980_v58  ;;  %v2020_v27 = vmul.f32 %v6910_v3, %v1980_v58  ;;  %v2021_v16 = vmul.f32 %v6915_v38, %v1980_v58  ;;  %v7032_v6 = vld.sshfl [vmem:[%s9674_s1 + $0x1e] sm:$0x11 pattern:$0x75316420] }
 0x103   :  { %v2022_v56 = vmul.f32 %v6920_v33, %v1980_v58  ;;  %v7023_v22 = vadd.f32 %v2015_v24, %v2007_v26  ;;  %v7025_v0 = vadd.f32 %v2016_v54, %v2008_v52  ;;  %v7027_v25 = vadd.f32 %v2017_v43, %v2009_v42  ;;  %v7069_v42 = vld [vmem:[%s9675_s2 + $0x1d8] sm:$0xff]  ;;  %v4813_v24 = vld [vmem:[%s9676_s3 + $0x1c0] sm:$0xff]  ;;  %v4814_v54 = vld [vmem:[%s9676_s3 + $0x1c8] sm:$0xff] }
 0x104   :  { %v7034_v3 = vadd.f32 %v2018_v28, %v2010_v48  ;;  %v7036_v38 = vadd.f32 %v2019_v40, %v2011_v17  ;;  %v7038_v13 = vadd.f32 %v2020_v27, %v2012_v14  ;;  %v7040_v49 = vadd.f32 %v2021_v16, %v2013_v34 }
 0x105   :  { %v7042_v33 = vadd.f32 %v2022_v56, %v2014_v61  ;;  %v2041_v55 = vcombine.high %v4806_v45, %v4806_v45  ;;  %v2048_v58 = vrot.slane %v4806_v45, %v5059_v9  ;;  %v2066_v18 = vcombine.high %v4808_v62, %v4808_v62 }
 0x106   :  { %v2073_v39 = vrot.slane %v4808_v62, %v5059_v9  ;;  %v2185_v57 = vcombine.high %v4818_v50, %v4818_v50  ;;  %v2192_v63 = vrot.slane %v4818_v50, %v5059_v9  ;;  %v2210_v46 = vcombine.high %v7032_v6, %v7032_v6 }
 0x107   :  { %v2055_v26 = vrot.slane %v2041_v55, %v5059_v9  ;;  %v2080_v52 = vrot.slane %v2066_v18, %v5059_v9  ;;  %v2094_v48 = vrot.slane %v2048_v58, %v5061_v10  ;;  %v2217_v17 = vrot.slane %v7032_v6, %v5059_v9  ;;  %v4827_v6 = vld [vmem:[%s9676_s3 + $0x1f0] sm:$0xff] }
 0x108   :  { %v2120_v14 = vrot.slane %v2073_v39, %v5061_v10  ;;  %v7076_v34 = vrot.slane %v2185_v57, %v5059_v9  ;;  %v7079_v45 = vrot.slane %v2210_v46, %v5059_v9  ;;  %v7082_v61 = vrot.slane %v2192_v63, %v5061_v10 }
 0x109   :  { %v2098_v43 = vrot.slane %v2055_v26, %v5061_v10  ;;  %v2101_v62 = vmul.f32 %v7049_v47, %v2094_v48  ;;  %v2102_v28 = vmul.f32 %v7054_v32, %v2094_v48  ;;  %v2103_v40 = vmul.f32 %v7059_v15, %v2094_v48 }
 0x10a   :  { %v2104_v27 = vmul.f32 %v7069_v42, %v2094_v48  ;;  %v2124_v16 = vrot.slane %v2080_v52, %v5061_v10  ;;  %v7096_v50 = vmul.f32 %v4813_v24, %v2120_v14  ;;  %v7098_v56 = vmul.f32 %v4814_v54, %v2120_v14 }
 0x10b   :  { %v2105_v55 = vmul.f32 %v7049_v47, %v2098_v43  ;;  %v2106_v58 = vmul.f32 %v7054_v32, %v2098_v43  ;;  %v2107_v18 = vmul.f32 %v7059_v15, %v2098_v43  ;;  %v2108_v39 = vmul.f32 %v7069_v42, %v2098_v43 }
 0x10c   :  { %v7107_v57 = vadd.f32 %v2101_v62, %v1991_v53  ;;  %v7112_v63 = vadd.f32 %v2102_v28, %v1992_v36  ;;  %v7117_v46 = vadd.f32 %v2103_v40, %v1993_v35  ;;  %v7122_v26 = vadd.f32 %v2104_v27, %v1994_v4 }
 0x10d   :  { %v7133_v59 = vadd.f32 %v2105_v55, %v1995_v60  ;;  %v7138_v12 = vadd.f32 %v2106_v58, %v1996_v7  ;;  %v7143_v41 = vadd.f32 %v2107_v18, %v1997_v44  ;;  %v7148_v19 = vadd.f32 %v2108_v39, %v1998_v51 }
 0x10e   :  { %v7150_v20 = vmul.f32 %v4815_v37, %v2120_v14  ;;  %v7152_v23 = vmul.f32 %v4816_v5, %v2120_v14  ;;  %v7154_v30 = vmul.f32 %v4813_v24, %v2124_v16  ;;  %v7156_v21 = vmul.f32 %v4814_v54, %v2124_v16 }
 0x10f   :  { %v7158_v29 = vmul.f32 %v4815_v37, %v2124_v16  ;;  %v7160_v11 = vmul.f32 %v4816_v5, %v2124_v16  ;;  %v2135_v1 = vsub.f32 %v7107_v57, %v7096_v50  ;;  %v2136_v2 = vsub.f32 %v7112_v63, %v7098_v56  ;;  %v7202_v57 = vld [vmem:[%s9675_s2 + $0x1e8] sm:$0xff] }
 0x110   :  { %v2137_v8 = vsub.f32 %v7117_v46, %v7150_v20  ;;  %v2138_v31 = vsub.f32 %v7122_v26, %v7152_v23  ;;  %v2139_v53 = vsub.f32 %v7133_v59, %v7154_v30  ;;  %v2140_v36 = vsub.f32 %v7138_v12, %v7156_v21  ;;  %v4825_v30 = vld [vmem:[%s9676_s3 + $0x1e0] sm:$0xff]  ;;  %v4826_v21 = vld [vmem:[%s9676_s3 + $0x1e8] sm:$0xff] }
 0x111   :  { %v2141_v35 = vsub.f32 %v7143_v41, %v7158_v29  ;;  %v2142_v4 = vsub.f32 %v7148_v19, %v7160_v11  ;;  %v2143_v60 = vmul.f32 %v4813_v24, %v2094_v48  ;;  %v2144_v7 = vmul.f32 %v4814_v54, %v2094_v48 }
 0x112   :  { %v2145_v44 = vmul.f32 %v4815_v37, %v2094_v48  ;;  %v2146_v51 = vmul.f32 %v4816_v5, %v2094_v48  ;;  %v2147_v52 = vmul.f32 %v4813_v24, %v2098_v43  ;;  %v2148_v62 = vmul.f32 %v4814_v54, %v2098_v43 }
 0x113   :  { %v2149_v28 = vmul.f32 %v4815_v37, %v2098_v43  ;;  %v2150_v40 = vmul.f32 %v4816_v5, %v2098_v43  ;;  %v2151_v27 = vadd.f32 %v2143_v60, %v7023_v22  ;;  %v2152_v50 = vadd.f32 %v2144_v7, %v7025_v0 }
 0x114   :  { %v2153_v56 = vadd.f32 %v2145_v44, %v7027_v25  ;;  %v2154_v55 = vadd.f32 %v2146_v51, %v7034_v3  ;;  %v2155_v58 = vadd.f32 %v2147_v52, %v7036_v38  ;;  %v2156_v18 = vadd.f32 %v2148_v62, %v7038_v13  ;;  %v7195_v38 = vld [vmem:[%s9675_s2 + $0x1e0] sm:$0xff]  ;;  %v4828_v62 = vld [vmem:[%s9676_s3 + $0x1f8] sm:$0xff] }
 0x115   :  { %v2157_v39 = vadd.f32 %v2149_v28, %v7040_v49  ;;  %v2158_v48 = vadd.f32 %v2150_v40, %v7042_v33  ;;  %v2159_v24 = vmul.f32 %v7049_v47, %v2120_v14  ;;  %v2160_v54 = vmul.f32 %v7054_v32, %v2120_v14 }
 0x116   :  { %v2161_v22 = vmul.f32 %v7059_v15, %v2120_v14  ;;  %v2162_v0 = vmul.f32 %v7069_v42, %v2120_v14  ;;  %v2163_v25 = vmul.f32 %v7049_v47, %v2124_v16  ;;  %v2164_v3 = vmul.f32 %v7054_v32, %v2124_v16  ;;  %v7207_v47 = vld [vmem:[%s9675_s2 + $0x1f0] sm:$0xff]  ;;  %v7212_v32 = vld [vmem:[%s9675_s2 + $0x1f8] sm:$0xff] }
 0x117   :  { %v2165_v13 = vmul.f32 %v7059_v15, %v2124_v16  ;;  %v2166_v49 = vmul.f32 %v7069_v42, %v2124_v16  ;;  %v2167_v33 = vadd.f32 %v2159_v24, %v2151_v27  ;;  %v2168_v43 = vadd.f32 %v2160_v54, %v2152_v50 }
 0x118   :  { %v2169_v15 = vadd.f32 %v2161_v22, %v2153_v56  ;;  %v2170_v14 = vadd.f32 %v2162_v0, %v2154_v55  ;;  %v2171_v42 = vadd.f32 %v2163_v25, %v2155_v58  ;;  %v2172_v16 = vadd.f32 %v2164_v3, %v2156_v18 }
 0x119   :  { %v2173_v63 = vadd.f32 %v2165_v13, %v2157_v39  ;;  %v2174_v46 = vadd.f32 %v2166_v49, %v2158_v48  ;;  %v2242_v26 = vrot.slane %v7076_v34, %v5061_v10  ;;  %v2245_v37 = vmul.f32 %v7195_v38, %v7082_v61 }
 0x11a   :  { %v2246_v5 = vmul.f32 %v7202_v57, %v7082_v61  ;;  %v2247_v59 = vmul.f32 %v7207_v47, %v7082_v61  ;;  %v2248_v12 = vmul.f32 %v7212_v32, %v7082_v61  ;;  %v2264_v41 = vrot.slane %v2217_v17, %v5061_v10 }
 0x11b   :  { %v2249_v19 = vmul.f32 %v7195_v38, %v2242_v26  ;;  %v2250_v34 = vmul.f32 %v7202_v57, %v2242_v26  ;;  %v2251_v20 = vmul.f32 %v7207_v47, %v2242_v26  ;;  %v2252_v23 = vmul.f32 %v7212_v32, %v2242_v26 }
 0x11c   :  { %v7241_v17 = vadd.f32 %v2245_v37, %v2135_v1  ;;  %v7243_v29 = vadd.f32 %v2246_v5, %v2136_v2  ;;  %v7245_v11 = vadd.f32 %v2247_v59, %v2137_v8  ;;  %v7247_v60 = vadd.f32 %v2248_v12, %v2138_v31 }
 0x11d   :  { %v7249_v7 = vadd.f32 %v2249_v19, %v2139_v53  ;;  %v7251_v44 = vadd.f32 %v2250_v34, %v2140_v36  ;;  %v7253_v51 = vadd.f32 %v2251_v20, %v2141_v35  ;;  %v7255_v52 = vadd.f32 %v2252_v23, %v2142_v4  ;;  %v4830_v34 = vld.sshfl [vmem:[%s9673_s0 + $0x20] sm:$0x11 pattern:$0x75316420] }
 0x11e   :  { %v2268_v1 = vrot.slane %v7079_v45, %v5061_v10  ;;  %v7262_v2 = vmul.f32 %v4825_v30, %v2264_v41  ;;  %v7264_v8 = vmul.f32 %v4826_v21, %v2264_v41  ;;  %v7266_v31 = vmul.f32 %v4827_v6, %v2264_v41 }
 0x11f   :  { %v7268_v53 = vmul.f32 %v4828_v62, %v2264_v41  ;;  %v2287_v36 = vmul.f32 %v4825_v30, %v7082_v61  ;;  %v2288_v35 = vmul.f32 %v4826_v21, %v7082_v61  ;;  %v2289_v4 = vmul.f32 %v4827_v6, %v7082_v61 }
 0x120   :  { %v7273_v28 = vmul.f32 %v4825_v30, %v2268_v1  ;;  %v7275_v40 = vmul.f32 %v4826_v21, %v2268_v1  ;;  %v7277_v27 = vmul.f32 %v4827_v6, %v2268_v1  ;;  %v7279_v45 = vmul.f32 %v4828_v62, %v2268_v1 }
 0x121   :  { %v2279_v50 = vsub.f32 %v7241_v17, %v7262_v2  ;;  %v2280_v56 = vsub.f32 %v7243_v29, %v7264_v8  ;;  %v2281_v55 = vsub.f32 %v7245_v11, %v7266_v31  ;;  %v2282_v58 = vsub.f32 %v7247_v60, %v7268_v53  ;;  %v4839_v17 = vld [vmem:[%s9676_s3 + $0x210] sm:$0xff]  ;;  %v4840_v29 = vld [vmem:[%s9676_s3 + $0x218] sm:$0xff] }
 0x122   :  { %v2283_v18 = vsub.f32 %v7249_v7, %v7273_v28  ;;  %v2284_v39 = vsub.f32 %v7251_v44, %v7275_v40  ;;  %v2285_v48 = vsub.f32 %v7253_v51, %v7277_v27  ;;  %v2286_v24 = vsub.f32 %v7255_v52, %v7279_v45 }
 0x123   :  { %v2290_v54 = vmul.f32 %v4828_v62, %v7082_v61  ;;  %v2291_v22 = vmul.f32 %v4825_v30, %v2242_v26  ;;  %v2292_v0 = vmul.f32 %v4826_v21, %v2242_v26  ;;  %v2293_v25 = vmul.f32 %v4827_v6, %v2242_v26 }
 0x124   :  { %v2294_v3 = vmul.f32 %v4828_v62, %v2242_v26  ;;  %v2295_v13 = vadd.f32 %v2287_v36, %v2167_v33  ;;  %v2296_v49 = vadd.f32 %v2288_v35, %v2168_v43  ;;  %v2297_v37 = vadd.f32 %v2289_v4, %v2169_v15  ;;  %v4832_v33 = vld.sshfl [vmem:[%s9674_s1 + $0x20] sm:$0x11 pattern:$0x75316420] }
 0x125   :  { %v2298_v5 = vadd.f32 %v2290_v54, %v2170_v14  ;;  %v2299_v59 = vadd.f32 %v2291_v22, %v2171_v42  ;;  %v2300_v12 = vadd.f32 %v2292_v0, %v2172_v16  ;;  %v2301_v19 = vadd.f32 %v2293_v25, %v2173_v63  ;;  %v4842_v16 = vld.sshfl [vmem:[%s9673_s0 + $0x22] sm:$0x11 pattern:$0x75316420]  ;;  %v7346_v54 = vld [vmem:[%s9675_s2 + $0x208] sm:$0xff]  ;;  %v7351_v22 = vld [vmem:[%s9675_s2 + $0x210] sm:$0xff] }
 0x126   :  { %v2302_v20 = vadd.f32 %v2294_v3, %v2174_v46  ;;  %v2303_v23 = vmul.f32 %v7195_v38, %v2264_v41  ;;  %v2304_v61 = vmul.f32 %v7202_v57, %v2264_v41  ;;  %v2305_v30 = vmul.f32 %v7207_v47, %v2264_v41  ;;  %v7341_v4 = vld [vmem:[%s9675_s2 + $0x200] sm:$0xff] }
 0x127   :  { %v2306_v43 = vmul.f32 %v7212_v32, %v2264_v41  ;;  %v2307_v15 = vmul.f32 %v7195_v38, %v2268_v1  ;;  %v2308_v14 = vmul.f32 %v7202_v57, %v2268_v1  ;;  %v2309_v42 = vmul.f32 %v7207_v47, %v2268_v1  ;;  %v7324_v38 = vld.sshfl [vmem:[%s9674_s1 + $0x22] sm:$0x11 pattern:$0x75316420] }
 0x128   :  { %v2310_v63 = vmul.f32 %v7212_v32, %v2268_v1  ;;  %v7315_v46 = vadd.f32 %v2303_v23, %v2295_v13  ;;  %v7317_v26 = vadd.f32 %v2304_v61, %v2296_v49  ;;  %v7319_v21 = vadd.f32 %v2305_v30, %v2297_v37  ;;  %v7361_v37 = vld [vmem:[%s9675_s2 + $0x218] sm:$0xff]  ;;  %v4837_v23 = vld [vmem:[%s9676_s3 + $0x200] sm:$0xff]  ;;  %v4838_v61 = vld [vmem:[%s9676_s3 + $0x208] sm:$0xff] }
 0x129   :  { %v7326_v57 = vadd.f32 %v2306_v43, %v2298_v5  ;;  %v7328_v47 = vadd.f32 %v2307_v15, %v2299_v59  ;;  %v7330_v41 = vadd.f32 %v2308_v14, %v2300_v12  ;;  %v7332_v6 = vadd.f32 %v2309_v42, %v2301_v19 }
 0x12a   :  { %v7334_v32 = vadd.f32 %v2310_v63, %v2302_v20  ;;  %v2329_v62 = vcombine.high %v4830_v34, %v4830_v34  ;;  %v2336_v1 = vrot.slane %v4830_v34, %v5059_v9  ;;  %v2354_v36 = vcombine.high %v4832_v33, %v4832_v33 }
 0x12b   :  { %v2361_v35 = vrot.slane %v4832_v33, %v5059_v9  ;;  %v2473_v0 = vcombine.high %v4842_v16, %v4842_v16  ;;  %v2480_v25 = vrot.slane %v4842_v16, %v5059_v9  ;;  %v2498_v3 = vcombine.high %v7324_v38, %v7324_v38 }
 0x12c   :  { %v2343_v13 = vrot.slane %v2329_v62, %v5059_v9  ;;  %v2368_v49 = vrot.slane %v2354_v36, %v5059_v9  ;;  %v2382_v5 = vrot.slane %v2336_v1, %v5061_v10  ;;  %v2505_v59 = vrot.slane %v7324_v38, %v5059_v9  ;;  %v4851_v38 = vld [vmem:[%s9676_s3 + $0x230] sm:$0xff] }
 0x12d   :  { %v2408_v12 = vrot.slane %v2361_v35, %v5061_v10  ;;  %v7368_v19 = vrot.slane %v2473_v0, %v5059_v9  ;;  %v7371_v34 = vrot.slane %v2498_v3, %v5059_v9  ;;  %v7374_v20 = vrot.slane %v2480_v25, %v5061_v10 }
 0x12e   :  { %v2386_v30 = vrot.slane %v2343_v13, %v5061_v10  ;;  %v2389_v33 = vmul.f32 %v7341_v4, %v2382_v5  ;;  %v2390_v43 = vmul.f32 %v7346_v54, %v2382_v5  ;;  %v2391_v15 = vmul.f32 %v7351_v22, %v2382_v5 }
 0x12f   :  { %v2392_v14 = vmul.f32 %v7361_v37, %v2382_v5  ;;  %v2412_v42 = vrot.slane %v2368_v49, %v5061_v10  ;;  %v7388_v16 = vmul.f32 %v4837_v23, %v2408_v12  ;;  %v7390_v63 = vmul.f32 %v4838_v61, %v2408_v12 }
 0x130   :  { %v2393_v62 = vmul.f32 %v7341_v4, %v2386_v30  ;;  %v2394_v1 = vmul.f32 %v7346_v54, %v2386_v30  ;;  %v2395_v36 = vmul.f32 %v7351_v22, %v2386_v30  ;;  %v2396_v35 = vmul.f32 %v7361_v37, %v2386_v30 }
 0x131   :  { %v7399_v0 = vadd.f32 %v2389_v33, %v2279_v50  ;;  %v7404_v25 = vadd.f32 %v2390_v43, %v2280_v56  ;;  %v7409_v3 = vadd.f32 %v2391_v15, %v2281_v55  ;;  %v7414_v13 = vadd.f32 %v2392_v14, %v2282_v58 }
 0x132   :  { %v7425_v2 = vadd.f32 %v2393_v62, %v2283_v18  ;;  %v7430_v11 = vadd.f32 %v2394_v1, %v2284_v39  ;;  %v7435_v60 = vadd.f32 %v2395_v36, %v2285_v48  ;;  %v7440_v8 = vadd.f32 %v2396_v35, %v2286_v24 }
 0x133   :  { %v7442_v31 = vmul.f32 %v4839_v17, %v2408_v12  ;;  %v7444_v7 = vmul.f32 %v4840_v29, %v2408_v12  ;;  %v7446_v53 = vmul.f32 %v4837_v23, %v2412_v42  ;;  %v7448_v28 = vmul.f32 %v4838_v61, %v2412_v42 }
 0x134   :  { %v7450_v44 = vmul.f32 %v4839_v17, %v2412_v42  ;;  %v7452_v40 = vmul.f32 %v4840_v29, %v2412_v42  ;;  %v2423_v51 = vsub.f32 %v7399_v0, %v7388_v16  ;;  %v2424_v52 = vsub.f32 %v7404_v25, %v7390_v63  ;;  %v7494_v0 = vld [vmem:[%s9675_s2 + $0x228] sm:$0xff] }
 0x135   :  { %v2425_v27 = vsub.f32 %v7409_v3, %v7442_v31  ;;  %v2426_v45 = vsub.f32 %v7414_v13, %v7444_v7  ;;  %v2427_v50 = vsub.f32 %v7425_v2, %v7446_v53  ;;  %v2428_v56 = vsub.f32 %v7430_v11, %v7448_v28  ;;  %v4849_v53 = vld [vmem:[%s9676_s3 + $0x220] sm:$0xff]  ;;  %v4850_v28 = vld [vmem:[%s9676_s3 + $0x228] sm:$0xff] }
 0x136   :  { %v2429_v55 = vsub.f32 %v7435_v60, %v7450_v44  ;;  %v2430_v58 = vsub.f32 %v7440_v8, %v7452_v40  ;;  %v2431_v18 = vmul.f32 %v4837_v23, %v2382_v5  ;;  %v2432_v39 = vmul.f32 %v4838_v61, %v2382_v5 }
 0x137   :  { %v2433_v48 = vmul.f32 %v4839_v17, %v2382_v5  ;;  %v2434_v24 = vmul.f32 %v4840_v29, %v2382_v5  ;;  %v2435_v49 = vmul.f32 %v4837_v23, %v2386_v30  ;;  %v2436_v33 = vmul.f32 %v4838_v61, %v2386_v30 }
 0x138   :  { %v2437_v43 = vmul.f32 %v4839_v17, %v2386_v30  ;;  %v2438_v15 = vmul.f32 %v4840_v29, %v2386_v30  ;;  %v2439_v14 = vadd.f32 %v2431_v18, %v7315_v46  ;;  %v2440_v16 = vadd.f32 %v2432_v39, %v7317_v26 }
 0x139   :  { %v2441_v63 = vadd.f32 %v2433_v48, %v7319_v21  ;;  %v2442_v62 = vadd.f32 %v2434_v24, %v7326_v57  ;;  %v2443_v1 = vadd.f32 %v2435_v49, %v7328_v47  ;;  %v2444_v36 = vadd.f32 %v2436_v33, %v7330_v41  ;;  %v7487_v47 = vld [vmem:[%s9675_s2 + $0x220] sm:$0xff]  ;;  %v4852_v33 = vld [vmem:[%s9676_s3 + $0x238] sm:$0xff] }
 0x13a   :  { %v2445_v35 = vadd.f32 %v2437_v43, %v7332_v6  ;;  %v2446_v5 = vadd.f32 %v2438_v15, %v7334_v32  ;;  %v2447_v23 = vmul.f32 %v7341_v4, %v2408_v12  ;;  %v2448_v61 = vmul.f32 %v7346_v54, %v2408_v12 }
 0x13b   :  { %v2449_v46 = vmul.f32 %v7351_v22, %v2408_v12  ;;  %v2450_v26 = vmul.f32 %v7361_v37, %v2408_v12  ;;  %v2451_v21 = vmul.f32 %v7341_v4, %v2412_v42  ;;  %v2452_v57 = vmul.f32 %v7346_v54, %v2412_v42  ;;  %v7499_v4 = vld [vmem:[%s9675_s2 + $0x230] sm:$0xff]  ;;  %v7504_v54 = vld [vmem:[%s9675_s2 + $0x238] sm:$0xff] }
 0x13c   :  { %v2453_v41 = vmul.f32 %v7351_v22, %v2412_v42  ;;  %v2454_v6 = vmul.f32 %v7361_v37, %v2412_v42  ;;  %v2455_v32 = vadd.f32 %v2447_v23, %v2439_v14  ;;  %v2456_v30 = vadd.f32 %v2448_v61, %v2440_v16 }
 0x13d   :  { %v2457_v22 = vadd.f32 %v2449_v46, %v2441_v63  ;;  %v2458_v12 = vadd.f32 %v2450_v26, %v2442_v62  ;;  %v2459_v37 = vadd.f32 %v2451_v21, %v2443_v1  ;;  %v2460_v42 = vadd.f32 %v2452_v57, %v2444_v36 }
 0x13e   :  { %v2461_v25 = vadd.f32 %v2453_v41, %v2445_v35  ;;  %v2462_v3 = vadd.f32 %v2454_v6, %v2446_v5  ;;  %v2530_v13 = vrot.slane %v7368_v19, %v5061_v10  ;;  %v2533_v17 = vmul.f32 %v7487_v47, %v7374_v20 }
 0x13f   :  { %v2534_v29 = vmul.f32 %v7494_v0, %v7374_v20  ;;  %v2535_v2 = vmul.f32 %v7499_v4, %v7374_v20  ;;  %v2536_v11 = vmul.f32 %v7504_v54, %v7374_v20  ;;  %v2552_v60 = vrot.slane %v2505_v59, %v5061_v10 }
 0x140   :  { %v2537_v8 = vmul.f32 %v7487_v47, %v2530_v13  ;;  %v2538_v19 = vmul.f32 %v7494_v0, %v2530_v13  ;;  %v2539_v31 = vmul.f32 %v7499_v4, %v2530_v13  ;;  %v2540_v7 = vmul.f32 %v7504_v54, %v2530_v13 }
 0x141   :  { %v7533_v59 = vadd.f32 %v2533_v17, %v2423_v51  ;;  %v7535_v44 = vadd.f32 %v2534_v29, %v2424_v52  ;;  %v7537_v40 = vadd.f32 %v2535_v2, %v2425_v27  ;;  %v7539_v18 = vadd.f32 %v2536_v11, %v2426_v45 }
 0x142   :  { %v7541_v39 = vadd.f32 %v2537_v8, %v2427_v50  ;;  %v7543_v48 = vadd.f32 %v2538_v19, %v2428_v56  ;;  %v7545_v24 = vadd.f32 %v2539_v31, %v2429_v55  ;;  %v7547_v49 = vadd.f32 %v2540_v7, %v2430_v58  ;;  %v4854_v19 = vld.sshfl [vmem:[%s9673_s0 + $0x24] sm:$0x11 pattern:$0x75316420] }
 0x143   :  { %v2556_v51 = vrot.slane %v7371_v34, %v5061_v10  ;;  %v7554_v52 = vmul.f32 %v4849_v53, %v2552_v60  ;;  %v7556_v27 = vmul.f32 %v4850_v28, %v2552_v60  ;;  %v7558_v45 = vmul.f32 %v4851_v38, %v2552_v60 }
 0x144   :  { %v7560_v50 = vmul.f32 %v4852_v33, %v2552_v60  ;;  %v2575_v56 = vmul.f32 %v4849_v53, %v7374_v20  ;;  %v2576_v55 = vmul.f32 %v4850_v28, %v7374_v20  ;;  %v2577_v58 = vmul.f32 %v4851_v38, %v7374_v20 }
 0x145   :  { %v7565_v43 = vmul.f32 %v4849_v53, %v2556_v51  ;;  %v7567_v15 = vmul.f32 %v4850_v28, %v2556_v51  ;;  %v7569_v14 = vmul.f32 %v4851_v38, %v2556_v51  ;;  %v7571_v34 = vmul.f32 %v4852_v33, %v2556_v51 }
 0x146   :  { %v2567_v16 = vsub.f32 %v7533_v59, %v7554_v52  ;;  %v2568_v63 = vsub.f32 %v7535_v44, %v7556_v27  ;;  %v2569_v62 = vsub.f32 %v7537_v40, %v7558_v45  ;;  %v2570_v1 = vsub.f32 %v7539_v18, %v7560_v50  ;;  %v4863_v59 = vld [vmem:[%s9676_s3 + $0x250] sm:$0xff]  ;;  %v4864_v44 = vld [vmem:[%s9676_s3 + $0x258] sm:$0xff] }
 0x147   :  { %v2571_v36 = vsub.f32 %v7541_v39, %v7565_v43  ;;  %v2572_v35 = vsub.f32 %v7543_v48, %v7567_v15  ;;  %v2573_v5 = vsub.f32 %v7545_v24, %v7569_v14  ;;  %v2574_v23 = vsub.f32 %v7547_v49, %v7571_v34 }
 0x148   :  { %v2578_v61 = vmul.f32 %v4852_v33, %v7374_v20  ;;  %v2579_v46 = vmul.f32 %v4849_v53, %v2530_v13  ;;  %v2580_v26 = vmul.f32 %v4850_v28, %v2530_v13  ;;  %v2581_v21 = vmul.f32 %v4851_v38, %v2530_v13 }
 0x149   :  { %v2582_v57 = vmul.f32 %v4852_v33, %v2530_v13  ;;  %v2583_v41 = vadd.f32 %v2575_v56, %v2455_v32  ;;  %v2584_v6 = vadd.f32 %v2576_v55, %v2456_v30  ;;  %v2585_v17 = vadd.f32 %v2577_v58, %v2457_v22  ;;  %v4856_v32 = vld.sshfl [vmem:[%s9674_s1 + $0x24] sm:$0x11 pattern:$0x75316420] }
 0x14a   :  { %v2586_v29 = vadd.f32 %v2578_v61, %v2458_v12  ;;  %v2587_v2 = vadd.f32 %v2579_v46, %v2459_v37  ;;  %v2588_v11 = vadd.f32 %v2580_v26, %v2460_v42  ;;  %v2589_v8 = vadd.f32 %v2581_v21, %v2461_v25  ;;  %v4866_v42 = vld.sshfl [vmem:[%s9673_s0 + $0x26] sm:$0x11 pattern:$0x75316420]  ;;  %v7638_v61 = vld [vmem:[%s9675_s2 + $0x248] sm:$0xff]  ;;  %v7643_v46 = vld [vmem:[%s9675_s2 + $0x250] sm:$0xff] }
 0x14b   :  { %v2590_v31 = vadd.f32 %v2582_v57, %v2462_v3  ;;  %v2591_v7 = vmul.f32 %v7487_v47, %v2552_v60  ;;  %v2592_v20 = vmul.f32 %v7494_v0, %v2552_v60  ;;  %v2593_v53 = vmul.f32 %v7499_v4, %v2552_v60  ;;  %v7633_v58 = vld [vmem:[%s9675_s2 + $0x240] sm:$0xff] }
 0x14c   :  { %v2594_v30 = vmul.f32 %v7504_v54, %v2552_v60  ;;  %v2595_v22 = vmul.f32 %v7487_v47, %v2556_v51  ;;  %v2596_v12 = vmul.f32 %v7494_v0, %v2556_v51  ;;  %v2597_v37 = vmul.f32 %v7499_v4, %v2556_v51  ;;  %v7616_v47 = vld.sshfl [vmem:[%s9674_s1 + $0x26] sm:$0x11 pattern:$0x75316420] }
 0x14d   :  { %v2598_v25 = vmul.f32 %v7504_v54, %v2556_v51  ;;  %v7607_v3 = vadd.f32 %v2591_v7, %v2583_v41  ;;  %v7609_v13 = vadd.f32 %v2592_v20, %v2584_v6  ;;  %v7611_v28 = vadd.f32 %v2593_v53, %v2585_v17  ;;  %v7653_v17 = vld [vmem:[%s9675_s2 + $0x258] sm:$0xff]  ;;  %v4861_v7 = vld [vmem:[%s9676_s3 + $0x240] sm:$0xff]  ;;  %v4862_v20 = vld [vmem:[%s9676_s3 + $0x248] sm:$0xff] }
 0x14e   :  { %v7618_v0 = vadd.f32 %v2594_v30, %v2586_v29  ;;  %v7620_v4 = vadd.f32 %v2595_v22, %v2587_v2  ;;  %v7622_v60 = vadd.f32 %v2596_v12, %v2588_v11  ;;  %v7624_v38 = vadd.f32 %v2597_v37, %v2589_v8 }
 0x14f   :  { %v7626_v54 = vadd.f32 %v2598_v25, %v2590_v31  ;;  %v2617_v33 = vcombine.high %v4854_v19, %v4854_v19  ;;  %v2624_v51 = vrot.slane %v4854_v19, %v5059_v9  ;;  %v2642_v56 = vcombine.high %v4856_v32, %v4856_v32 }
 0x150   :  { %v2649_v55 = vrot.slane %v4856_v32, %v5059_v9  ;;  %v2761_v26 = vcombine.high %v4866_v42, %v4866_v42  ;;  %v2768_v21 = vrot.slane %v4866_v42, %v5059_v9  ;;  %v2786_v57 = vcombine.high %v7616_v47, %v7616_v47 }
 0x151   :  { %v2631_v41 = vrot.slane %v2617_v33, %v5059_v9  ;;  %v2656_v6 = vrot.slane %v2642_v56, %v5059_v9  ;;  %v2670_v29 = vrot.slane %v2624_v51, %v5061_v10  ;;  %v2793_v2 = vrot.slane %v7616_v47, %v5059_v9  ;;  %v4875_v47 = vld [vmem:[%s9676_s3 + $0x270] sm:$0xff] }
 0x152   :  { %v2696_v11 = vrot.slane %v2649_v55, %v5061_v10  ;;  %v7660_v8 = vrot.slane %v2761_v26, %v5059_v9  ;;  %v7663_v19 = vrot.slane %v2786_v57, %v5059_v9  ;;  %v7666_v31 = vrot.slane %v2768_v21, %v5061_v10 }
 0x153   :  { %v2674_v53 = vrot.slane %v2631_v41, %v5061_v10  ;;  %v2677_v32 = vmul.f32 %v7633_v58, %v2670_v29  ;;  %v2678_v30 = vmul.f32 %v7638_v61, %v2670_v29  ;;  %v2679_v22 = vmul.f32 %v7643_v46, %v2670_v29 }
 0x154   :  { %v2680_v12 = vmul.f32 %v7653_v17, %v2670_v29  ;;  %v2700_v37 = vrot.slane %v2656_v6, %v5061_v10  ;;  %v7680_v42 = vmul.f32 %v4861_v7, %v2696_v11  ;;  %v7682_v25 = vmul.f32 %v4862_v20, %v2696_v11 }
 0x155   :  { %v2681_v33 = vmul.f32 %v7633_v58, %v2674_v53  ;;  %v2682_v51 = vmul.f32 %v7638_v61, %v2674_v53  ;;  %v2683_v56 = vmul.f32 %v7643_v46, %v2674_v53  ;;  %v2684_v55 = vmul.f32 %v7653_v17, %v2674_v53 }
 0x156   :  { %v7691_v26 = vadd.f32 %v2677_v32, %v2567_v16  ;;  %v7696_v21 = vadd.f32 %v2678_v30, %v2568_v63  ;;  %v7701_v57 = vadd.f32 %v2679_v22, %v2569_v62  ;;  %v7706_v41 = vadd.f32 %v2680_v12, %v2570_v1 }
 0x157   :  { %v7717_v52 = vadd.f32 %v2681_v33, %v2571_v36  ;;  %v7722_v40 = vadd.f32 %v2682_v51, %v2572_v35  ;;  %v7727_v18 = vadd.f32 %v2683_v56, %v2573_v5  ;;  %v7732_v27 = vadd.f32 %v2684_v55, %v2574_v23 }
 0x158   :  { %v7734_v45 = vmul.f32 %v4863_v59, %v2696_v11  ;;  %v7736_v39 = vmul.f32 %v4864_v44, %v2696_v11  ;;  %v7738_v50 = vmul.f32 %v4861_v7, %v2700_v37  ;;  %v7740_v43 = vmul.f32 %v4862_v20, %v2700_v37 }
 0x159   :  { %v7742_v48 = vmul.f32 %v4863_v59, %v2700_v37  ;;  %v7744_v15 = vmul.f32 %v4864_v44, %v2700_v37  ;;  %v2711_v24 = vsub.f32 %v7691_v26, %v7680_v42  ;;  %v2712_v49 = vsub.f32 %v7696_v21, %v7682_v25  ;;  %v7786_v26 = vld [vmem:[%s9675_s2 + $0x268] sm:$0xff] }
 0x15a   :  { %v2713_v14 = vsub.f32 %v7701_v57, %v7734_v45  ;;  %v2714_v34 = vsub.f32 %v7706_v41, %v7736_v39  ;;  %v2715_v16 = vsub.f32 %v7717_v52, %v7738_v50  ;;  %v2716_v63 = vsub.f32 %v7722_v40, %v7740_v43  ;;  %v4873_v50 = vld [vmem:[%s9676_s3 + $0x260] sm:$0xff]  ;;  %v4874_v43 = vld [vmem:[%s9676_s3 + $0x268] sm:$0xff] }
 0x15b   :  { %v2717_v62 = vsub.f32 %v7727_v18, %v7742_v48  ;;  %v2718_v1 = vsub.f32 %v7732_v27, %v7744_v15  ;;  %v2719_v36 = vmul.f32 %v4861_v7, %v2670_v29  ;;  %v2720_v35 = vmul.f32 %v4862_v20, %v2670_v29 }
 0x15c   :  { %v2721_v5 = vmul.f32 %v4863_v59, %v2670_v29  ;;  %v2722_v23 = vmul.f32 %v4864_v44, %v2670_v29  ;;  %v2723_v6 = vmul.f32 %v4861_v7, %v2674_v53  ;;  %v2724_v32 = vmul.f32 %v4862_v20, %v2674_v53 }
 0x15d   :  { %v2725_v30 = vmul.f32 %v4863_v59, %v2674_v53  ;;  %v2726_v22 = vmul.f32 %v4864_v44, %v2674_v53  ;;  %v2727_v12 = vadd.f32 %v2719_v36, %v7607_v3  ;;  %v2728_v42 = vadd.f32 %v2720_v35, %v7609_v13 }
 0x15e   :  { %v2729_v25 = vadd.f32 %v2721_v5, %v7611_v28  ;;  %v2730_v33 = vadd.f32 %v2722_v23, %v7618_v0  ;;  %v2731_v51 = vadd.f32 %v2723_v6, %v7620_v4  ;;  %v2732_v56 = vadd.f32 %v2724_v32, %v7622_v60  ;;  %v7779_v4 = vld [vmem:[%s9675_s2 + $0x260] sm:$0xff]  ;;  %v4876_v32 = vld [vmem:[%s9676_s3 + $0x278] sm:$0xff] }
 0x15f   :  { %v2733_v55 = vadd.f32 %v2725_v30, %v7624_v38  ;;  %v2734_v29 = vadd.f32 %v2726_v22, %v7626_v54  ;;  %v2735_v7 = vmul.f32 %v7633_v58, %v2696_v11  ;;  %v2736_v20 = vmul.f32 %v7638_v61, %v2696_v11 }
 0x160   :  { %v2737_v3 = vmul.f32 %v7643_v46, %v2696_v11  ;;  %v2738_v13 = vmul.f32 %v7653_v17, %v2696_v11  ;;  %v2739_v28 = vmul.f32 %v7633_v58, %v2700_v37  ;;  %v2740_v0 = vmul.f32 %v7638_v61, %v2700_v37  ;;  %v7791_v58 = vld [vmem:[%s9675_s2 + $0x270] sm:$0xff]  ;;  %v7796_v61 = vld [vmem:[%s9675_s2 + $0x278] sm:$0xff] }
 0x161   :  { %v2741_v60 = vmul.f32 %v7643_v46, %v2700_v37  ;;  %v2742_v38 = vmul.f32 %v7653_v17, %v2700_v37  ;;  %v2743_v54 = vadd.f32 %v2735_v7, %v2727_v12  ;;  %v2744_v53 = vadd.f32 %v2736_v20, %v2728_v42 }
 0x162   :  { %v2745_v46 = vadd.f32 %v2737_v3, %v2729_v25  ;;  %v2746_v11 = vadd.f32 %v2738_v13, %v2730_v33  ;;  %v2747_v17 = vadd.f32 %v2739_v28, %v2731_v51  ;;  %v2748_v37 = vadd.f32 %v2740_v0, %v2732_v56 }
 0x163   :  { %v2749_v21 = vadd.f32 %v2741_v60, %v2733_v55  ;;  %v2750_v57 = vadd.f32 %v2742_v38, %v2734_v29  ;;  %v2818_v41 = vrot.slane %v7660_v8, %v5061_v10  ;;  %v2821_v59 = vmul.f32 %v7779_v4, %v7666_v31 }
 0x164   :  { %v2822_v44 = vmul.f32 %v7786_v26, %v7666_v31  ;;  %v2823_v52 = vmul.f32 %v7791_v58, %v7666_v31  ;;  %v2824_v40 = vmul.f32 %v7796_v61, %v7666_v31  ;;  %v2840_v18 = vrot.slane %v2793_v2, %v5061_v10 }
 0x165   :  { %v2825_v27 = vmul.f32 %v7779_v4, %v2818_v41  ;;  %v2826_v8 = vmul.f32 %v7786_v26, %v2818_v41  ;;  %v2827_v45 = vmul.f32 %v7791_v58, %v2818_v41  ;;  %v2828_v39 = vmul.f32 %v7796_v61, %v2818_v41 }
 0x166   :  { %v7825_v2 = vadd.f32 %v2821_v59, %v2711_v24  ;;  %v7827_v48 = vadd.f32 %v2822_v44, %v2712_v49  ;;  %v7829_v15 = vadd.f32 %v2823_v52, %v2713_v14  ;;  %v7831_v36 = vadd.f32 %v2824_v40, %v2714_v34 }
 0x167   :  { %v7833_v35 = vadd.f32 %v2825_v27, %v2715_v16  ;;  %v7835_v5 = vadd.f32 %v2826_v8, %v2716_v63  ;;  %v7837_v23 = vadd.f32 %v2827_v45, %v2717_v62  ;;  %v7839_v6 = vadd.f32 %v2828_v39, %v2718_v1  ;;  %v4878_v8 = vld.sshfl [vmem:[%s9673_s0 + $0x28] sm:$0x11 pattern:$0x75316420] }
 0x168   :  { %v2844_v24 = vrot.slane %v7663_v19, %v5061_v10  ;;  %v7846_v49 = vmul.f32 %v4873_v50, %v2840_v18  ;;  %v7848_v14 = vmul.f32 %v4874_v43, %v2840_v18  ;;  %v7850_v34 = vmul.f32 %v4875_v47, %v2840_v18 }
 0x169   :  { %v7852_v16 = vmul.f32 %v4876_v32, %v2840_v18  ;;  %v2863_v63 = vmul.f32 %v4873_v50, %v7666_v31  ;;  %v2864_v62 = vmul.f32 %v4874_v43, %v7666_v31  ;;  %v2865_v1 = vmul.f32 %v4875_v47, %v7666_v31 }
 0x16a   :  { %v7857_v30 = vmul.f32 %v4873_v50, %v2844_v24  ;;  %v7859_v22 = vmul.f32 %v4874_v43, %v2844_v24  ;;  %v7861_v12 = vmul.f32 %v4875_v47, %v2844_v24  ;;  %v7863_v19 = vmul.f32 %v4876_v32, %v2844_v24 }
 0x16b   :  { %v2855_v42 = vsub.f32 %v7825_v2, %v7846_v49  ;;  %v2856_v25 = vsub.f32 %v7827_v48, %v7848_v14  ;;  %v2857_v33 = vsub.f32 %v7829_v15, %v7850_v34  ;;  %v2858_v51 = vsub.f32 %v7831_v36, %v7852_v16  ;;  %v4887_v2 = vld [vmem:[%s9676_s3 + $0x290] sm:$0xff]  ;;  %v4888_v48 = vld [vmem:[%s9676_s3 + $0x298] sm:$0xff] }
 0x16c   :  { %v2859_v56 = vsub.f32 %v7833_v35, %v7857_v30  ;;  %v2860_v55 = vsub.f32 %v7835_v5, %v7859_v22  ;;  %v2861_v29 = vsub.f32 %v7837_v23, %v7861_v12  ;;  %v2862_v7 = vsub.f32 %v7839_v6, %v7863_v19 }
 0x16d   :  { %v2866_v20 = vmul.f32 %v4876_v32, %v7666_v31  ;;  %v2867_v3 = vmul.f32 %v4873_v50, %v2818_v41  ;;  %v2868_v13 = vmul.f32 %v4874_v43, %v2818_v41  ;;  %v2869_v28 = vmul.f32 %v4875_v47, %v2818_v41 }
 0x16e   :  { %v2870_v0 = vmul.f32 %v4876_v32, %v2818_v41  ;;  %v2871_v60 = vadd.f32 %v2863_v63, %v2743_v54  ;;  %v2872_v38 = vadd.f32 %v2864_v62, %v2744_v53  ;;  %v2873_v59 = vadd.f32 %v2865_v1, %v2745_v46  ;;  %v4880_v54 = vld.sshfl [vmem:[%s9674_s1 + $0x28] sm:$0x11 pattern:$0x75316420]  ;;  %v7925_v1 = vld [vmem:[%s9675_s2 + $0x280] sm:$0xff] }
 0x16f   :  { %v2874_v44 = vadd.f32 %v2866_v20, %v2746_v11  ;;  %v2875_v52 = vadd.f32 %v2867_v3, %v2747_v17  ;;  %v2876_v40 = vadd.f32 %v2868_v13, %v2748_v37  ;;  %v2877_v27 = vadd.f32 %v2869_v28, %v2749_v21  ;;  %v4890_v37 = vld.sshfl [vmem:[%s9673_s0 + $0x2a] sm:$0x11 pattern:$0x75316420]  ;;  %v7935_v3 = vld [vmem:[%s9675_s2 + $0x290] sm:$0xff] }
 0x170   :  { %v2878_v45 = vadd.f32 %v2870_v0, %v2750_v57  ;;  %v2879_v39 = vmul.f32 %v7779_v4, %v2840_v18  ;;  %v2880_v31 = vmul.f32 %v7786_v26, %v2840_v18  ;;  %v2881_v50 = vmul.f32 %v7791_v58, %v2840_v18  ;;  %v7930_v20 = vld [vmem:[%s9675_s2 + $0x288] sm:$0xff] }
 0x171   :  { %v2882_v53 = vmul.f32 %v7796_v61, %v2840_v18  ;;  %v2883_v46 = vmul.f32 %v7779_v4, %v2844_v24  ;;  %v2884_v11 = vmul.f32 %v7786_v26, %v2844_v24  ;;  %v2885_v17 = vmul.f32 %v7791_v58, %v2844_v24  ;;  %v7908_v4 = vld.sshfl [vmem:[%s9674_s1 + $0x2a] sm:$0x11 pattern:$0x75316420] }
 0x172   :  { %v2886_v21 = vmul.f32 %v7796_v61, %v2844_v24  ;;  %v7899_v57 = vadd.f32 %v2879_v39, %v2871_v60  ;;  %v7901_v41 = vadd.f32 %v2880_v31, %v2872_v38  ;;  %v7903_v43 = vadd.f32 %v2881_v50, %v2873_v59  ;;  %v7945_v59 = vld [vmem:[%s9675_s2 + $0x298] sm:$0xff]  ;;  %v4885_v39 = vld [vmem:[%s9676_s3 + $0x280] sm:$0xff]  ;;  %v4886_v31 = vld [vmem:[%s9676_s3 + $0x288] sm:$0xff] }
 0x173   :  { %v7910_v26 = vadd.f32 %v2882_v53, %v2874_v44  ;;  %v7912_v58 = vadd.f32 %v2883_v46, %v2875_v52  ;;  %v7914_v18 = vadd.f32 %v2884_v11, %v2876_v40  ;;  %v7916_v47 = vadd.f32 %v2885_v17, %v2877_v27 }
 0x174   :  { %v7918_v61 = vadd.f32 %v2886_v21, %v2878_v45  ;;  %v2905_v32 = vcombine.high %v4878_v8, %v4878_v8  ;;  %v2912_v24 = vrot.slane %v4878_v8, %v5059_v9  ;;  %v2930_v63 = vcombine.high %v4880_v54, %v4880_v54 }
 0x175   :  { %v2937_v62 = vrot.slane %v4880_v54, %v5059_v9  ;;  %v3049_v13 = vcombine.high %v4890_v37, %v4890_v37  ;;  %v3056_v28 = vrot.slane %v4890_v37, %v5059_v9  ;;  %v3074_v0 = vcombine.high %v7908_v4, %v7908_v4 }
 0x176   :  { %v2919_v60 = vrot.slane %v2905_v32, %v5059_v9  ;;  %v2944_v38 = vrot.slane %v2930_v63, %v5059_v9  ;;  %v2958_v44 = vrot.slane %v2912_v24, %v5061_v10  ;;  %v3081_v52 = vrot.slane %v7908_v4, %v5059_v9  ;;  %v4899_v4 = vld [vmem:[%s9676_s3 + $0x2b0] sm:$0xff] }
 0x177   :  { %v2984_v40 = vrot.slane %v2937_v62, %v5061_v10  ;;  %v7952_v27 = vrot.slane %v3049_v13, %v5059_v9  ;;  %v7955_v8 = vrot.slane %v3074_v0, %v5059_v9  ;;  %v7958_v45 = vrot.slane %v3056_v28, %v5061_v10 }
 0x178   :  { %v2962_v50 = vrot.slane %v2919_v60, %v5061_v10  ;;  %v2965_v54 = vmul.f32 %v7925_v1, %v2958_v44  ;;  %v2966_v53 = vmul.f32 %v7930_v20, %v2958_v44  ;;  %v2967_v46 = vmul.f32 %v7935_v3, %v2958_v44 }
 0x179   :  { %v2968_v11 = vmul.f32 %v7945_v59, %v2958_v44  ;;  %v2988_v17 = vrot.slane %v2944_v38, %v5061_v10  ;;  %v7972_v37 = vmul.f32 %v4885_v39, %v2984_v40  ;;  %v7974_v21 = vmul.f32 %v4886_v31, %v2984_v40 }
 0x17a   :  { %v2969_v32 = vmul.f32 %v7925_v1, %v2962_v50  ;;  %v2970_v24 = vmul.f32 %v7930_v20, %v2962_v50  ;;  %v2971_v63 = vmul.f32 %v7935_v3, %v2962_v50  ;;  %v2972_v62 = vmul.f32 %v7945_v59, %v2962_v50 }
 0x17b   :  { %v7983_v13 = vadd.f32 %v2965_v54, %v2855_v42  ;;  %v7988_v28 = vadd.f32 %v2966_v53, %v2856_v25  ;;  %v7993_v0 = vadd.f32 %v2967_v46, %v2857_v33  ;;  %v7998_v60 = vadd.f32 %v2968_v11, %v2858_v51 }
 0x17c   :  { %v8009_v49 = vadd.f32 %v2969_v32, %v2859_v56  ;;  %v8014_v15 = vadd.f32 %v2970_v24, %v2860_v55  ;;  %v8019_v36 = vadd.f32 %v2971_v63, %v2861_v29  ;;  %v8024_v14 = vadd.f32 %v2972_v62, %v2862_v7 }
 0x17d   :  { %v8026_v34 = vmul.f32 %v4887_v2, %v2984_v40  ;;  %v8028_v35 = vmul.f32 %v4888_v48, %v2984_v40  ;;  %v8030_v16 = vmul.f32 %v4885_v39, %v2988_v17  ;;  %v8032_v30 = vmul.f32 %v4886_v31, %v2988_v17 }
 0x17e   :  { %v8034_v5 = vmul.f32 %v4887_v2, %v2988_v17  ;;  %v8036_v22 = vmul.f32 %v4888_v48, %v2988_v17  ;;  %v2999_v23 = vsub.f32 %v7983_v13, %v7972_v37  ;;  %v3000_v6 = vsub.f32 %v7988_v28, %v7974_v21  ;;  %v8078_v13 = vld [vmem:[%s9675_s2 + $0x2a8] sm:$0xff] }
 0x17f   :  { %v3001_v12 = vsub.f32 %v7993_v0, %v8026_v34  ;;  %v3002_v19 = vsub.f32 %v7998_v60, %v8028_v35  ;;  %v3003_v42 = vsub.f32 %v8009_v49, %v8030_v16  ;;  %v3004_v25 = vsub.f32 %v8014_v15, %v8032_v30  ;;  %v4897_v16 = vld [vmem:[%s9676_s3 + $0x2a0] sm:$0xff]  ;;  %v4898_v30 = vld [vmem:[%s9676_s3 + $0x2a8] sm:$0xff] }
 0x180   :  { %v3005_v33 = vsub.f32 %v8019_v36, %v8034_v5  ;;  %v3006_v51 = vsub.f32 %v8024_v14, %v8036_v22  ;;  %v3007_v56 = vmul.f32 %v4885_v39, %v2958_v44  ;;  %v3008_v55 = vmul.f32 %v4886_v31, %v2958_v44 }
 0x181   :  { %v3009_v29 = vmul.f32 %v4887_v2, %v2958_v44  ;;  %v3010_v7 = vmul.f32 %v4888_v48, %v2958_v44  ;;  %v3011_v38 = vmul.f32 %v4885_v39, %v2962_v50  ;;  %v3012_v54 = vmul.f32 %v4886_v31, %v2962_v50 }
 0x182   :  { %v3013_v53 = vmul.f32 %v4887_v2, %v2962_v50  ;;  %v3014_v46 = vmul.f32 %v4888_v48, %v2962_v50  ;;  %v3015_v11 = vadd.f32 %v3007_v56, %v7899_v57  ;;  %v3016_v37 = vadd.f32 %v3008_v55, %v7901_v41 }
 0x183   :  { %v3017_v21 = vadd.f32 %v3009_v29, %v7903_v43  ;;  %v3018_v32 = vadd.f32 %v3010_v7, %v7910_v26  ;;  %v3019_v24 = vadd.f32 %v3011_v38, %v7912_v58  ;;  %v3020_v63 = vadd.f32 %v3012_v54, %v7914_v18  ;;  %v8071_v58 = vld [vmem:[%s9675_s2 + $0x2a0] sm:$0xff]  ;;  %v4900_v54 = vld [vmem:[%s9676_s3 + $0x2b8] sm:$0xff] }
 0x184   :  { %v3021_v62 = vadd.f32 %v3013_v53, %v7916_v47  ;;  %v3022_v44 = vadd.f32 %v3014_v46, %v7918_v61  ;;  %v3023_v39 = vmul.f32 %v7925_v1, %v2984_v40  ;;  %v3024_v31 = vmul.f32 %v7930_v20, %v2984_v40 }
 0x185   :  { %v3025_v57 = vmul.f32 %v7935_v3, %v2984_v40  ;;  %v3026_v41 = vmul.f32 %v7945_v59, %v2984_v40  ;;  %v3027_v43 = vmul.f32 %v7925_v1, %v2988_v17  ;;  %v3028_v26 = vmul.f32 %v7930_v20, %v2988_v17  ;;  %v8083_v1 = vld [vmem:[%s9675_s2 + $0x2b0] sm:$0xff]  ;;  %v8088_v20 = vld [vmem:[%s9675_s2 + $0x2b8] sm:$0xff] }
 0x186   :  { %v3029_v18 = vmul.f32 %v7935_v3, %v2988_v17  ;;  %v3030_v47 = vmul.f32 %v7945_v59, %v2988_v17  ;;  %v3031_v61 = vadd.f32 %v3023_v39, %v3015_v11  ;;  %v3032_v50 = vadd.f32 %v3024_v31, %v3016_v37 }
 0x187   :  { %v3033_v3 = vadd.f32 %v3025_v57, %v3017_v21  ;;  %v3034_v40 = vadd.f32 %v3026_v41, %v3018_v32  ;;  %v3035_v59 = vadd.f32 %v3027_v43, %v3019_v24  ;;  %v3036_v17 = vadd.f32 %v3028_v26, %v3020_v63 }
 0x188   :  { %v3037_v28 = vadd.f32 %v3029_v18, %v3021_v62  ;;  %v3038_v0 = vadd.f32 %v3030_v47, %v3022_v44  ;;  %v3106_v60 = vrot.slane %v7952_v27, %v5061_v10  ;;  %v3109_v2 = vmul.f32 %v8071_v58, %v7958_v45 }
 0x189   :  { %v3110_v48 = vmul.f32 %v8078_v13, %v7958_v45  ;;  %v3111_v49 = vmul.f32 %v8083_v1, %v7958_v45  ;;  %v3112_v15 = vmul.f32 %v8088_v20, %v7958_v45  ;;  %v3128_v36 = vrot.slane %v3081_v52, %v5061_v10 }
 0x18a   :  { %v3113_v14 = vmul.f32 %v8071_v58, %v3106_v60  ;;  %v3114_v27 = vmul.f32 %v8078_v13, %v3106_v60  ;;  %v3115_v34 = vmul.f32 %v8083_v1, %v3106_v60  ;;  %v3116_v35 = vmul.f32 %v8088_v20, %v3106_v60 }
 0x18b   :  { %v8117_v52 = vadd.f32 %v3109_v2, %v2999_v23  ;;  %v8119_v5 = vadd.f32 %v3110_v48, %v3000_v6  ;;  %v8121_v22 = vadd.f32 %v3111_v49, %v3001_v12  ;;  %v8123_v56 = vadd.f32 %v3112_v15, %v3002_v19 }
 0x18c   :  { %v8125_v55 = vadd.f32 %v3113_v14, %v3003_v42  ;;  %v8127_v29 = vadd.f32 %v3114_v27, %v3004_v25  ;;  %v8129_v7 = vadd.f32 %v3115_v34, %v3005_v33  ;;  %v8131_v38 = vadd.f32 %v3116_v35, %v3006_v51  ;;  %v4902_v27 = vld.sshfl [vmem:[%s9673_s0 + $0x2c] sm:$0x11 pattern:$0x75316420] }
 0x18d   :  { %v3132_v23 = vrot.slane %v7955_v8, %v5061_v10  ;;  %v8138_v6 = vmul.f32 %v4897_v16, %v3128_v36  ;;  %v8140_v12 = vmul.f32 %v4898_v30, %v3128_v36  ;;  %v8142_v19 = vmul.f32 %v4899_v4, %v3128_v36 }
 0x18e   :  { %v8144_v42 = vmul.f32 %v4900_v54, %v3128_v36  ;;  %v3151_v25 = vmul.f32 %v4897_v16, %v7958_v45  ;;  %v3152_v33 = vmul.f32 %v4898_v30, %v7958_v45  ;;  %v3153_v51 = vmul.f32 %v4899_v4, %v7958_v45 }
 0x18f   :  { %v8149_v53 = vmul.f32 %v4897_v16, %v3132_v23  ;;  %v8151_v46 = vmul.f32 %v4898_v30, %v3132_v23  ;;  %v8153_v11 = vmul.f32 %v4899_v4, %v3132_v23  ;;  %v8155_v8 = vmul.f32 %v4900_v54, %v3132_v23 }
 0x190   :  { %v3143_v37 = vsub.f32 %v8117_v52, %v8138_v6  ;;  %v3144_v21 = vsub.f32 %v8119_v5, %v8140_v12  ;;  %v3145_v32 = vsub.f32 %v8121_v22, %v8142_v19  ;;  %v3146_v24 = vsub.f32 %v8123_v56, %v8144_v42  ;;  %v4911_v52 = vld [vmem:[%s9676_s3 + $0x2d0] sm:$0xff]  ;;  %v4912_v5 = vld [vmem:[%s9676_s3 + $0x2d8] sm:$0xff] }
 0x191   :  { %v3147_v63 = vsub.f32 %v8125_v55, %v8149_v53  ;;  %v3148_v62 = vsub.f32 %v8127_v29, %v8151_v46  ;;  %v3149_v44 = vsub.f32 %v8129_v7, %v8153_v11  ;;  %v3150_v39 = vsub.f32 %v8131_v38, %v8155_v8 }
 0x192   :  { %v3154_v31 = vmul.f32 %v4900_v54, %v7958_v45  ;;  %v3155_v57 = vmul.f32 %v4897_v16, %v3106_v60  ;;  %v3156_v41 = vmul.f32 %v4898_v30, %v3106_v60  ;;  %v3157_v43 = vmul.f32 %v4899_v4, %v3106_v60 }
 0x193   :  { %v3158_v26 = vmul.f32 %v4900_v54, %v3106_v60  ;;  %v3159_v18 = vadd.f32 %v3151_v25, %v3031_v61  ;;  %v3160_v47 = vadd.f32 %v3152_v33, %v3032_v50  ;;  %v3161_v2 = vadd.f32 %v3153_v51, %v3033_v3  ;;  %v4904_v61 = vld.sshfl [vmem:[%s9674_s1 + $0x2c] sm:$0x11 pattern:$0x75316420]  ;;  %v8217_v51 = vld [vmem:[%s9675_s2 + $0x2c0] sm:$0xff] }
 0x194   :  { %v3162_v48 = vadd.f32 %v3154_v31, %v3034_v40  ;;  %v3163_v49 = vadd.f32 %v3155_v57, %v3035_v59  ;;  %v3164_v15 = vadd.f32 %v3156_v41, %v3036_v17  ;;  %v3165_v14 = vadd.f32 %v3157_v43, %v3037_v28  ;;  %v4914_v17 = vld.sshfl [vmem:[%s9673_s0 + $0x2e] sm:$0x11 pattern:$0x75316420]  ;;  %v8227_v57 = vld [vmem:[%s9675_s2 + $0x2d0] sm:$0xff] }
 0x195   :  { %v3166_v34 = vadd.f32 %v3158_v26, %v3038_v0  ;;  %v3167_v35 = vmul.f32 %v8071_v58, %v3128_v36  ;;  %v3168_v45 = vmul.f32 %v8078_v13, %v3128_v36  ;;  %v3169_v16 = vmul.f32 %v8083_v1, %v3128_v36  ;;  %v8222_v31 = vld [vmem:[%s9675_s2 + $0x2c8] sm:$0xff] }
 0x196   :  { %v3170_v50 = vmul.f32 %v8088_v20, %v3128_v36  ;;  %v3171_v3 = vmul.f32 %v8071_v58, %v3132_v23  ;;  %v3172_v40 = vmul.f32 %v8078_v13, %v3132_v23  ;;  %v3173_v59 = vmul.f32 %v8083_v1, %v3132_v23  ;;  %v8200_v58 = vld.sshfl [vmem:[%s9674_s1 + $0x2e] sm:$0x11 pattern:$0x75316420] }
 0x197   :  { %v3174_v28 = vmul.f32 %v8088_v20, %v3132_v23  ;;  %v8191_v0 = vadd.f32 %v3167_v35, %v3159_v18  ;;  %v8193_v60 = vadd.f32 %v3168_v45, %v3160_v47  ;;  %v8195_v30 = vadd.f32 %v3169_v16, %v3161_v2  ;;  %v8237_v2 = vld [vmem:[%s9675_s2 + $0x2d8] sm:$0xff]  ;;  %v4909_v35 = vld [vmem:[%s9676_s3 + $0x2c0] sm:$0xff]  ;;  %v4910_v45 = vld [vmem:[%s9676_s3 + $0x2c8] sm:$0xff] }
 0x198   :  { %v8202_v13 = vadd.f32 %v3170_v50, %v3162_v48  ;;  %v8204_v1 = vadd.f32 %v3171_v3, %v3163_v49  ;;  %v8206_v36 = vadd.f32 %v3172_v40, %v3164_v15  ;;  %v8208_v4 = vadd.f32 %v3173_v59, %v3165_v14 }
 0x199   :  { %v8210_v20 = vadd.f32 %v3174_v28, %v3166_v34  ;;  %v3193_v54 = vcombine.high %v4902_v27, %v4902_v27  ;;  %v3200_v23 = vrot.slane %v4902_v27, %v5059_v9  ;;  %v3218_v25 = vcombine.high %v4904_v61, %v4904_v61 }
 0x19a   :  { %v3225_v33 = vrot.slane %v4904_v61, %v5059_v9  ;;  %v3337_v41 = vcombine.high %v4914_v17, %v4914_v17  ;;  %v3344_v43 = vrot.slane %v4914_v17, %v5059_v9  ;;  %v3362_v26 = vcombine.high %v8200_v58, %v8200_v58 }
 0x19b   :  { %v3207_v18 = vrot.slane %v3193_v54, %v5059_v9  ;;  %v3232_v47 = vrot.slane %v3218_v25, %v5059_v9  ;;  %v3246_v48 = vrot.slane %v3200_v23, %v5061_v10  ;;  %v3369_v49 = vrot.slane %v8200_v58, %v5059_v9  ;;  %v4923_v58 = vld [vmem:[%s9676_s3 + $0x2f0] sm:$0xff] }
 0x19c   :  { %v3272_v15 = vrot.slane %v3225_v33, %v5061_v10  ;;  %v8244_v14 = vrot.slane %v3337_v41, %v5059_v9  ;;  %v8247_v27 = vrot.slane %v3362_v26, %v5059_v9  ;;  %v8250_v34 = vrot.slane %v3344_v43, %v5061_v10 }
 0x19d   :  { %v3250_v16 = vrot.slane %v3207_v18, %v5061_v10  ;;  %v3253_v61 = vmul.f32 %v8217_v51, %v3246_v48  ;;  %v3254_v50 = vmul.f32 %v8222_v31, %v3246_v48  ;;  %v3255_v3 = vmul.f32 %v8227_v57, %v3246_v48 }
 0x19e   :  { %v3256_v40 = vmul.f32 %v8237_v2, %v3246_v48  ;;  %v3276_v59 = vrot.slane %v3232_v47, %v5061_v10  ;;  %v8264_v17 = vmul.f32 %v4909_v35, %v3272_v15  ;;  %v8266_v28 = vmul.f32 %v4910_v45, %v3272_v15 }
 0x19f   :  { %v3257_v54 = vmul.f32 %v8217_v51, %v3250_v16  ;;  %v3258_v23 = vmul.f32 %v8222_v31, %v3250_v16  ;;  %v3259_v25 = vmul.f32 %v8227_v57, %v3250_v16  ;;  %v3260_v33 = vmul.f32 %v8237_v2, %v3250_v16 }
 0x1a0   :  { %v8275_v41 = vadd.f32 %v3253_v61, %v3143_v37  ;;  %v8280_v43 = vadd.f32 %v3254_v50, %v3144_v21  ;;  %v8285_v26 = vadd.f32 %v3255_v3, %v3145_v32  ;;  %v8290_v18 = vadd.f32 %v3256_v40, %v3146_v24 }
 0x1a1   :  { %v8301_v6 = vadd.f32 %v3257_v54, %v3147_v63  ;;  %v8306_v22 = vadd.f32 %v3258_v23, %v3148_v62  ;;  %v8311_v56 = vadd.f32 %v3259_v25, %v3149_v44  ;;  %v8316_v12 = vadd.f32 %v3260_v33, %v3150_v39 }
 0x1a2   :  { %v8318_v19 = vmul.f32 %v4911_v52, %v3272_v15  ;;  %v8320_v55 = vmul.f32 %v4912_v5, %v3272_v15  ;;  %v8322_v42 = vmul.f32 %v4909_v35, %v3276_v59  ;;  %v8324_v53 = vmul.f32 %v4910_v45, %v3276_v59 }
 0x1a3   :  { %v8326_v29 = vmul.f32 %v4911_v52, %v3276_v59  ;;  %v8328_v46 = vmul.f32 %v4912_v5, %v3276_v59  ;;  %v3287_v7 = vsub.f32 %v8275_v41, %v8264_v17  ;;  %v3288_v38 = vsub.f32 %v8280_v43, %v8266_v28  ;;  %v8370_v41 = vld [vmem:[%s9675_s2 + $0x2e8] sm:$0xff] }
 0x1a4   :  { %v3289_v11 = vsub.f32 %v8285_v26, %v8318_v19  ;;  %v3290_v8 = vsub.f32 %v8290_v18, %v8320_v55  ;;  %v3291_v37 = vsub.f32 %v8301_v6, %v8322_v42  ;;  %v3292_v21 = vsub.f32 %v8306_v22, %v8324_v53  ;;  %v4921_v42 = vld [vmem:[%s9676_s3 + $0x2e0] sm:$0xff]  ;;  %v4922_v53 = vld [vmem:[%s9676_s3 + $0x2e8] sm:$0xff] }
 0x1a5   :  { %v3293_v32 = vsub.f32 %v8311_v56, %v8326_v29  ;;  %v3294_v24 = vsub.f32 %v8316_v12, %v8328_v46  ;;  %v3295_v63 = vmul.f32 %v4909_v35, %v3246_v48  ;;  %v3296_v62 = vmul.f32 %v4910_v45, %v3246_v48 }
 0x1a6   :  { %v3297_v44 = vmul.f32 %v4911_v52, %v3246_v48  ;;  %v3298_v39 = vmul.f32 %v4912_v5, %v3246_v48  ;;  %v3299_v47 = vmul.f32 %v4909_v35, %v3250_v16  ;;  %v3300_v61 = vmul.f32 %v4910_v45, %v3250_v16 }
 0x1a7   :  { %v3301_v50 = vmul.f32 %v4911_v52, %v3250_v16  ;;  %v3302_v3 = vmul.f32 %v4912_v5, %v3250_v16  ;;  %v3303_v40 = vadd.f32 %v3295_v63, %v8191_v0  ;;  %v3304_v17 = vadd.f32 %v3296_v62, %v8193_v60 }
 0x1a8   :  { %v3305_v28 = vadd.f32 %v3297_v44, %v8195_v30  ;;  %v3306_v54 = vadd.f32 %v3298_v39, %v8202_v13  ;;  %v3307_v23 = vadd.f32 %v3299_v47, %v8204_v1  ;;  %v3308_v25 = vadd.f32 %v3300_v61, %v8206_v36  ;;  %v8363_v1 = vld [vmem:[%s9675_s2 + $0x2e0] sm:$0xff]  ;;  %v4924_v61 = vld [vmem:[%s9676_s3 + $0x2f8] sm:$0xff] }
 0x1a9   :  { %v3309_v33 = vadd.f32 %v3301_v50, %v8208_v4  ;;  %v3310_v48 = vadd.f32 %v3302_v3, %v8210_v20  ;;  %v3311_v35 = vmul.f32 %v8217_v51, %v3272_v15  ;;  %v3312_v45 = vmul.f32 %v8222_v31, %v3272_v15 }
 0x1aa   :  { %v3313_v0 = vmul.f32 %v8227_v57, %v3272_v15  ;;  %v3314_v60 = vmul.f32 %v8237_v2, %v3272_v15  ;;  %v3315_v30 = vmul.f32 %v8217_v51, %v3276_v59  ;;  %v3316_v13 = vmul.f32 %v8222_v31, %v3276_v59  ;;  %v8375_v51 = vld [vmem:[%s9675_s2 + $0x2f0] sm:$0xff]  ;;  %v8380_v31 = vld [vmem:[%s9675_s2 + $0x2f8] sm:$0xff] }
 0x1ab   :  { %v3317_v36 = vmul.f32 %v8227_v57, %v3276_v59  ;;  %v3318_v4 = vmul.f32 %v8237_v2, %v3276_v59  ;;  %v3319_v20 = vadd.f32 %v3311_v35, %v3303_v40  ;;  %v3320_v16 = vadd.f32 %v3312_v45, %v3304_v17 }
 0x1ac   :  { %v3321_v57 = vadd.f32 %v3313_v0, %v3305_v28  ;;  %v3322_v15 = vadd.f32 %v3314_v60, %v3306_v54  ;;  %v3323_v2 = vadd.f32 %v3315_v30, %v3307_v23  ;;  %v3324_v59 = vadd.f32 %v3316_v13, %v3308_v25 }
 0x1ad   :  { %v3325_v43 = vadd.f32 %v3317_v36, %v3309_v33  ;;  %v3326_v26 = vadd.f32 %v3318_v4, %v3310_v48  ;;  %v3394_v18 = vrot.slane %v8244_v14, %v5061_v10  ;;  %v3397_v52 = vmul.f32 %v8363_v1, %v8250_v34 }
 0x1ae   :  { %v3398_v5 = vmul.f32 %v8370_v41, %v8250_v34  ;;  %v3399_v6 = vmul.f32 %v8375_v51, %v8250_v34  ;;  %v3400_v22 = vmul.f32 %v8380_v31, %v8250_v34  ;;  %v3416_v56 = vrot.slane %v3369_v49, %v5061_v10 }
 0x1af   :  { %v3401_v12 = vmul.f32 %v8363_v1, %v3394_v18  ;;  %v3402_v14 = vmul.f32 %v8370_v41, %v3394_v18  ;;  %v3403_v19 = vmul.f32 %v8375_v51, %v3394_v18  ;;  %v3404_v55 = vmul.f32 %v8380_v31, %v3394_v18 }
 0x1b0   :  { %v8409_v49 = vadd.f32 %v3397_v52, %v3287_v7  ;;  %v8411_v29 = vadd.f32 %v3398_v5, %v3288_v38  ;;  %v8413_v46 = vadd.f32 %v3399_v6, %v3289_v11  ;;  %v8415_v63 = vadd.f32 %v3400_v22, %v3290_v8 }
 0x1b1   :  { %v8417_v62 = vadd.f32 %v3401_v12, %v3291_v37  ;;  %v8419_v44 = vadd.f32 %v3402_v14, %v3292_v21  ;;  %v8421_v39 = vadd.f32 %v3403_v19, %v3293_v32  ;;  %v8423_v47 = vadd.f32 %v3404_v55, %v3294_v24  ;;  %v4926_v14 = vld.sshfl [vmem:[%s9673_s0 + $0x30] sm:$0x11 pattern:$0x75316420] }
 0x1b2   :  { %v3420_v7 = vrot.slane %v8247_v27, %v5061_v10  ;;  %v8430_v38 = vmul.f32 %v4921_v42, %v3416_v56  ;;  %v8432_v11 = vmul.f32 %v4922_v53, %v3416_v56  ;;  %v8434_v8 = vmul.f32 %v4923_v58, %v3416_v56 }
 0x1b3   :  { %v8436_v37 = vmul.f32 %v4924_v61, %v3416_v56  ;;  %v3439_v21 = vmul.f32 %v4921_v42, %v8250_v34  ;;  %v3440_v32 = vmul.f32 %v4922_v53, %v8250_v34  ;;  %v3441_v24 = vmul.f32 %v4923_v58, %v8250_v34 }
 0x1b4   :  { %v8441_v50 = vmul.f32 %v4921_v42, %v3420_v7  ;;  %v8443_v3 = vmul.f32 %v4922_v53, %v3420_v7  ;;  %v8445_v40 = vmul.f32 %v4923_v58, %v3420_v7  ;;  %v8447_v27 = vmul.f32 %v4924_v61, %v3420_v7 }
 0x1b5   :  { %v3431_v17 = vsub.f32 %v8409_v49, %v8430_v38  ;;  %v3432_v28 = vsub.f32 %v8411_v29, %v8432_v11  ;;  %v3433_v54 = vsub.f32 %v8413_v46, %v8434_v8  ;;  %v3434_v23 = vsub.f32 %v8415_v63, %v8436_v37  ;;  %v4935_v49 = vld [vmem:[%s9676_s3 + $0x310] sm:$0xff]  ;;  %v4936_v29 = vld [vmem:[%s9676_s3 + $0x318] sm:$0xff] }
 0x1b6   :  { %v3435_v25 = vsub.f32 %v8417_v62, %v8441_v50  ;;  %v3436_v33 = vsub.f32 %v8419_v44, %v8443_v3  ;;  %v3437_v48 = vsub.f32 %v8421_v39, %v8445_v40  ;;  %v3438_v35 = vsub.f32 %v8423_v47, %v8447_v27 }
 0x1b7   :  { %v3442_v45 = vmul.f32 %v4924_v61, %v8250_v34  ;;  %v3443_v0 = vmul.f32 %v4921_v42, %v3394_v18  ;;  %v3444_v60 = vmul.f32 %v4922_v53, %v3394_v18  ;;  %v3445_v30 = vmul.f32 %v4923_v58, %v3394_v18 }
 0x1b8   :  { %v3446_v13 = vmul.f32 %v4924_v61, %v3394_v18  ;;  %v3447_v36 = vadd.f32 %v3439_v21, %v3319_v20  ;;  %v3448_v4 = vadd.f32 %v3440_v32, %v3320_v16  ;;  %v3449_v52 = vadd.f32 %v3441_v24, %v3321_v57  ;;  %v4928_v20 = vld.sshfl [vmem:[%s9674_s1 + $0x30] sm:$0x11 pattern:$0x75316420]  ;;  %v8509_v24 = vld [vmem:[%s9675_s2 + $0x300] sm:$0xff] }
 0x1b9   :  { %v3450_v5 = vadd.f32 %v3442_v45, %v3322_v15  ;;  %v3451_v6 = vadd.f32 %v3443_v0, %v3323_v2  ;;  %v3452_v22 = vadd.f32 %v3444_v60, %v3324_v59  ;;  %v3453_v12 = vadd.f32 %v3445_v30, %v3325_v43  ;;  %v4938_v59 = vld.sshfl [vmem:[%s9673_s0 + $0x32] sm:$0x11 pattern:$0x75316420]  ;;  %v8514_v45 = vld [vmem:[%s9675_s2 + $0x308] sm:$0xff] }
 0x1ba   :  { %v3454_v19 = vadd.f32 %v3446_v13, %v3326_v26  ;;  %v3455_v55 = vmul.f32 %v8363_v1, %v3416_v56  ;;  %v3456_v34 = vmul.f32 %v8370_v41, %v3416_v56  ;;  %v3457_v42 = vmul.f32 %v8375_v51, %v3416_v56  ;;  %v8519_v0 = vld [vmem:[%s9675_s2 + $0x310] sm:$0xff] }
 0x1bb   :  { %v3458_v16 = vmul.f32 %v8380_v31, %v3416_v56  ;;  %v3459_v57 = vmul.f32 %v8363_v1, %v3420_v7  ;;  %v3460_v15 = vmul.f32 %v8370_v41, %v3420_v7  ;;  %v3461_v2 = vmul.f32 %v8375_v51, %v3420_v7  ;;  %v8492_v1 = vld.sshfl [vmem:[%s9674_s1 + $0x32] sm:$0x11 pattern:$0x75316420] }
 0x1bc   :  { %v3462_v43 = vmul.f32 %v8380_v31, %v3420_v7  ;;  %v8483_v26 = vadd.f32 %v3455_v55, %v3447_v36  ;;  %v8485_v18 = vadd.f32 %v3456_v34, %v3448_v4  ;;  %v8487_v53 = vadd.f32 %v3457_v42, %v3449_v52  ;;  %v8529_v52 = vld [vmem:[%s9675_s2 + $0x318] sm:$0xff]  ;;  %v4933_v55 = vld [vmem:[%s9676_s3 + $0x300] sm:$0xff]  ;;  %v4934_v34 = vld [vmem:[%s9676_s3 + $0x308] sm:$0xff] }
 0x1bd   :  { %v8494_v41 = vadd.f32 %v3458_v16, %v3450_v5  ;;  %v8496_v51 = vadd.f32 %v3459_v57, %v3451_v6  ;;  %v8498_v56 = vadd.f32 %v3460_v15, %v3452_v22  ;;  %v8500_v58 = vadd.f32 %v3461_v2, %v3453_v12 }
 0x1be   :  { %v8502_v31 = vadd.f32 %v3462_v43, %v3454_v19  ;;  %v3481_v61 = vcombine.high %v4926_v14, %v4926_v14  ;;  %v3488_v7 = vrot.slane %v4926_v14, %v5059_v9  ;;  %v3506_v21 = vcombine.high %v4928_v20, %v4928_v20 }
 0x1bf   :  { %v3513_v32 = vrot.slane %v4928_v20, %v5059_v9  ;;  %v3625_v60 = vcombine.high %v4938_v59, %v4938_v59  ;;  %v3632_v30 = vrot.slane %v4938_v59, %v5059_v9  ;;  %v3650_v13 = vcombine.high %v8492_v1, %v8492_v1 }
 0x1c0   :  { %v3495_v36 = vrot.slane %v3481_v61, %v5059_v9  ;;  %v3520_v4 = vrot.slane %v3506_v21, %v5059_v9  ;;  %v3534_v5 = vrot.slane %v3488_v7, %v5061_v10  ;;  %v3657_v6 = vrot.slane %v8492_v1, %v5059_v9  ;;  %v4947_v1 = vld [vmem:[%s9676_s3 + $0x330] sm:$0xff] }
 0x1c1   :  { %v3560_v22 = vrot.slane %v3513_v32, %v5061_v10  ;;  %v8536_v12 = vrot.slane %v3625_v60, %v5059_v9  ;;  %v8539_v14 = vrot.slane %v3650_v13, %v5059_v9  ;;  %v8542_v19 = vrot.slane %v3632_v30, %v5061_v10 }
 0x1c2   :  { %v3538_v42 = vrot.slane %v3495_v36, %v5061_v10  ;;  %v3541_v20 = vmul.f32 %v8509_v24, %v3534_v5  ;;  %v3542_v16 = vmul.f32 %v8514_v45, %v3534_v5  ;;  %v3543_v57 = vmul.f32 %v8519_v0, %v3534_v5 }
 0x1c3   :  { %v3544_v15 = vmul.f32 %v8529_v52, %v3534_v5  ;;  %v3564_v2 = vrot.slane %v3520_v4, %v5061_v10  ;;  %v8556_v59 = vmul.f32 %v4933_v55, %v3560_v22  ;;  %v8558_v43 = vmul.f32 %v4934_v34, %v3560_v22 }
 0x1c4   :  { %v3545_v61 = vmul.f32 %v8509_v24, %v3538_v42  ;;  %v3546_v7 = vmul.f32 %v8514_v45, %v3538_v42  ;;  %v3547_v21 = vmul.f32 %v8519_v0, %v3538_v42  ;;  %v3548_v32 = vmul.f32 %v8529_v52, %v3538_v42 }
 0x1c5   :  { %v8567_v60 = vadd.f32 %v3541_v20, %v3431_v17  ;;  %v8572_v30 = vadd.f32 %v3542_v16, %v3432_v28  ;;  %v8577_v13 = vadd.f32 %v3543_v57, %v3433_v54  ;;  %v8582_v36 = vadd.f32 %v3544_v15, %v3434_v23 }
 0x1c6   :  { %v8593_v38 = vadd.f32 %v3545_v61, %v3435_v25  ;;  %v8598_v46 = vadd.f32 %v3546_v7, %v3436_v33  ;;  %v8603_v63 = vadd.f32 %v3547_v21, %v3437_v48  ;;  %v8608_v11 = vadd.f32 %v3548_v32, %v3438_v35 }
 0x1c7   :  { %v8610_v8 = vmul.f32 %v4935_v49, %v3560_v22  ;;  %v8612_v62 = vmul.f32 %v4936_v29, %v3560_v22  ;;  %v8614_v37 = vmul.f32 %v4933_v55, %v3564_v2  ;;  %v8616_v50 = vmul.f32 %v4934_v34, %v3564_v2 }
 0x1c8   :  { %v8618_v44 = vmul.f32 %v4935_v49, %v3564_v2  ;;  %v8620_v3 = vmul.f32 %v4936_v29, %v3564_v2  ;;  %v3575_v39 = vsub.f32 %v8567_v60, %v8556_v59  ;;  %v3576_v47 = vsub.f32 %v8572_v30, %v8558_v43  ;;  %v8662_v60 = vld [vmem:[%s9675_s2 + $0x328] sm:$0xff] }
 0x1c9   :  { %v3577_v40 = vsub.f32 %v8577_v13, %v8610_v8  ;;  %v3578_v27 = vsub.f32 %v8582_v36, %v8612_v62  ;;  %v3579_v17 = vsub.f32 %v8593_v38, %v8614_v37  ;;  %v3580_v28 = vsub.f32 %v8598_v46, %v8616_v50  ;;  %v4945_v37 = vld [vmem:[%s9676_s3 + $0x320] sm:$0xff]  ;;  %v4946_v50 = vld [vmem:[%s9676_s3 + $0x328] sm:$0xff] }
 0x1ca   :  { %v3581_v54 = vsub.f32 %v8603_v63, %v8618_v44  ;;  %v3582_v23 = vsub.f32 %v8608_v11, %v8620_v3  ;;  %v3583_v25 = vmul.f32 %v4933_v55, %v3534_v5  ;;  %v3584_v33 = vmul.f32 %v4934_v34, %v3534_v5 }
 0x1cb   :  { %v3585_v48 = vmul.f32 %v4935_v49, %v3534_v5  ;;  %v3586_v35 = vmul.f32 %v4936_v29, %v3534_v5  ;;  %v3587_v4 = vmul.f32 %v4933_v55, %v3538_v42  ;;  %v3588_v20 = vmul.f32 %v4934_v34, %v3538_v42 }
 0x1cc   :  { %v3589_v16 = vmul.f32 %v4935_v49, %v3538_v42  ;;  %v3590_v57 = vmul.f32 %v4936_v29, %v3538_v42  ;;  %v3591_v15 = vadd.f32 %v3583_v25, %v8483_v26  ;;  %v3592_v59 = vadd.f32 %v3584_v33, %v8485_v18 }
 0x1cd   :  { %v3593_v43 = vadd.f32 %v3585_v48, %v8487_v53  ;;  %v3594_v61 = vadd.f32 %v3586_v35, %v8494_v41  ;;  %v3595_v7 = vadd.f32 %v3587_v4, %v8496_v51  ;;  %v3596_v21 = vadd.f32 %v3588_v20, %v8498_v56  ;;  %v8655_v51 = vld [vmem:[%s9675_s2 + $0x320] sm:$0xff]  ;;  %v4948_v20 = vld [vmem:[%s9676_s3 + $0x338] sm:$0xff] }
 0x1ce   :  { %v3597_v32 = vadd.f32 %v3589_v16, %v8500_v58  ;;  %v3598_v5 = vadd.f32 %v3590_v57, %v8502_v31  ;;  %v3599_v55 = vmul.f32 %v8509_v24, %v3560_v22  ;;  %v3600_v34 = vmul.f32 %v8514_v45, %v3560_v22 }
 0x1cf   :  { %v3601_v26 = vmul.f32 %v8519_v0, %v3560_v22  ;;  %v3602_v18 = vmul.f32 %v8529_v52, %v3560_v22  ;;  %v3603_v53 = vmul.f32 %v8509_v24, %v3564_v2  ;;  %v3604_v41 = vmul.f32 %v8514_v45, %v3564_v2  ;;  %v8667_v24 = vld [vmem:[%s9675_s2 + $0x330] sm:$0xff]  ;;  %v8672_v45 = vld [vmem:[%s9675_s2 + $0x338] sm:$0xff] }
 0x1d0   :  { %v3605_v56 = vmul.f32 %v8519_v0, %v3564_v2  ;;  %v3606_v58 = vmul.f32 %v8529_v52, %v3564_v2  ;;  %v3607_v31 = vadd.f32 %v3599_v55, %v3591_v15  ;;  %v3608_v42 = vadd.f32 %v3600_v34, %v3592_v59 }
 0x1d1   :  { %v3609_v0 = vadd.f32 %v3601_v26, %v3593_v43  ;;  %v3610_v22 = vadd.f32 %v3602_v18, %v3594_v61  ;;  %v3611_v52 = vadd.f32 %v3603_v53, %v3595_v7  ;;  %v3612_v2 = vadd.f32 %v3604_v41, %v3596_v21 }
 0x1d2   :  { %v3613_v30 = vadd.f32 %v3605_v56, %v3597_v32  ;;  %v3614_v13 = vadd.f32 %v3606_v58, %v3598_v5  ;;  %v3682_v36 = vrot.slane %v8536_v12, %v5061_v10  ;;  %v3685_v49 = vmul.f32 %v8655_v51, %v8542_v19 }
 0x1d3   :  { %v3686_v29 = vmul.f32 %v8662_v60, %v8542_v19  ;;  %v3687_v38 = vmul.f32 %v8667_v24, %v8542_v19  ;;  %v3688_v46 = vmul.f32 %v8672_v45, %v8542_v19  ;;  %v3704_v63 = vrot.slane %v3657_v6, %v5061_v10 }
 0x1d4   :  { %v3689_v11 = vmul.f32 %v8655_v51, %v3682_v36  ;;  %v3690_v12 = vmul.f32 %v8662_v60, %v3682_v36  ;;  %v3691_v8 = vmul.f32 %v8667_v24, %v3682_v36  ;;  %v3692_v62 = vmul.f32 %v8672_v45, %v3682_v36 }
 0x1d5   :  { %v8701_v6 = vadd.f32 %v3685_v49, %v3575_v39  ;;  %v8703_v44 = vadd.f32 %v3686_v29, %v3576_v47  ;;  %v8705_v3 = vadd.f32 %v3687_v38, %v3577_v40  ;;  %v8707_v25 = vadd.f32 %v3688_v46, %v3578_v27 }
 0x1d6   :  { %v8709_v33 = vadd.f32 %v3689_v11, %v3579_v17  ;;  %v8711_v48 = vadd.f32 %v3690_v12, %v3580_v28  ;;  %v8713_v35 = vadd.f32 %v3691_v8, %v3581_v54  ;;  %v8715_v4 = vadd.f32 %v3692_v62, %v3582_v23  ;;  %v4950_v12 = vld.sshfl [vmem:[%s9673_s0 + $0x34] sm:$0x11 pattern:$0x75316420] }
 0x1d7   :  { %v3708_v39 = vrot.slane %v8539_v14, %v5061_v10  ;;  %v8722_v47 = vmul.f32 %v4945_v37, %v3704_v63  ;;  %v8724_v40 = vmul.f32 %v4946_v50, %v3704_v63  ;;  %v8726_v27 = vmul.f32 %v4947_v1, %v3704_v63 }
 0x1d8   :  { %v8728_v17 = vmul.f32 %v4948_v20, %v3704_v63  ;;  %v3727_v28 = vmul.f32 %v4945_v37, %v8542_v19  ;;  %v3728_v54 = vmul.f32 %v4946_v50, %v8542_v19  ;;  %v3729_v23 = vmul.f32 %v4947_v1, %v8542_v19 }
 0x1d9   :  { %v8733_v16 = vmul.f32 %v4945_v37, %v3708_v39  ;;  %v8735_v57 = vmul.f32 %v4946_v50, %v3708_v39  ;;  %v8737_v15 = vmul.f32 %v4947_v1, %v3708_v39  ;;  %v8739_v14 = vmul.f32 %v4948_v20, %v3708_v39 }
 0x1da   :  { %v3719_v59 = vsub.f32 %v8701_v6, %v8722_v47  ;;  %v3720_v43 = vsub.f32 %v8703_v44, %v8724_v40  ;;  %v3721_v61 = vsub.f32 %v8705_v3, %v8726_v27  ;;  %v3722_v7 = vsub.f32 %v8707_v25, %v8728_v17  ;;  %v4959_v6 = vld [vmem:[%s9676_s3 + $0x350] sm:$0xff]  ;;  %v4960_v44 = vld [vmem:[%s9676_s3 + $0x358] sm:$0xff] }
 0x1db   :  { %v3723_v21 = vsub.f32 %v8709_v33, %v8733_v16  ;;  %v3724_v32 = vsub.f32 %v8711_v48, %v8735_v57  ;;  %v3725_v5 = vsub.f32 %v8713_v35, %v8737_v15  ;;  %v3726_v55 = vsub.f32 %v8715_v4, %v8739_v14 }
 0x1dc   :  { %v3730_v34 = vmul.f32 %v4948_v20, %v8542_v19  ;;  %v3731_v26 = vmul.f32 %v4945_v37, %v3682_v36  ;;  %v3732_v18 = vmul.f32 %v4946_v50, %v3682_v36  ;;  %v3733_v53 = vmul.f32 %v4947_v1, %v3682_v36 }
 0x1dd   :  { %v3734_v41 = vmul.f32 %v4948_v20, %v3682_v36  ;;  %v3735_v56 = vadd.f32 %v3727_v28, %v3607_v31  ;;  %v3736_v58 = vadd.f32 %v3728_v54, %v3608_v42  ;;  %v3737_v49 = vadd.f32 %v3729_v23, %v3609_v0  ;;  %v4952_v31 = vld.sshfl [vmem:[%s9674_s1 + $0x34] sm:$0x11 pattern:$0x75316420]  ;;  %v8801_v23 = vld [vmem:[%s9675_s2 + $0x340] sm:$0xff] }
 0x1de   :  { %v3738_v29 = vadd.f32 %v3730_v34, %v3610_v22  ;;  %v3739_v38 = vadd.f32 %v3731_v26, %v3611_v52  ;;  %v3740_v46 = vadd.f32 %v3732_v18, %v3612_v2  ;;  %v3741_v11 = vadd.f32 %v3733_v53, %v3613_v30  ;;  %v4962_v2 = vld.sshfl [vmem:[%s9673_s0 + $0x36] sm:$0x11 pattern:$0x75316420]  ;;  %v8806_v34 = vld [vmem:[%s9675_s2 + $0x348] sm:$0xff] }
 0x1df   :  { %v3742_v8 = vadd.f32 %v3734_v41, %v3614_v13  ;;  %v3743_v62 = vmul.f32 %v8655_v51, %v3704_v63  ;;  %v3744_v19 = vmul.f32 %v8662_v60, %v3704_v63  ;;  %v3745_v37 = vmul.f32 %v8667_v24, %v3704_v63  ;;  %v8811_v26 = vld [vmem:[%s9675_s2 + $0x350] sm:$0xff] }
 0x1e0   :  { %v3746_v42 = vmul.f32 %v8672_v45, %v3704_v63  ;;  %v3747_v0 = vmul.f32 %v8655_v51, %v3708_v39  ;;  %v3748_v22 = vmul.f32 %v8662_v60, %v3708_v39  ;;  %v3749_v52 = vmul.f32 %v8667_v24, %v3708_v39  ;;  %v8784_v51 = vld.sshfl [vmem:[%s9674_s1 + $0x36] sm:$0x11 pattern:$0x75316420] }
 0x1e1   :  { %v3750_v30 = vmul.f32 %v8672_v45, %v3708_v39  ;;  %v8775_v13 = vadd.f32 %v3743_v62, %v3735_v56  ;;  %v8777_v36 = vadd.f32 %v3744_v19, %v3736_v58  ;;  %v8779_v50 = vadd.f32 %v3745_v37, %v3737_v49  ;;  %v8821_v49 = vld [vmem:[%s9675_s2 + $0x358] sm:$0xff]  ;;  %v4957_v62 = vld [vmem:[%s9676_s3 + $0x340] sm:$0xff]  ;;  %v4958_v19 = vld [vmem:[%s9676_s3 + $0x348] sm:$0xff] }
 0x1e2   :  { %v8786_v60 = vadd.f32 %v3746_v42, %v3738_v29  ;;  %v8788_v24 = vadd.f32 %v3747_v0, %v3739_v38  ;;  %v8790_v63 = vadd.f32 %v3748_v22, %v3740_v46  ;;  %v8792_v1 = vadd.f32 %v3749_v52, %v3741_v11 }
 0x1e3   :  { %v8794_v45 = vadd.f32 %v3750_v30, %v3742_v8  ;;  %v3769_v20 = vcombine.high %v4950_v12, %v4950_v12  ;;  %v3776_v39 = vrot.slane %v4950_v12, %v5059_v9  ;;  %v3794_v28 = vcombine.high %v4952_v31, %v4952_v31 }
 0x1e4   :  { %v3801_v54 = vrot.slane %v4952_v31, %v5059_v9  ;;  %v3913_v18 = vcombine.high %v4962_v2, %v4962_v2  ;;  %v3920_v53 = vrot.slane %v4962_v2, %v5059_v9  ;;  %v3938_v41 = vcombine.high %v8784_v51, %v8784_v51 }
 0x1e5   :  { %v3783_v56 = vrot.slane %v3769_v20, %v5059_v9  ;;  %v3808_v58 = vrot.slane %v3794_v28, %v5059_v9  ;;  %v3822_v29 = vrot.slane %v3776_v39, %v5061_v10  ;;  %v3945_v38 = vrot.slane %v8784_v51, %v5059_v9  ;;  %v4971_v51 = vld [vmem:[%s9676_s3 + $0x370] sm:$0xff] }
 0x1e6   :  { %v3848_v46 = vrot.slane %v3801_v54, %v5061_v10  ;;  %v8828_v11 = vrot.slane %v3913_v18, %v5059_v9  ;;  %v8831_v12 = vrot.slane %v3938_v41, %v5059_v9  ;;  %v8834_v8 = vrot.slane %v3920_v53, %v5061_v10 }
 0x1e7   :  { %v3826_v37 = vrot.slane %v3783_v56, %v5061_v10  ;;  %v3829_v31 = vmul.f32 %v8801_v23, %v3822_v29  ;;  %v3830_v42 = vmul.f32 %v8806_v34, %v3822_v29  ;;  %v3831_v0 = vmul.f32 %v8811_v26, %v3822_v29 }
 0x1e8   :  { %v3832_v22 = vmul.f32 %v8821_v49, %v3822_v29  ;;  %v3852_v52 = vrot.slane %v3808_v58, %v5061_v10  ;;  %v8848_v2 = vmul.f32 %v4957_v62, %v3848_v46  ;;  %v8850_v30 = vmul.f32 %v4958_v19, %v3848_v46 }
 0x1e9   :  { %v3833_v20 = vmul.f32 %v8801_v23, %v3826_v37  ;;  %v3834_v39 = vmul.f32 %v8806_v34, %v3826_v37  ;;  %v3835_v28 = vmul.f32 %v8811_v26, %v3826_v37  ;;  %v3836_v54 = vmul.f32 %v8821_v49, %v3826_v37 }
 0x1ea   :  { %v8859_v18 = vadd.f32 %v3829_v31, %v3719_v59  ;;  %v8864_v53 = vadd.f32 %v3830_v42, %v3720_v43  ;;  %v8869_v41 = vadd.f32 %v3831_v0, %v3721_v61  ;;  %v8874_v56 = vadd.f32 %v3832_v22, %v3722_v7 }
 0x1eb   :  { %v8885_v47 = vadd.f32 %v3833_v20, %v3723_v21  ;;  %v8890_v3 = vadd.f32 %v3834_v39, %v3724_v32  ;;  %v8895_v25 = vadd.f32 %v3835_v28, %v3725_v5  ;;  %v8900_v40 = vadd.f32 %v3836_v54, %v3726_v55 }
 0x1ec   :  { %v8902_v27 = vmul.f32 %v4959_v6, %v3848_v46  ;;  %v8904_v33 = vmul.f32 %v4960_v44, %v3848_v46  ;;  %v8906_v17 = vmul.f32 %v4957_v62, %v3852_v52  ;;  %v8908_v16 = vmul.f32 %v4958_v19, %v3852_v52 }
 0x1ed   :  { %v8910_v48 = vmul.f32 %v4959_v6, %v3852_v52  ;;  %v8912_v57 = vmul.f32 %v4960_v44, %v3852_v52  ;;  %v3863_v35 = vsub.f32 %v8859_v18, %v8848_v2  ;;  %v3864_v4 = vsub.f32 %v8864_v53, %v8850_v30  ;;  %v8954_v18 = vld [vmem:[%s9675_s2 + $0x368] sm:$0xff] }
 0x1ee   :  { %v3865_v15 = vsub.f32 %v8869_v41, %v8902_v27  ;;  %v3866_v14 = vsub.f32 %v8874_v56, %v8904_v33  ;;  %v3867_v59 = vsub.f32 %v8885_v47, %v8906_v17  ;;  %v3868_v43 = vsub.f32 %v8890_v3, %v8908_v16  ;;  %v4969_v17 = vld [vmem:[%s9676_s3 + $0x360] sm:$0xff]  ;;  %v4970_v16 = vld [vmem:[%s9676_s3 + $0x368] sm:$0xff] }
 0x1ef   :  { %v3869_v61 = vsub.f32 %v8895_v25, %v8910_v48  ;;  %v3870_v7 = vsub.f32 %v8900_v40, %v8912_v57  ;;  %v3871_v21 = vmul.f32 %v4957_v62, %v3822_v29  ;;  %v3872_v32 = vmul.f32 %v4958_v19, %v3822_v29 }
 0x1f0   :  { %v3873_v5 = vmul.f32 %v4959_v6, %v3822_v29  ;;  %v3874_v55 = vmul.f32 %v4960_v44, %v3822_v29  ;;  %v3875_v58 = vmul.f32 %v4957_v62, %v3826_v37  ;;  %v3876_v31 = vmul.f32 %v4958_v19, %v3826_v37 }
 0x1f1   :  { %v3877_v42 = vmul.f32 %v4959_v6, %v3826_v37  ;;  %v3878_v0 = vmul.f32 %v4960_v44, %v3826_v37  ;;  %v3879_v22 = vadd.f32 %v3871_v21, %v8775_v13  ;;  %v3880_v2 = vadd.f32 %v3872_v32, %v8777_v36 }
 0x1f2   :  { %v3881_v30 = vadd.f32 %v3873_v5, %v8779_v50  ;;  %v3882_v20 = vadd.f32 %v3874_v55, %v8786_v60  ;;  %v3883_v39 = vadd.f32 %v3875_v58, %v8788_v24  ;;  %v3884_v28 = vadd.f32 %v3876_v31, %v8790_v63  ;;  %v8947_v24 = vld [vmem:[%s9675_s2 + $0x360] sm:$0xff]  ;;  %v4972_v31 = vld [vmem:[%s9676_s3 + $0x378] sm:$0xff] }
 0x1f3   :  { %v3885_v54 = vadd.f32 %v3877_v42, %v8792_v1  ;;  %v3886_v29 = vadd.f32 %v3878_v0, %v8794_v45  ;;  %v3887_v62 = vmul.f32 %v8801_v23, %v3848_v46  ;;  %v3888_v19 = vmul.f32 %v8806_v34, %v3848_v46 }
 0x1f4   :  { %v3889_v13 = vmul.f32 %v8811_v26, %v3848_v46  ;;  %v3890_v36 = vmul.f32 %v8821_v49, %v3848_v46  ;;  %v3891_v50 = vmul.f32 %v8801_v23, %v3852_v52  ;;  %v3892_v60 = vmul.f32 %v8806_v34, %v3852_v52  ;;  %v8959_v23 = vld [vmem:[%s9675_s2 + $0x370] sm:$0xff]  ;;  %v8964_v34 = vld [vmem:[%s9675_s2 + $0x378] sm:$0xff] }
 0x1f5   :  { %v3893_v63 = vmul.f32 %v8811_v26, %v3852_v52  ;;  %v3894_v1 = vmul.f32 %v8821_v49, %v3852_v52  ;;  %v3895_v45 = vadd.f32 %v3887_v62, %v3879_v22  ;;  %v3896_v37 = vadd.f32 %v3888_v19, %v3880_v2 }
 0x1f6   :  { %v3897_v26 = vadd.f32 %v3889_v13, %v3881_v30  ;;  %v3898_v46 = vadd.f32 %v3890_v36, %v3882_v20  ;;  %v3899_v49 = vadd.f32 %v3891_v50, %v3883_v39  ;;  %v3900_v52 = vadd.f32 %v3892_v60, %v3884_v28 }
 0x1f7   :  { %v3901_v53 = vadd.f32 %v3893_v63, %v3885_v54  ;;  %v3902_v41 = vadd.f32 %v3894_v1, %v3886_v29  ;;  %v3970_v56 = vrot.slane %v8828_v11, %v5061_v10  ;;  %v3973_v6 = vmul.f32 %v8947_v24, %v8834_v8 }
 0x1f8   :  { %v3974_v44 = vmul.f32 %v8954_v18, %v8834_v8  ;;  %v3975_v47 = vmul.f32 %v8959_v23, %v8834_v8  ;;  %v3976_v3 = vmul.f32 %v8964_v34, %v8834_v8  ;;  %v3992_v25 = vrot.slane %v3945_v38, %v5061_v10 }
 0x1f9   :  { %v3977_v40 = vmul.f32 %v8947_v24, %v3970_v56  ;;  %v3978_v11 = vmul.f32 %v8954_v18, %v3970_v56  ;;  %v3979_v27 = vmul.f32 %v8959_v23, %v3970_v56  ;;  %v3980_v33 = vmul.f32 %v8964_v34, %v3970_v56 }
 0x1fa   :  { %v8993_v38 = vadd.f32 %v3973_v6, %v3863_v35  ;;  %v8995_v48 = vadd.f32 %v3974_v44, %v3864_v4  ;;  %v8997_v57 = vadd.f32 %v3975_v47, %v3865_v15  ;;  %v8999_v21 = vadd.f32 %v3976_v3, %v3866_v14 }
 0x1fb   :  { %v9001_v32 = vadd.f32 %v3977_v40, %v3867_v59  ;;  %v9003_v5 = vadd.f32 %v3978_v11, %v3868_v43  ;;  %v9005_v55 = vadd.f32 %v3979_v27, %v3869_v61  ;;  %v9007_v58 = vadd.f32 %v3980_v33, %v3870_v7  ;;  %v4974_v11 = vld.sshfl [vmem:[%s9673_s0 + $0x38] sm:$0x11 pattern:$0x75316420] }
 0x1fc   :  { %v3996_v35 = vrot.slane %v8831_v12, %v5061_v10  ;;  %v9014_v4 = vmul.f32 %v4969_v17, %v3992_v25  ;;  %v9016_v15 = vmul.f32 %v4970_v16, %v3992_v25  ;;  %v9018_v14 = vmul.f32 %v4971_v51, %v3992_v25 }
 0x1fd   :  { %v9020_v59 = vmul.f32 %v4972_v31, %v3992_v25  ;;  %v4015_v43 = vmul.f32 %v4969_v17, %v8834_v8  ;;  %v4016_v61 = vmul.f32 %v4970_v16, %v8834_v8  ;;  %v4017_v7 = vmul.f32 %v4971_v51, %v8834_v8 }
 0x1fe   :  { %v9025_v42 = vmul.f32 %v4969_v17, %v3996_v35  ;;  %v9027_v0 = vmul.f32 %v4970_v16, %v3996_v35  ;;  %v9029_v22 = vmul.f32 %v4971_v51, %v3996_v35  ;;  %v9031_v12 = vmul.f32 %v4972_v31, %v3996_v35 }
 0x1ff   :  { %v4007_v2 = vsub.f32 %v8993_v38, %v9014_v4  ;;  %v4008_v30 = vsub.f32 %v8995_v48, %v9016_v15  ;;  %v4009_v20 = vsub.f32 %v8997_v57, %v9018_v14  ;;  %v4010_v39 = vsub.f32 %v8999_v21, %v9020_v59  ;;  %v4983_v38 = vld [vmem:[%s9676_s3 + $0x390] sm:$0xff]  ;;  %v4984_v48 = vld [vmem:[%s9676_s3 + $0x398] sm:$0xff] }
 0x200   :  { %v4011_v28 = vsub.f32 %v9001_v32, %v9025_v42  ;;  %v4012_v54 = vsub.f32 %v9003_v5, %v9027_v0  ;;  %v4013_v29 = vsub.f32 %v9005_v55, %v9029_v22  ;;  %v4014_v62 = vsub.f32 %v9007_v58, %v9031_v12 }
 0x201   :  { %v4018_v19 = vmul.f32 %v4972_v31, %v8834_v8  ;;  %v4019_v13 = vmul.f32 %v4969_v17, %v3970_v56  ;;  %v4020_v36 = vmul.f32 %v4970_v16, %v3970_v56  ;;  %v4021_v50 = vmul.f32 %v4971_v51, %v3970_v56 }
 0x202   :  { %v4022_v60 = vmul.f32 %v4972_v31, %v3970_v56  ;;  %v4023_v63 = vadd.f32 %v4015_v43, %v3895_v45  ;;  %v4024_v1 = vadd.f32 %v4016_v61, %v3896_v37  ;;  %v4025_v6 = vadd.f32 %v4017_v7, %v3897_v26  ;;  %v4976_v45 = vld.sshfl [vmem:[%s9674_s1 + $0x38] sm:$0x11 pattern:$0x75316420]  ;;  %v9093_v7 = vld [vmem:[%s9675_s2 + $0x380] sm:$0xff] }
 0x203   :  { %v4026_v44 = vadd.f32 %v4018_v19, %v3898_v46  ;;  %v4027_v47 = vadd.f32 %v4019_v13, %v3899_v49  ;;  %v4028_v3 = vadd.f32 %v4020_v36, %v3900_v52  ;;  %v4029_v40 = vadd.f32 %v4021_v50, %v3901_v53  ;;  %v4986_v52 = vld.sshfl [vmem:[%s9673_s0 + $0x3a] sm:$0x11 pattern:$0x75316420]  ;;  %v9098_v19 = vld [vmem:[%s9675_s2 + $0x388] sm:$0xff]  ;;  %v9103_v13 = vld [vmem:[%s9675_s2 + $0x390] sm:$0xff] }
 0x204   :  { %v4030_v27 = vadd.f32 %v4022_v60, %v3902_v41  ;;  %v4031_v33 = vmul.f32 %v8947_v24, %v3992_v25  ;;  %v4032_v8 = vmul.f32 %v8954_v18, %v3992_v25  ;;  %v4033_v17 = vmul.f32 %v8959_v23, %v3992_v25 }
 0x205   :  { %v4034_v37 = vmul.f32 %v8964_v34, %v3992_v25  ;;  %v4035_v26 = vmul.f32 %v8947_v24, %v3996_v35  ;;  %v4036_v46 = vmul.f32 %v8954_v18, %v3996_v35  ;;  %v4037_v49 = vmul.f32 %v8959_v23, %v3996_v35  ;;  %v9076_v24 = vld.sshfl [vmem:[%s9674_s1 + $0x3a] sm:$0x11 pattern:$0x75316420] }
 0x206   :  { %v4038_v53 = vmul.f32 %v8964_v34, %v3996_v35  ;;  %v9067_v41 = vadd.f32 %v4031_v33, %v4023_v63  ;;  %v9069_v56 = vadd.f32 %v4032_v8, %v4024_v1  ;;  %v9071_v16 = vadd.f32 %v4033_v17, %v4025_v6  ;;  %v9113_v6 = vld [vmem:[%s9675_s2 + $0x398] sm:$0xff]  ;;  %v4981_v33 = vld [vmem:[%s9676_s3 + $0x380] sm:$0xff]  ;;  %v4982_v8 = vld [vmem:[%s9676_s3 + $0x388] sm:$0xff] }
 0x207   :  { %v9078_v18 = vadd.f32 %v4034_v37, %v4026_v44  ;;  %v9080_v23 = vadd.f32 %v4035_v26, %v4027_v47  ;;  %v9082_v25 = vadd.f32 %v4036_v46, %v4028_v3  ;;  %v9084_v51 = vadd.f32 %v4037_v49, %v4029_v40 }
 0x208   :  { %v9086_v34 = vadd.f32 %v4038_v53, %v4030_v27  ;;  %v4057_v31 = vcombine.high %v4974_v11, %v4974_v11  ;;  %v4064_v35 = vrot.slane %v4974_v11, %v5059_v9  ;;  %v4082_v43 = vcombine.high %v4976_v45, %v4976_v45 }
 0x209   :  { %v4089_v61 = vrot.slane %v4976_v45, %v5059_v9  ;;  %v4201_v36 = vcombine.high %v4986_v52, %v4986_v52  ;;  %v4208_v50 = vrot.slane %v4986_v52, %v5059_v9  ;;  %v4226_v60 = vcombine.high %v9076_v24, %v9076_v24 }
 0x20a   :  { %v4071_v63 = vrot.slane %v4057_v31, %v5059_v9  ;;  %v4096_v1 = vrot.slane %v4082_v43, %v5059_v9  ;;  %v4110_v44 = vrot.slane %v4064_v35, %v5061_v10  ;;  %v4233_v47 = vrot.slane %v9076_v24, %v5059_v9  ;;  %v4995_v24 = vld [vmem:[%s9676_s3 + $0x3b0] sm:$0xff] }
 0x20b   :  { %v4136_v3 = vrot.slane %v4089_v61, %v5061_v10  ;;  %v9120_v40 = vrot.slane %v4201_v36, %v5059_v9  ;;  %v9123_v11 = vrot.slane %v4226_v60, %v5059_v9  ;;  %v9126_v27 = vrot.slane %v4208_v50, %v5061_v10 }
 0x20c   :  { %v4114_v17 = vrot.slane %v4071_v63, %v5061_v10  ;;  %v4117_v45 = vmul.f32 %v9093_v7, %v4110_v44  ;;  %v4118_v37 = vmul.f32 %v9098_v19, %v4110_v44  ;;  %v4119_v26 = vmul.f32 %v9103_v13, %v4110_v44 }
 0x20d   :  { %v4120_v46 = vmul.f32 %v9113_v6, %v4110_v44  ;;  %v4140_v49 = vrot.slane %v4096_v1, %v5061_v10  ;;  %v9140_v52 = vmul.f32 %v4981_v33, %v4136_v3  ;;  %v9142_v53 = vmul.f32 %v4982_v8, %v4136_v3 }
 0x20e   :  { %v4121_v31 = vmul.f32 %v9093_v7, %v4114_v17  ;;  %v4122_v35 = vmul.f32 %v9098_v19, %v4114_v17  ;;  %v4123_v43 = vmul.f32 %v9103_v13, %v4114_v17  ;;  %v4124_v61 = vmul.f32 %v9113_v6, %v4114_v17 }
 0x20f   :  { %v9151_v36 = vadd.f32 %v4117_v45, %v4007_v2  ;;  %v9156_v50 = vadd.f32 %v4118_v37, %v4008_v30  ;;  %v9161_v60 = vadd.f32 %v4119_v26, %v4009_v20  ;;  %v9166_v63 = vadd.f32 %v4120_v46, %v4010_v39 }
 0x210   :  { %v9177_v4 = vadd.f32 %v4121_v31, %v4011_v28  ;;  %v9182_v57 = vadd.f32 %v4122_v35, %v4012_v54  ;;  %v9187_v21 = vadd.f32 %v4123_v43, %v4013_v29  ;;  %v9192_v15 = vadd.f32 %v4124_v61, %v4014_v62 }
 0x211   :  { %v9194_v14 = vmul.f32 %v4983_v38, %v4136_v3  ;;  %v9196_v32 = vmul.f32 %v4984_v48, %v4136_v3  ;;  %v9198_v59 = vmul.f32 %v4981_v33, %v4140_v49  ;;  %v9200_v42 = vmul.f32 %v4982_v8, %v4140_v49 }
 0x212   :  { %v9202_v5 = vmul.f32 %v4983_v38, %v4140_v49  ;;  %v9204_v0 = vmul.f32 %v4984_v48, %v4140_v49  ;;  %v4151_v55 = vsub.f32 %v9151_v36, %v9140_v52  ;;  %v4152_v58 = vsub.f32 %v9156_v50, %v9142_v53  ;;  %v9246_v36 = vld [vmem:[%s9675_s2 + $0x3a8] sm:$0xff] }
 0x213   :  { %v4153_v22 = vsub.f32 %v9161_v60, %v9194_v14  ;;  %v4154_v12 = vsub.f32 %v9166_v63, %v9196_v32  ;;  %v4155_v2 = vsub.f32 %v9177_v4, %v9198_v59  ;;  %v4156_v30 = vsub.f32 %v9182_v57, %v9200_v42  ;;  %v4993_v59 = vld [vmem:[%s9676_s3 + $0x3a0] sm:$0xff]  ;;  %v4994_v42 = vld [vmem:[%s9676_s3 + $0x3a8] sm:$0xff] }
 0x214   :  { %v4157_v20 = vsub.f32 %v9187_v21, %v9202_v5  ;;  %v4158_v39 = vsub.f32 %v9192_v15, %v9204_v0  ;;  %v4159_v28 = vmul.f32 %v4981_v33, %v4110_v44  ;;  %v4160_v54 = vmul.f32 %v4982_v8, %v4110_v44 }
 0x215   :  { %v4161_v29 = vmul.f32 %v4983_v38, %v4110_v44  ;;  %v4162_v62 = vmul.f32 %v4984_v48, %v4110_v44  ;;  %v4163_v1 = vmul.f32 %v4981_v33, %v4114_v17  ;;  %v4164_v45 = vmul.f32 %v4982_v8, %v4114_v17 }
 0x216   :  { %v4165_v37 = vmul.f32 %v4983_v38, %v4114_v17  ;;  %v4166_v26 = vmul.f32 %v4984_v48, %v4114_v17  ;;  %v4167_v46 = vadd.f32 %v4159_v28, %v9067_v41  ;;  %v4168_v52 = vadd.f32 %v4160_v54, %v9069_v56 }
 0x217   :  { %v4169_v53 = vadd.f32 %v4161_v29, %v9071_v16  ;;  %v4170_v31 = vadd.f32 %v4162_v62, %v9078_v18  ;;  %v4171_v35 = vadd.f32 %v4163_v1, %v9080_v23  ;;  %v4172_v43 = vadd.f32 %v4164_v45, %v9082_v25  ;;  %v9239_v23 = vld [vmem:[%s9675_s2 + $0x3a0] sm:$0xff]  ;;  %v4996_v45 = vld [vmem:[%s9676_s3 + $0x3b8] sm:$0xff] }
 0x218   :  { %v4173_v61 = vadd.f32 %v4165_v37, %v9084_v51  ;;  %v4174_v44 = vadd.f32 %v4166_v26, %v9086_v34  ;;  %v4175_v33 = vmul.f32 %v9093_v7, %v4136_v3  ;;  %v4176_v8 = vmul.f32 %v9098_v19, %v4136_v3 }
 0x219   :  { %v4177_v41 = vmul.f32 %v9103_v13, %v4136_v3  ;;  %v4178_v56 = vmul.f32 %v9113_v6, %v4136_v3  ;;  %v4179_v16 = vmul.f32 %v9093_v7, %v4140_v49  ;;  %v4180_v18 = vmul.f32 %v9098_v19, %v4140_v49  ;;  %v9251_v7 = vld [vmem:[%s9675_s2 + $0x3b0] sm:$0xff]  ;;  %v9256_v19 = vld [vmem:[%s9675_s2 + $0x3b8] sm:$0xff] }
 0x21a   :  { %v4181_v25 = vmul.f32 %v9103_v13, %v4140_v49  ;;  %v4182_v51 = vmul.f32 %v9113_v6, %v4140_v49  ;;  %v4183_v34 = vadd.f32 %v4175_v33, %v4167_v46  ;;  %v4184_v17 = vadd.f32 %v4176_v8, %v4168_v52 }
 0x21b   :  { %v4185_v13 = vadd.f32 %v4177_v41, %v4169_v53  ;;  %v4186_v3 = vadd.f32 %v4178_v56, %v4170_v31  ;;  %v4187_v6 = vadd.f32 %v4179_v16, %v4171_v35  ;;  %v4188_v49 = vadd.f32 %v4180_v18, %v4172_v43 }
 0x21c   :  { %v4189_v50 = vadd.f32 %v4181_v25, %v4173_v61  ;;  %v4190_v60 = vadd.f32 %v4182_v51, %v4174_v44  ;;  %v4258_v63 = vrot.slane %v9120_v40, %v5061_v10  ;;  %v4261_v38 = vmul.f32 %v9239_v23, %v9126_v27 }
 0x21d   :  { %v4262_v48 = vmul.f32 %v9246_v36, %v9126_v27  ;;  %v4263_v4 = vmul.f32 %v9251_v7, %v9126_v27  ;;  %v4264_v57 = vmul.f32 %v9256_v19, %v9126_v27  ;;  %v4280_v21 = vrot.slane %v4233_v47, %v5061_v10 }
 0x21e   :  { %v4265_v15 = vmul.f32 %v9239_v23, %v4258_v63  ;;  %v4266_v40 = vmul.f32 %v9246_v36, %v4258_v63  ;;  %v4267_v14 = vmul.f32 %v9251_v7, %v4258_v63  ;;  %v4268_v32 = vmul.f32 %v9256_v19, %v4258_v63 }
 0x21f   :  { %v9285_v47 = vadd.f32 %v4261_v38, %v4151_v55  ;;  %v9287_v5 = vadd.f32 %v4262_v48, %v4152_v58  ;;  %v9289_v0 = vadd.f32 %v4263_v4, %v4153_v22  ;;  %v9291_v28 = vadd.f32 %v4264_v57, %v4154_v12 }
 0x220   :  { %v9293_v54 = vadd.f32 %v4265_v15, %v4155_v2  ;;  %v9295_v29 = vadd.f32 %v4266_v40, %v4156_v30  ;;  %v9297_v62 = vadd.f32 %v4267_v14, %v4157_v20  ;;  %v9299_v1 = vadd.f32 %v4268_v32, %v4158_v39  ;;  %v4998_v40 = vld.sshfl [vmem:[%s9673_s0 + $0x3c] sm:$0x11 pattern:$0x75316420] }
 0x221   :  { %v4284_v55 = vrot.slane %v9123_v11, %v5061_v10  ;;  %v9306_v58 = vmul.f32 %v4993_v59, %v4280_v21  ;;  %v9308_v22 = vmul.f32 %v4994_v42, %v4280_v21  ;;  %v9310_v12 = vmul.f32 %v4995_v24, %v4280_v21 }
 0x222   :  { %v9312_v2 = vmul.f32 %v4996_v45, %v4280_v21  ;;  %v4303_v30 = vmul.f32 %v4993_v59, %v9126_v27  ;;  %v4304_v20 = vmul.f32 %v4994_v42, %v9126_v27  ;;  %v4305_v39 = vmul.f32 %v4995_v24, %v9126_v27 }
 0x223   :  { %v9317_v37 = vmul.f32 %v4993_v59, %v4284_v55  ;;  %v9319_v26 = vmul.f32 %v4994_v42, %v4284_v55  ;;  %v9321_v46 = vmul.f32 %v4995_v24, %v4284_v55  ;;  %v9323_v11 = vmul.f32 %v4996_v45, %v4284_v55 }
 0x224   :  { %v4295_v52 = vsub.f32 %v9285_v47, %v9306_v58  ;;  %v4296_v53 = vsub.f32 %v9287_v5, %v9308_v22  ;;  %v4297_v31 = vsub.f32 %v9289_v0, %v9310_v12  ;;  %v4298_v35 = vsub.f32 %v9291_v28, %v9312_v2  ;;  %v5007_v47 = vld [vmem:[%s9676_s3 + $0x3d0] sm:$0xff]  ;;  %v5008_v5 = vld [vmem:[%s9676_s3 + $0x3d8] sm:$0xff] }
 0x225   :  { %v4299_v43 = vsub.f32 %v9293_v54, %v9317_v37  ;;  %v4300_v61 = vsub.f32 %v9295_v29, %v9319_v26  ;;  %v4301_v44 = vsub.f32 %v9297_v62, %v9321_v46  ;;  %v4302_v33 = vsub.f32 %v9299_v1, %v9323_v11 }
 0x226   :  { %v4306_v8 = vmul.f32 %v4996_v45, %v9126_v27  ;;  %v4307_v41 = vmul.f32 %v4993_v59, %v4258_v63  ;;  %v4308_v56 = vmul.f32 %v4994_v42, %v4258_v63  ;;  %v4309_v16 = vmul.f32 %v4995_v24, %v4258_v63 }
 0x227   :  { %v4310_v18 = vmul.f32 %v4996_v45, %v4258_v63  ;;  %v4311_v25 = vadd.f32 %v4303_v30, %v4183_v34  ;;  %v4312_v51 = vadd.f32 %v4304_v20, %v4184_v17  ;;  %v4313_v38 = vadd.f32 %v4305_v39, %v4185_v13  ;;  %v5000_v34 = vld.sshfl [vmem:[%s9674_s1 + $0x3c] sm:$0x11 pattern:$0x75316420]  ;;  %v9385_v39 = vld [vmem:[%s9675_s2 + $0x3c0] sm:$0xff] }
 0x228   :  { %v4314_v48 = vadd.f32 %v4306_v8, %v4186_v3  ;;  %v4315_v4 = vadd.f32 %v4307_v41, %v4187_v6  ;;  %v4316_v57 = vadd.f32 %v4308_v56, %v4188_v49  ;;  %v4317_v15 = vadd.f32 %v4309_v16, %v4189_v50  ;;  %v5010_v49 = vld.sshfl [vmem:[%s9673_s0 + $0x3e] sm:$0x11 pattern:$0x75316420]  ;;  %v9390_v8 = vld [vmem:[%s9675_s2 + $0x3c8] sm:$0xff]  ;;  %v9395_v41 = vld [vmem:[%s9675_s2 + $0x3d0] sm:$0xff] }
 0x229   :  { %v4318_v14 = vadd.f32 %v4310_v18, %v4190_v60  ;;  %v4319_v32 = vmul.f32 %v9239_v23, %v4280_v21  ;;  %v4320_v27 = vmul.f32 %v9246_v36, %v4280_v21  ;;  %v4321_v59 = vmul.f32 %v9251_v7, %v4280_v21 }
 0x22a   :  { %v4322_v17 = vmul.f32 %v9256_v19, %v4280_v21  ;;  %v4323_v13 = vmul.f32 %v9239_v23, %v4284_v55  ;;  %v4324_v3 = vmul.f32 %v9246_v36, %v4284_v55  ;;  %v4325_v6 = vmul.f32 %v9251_v7, %v4284_v55  ;;  %v9368_v23 = vld.sshfl [vmem:[%s9674_s1 + $0x3e] sm:$0x11 pattern:$0x75316420] }
 0x22b   :  { %v4326_v50 = vmul.f32 %v9256_v19, %v4284_v55  ;;  %v9359_v60 = vadd.f32 %v4319_v32, %v4311_v25  ;;  %v9361_v63 = vadd.f32 %v4320_v27, %v4312_v51  ;;  %v9363_v42 = vadd.f32 %v4321_v59, %v4313_v38  ;;  %v9405_v38 = vld [vmem:[%s9675_s2 + $0x3d8] sm:$0xff]  ;;  %v5005_v32 = vld [vmem:[%s9676_s3 + $0x3c0] sm:$0xff]  ;;  %v5006_v27 = vld [vmem:[%s9676_s3 + $0x3c8] sm:$0xff] }
 0x22c   :  { %v9370_v36 = vadd.f32 %v4322_v17, %v4314_v48  ;;  %v9372_v7 = vadd.f32 %v4323_v13, %v4315_v4  ;;  %v9374_v21 = vadd.f32 %v4324_v3, %v4316_v57  ;;  %v9376_v24 = vadd.f32 %v4325_v6, %v4317_v15 }
 0x22d   :  { %v9378_v19 = vadd.f32 %v4326_v50, %v4318_v14  ;;  %v4345_v45 = vcombine.high %v4998_v40, %v4998_v40  ;;  %v4352_v55 = vrot.slane %v4998_v40, %v5059_v9  ;;  %v4370_v30 = vcombine.high %v5000_v34, %v5000_v34 }
 0x22e   :  { %v4377_v20 = vrot.slane %v5000_v34, %v5059_v9  ;;  %v4489_v56 = vcombine.high %v5010_v49, %v5010_v49  ;;  %v4496_v16 = vrot.slane %v5010_v49, %v5059_v9  ;;  %v4514_v18 = vcombine.high %v9368_v23, %v9368_v23 }
 0x22f   :  { %v4359_v25 = vrot.slane %v4345_v45, %v5059_v9  ;;  %v4384_v51 = vrot.slane %v4370_v30, %v5059_v9  ;;  %v4398_v48 = vrot.slane %v4352_v55, %v5061_v10  ;;  %v4521_v4 = vrot.slane %v9368_v23, %v5059_v9 }
 0x230   :  { %v4424_v57 = vrot.slane %v4377_v20, %v5061_v10  ;;  %v9412_v15 = vrot.slane %v4489_v56, %v5059_v9  ;;  %v9415_v40 = vrot.slane %v4514_v18, %v5059_v9  ;;  %v9418_v14 = vrot.slane %v4496_v16, %v5061_v10  ;;  %v5019_v9 = vld [vmem:[%s9676_s3 + $0x3f0] sm:$0xff] }
 0x231   :  { %v4402_v59 = vrot.slane %v4359_v25, %v5061_v10  ;;  %v4405_v34 = vmul.f32 %v9385_v39, %v4398_v48  ;;  %v4406_v17 = vmul.f32 %v9390_v8, %v4398_v48  ;;  %v4407_v13 = vmul.f32 %v9395_v41, %v4398_v48 }
 0x232   :  { %v4408_v3 = vmul.f32 %v9405_v38, %v4398_v48  ;;  %v4428_v6 = vrot.slane %v4384_v51, %v5061_v10  ;;  %v9432_v49 = vmul.f32 %v5005_v32, %v4424_v57  ;;  %v9434_v50 = vmul.f32 %v5006_v27, %v4424_v57 }
 0x233   :  { %v4409_v45 = vmul.f32 %v9385_v39, %v4402_v59  ;;  %v4410_v55 = vmul.f32 %v9390_v8, %v4402_v59  ;;  %v4411_v30 = vmul.f32 %v9395_v41, %v4402_v59  ;;  %v4412_v20 = vmul.f32 %v9405_v38, %v4402_v59 }
 0x234   :  { %v9443_v56 = vadd.f32 %v4405_v34, %v4295_v52  ;;  %v9448_v16 = vadd.f32 %v4406_v17, %v4296_v53  ;;  %v9453_v18 = vadd.f32 %v4407_v13, %v4297_v31  ;;  %v9458_v25 = vadd.f32 %v4408_v3, %v4298_v35 }
 0x235   :  { %v9469_v58 = vadd.f32 %v4409_v45, %v4299_v43  ;;  %v9474_v0 = vadd.f32 %v4410_v55, %v4300_v61  ;;  %v9479_v28 = vadd.f32 %v4411_v30, %v4301_v44  ;;  %v9484_v22 = vadd.f32 %v4412_v20, %v4302_v33 }
 0x236   :  { %v9486_v12 = vmul.f32 %v5007_v47, %v4424_v57  ;;  %v9488_v54 = vmul.f32 %v5008_v5, %v4424_v57  ;;  %v9490_v2 = vmul.f32 %v5005_v32, %v4428_v6  ;;  %v9492_v37 = vmul.f32 %v5006_v27, %v4428_v6 }
 0x237   :  { %v9494_v29 = vmul.f32 %v5007_v47, %v4428_v6  ;;  %v9496_v26 = vmul.f32 %v5008_v5, %v4428_v6  ;;  %v4439_v62 = vsub.f32 %v9443_v56, %v9432_v49  ;;  %v4440_v1 = vsub.f32 %v9448_v16, %v9434_v50 }
 0x238   :  { %v4441_v46 = vsub.f32 %v9453_v18, %v9486_v12  ;;  %v4442_v11 = vsub.f32 %v9458_v25, %v9488_v54  ;;  %v4443_v52 = vsub.f32 %v9469_v58, %v9490_v2  ;;  %v4444_v53 = vsub.f32 %v9474_v0, %v9492_v37  ;;  %v5017_v2 = vld [vmem:[%s9676_s3 + $0x3e0] sm:$0xff]  ;;  %v5018_v37 = vld [vmem:[%s9676_s3 + $0x3e8] sm:$0xff] }
 0x239   :  { %v4445_v31 = vsub.f32 %v9479_v28, %v9494_v29  ;;  %v4446_v35 = vsub.f32 %v9484_v22, %v9496_v26  ;;  %v4447_v43 = vmul.f32 %v5005_v32, %v4398_v48  ;;  %v4448_v61 = vmul.f32 %v5006_v27, %v4398_v48 }
 0x23a   :  { %v4449_v44 = vmul.f32 %v5007_v47, %v4398_v48  ;;  %v4450_v33 = vmul.f32 %v5008_v5, %v4398_v48  ;;  %v4451_v51 = vmul.f32 %v5005_v32, %v4402_v59  ;;  %v4452_v34 = vmul.f32 %v5006_v27, %v4402_v59 }
 0x23b   :  { %v4453_v17 = vmul.f32 %v5007_v47, %v4402_v59  ;;  %v4454_v13 = vmul.f32 %v5008_v5, %v4402_v59  ;;  %v4455_v3 = vadd.f32 %v4447_v43, %v9359_v60  ;;  %v4456_v49 = vadd.f32 %v4448_v61, %v9361_v63 }
 0x23c   :  { %v4457_v50 = vadd.f32 %v4449_v44, %v9363_v42  ;;  %v4458_v45 = vadd.f32 %v4450_v33, %v9370_v36  ;;  %v4459_v55 = vadd.f32 %v4451_v51, %v9372_v7  ;;  %v4460_v30 = vadd.f32 %v4452_v34, %v9374_v21  ;;  %v9531_v7 = vld [vmem:[%s9675_s2 + $0x3e0] sm:$0xff]  ;;  %v5020_v51 = vld [vmem:[%s9676_s3 + $0x3f8] sm:$0xff] }
 0x23d   :  { %v4461_v20 = vadd.f32 %v4453_v17, %v9376_v24  ;;  %v4462_v48 = vadd.f32 %v4454_v13, %v9378_v19  ;;  %v4463_v32 = vmul.f32 %v9385_v39, %v4424_v57  ;;  %v4464_v27 = vmul.f32 %v9390_v8, %v4424_v57 }
 0x23e   :  { %v4465_v60 = vmul.f32 %v9395_v41, %v4424_v57  ;;  %v4466_v63 = vmul.f32 %v9405_v38, %v4424_v57  ;;  %v4467_v42 = vmul.f32 %v9385_v39, %v4428_v6  ;;  %v4468_v36 = vmul.f32 %v9390_v8, %v4428_v6  ;;  %v9542_v57 = vld [vmem:[%s9675_s2 + $0x3e8] sm:$0xff]  ;;  %v9547_v39 = vld [vmem:[%s9675_s2 + $0x3f0] sm:$0xff]  ;;  %v9552_v8 = vld [vmem:[%s9675_s2 + $0x3f8] sm:$0xff] }
 0x23f   :  { %v4469_v21 = vmul.f32 %v9395_v41, %v4428_v6  ;;  %v4470_v24 = vmul.f32 %v9405_v38, %v4428_v6  ;;  %v9535_v19 = vadd.f32 %v4463_v32, %v4455_v3  ;;  %v9537_v59 = vadd.f32 %v4464_v27, %v4456_v49 }
 0x240   :  { %v4473_v41 = vadd.f32 %v4465_v60, %v4457_v50  ;;  %v9554_v38 = vadd.f32 %v4466_v63, %v4458_v45  ;;  %v9556_v6 = vadd.f32 %v4467_v42, %v4459_v55  ;;  %v9558_v56 = vadd.f32 %v4468_v36, %v4460_v30 }
 0x241   :  { %v9560_v16 = vadd.f32 %v4469_v21, %v4461_v20  ;;  %v9562_v18 = vadd.f32 %v4470_v24, %v4462_v48  ;;  %v4546_v25 = vrot.slane %v9412_v15, %v5061_v10  ;;  %v4549_v47 = vmul.f32 %v9531_v7, %v9418_v14 }
 0x242   :  { %v4550_v5 = vmul.f32 %v9542_v57, %v9418_v14  ;;  %v4551_v58 = vmul.f32 %v9547_v39, %v9418_v14  ;;  %v4552_v0 = vmul.f32 %v9552_v8, %v9418_v14  ;;  %v9578_v28 = vrot.slane %v4521_v4, %v5061_v10 }
 0x243   :  { %v4553_v15 = vmul.f32 %v9531_v7, %v4546_v25  ;;  %v4554_v22 = vmul.f32 %v9542_v57, %v4546_v25  ;;  %v4555_v12 = vmul.f32 %v9547_v39, %v4546_v25  ;;  %v4556_v54 = vmul.f32 %v9552_v8, %v4546_v25 }
 0x244   :  { %v4557_v23 = vadd.f32 %v4549_v47, %v4439_v62  ;;  %v4558_v4 = vadd.f32 %v4550_v5, %v4440_v1  ;;  %v4559_v29 = vadd.f32 %v4551_v58, %v4441_v46  ;;  %v4560_v26 = vadd.f32 %v4552_v0, %v4442_v11 }
 0x245   :  { %v4561_v43 = vadd.f32 %v4553_v15, %v4443_v52  ;;  %v4562_v61 = vadd.f32 %v4554_v22, %v4444_v53  ;;  %v4563_v44 = vadd.f32 %v4555_v12, %v4445_v31  ;;  %v4564_v33 = vadd.f32 %v4556_v54, %v4446_v35 }
 0x246   :  { %v4572_v34 = vrot.slane %v9415_v40, %v5061_v10  ;;  %v4575_v17 = vmul.f32 %v5017_v2, %v9578_v28  ;;  %v4576_v13 = vmul.f32 %v5018_v37, %v9578_v28  ;;  %v4577_v62 = vmul.f32 %v5019_v9, %v9578_v28 }
 0x247   :  { %v4578_v1 = vmul.f32 %v5020_v51, %v9578_v28  ;;  %v4591_v46 = vmul.f32 %v5017_v2, %v9418_v14  ;;  %v4592_v11 = vmul.f32 %v5018_v37, %v9418_v14  ;;  %v4593_v52 = vmul.f32 %v5019_v9, %v9418_v14 }
 0x248   :  { %v4579_v53 = vmul.f32 %v5017_v2, %v4572_v34  ;;  %v4580_v31 = vmul.f32 %v5018_v37, %v4572_v34  ;;  %v4581_v35 = vmul.f32 %v5019_v9, %v4572_v34  ;;  %v4582_v3 = vmul.f32 %v5020_v51, %v4572_v34 }
 0x249   :  { %v4583_v49 = vsub.f32 %v4557_v23, %v4575_v17  ;;  %v4584_v10 = vsub.f32 %v4558_v4, %v4576_v13  ;;  %v4585_v40 = vsub.f32 %v4559_v29, %v4577_v62  ;;  %v4586_v50 = vsub.f32 %v4560_v26, %v4578_v1 }
 0x24a   :  { %v4587_v45 = vsub.f32 %v4561_v43, %v4579_v53  ;;  %v4588_v55 = vsub.f32 %v4562_v61, %v4580_v31  ;;  %v4589_v30 = vsub.f32 %v4563_v44, %v4581_v35  ;;  %v4590_v20 = vsub.f32 %v4564_v33, %v4582_v3 }
 0x24b   :  { %v4594_v48 = vmul.f32 %v5020_v51, %v9418_v14  ;;  %v4595_v32 = vmul.f32 %v5017_v2, %v4546_v25  ;;  %v4596_v27 = vmul.f32 %v5018_v37, %v4546_v25  ;;  %v4597_v60 = vmul.f32 %v5019_v9, %v4546_v25  ;;  %4623 = vst [vmem:[%s9677_s4] sm:$0xff] %v4583_v49 }
 0x24c   :  { %4624 = vst [vmem:[%s9677_s4 + $0x8] sm:$0xff] %v4584_v10  ;;  %4625 = vst [vmem:[%s9677_s4 + $0x10] sm:$0xff] %v4585_v40  ;;  %v4598_v14 = vmul.f32 %v5020_v51, %v4546_v25  ;;  %v4599_v63 = vadd.f32 %v4591_v46, %v9535_v19  ;;  %v4600_v42 = vadd.f32 %v4592_v11, %v9537_v59 }
 0x24d   :  { %4626 = vst [vmem:[%s9677_s4 + $0x18] sm:$0xff] %v4586_v50  ;;  %v4601_v36 = vadd.f32 %v4593_v52, %v4473_v41  ;;  %4627 = vst [vmem:[%s9677_s4 + $0x20] sm:$0xff] %v4587_v45  ;;  %v4602_v21 = vadd.f32 %v4594_v48, %v9554_v38  ;;  %v4603_v24 = vadd.f32 %v4595_v32, %v9556_v6 }
 0x24e   :  { %4628 = vst [vmem:[%s9677_s4 + $0x28] sm:$0xff] %v4588_v55  ;;  %4629 = vst [vmem:[%s9677_s4 + $0x30] sm:$0xff] %v4589_v30  ;;  %v4604_v19 = vadd.f32 %v4596_v27, %v9558_v56  ;;  %v4605_v59 = vadd.f32 %v4597_v60, %v9560_v16  ;;  %v4606_v41 = vadd.f32 %v4598_v14, %v9562_v18 }
 0x24f   :  { %4630 = vst [vmem:[%s9677_s4 + $0x38] sm:$0xff] %v4590_v20  ;;  %v4607_v25 = vmul.f32 %v9531_v7, %v9578_v28  ;;  %v4608_v47 = vmul.f32 %v9542_v57, %v9578_v28  ;;  %v4609_v5 = vmul.f32 %v9547_v39, %v9578_v28  ;;  %v4610_v38 = vmul.f32 %v9552_v8, %v9578_v28 }
 0x250   :  { %v4611_v6 = vmul.f32 %v9531_v7, %v4572_v34  ;;  %v4612_v56 = vmul.f32 %v9542_v57, %v4572_v34  ;;  %v4613_v16 = vmul.f32 %v9547_v39, %v4572_v34  ;;  %v4614_v18 = vmul.f32 %v9552_v8, %v4572_v34 }
 0x251   :  { %v4615_v58 = vadd.f32 %v4607_v25, %v4599_v63  ;;  %v4616_v0 = vadd.f32 %v4608_v47, %v4600_v42  ;;  %v4617_v15 = vadd.f32 %v4609_v5, %v4601_v36  ;;  %v4618_v22 = vadd.f32 %v4610_v38, %v4602_v21 }
 0x252   :  { %v4619_v12 = vadd.f32 %v4611_v6, %v4603_v24  ;;  %v4620_v54 = vadd.f32 %v4612_v56, %v4604_v19  ;;  %v4621_v2 = vadd.f32 %v4613_v16, %v4605_v59  ;;  %v4622_v37 = vadd.f32 %v4614_v18, %v4606_v41 }
 0x253   :  { %4631 = vst [vmem:[%s9678_s5] sm:$0xff] %v4615_v58  ;;  %4632 = vst [vmem:[%s9678_s5 + $0x8] sm:$0xff] %v4616_v0 }
 0x254   :  { %4633 = vst [vmem:[%s9678_s5 + $0x10] sm:$0xff] %v4617_v15  ;;  %4634 = vst [vmem:[%s9678_s5 + $0x18] sm:$0xff] %v4618_v22 }
 0x255   :  { %4635 = vst [vmem:[%s9678_s5 + $0x20] sm:$0xff] %v4619_v12  ;;  %4636 = vst [vmem:[%s9678_s5 + $0x28] sm:$0xff] %v4620_v54 }
 0x256   :  { %4637 = vst [vmem:[%s9678_s5 + $0x30] sm:$0xff] %v4621_v2  ;;  %4638 = vst [vmem:[%s9678_s5 + $0x38] sm:$0xff] %v4622_v37 }

// kernel: fno2d_forward.12
= control target key start
LH: loop header
LB: loop body
LE: loop exit
PB: predicated region body
PF: predicated region fallthrough
CT: control target
= control target key end

     0   :  { %s1164_s15 = smov 0   ;;  %s1498_s0 = inlined_call_operand.vmem [shape: f32[512,32], index: 0, kind: input, shape index: {}]   ;;  %s1499_s1 = inlined_call_operand.vmem [shape: f32[512,32], index: 1, kind: input, shape index: {}]   ;;  %s1500_s2 = inlined_call_operand.vmem [shape: f32[32,32], index: 2, kind: input, shape index: {}]   ;;  %s1501_s3 = inlined_call_operand.vmem [shape: f32[1,32], index: 3, kind: input, shape index: {}]   ;;  %s1502_s4 = inlined_call_operand.vmem [shape: f32[512,32], index: 4, kind: output, shape index: {}]  }
   0x1 LB: > { %s913_s16 = sadd.s32 4294967295, %s1137_s15   ;;  %p917_p0 = scmp.ge.s32.totalorder %s1137_s15, 1  ;;  %s1137_s15 = sphi %s1164_s15, %s14_s15  }
   0x2   : > { %p174_p1 = scmp.lt.s32.totalorder %s1137_s15, 3 }
   0x4   : > { %p175_p2 = pnand %p917_p0, %p174_p1 }
   0x5   : > { %s918_s21 = sshll.u32 (!%p175_p2), %s913_s16, 5 }
   0x6   : > { %178 = sbr.rel (%p175_p2) target bundleno = 286 (0x11e), region = 36  ;;  %p206_p3 = scmp.lt.s32.totalorder (!%p175_p2), %s918_s21, 63 }
   0xb   : > { %v258_v0 = vld [vmem:[%s1500_s2 + $0x18] sm:$0xff]  ;;  %v257_v1 = vld [vmem:[%s1500_s2 + $0x10] sm:$0xff]  ;;  %v256_v2 = vld [vmem:[%s1500_s2 + $0x8] sm:$0xff]  ;;  %s1504_s21 = smov (!%p206_p3, %s918_s21), 63  ;;  %vm266_vm0 = vcmask 261120  }
   0xc   : > { %995 = vmatprep.subr.mxu0 %v258_v0  ;;  %1051 = vmatprep.subr.mxu1 %v258_v0  ;;  %v255_v3 = vld [vmem:[%s1500_s2] sm:$0xff]  ;;  %s1184_s26 = sshll.u32 %s1504_s21, 3 }
   0xd   : > { %996 = vmatpush3.msra.mxu0 %v258_v0  ;;  %1055 = vmatpush3.msra.mxu1 %v258_v0  ;;  %s1190_s29 = scalar_lea.vmem %s1498_s0, %s1184_s26  ;;  %s1260_s6 = scalar_lea.vmem %s1499_s1, %s1184_s26  ;;  %v1265_v36 = vld [vmem:[%s1501_s3] ss:$0 sm:$0xff] }
   0xe   : > { %997 = vmatprep.subr.mxu0 %v257_v1  ;;  %1052 = vmatprep.subr.mxu1 %v257_v1  ;;  %v223_v4 = vld [vmem:[%s1190_s29] sm:$0xff]  ;;  %v224_v6 = vld [vmem:[%s1190_s29 + $0x8] sm:$0xff]  ;;  %v225_v8 = vld [vmem:[%s1190_s29 + $0x10] sm:$0xff]  ;;  %s1332_s11 = scalar_lea.vmem %s1502_s4, %s1184_s26 }
   0xf   : > { %998 = vmatpush3.msra.mxu0 %v257_v1  ;;  %1056 = vmatpush3.msra.mxu1 %v257_v1  ;;  %v239_v5 = vld [vmem:[%s1190_s29 + $0x80] sm:$0xff]  ;;  %v240_v7 = vld [vmem:[%s1190_s29 + $0x88] sm:$0xff]  ;;  %v241_v9 = vld [vmem:[%s1190_s29 + $0x90] sm:$0xff] }
  0x10   : > { %999 = vmatprep.subr.mxu0 %v256_v2  ;;  %1053 = vmatprep.subr.mxu1 %v256_v2  ;;  %v226_v10 = vld [vmem:[%s1190_s29 + $0x18] sm:$0xff]  ;;  %v227_v12 = vld [vmem:[%s1190_s29 + $0x20] sm:$0xff]  ;;  %v228_v14 = vld [vmem:[%s1190_s29 + $0x28] sm:$0xff] }
  0x11   : > { %1000 = vmatpush3.msra.mxu0 %v256_v2  ;;  %1057 = vmatpush3.msra.mxu1 %v256_v2  ;;  %v242_v11 = vld [vmem:[%s1190_s29 + $0x98] sm:$0xff]  ;;  %v243_v13 = vld [vmem:[%s1190_s29 + $0xa0] sm:$0xff]  ;;  %v244_v15 = vld [vmem:[%s1190_s29 + $0xa8] sm:$0xff] }
  0x12   : > { %1001 = vmatprep.subr.mxu0 %v255_v3  ;;  %1054 = vmatprep.subr.mxu1 %v255_v3  ;;  %v229_v16 = vld [vmem:[%s1190_s29 + $0x30] sm:$0xff]  ;;  %v230_v18 = vld [vmem:[%s1190_s29 + $0x38] sm:$0xff]  ;;  %v231_v20 = vld [vmem:[%s1190_s29 + $0x40] sm:$0xff] }
  0x13   : > { %1002 = vmatpush3.msra.mxu0 %v255_v3  ;;  %1058 = vmatpush3.msra.mxu1 %v255_v3  ;;  %v245_v17 = vld [vmem:[%s1190_s29 + $0xb0] sm:$0xff]  ;;  %v246_v19 = vld [vmem:[%s1190_s29 + $0xb8] sm:$0xff]  ;;  %v247_v21 = vld [vmem:[%s1190_s29 + $0xc0] sm:$0xff] }
  0x14   : > { %1003 = vmatprep.mubr.msk.f32.mxu0 %vm266_vm0, %v223_v4  ;;  %1027 = vmatprep.mubr.msk.f32.mxu1 %vm266_vm0, %v239_v5  ;;  %v232_v22 = vld [vmem:[%s1190_s29 + $0x48] sm:$0xff]  ;;  %v233_v24 = vld [vmem:[%s1190_s29 + $0x50] sm:$0xff]  ;;  %v234_v26 = vld [vmem:[%s1190_s29 + $0x58] sm:$0xff] }
  0x15   : > { %1004 = vmatmul.mubr.msk.f32.vlgmr.msra.gmra.mxu0 %vm266_vm0, %v224_v6  ;;  %1028 = vmatmul.mubr.msk.f32.vlgmr.msra.gmra.mxu1 %vm266_vm0, %v240_v7  ;;  %v248_v23 = vld [vmem:[%s1190_s29 + $0xc8] sm:$0xff]  ;;  %v249_v25 = vld [vmem:[%s1190_s29 + $0xd0] sm:$0xff]  ;;  %v250_v27 = vld [vmem:[%s1190_s29 + $0xd8] sm:$0xff] }
  0x16   : > { %1006 = vmatprep.mubr.msk.f32.mxu0 %vm266_vm0, %v225_v8  ;;  %1030 = vmatprep.mubr.msk.f32.mxu1 %vm266_vm0, %v241_v9  ;;  %v235_v28 = vld [vmem:[%s1190_s29 + $0x60] sm:$0xff]  ;;  %v236_v30 = vld [vmem:[%s1190_s29 + $0x68] sm:$0xff]  ;;  %v237_v32 = vld [vmem:[%s1190_s29 + $0x70] sm:$0xff] }
  0x17   : > { %v251_v29 = vld [vmem:[%s1190_s29 + $0xe0] sm:$0xff]  ;;  %v252_v31 = vld [vmem:[%s1190_s29 + $0xe8] sm:$0xff]  ;;  %v253_v33 = vld [vmem:[%s1190_s29 + $0xf0] sm:$0xff] }
  0x18   : > { %v238_v34 = vld [vmem:[%s1190_s29 + $0x78] sm:$0xff]  ;;  %v589_v38 = vld [vmem:[%s1260_s6 + $0x8] sm:$0xff]  ;;  %v588_v48 = vld [vmem:[%s1260_s6] sm:$0xff] }
  0x19   : > { %1007 = vmatmul.mubr.msk.f32.gmra.mxu0 %vm266_vm0, %v226_v10  ;;  %1031 = vmatmul.mubr.msk.f32.gmra.mxu1 %vm266_vm0, %v242_v11  ;;  %v254_v35 = vld [vmem:[%s1190_s29 + $0xf8] sm:$0xff]  ;;  %v605_v40 = vld [vmem:[%s1260_s6 + $0x88] sm:$0xff]  ;;  %v604_v50 = vld [vmem:[%s1260_s6 + $0x80] sm:$0xff] }
  0x1a   : > { %1009 = vmatprep.mubr.msk.f32.mxu0 %vm266_vm0, %v227_v12  ;;  %1033 = vmatprep.mubr.msk.f32.mxu1 %vm266_vm0, %v243_v13  ;;  %v591_v58 = vld [vmem:[%s1260_s6 + $0x18] sm:$0xff]  ;;  %v590_v62 = vld [vmem:[%s1260_s6 + $0x10] sm:$0xff]  ;;  %v593_v12 = vld [vmem:[%s1260_s6 + $0x28] sm:$0xff] }
  0x1b   : > { %v607_v60 = vld [vmem:[%s1260_s6 + $0x98] sm:$0xff]  ;;  %v606_v2 = vld [vmem:[%s1260_s6 + $0x90] sm:$0xff] }
  0x1d   : > { %1010 = vmatmul.mubr.msk.f32.gmra.mxu0 %vm266_vm0, %v228_v14  ;;  %1034 = vmatmul.mubr.msk.f32.gmra.mxu1 %vm266_vm0, %v244_v15  ;;  %v609_v14 = vld [vmem:[%s1260_s6 + $0xa8] sm:$0xff] }
  0x1e   : > { %1012 = vmatprep.mubr.msk.f32.mxu0 %vm266_vm0, %v229_v16  ;;  %1036 = vmatprep.mubr.msk.f32.mxu1 %vm266_vm0, %v245_v17 }
  0x21   : > { %1013 = vmatmul.mubr.msk.f32.gmra.mxu0 %vm266_vm0, %v230_v18  ;;  %1037 = vmatmul.mubr.msk.f32.gmra.mxu1 %vm266_vm0, %v246_v19 }
  0x22   : > { %1015 = vmatprep.mubr.msk.f32.mxu0 %vm266_vm0, %v231_v20  ;;  %1039 = vmatprep.mubr.msk.f32.mxu1 %vm266_vm0, %v247_v21 }
  0x25   : > { %1016 = vmatmul.mubr.msk.f32.gmra.mxu0 %vm266_vm0, %v232_v22  ;;  %1040 = vmatmul.mubr.msk.f32.gmra.mxu1 %vm266_vm0, %v248_v23 }
  0x26   : > { %1018 = vmatprep.mubr.msk.f32.mxu0 %vm266_vm0, %v233_v24  ;;  %1042 = vmatprep.mubr.msk.f32.mxu1 %vm266_vm0, %v249_v25 }
  0x29   : > { %1019 = vmatmul.mubr.msk.f32.gmra.mxu0 %vm266_vm0, %v234_v26  ;;  %1043 = vmatmul.mubr.msk.f32.gmra.mxu1 %vm266_vm0, %v250_v27  ;;  %v592_v26 = vld [vmem:[%s1260_s6 + $0x20] sm:$0xff] }
  0x2a   : > { %1021 = vmatprep.mubr.msk.f32.mxu0 %vm266_vm0, %v235_v28  ;;  %1045 = vmatprep.mubr.msk.f32.mxu1 %vm266_vm0, %v251_v29  ;;  %v608_v27 = vld [vmem:[%s1260_s6 + $0xa0] sm:$0xff] }
  0x2d   : > { %1022 = vmatmul.mubr.msk.f32.gmra.mxu0 %vm266_vm0, %v236_v30  ;;  %1046 = vmatmul.mubr.msk.f32.gmra.mxu1 %vm266_vm0, %v252_v31  ;;  %v595_v31 = vld [vmem:[%s1260_s6 + $0x38] sm:$0xff] }
  0x2e   : > { %1024 = vmatprep.mubr.msk.f32.mxu0 %vm266_vm0, %v237_v32  ;;  %1048 = vmatprep.mubr.msk.f32.mxu1 %vm266_vm0, %v253_v33 }
  0x31   : > { %1025 = vmatmul.mubr.msk.f32.gmra.mxu0 %vm266_vm0, %v238_v34  ;;  %1049 = vmatmul.mubr.msk.f32.gmra.mxu1 %vm266_vm0, %v254_v35 }
  0xd5   : > { %v1005_v37 = vpop.f32.mrf.mxu0  ;;  %v1029_v39 = vpop.f32.mrf.mxu1 }
  0xd6   : > { %v435_v41 = vadd.f32 %v1005_v37, %v1265_v36  ;;  %v515_v42 = vadd.f32 %v1029_v39, %v1265_v36 }
  0xd7   : > { %v429_v43 = vpop.f32.mrf.mxu0  ;;  %v509_v44 = vpop.f32.mrf.mxu1 }
  0xd8   : > { %v621_v45 = vadd.f32 %v589_v38, %v435_v41  ;;  %v637_v46 = vadd.f32 %v605_v40, %v515_v42  ;;  %v430_v47 = vadd.f32 %v1265_v36, %v429_v43  ;;  %v510_v49 = vadd.f32 %v1265_v36, %v509_v44  ;;  %v611_v41 = vld [vmem:[%s1260_s6 + $0xb8] sm:$0xff] }
  0xd9   : > { %v1008_v51 = vpop.f32.mrf.mxu0  ;;  %v1032_v52 = vpop.f32.mrf.mxu1 }
  0xda   : > { %v686_v53 = vmul.f32 0.70710677, %v621_v45  ;;  %v702_v54 = vmul.f32 0.70710677, %v637_v46  ;;  %v620_v55 = vadd.f32 %v588_v48, %v430_v47  ;;  %v636_v56 = vadd.f32 %v604_v50, %v510_v49 }
  0xdb   : > { %v445_v57 = vadd.f32 %v1008_v51, %v1265_v36  ;;  %v525_v59 = vadd.f32 %v1032_v52, %v1265_v36  ;;  %v439_v61 = vpop.f32.mrf.mxu0  ;;  %v519_v63 = vpop.f32.mrf.mxu1  ;;  %v653_v18 = vmul.f32 0.5, %v621_v45  ;;  %v669_v33 = vmul.f32 0.5, %v637_v46  ;;  %v594_v46 = vld [vmem:[%s1260_s6 + $0x30] sm:$0xff] }
  0xdc   : > { %1067 = verf.f32 %v686_v53  ;;  %v440_v0 = vadd.f32 %v1265_v36, %v439_v61  ;;  %v520_v1 = vadd.f32 %v1265_v36, %v519_v63  ;;  %v685_v3 = vmul.f32 0.70710677, %v620_v55 }
  0xdd   : > { %1069 = verf.f32 %v702_v54  ;;  %v1011_v4 = vpop.f32.mrf.mxu0  ;;  %v1035_v5 = vpop.f32.mrf.mxu1  ;;  %v701_v6 = vmul.f32 0.70710677, %v636_v56  ;;  %v623_v7 = vadd.f32 %v591_v58, %v445_v57  ;;  %v639_v8 = vadd.f32 %v607_v60, %v525_v59  ;;  %v610_v58 = vld [vmem:[%s1260_s6 + $0xb0] sm:$0xff]  ;;  %v597_v60 = vld [vmem:[%s1260_s6 + $0x48] sm:$0xff] }
  0xde   : > { %v622_v9 = vadd.f32 %v590_v62, %v440_v0  ;;  %1071 = verf.f32 %v685_v3  ;;  %v1283_v10 = vadd.f32 %v606_v2, %v520_v1  ;;  %v455_v11 = vadd.f32 %v1011_v4, %v1265_v36 }
  0xdf   : > { %v535_v13 = vadd.f32 %v1035_v5, %v1265_v36  ;;  %v449_v15 = vpop.f32.mrf.mxu0  ;;  %v529_v16 = vpop.f32.mrf.mxu1  ;;  %1073 = verf.f32 %v701_v6  ;;  %v688_v17 = vmul.f32 0.70710677, %v623_v7  ;;  %v704_v19 = vmul.f32 0.70710677, %v639_v8 }
  0xe0   : > { %v687_v20 = vmul.f32 0.70710677, %v622_v9  ;;  %v703_v23 = vmul.f32 0.70710677, %v1283_v10  ;;  %v1290_v24 = vadd.f32 %v593_v12, %v455_v11  ;;  %v450_v28 = vadd.f32 %v1265_v36, %v449_v15 }
  0xe1   : > { %v1014_v21 = vpop.f32.mrf.mxu0  ;;  %v1038_v22 = vpop.f32.mrf.mxu1  ;;  %1075 = verf.f32 %v688_v17  ;;  %v1292_v25 = vadd.f32 %v609_v14, %v535_v13  ;;  %v530_v29 = vadd.f32 %v1265_v36, %v529_v16  ;;  %v652_v34 = vmul.f32 0.5, %v620_v55 }
  0xe2   : > { %1077 = verf.f32 %v704_v19  ;;  %v465_v30 = vadd.f32 %v1014_v21, %v1265_v36  ;;  %v690_v35 = vmul.f32 0.70710677, %v1290_v24  ;;  %v1302_v39 = vadd.f32 %v592_v26, %v450_v28  ;;  %v612_v28 = vld [vmem:[%s1260_s6 + $0xc0] sm:$0xff] }
  0xe3   : > { %v459_v32 = vpop.f32.mrf.mxu0  ;;  %1079 = verf.f32 %v687_v20  ;;  %v539_v37 = vpop.f32.mrf.mxu1  ;;  %v706_v38 = vmul.f32 0.70710677, %v1292_v25  ;;  %v1304_v40 = vadd.f32 %v608_v27, %v530_v29  ;;  %v545_v44 = vadd.f32 %v1038_v22, %v1265_v36  ;;  %v596_v27 = vld [vmem:[%s1260_s6 + $0x40] sm:$0xff] }
  0xe4   : > { %1081 = verf.f32 %v703_v23  ;;  %v1307_v43 = vadd.f32 %v595_v31, %v465_v30  ;;  %v460_v45 = vadd.f32 %v1265_v36, %v459_v32  ;;  %v668_v47 = vmul.f32 0.5, %v636_v56 }
  0xe5   : > { %v1017_v42 = vpop.f32.mrf.mxu0  ;;  %1083 = verf.f32 %v690_v35  ;;  %v1312_v48 = vmul.f32 0.5, %v623_v7  ;;  %v689_v49 = vmul.f32 0.70710677, %v1302_v39  ;;  %v1315_v50 = vmul.f32 0.5, %v639_v8  ;;  %v1041_v54 = vpop.f32.mrf.mxu1 }
  0xe6   : > { %1085 = verf.f32 %v706_v38  ;;  %v705_v51 = vmul.f32 0.70710677, %v1304_v40  ;;  %v692_v52 = vmul.f32 0.70710677, %v1307_v43  ;;  %v1319_v53 = vadd.f32 %v611_v41, %v545_v44 }
  0xe7   : > { %1087 = verf.f32 %v689_v49  ;;  %v1321_v57 = vadd.f32 %v594_v46, %v460_v45  ;;  %v540_v56 = vadd.f32 %v1265_v36, %v539_v37  ;;  %v475_v59 = vadd.f32 %v1017_v42, %v1265_v36  ;;  %v469_v61 = vpop.f32.mrf.mxu0  ;;  %v549_v11 = vpop.f32.mrf.mxu1 }
  0xe8   : > { %v654_v0 = vmul.f32 0.5, %v622_v9  ;;  %1089 = verf.f32 %v705_v51  ;;  %v708_v1 = vmul.f32 0.70710677, %v1319_v53  ;;  %v670_v3 = vmul.f32 0.5, %v1283_v10  ;;  %v613_v9 = vld [vmem:[%s1260_s6 + $0xc8] sm:$0xff]  ;;  %v599_v51 = vld [vmem:[%s1260_s6 + $0x58] sm:$0xff] }
  0xe9   : > { %v1068_v55 = vpop.eup %1067  ;;  %1091 = verf.f32 %v692_v52  ;;  %v691_v4 = vmul.f32 0.70710677, %v1321_v57  ;;  %v1336_v7 = vadd.f32 %v610_v58, %v540_v56  ;;  %v1338_v8 = vadd.f32 %v597_v60, %v475_v59  ;;  %v1020_v15 = vpop.f32.mrf.mxu0 }
  0xea   : > { %v1070_v62 = vpop.eup %1069  ;;  %v750_v63 = vadd.f32 1.0, %v1068_v55  ;;  %1093 = verf.f32 %v708_v1  ;;  %v555_v10 = vadd.f32 %v1041_v54, %v1265_v36  ;;  %v657_v17 = vmul.f32 0.5, %v1290_v24  ;;  %v1044_v31 = vpop.f32.mrf.mxu1 }
  0xeb   : > { %v766_v2 = vadd.f32 1.0, %v1070_v62  ;;  %v1072_v5 = vpop.eup %1071  ;;  %1095 = verf.f32 %v691_v4  ;;  %v707_v19 = vmul.f32 0.70710677, %v1336_v7  ;;  %v694_v22 = vmul.f32 0.70710677, %v1338_v8  ;;  %v479_v37 = vpop.f32.mrf.mxu0  ;;  %v615_v62 = vld [vmem:[%s1260_s6 + $0xd8] sm:$0xff] }
  0xec   : > { %v782_v6 = vmul.f32 %v750_v63, %v653_v18  ;;  %v1074_v12 = vpop.eup %1073  ;;  %v749_v14 = vadd.f32 1.0, %v1072_v5  ;;  %v673_v18 = vmul.f32 0.5, %v1292_v25  ;;  %v1350_v23 = vadd.f32 %v613_v9, %v555_v10  ;;  %v559_v58 = vpop.f32.mrf.mxu1  ;;  %v598_v4 = vld [vmem:[%s1260_s6 + $0x50] sm:$0xff] }
  0xed   : > { %v798_v13 = vmul.f32 %v766_v2, %v669_v33  ;;  %v765_v16 = vadd.f32 1.0, %v1074_v12  ;;  %v470_v26 = vadd.f32 %v1265_v36, %v469_v61  ;;  %1097 = verf.f32 %v707_v19  ;;  %v1023_v63 = vpop.f32.mrf.mxu0 }
  0xee   : > { %814 = vst.msk [vmem:[%s1332_s11 + $0x8] sm:$0xff] %vm266_vm0, %v782_v6  ;;  %v1076_v20 = vpop.eup %1075  ;;  %v781_v21 = vmul.f32 %v749_v14, %v652_v34  ;;  %v550_v25 = vadd.f32 %v1265_v36, %v549_v11  ;;  %v656_v34 = vmul.f32 0.5, %v1302_v39  ;;  %1099 = verf.f32 %v694_v22  ;;  %v1047_v10 = vpop.f32.mrf.mxu1 }
  0xef   : > { %830 = vst.msk [vmem:[%s1332_s11 + $0x88] sm:$0xff] %vm266_vm0, %v798_v13  ;;  %v1078_v29 = vpop.eup %1077  ;;  %v797_v24 = vmul.f32 %v765_v16, %v668_v47  ;;  %v752_v30 = vadd.f32 1.0, %v1076_v20  ;;  %v710_v35 = vmul.f32 0.70710677, %v1350_v23  ;;  %v1363_v44 = vadd.f32 %v596_v27, %v470_v26  ;;  %v614_v20 = vld [vmem:[%s1260_s6 + $0xd0] sm:$0xff] }
  0xf0   : > { %v1080_v32 = vpop.eup %1079  ;;  %813 = vst.msk [vmem:[%s1332_s11] sm:$0xff] %vm266_vm0, %v781_v21  ;;  %v768_v33 = vadd.f32 1.0, %v1078_v29  ;;  %v1365_v45 = vadd.f32 %v612_v28, %v550_v25  ;;  %v485_v49 = vadd.f32 %v1020_v15, %v1265_v36  ;;  %v672_v55 = vmul.f32 0.5, %v1304_v40  ;;  %v489_v21 = vpop.f32.mrf.mxu0 }
  0xf1   : > { %v1082_v38 = vpop.eup %1081  ;;  %829 = vst.msk [vmem:[%s1332_s11 + $0x80] sm:$0xff] %vm266_vm0, %v797_v24  ;;  %v784_v41 = vmul.f32 %v752_v30, %v1312_v48  ;;  %v751_v42 = vadd.f32 1.0, %v1080_v32  ;;  %1101 = verf.f32 %v710_v35  ;;  %v693_v56 = vmul.f32 0.70710677, %v1363_v44  ;;  %v600_v35 = vld [vmem:[%s1260_s6 + $0x60] sm:$0xff] }
  0xf2   : > { %v1084_v46 = vpop.eup %1083  ;;  %v800_v47 = vmul.f32 %v768_v33, %v1315_v50  ;;  %v767_v39 = vadd.f32 1.0, %v1082_v38  ;;  %v659_v60 = vmul.f32 0.5, %v1307_v43  ;;  %v709_v61 = vmul.f32 0.70710677, %v1365_v45  ;;  %v601_v33 = vld [vmem:[%s1260_s6 + $0x68] sm:$0xff] }
  0xf3   : > { %v1086_v52 = vpop.eup %1085  ;;  %816 = vst.msk [vmem:[%s1332_s11 + $0x18] sm:$0xff] %vm266_vm0, %v784_v41  ;;  %v783_v48 = vmul.f32 %v751_v42, %v654_v0  ;;  %v754_v54 = vadd.f32 1.0, %v1084_v46  ;;  %1103 = verf.f32 %v693_v56  ;;  %v1381_v1 = vadd.f32 %v599_v51, %v485_v49  ;;  %v1026_v46 = vpop.f32.mrf.mxu0 }
  0xf4   : > { %832 = vst.msk [vmem:[%s1332_s11 + $0x98] sm:$0xff] %vm266_vm0, %v800_v47  ;;  %v799_v50 = vmul.f32 %v767_v39, %v670_v3  ;;  %v770_v59 = vadd.f32 1.0, %v1086_v52  ;;  %v1088_v0 = vpop.eup %1087  ;;  %v565_v2 = vadd.f32 %v1044_v31, %v1265_v36  ;;  %1105 = verf.f32 %v709_v61 }
  0xf5   : > { %815 = vst.msk [vmem:[%s1332_s11 + $0x10] sm:$0xff] %vm266_vm0, %v783_v48  ;;  %v786_v40 = vmul.f32 %v754_v54, %v657_v17  ;;  %v1090_v3 = vpop.eup %1089  ;;  %v753_v5 = vadd.f32 1.0, %v1088_v0  ;;  %v480_v6 = vadd.f32 %v1265_v36, %v479_v37  ;;  %v675_v12 = vmul.f32 0.5, %v1319_v53  ;;  %v569_v37 = vpop.f32.mrf.mxu1 }
  0xf6   : > { %831 = vst.msk [vmem:[%s1332_s11 + $0x90] sm:$0xff] %vm266_vm0, %v799_v50  ;;  %v802_v43 = vmul.f32 %v770_v59, %v673_v18  ;;  %v1092_v9 = vpop.eup %1091  ;;  %v769_v11 = vadd.f32 1.0, %v1090_v3  ;;  %v696_v13 = vmul.f32 0.70710677, %v1381_v1  ;;  %v1392_v14 = vadd.f32 %v615_v62, %v565_v2  ;;  %v499_v2 = vpop.f32.mrf.mxu0 }
  0xf7   : > { %818 = vst.msk [vmem:[%s1332_s11 + $0x28] sm:$0xff] %vm266_vm0, %v786_v40  ;;  %v1094_v15 = vpop.eup %1093  ;;  %v785_v16 = vmul.f32 %v753_v5, %v656_v34  ;;  %v756_v17 = vadd.f32 1.0, %v1092_v9  ;;  %v1396_v18 = vadd.f32 %v598_v4, %v480_v6  ;;  %v560_v19 = vadd.f32 %v1265_v36, %v559_v58  ;;  %v617_v34 = vld [vmem:[%s1260_s6 + $0xe8] sm:$0xff]  ;;  %v1050_v61 = vpop.f32.mrf.mxu1 }
  0xf8   : > { %834 = vst.msk [vmem:[%s1332_s11 + $0xa8] sm:$0xff] %vm266_vm0, %v802_v43  ;;  %v1096_v53 = vpop.eup %1095  ;;  %v801_v22 = vmul.f32 %v769_v11, %v672_v55  ;;  %v772_v26 = vadd.f32 1.0, %v1094_v15  ;;  %v658_v27 = vmul.f32 0.5, %v1321_v57  ;;  %1107 = verf.f32 %v696_v13  ;;  %v619_v11 = vld [vmem:[%s1260_s6 + $0xf8] sm:$0xff]  ;;  %v602_v15 = vld [vmem:[%s1260_s6 + $0x70] sm:$0xff] }
  0xf9   : > { %817 = vst.msk [vmem:[%s1332_s11 + $0x20] sm:$0xff] %vm266_vm0, %v785_v16  ;;  %v788_v28 = vmul.f32 %v756_v17, %v659_v60  ;;  %v755_v29 = vadd.f32 1.0, %v1096_v53  ;;  %v674_v24 = vmul.f32 0.5, %v1336_v7  ;;  %v712_v30 = vmul.f32 0.70710677, %v1392_v14  ;;  %v603_v60 = vld [vmem:[%s1260_s6 + $0x78] sm:$0xff]  ;;  %v579_v16 = vpop.f32.mrf.mxu1 }
  0xfa   : > { %833 = vst.msk [vmem:[%s1332_s11 + $0xa0] sm:$0xff] %vm266_vm0, %v801_v22  ;;  %v804_v25 = vmul.f32 %v772_v26, %v675_v12  ;;  %v695_v31 = vmul.f32 0.70710677, %v1396_v18  ;;  %v1408_v32 = vadd.f32 %v614_v20, %v560_v19  ;;  %v495_v57 = vadd.f32 %v1023_v63, %v1265_v36  ;;  %v1098_v38 = vpop.eup %1097  ;;  %v618_v26 = vld [vmem:[%s1260_s6 + $0xf0] sm:$0xff] }
  0xfb   : > { %820 = vst.msk [vmem:[%s1332_s11 + $0x38] sm:$0xff] %vm266_vm0, %v788_v28  ;;  %v787_v7 = vmul.f32 %v755_v29, %v658_v27  ;;  %1109 = verf.f32 %v712_v30  ;;  %v575_v41 = vadd.f32 %v1047_v10, %v1265_v36  ;;  %v490_v42 = vadd.f32 %v1265_v36, %v489_v21  ;;  %v1100_v47 = vpop.eup %1099 }
  0xfc   : > { %836 = vst.msk [vmem:[%s1332_s11 + $0xb8] sm:$0xff] %vm266_vm0, %v804_v25  ;;  %v771_v39 = vadd.f32 1.0, %v1098_v38  ;;  %v661_v49 = vmul.f32 0.5, %v1338_v8  ;;  %1111 = verf.f32 %v695_v31  ;;  %v711_v51 = vmul.f32 0.70710677, %v1408_v32  ;;  %v616_v8 = vld [vmem:[%s1260_s6 + $0xe0] sm:$0xff] }
  0xfd   : > { %819 = vst.msk [vmem:[%s1332_s11 + $0x30] sm:$0xff] %vm266_vm0, %v787_v7  ;;  %v758_v52 = vadd.f32 1.0, %v1100_v47  ;;  %v1424_v48 = vadd.f32 %v601_v33, %v495_v57  ;;  %v1426_v54 = vadd.f32 %v617_v34, %v575_v41  ;;  %v1428_v55 = vadd.f32 %v600_v35, %v490_v42 }
  0xfe   : > { %v1102_v56 = vpop.eup %1101  ;;  %v803_v58 = vmul.f32 %v771_v39, %v674_v24  ;;  %1113 = verf.f32 %v711_v51  ;;  %v570_v50 = vadd.f32 %v1265_v36, %v569_v37  ;;  %v505_v59 = vadd.f32 %v1026_v46, %v1265_v36 }
  0xff   : > { %v790_v62 = vmul.f32 %v758_v52, %v661_v49  ;;  %v677_v63 = vmul.f32 0.5, %v1350_v23  ;;  %v774_v0 = vadd.f32 1.0, %v1102_v56  ;;  %v698_v40 = vmul.f32 0.70710677, %v1424_v48 }
 0x100   : > { %835 = vst.msk [vmem:[%s1332_s11 + $0xb0] sm:$0xff] %vm266_vm0, %v803_v58  ;;  %v660_v4 = vmul.f32 0.5, %v1363_v44  ;;  %v714_v3 = vmul.f32 0.70710677, %v1426_v54  ;;  %v697_v43 = vmul.f32 0.70710677, %v1428_v55  ;;  %v1104_v5 = vpop.eup %1103  ;;  %v1443_v23 = vadd.f32 %v616_v8, %v570_v50 }
 0x101   : > { %822 = vst.msk [vmem:[%s1332_s11 + $0x48] sm:$0xff] %vm266_vm0, %v790_v62  ;;  %v806_v6 = vmul.f32 %v774_v0, %v677_v63  ;;  %1115 = verf.f32 %v698_v40  ;;  %v1445_v9 = vadd.f32 %v603_v60, %v505_v59  ;;  %v1106_v12 = vpop.eup %1105  ;;  %v757_v13 = vadd.f32 1.0, %v1104_v5 }
 0x102   : > { %1117 = verf.f32 %v714_v3  ;;  %v585_v44 = vadd.f32 %v1050_v61, %v1265_v36  ;;  %v500_v10 = vadd.f32 %v1265_v36, %v499_v2  ;;  %v676_v17 = vmul.f32 0.5, %v1365_v45 }
 0x103   : > { %838 = vst.msk [vmem:[%s1332_s11 + $0xc8] sm:$0xff] %vm266_vm0, %v806_v6  ;;  %v773_v19 = vadd.f32 1.0, %v1106_v12  ;;  %1119 = verf.f32 %v697_v43  ;;  %v713_v20 = vmul.f32 0.70710677, %v1443_v23  ;;  %v789_v21 = vmul.f32 %v757_v13, %v660_v4 }
 0x104   : > { %v700_v53 = vmul.f32 0.70710677, %v1445_v9  ;;  %v651_v22 = vadd.f32 %v619_v11, %v585_v44  ;;  %v634_v29 = vadd.f32 %v602_v15, %v500_v10  ;;  %v580_v24 = vadd.f32 %v1265_v36, %v579_v16 }
 0x105   : > { %v1108_v27 = vpop.eup %1107  ;;  %v805_v28 = vmul.f32 %v773_v19, %v676_v17  ;;  %1121 = verf.f32 %v713_v20  ;;  %821 = vst.msk [vmem:[%s1332_s11 + $0x40] sm:$0xff] %vm266_vm0, %v789_v21  ;;  %v663_v45 = vmul.f32 0.5, %v1381_v1  ;;  %v679_v36 = vmul.f32 0.5, %v1392_v14 }
 0x106   : > { %v760_v30 = vadd.f32 1.0, %v1108_v27  ;;  %1123 = verf.f32 %v700_v53  ;;  %v716_v25 = vmul.f32 0.70710677, %v651_v22  ;;  %v699_v31 = vmul.f32 0.70710677, %v634_v29 }
 0x107   : > { %837 = vst.msk [vmem:[%s1332_s11 + $0xc0] sm:$0xff] %vm266_vm0, %v805_v28  ;;  %v650_v57 = vadd.f32 %v618_v26, %v580_v24  ;;  %v662_v1 = vmul.f32 0.5, %v1396_v18  ;;  %v678_v47 = vmul.f32 0.5, %v1408_v32  ;;  %v665_v52 = vmul.f32 0.5, %v1424_v48 }
 0x108   : > { %v1110_v33 = vpop.eup %1109  ;;  %v792_v34 = vmul.f32 %v760_v30, %v663_v45  ;;  %1125 = verf.f32 %v716_v25  ;;  %v681_v58 = vmul.f32 0.5, %v1426_v54  ;;  %v664_v8 = vmul.f32 0.5, %v1428_v55 }
 0x109   : > { %v1112_v35 = vpop.eup %1111  ;;  %v776_v37 = vadd.f32 1.0, %v1110_v33  ;;  %1127 = verf.f32 %v699_v31  ;;  %v715_v38 = vmul.f32 0.70710677, %v650_v57  ;;  %v680_v63 = vmul.f32 0.5, %v1443_v23 }
 0x10a   : > { %824 = vst.msk [vmem:[%s1332_s11 + $0x58] sm:$0xff] %vm266_vm0, %v792_v34  ;;  %v759_v7 = vadd.f32 1.0, %v1112_v35  ;;  %v667_v54 = vmul.f32 0.5, %v1445_v9  ;;  %v683_v43 = vmul.f32 0.5, %v651_v22  ;;  %v666_v6 = vmul.f32 0.5, %v634_v29 }
 0x10b   : > { %v1114_v41 = vpop.eup %1113  ;;  %v808_v42 = vmul.f32 %v776_v37, %v679_v36  ;;  %1129 = verf.f32 %v715_v38  ;;  %v682_v13 = vmul.f32 0.5, %v650_v57 }
 0x10c   : > { %v791_v46 = vmul.f32 %v759_v7, %v662_v1  ;;  %v775_v39 = vadd.f32 1.0, %v1114_v41 }
 0x10d   : > { %840 = vst.msk [vmem:[%s1332_s11 + $0xd8] sm:$0xff] %vm266_vm0, %v808_v42 }
 0x10e   : > { %v1116_v49 = vpop.eup %1115  ;;  %823 = vst.msk [vmem:[%s1332_s11 + $0x50] sm:$0xff] %vm266_vm0, %v791_v46  ;;  %v807_v14 = vmul.f32 %v775_v39, %v678_v47 }
 0x10f   : > { %v1118_v51 = vpop.eup %1117  ;;  %v762_v18 = vadd.f32 1.0, %v1116_v49 }
 0x110   : > { %v1120_v56 = vpop.eup %1119  ;;  %839 = vst.msk [vmem:[%s1332_s11 + $0xd0] sm:$0xff] %vm266_vm0, %v807_v14  ;;  %v778_v32 = vadd.f32 1.0, %v1118_v51 }
 0x111   : > { %v794_v50 = vmul.f32 %v762_v18, %v665_v52  ;;  %v761_v59 = vadd.f32 1.0, %v1120_v56 }
 0x112   : > { %v1122_v60 = vpop.eup %1121  ;;  %v810_v61 = vmul.f32 %v778_v32, %v681_v58 }
 0x113   : > { %v1124_v62 = vpop.eup %1123  ;;  %826 = vst.msk [vmem:[%s1332_s11 + $0x68] sm:$0xff] %vm266_vm0, %v794_v50  ;;  %v793_v48 = vmul.f32 %v761_v59, %v664_v8  ;;  %v777_v0 = vadd.f32 1.0, %v1122_v60 }
 0x114   : > { %842 = vst.msk [vmem:[%s1332_s11 + $0xe8] sm:$0xff] %vm266_vm0, %v810_v61  ;;  %v764_v40 = vadd.f32 1.0, %v1124_v62 }
 0x115   : > { %v1126_v2 = vpop.eup %1125  ;;  %825 = vst.msk [vmem:[%s1332_s11 + $0x60] sm:$0xff] %vm266_vm0, %v793_v48  ;;  %v809_v55 = vmul.f32 %v777_v0, %v680_v63 }
 0x116   : > { %v1128_v4 = vpop.eup %1127  ;;  %v796_v3 = vmul.f32 %v764_v40, %v667_v54  ;;  %v780_v5 = vadd.f32 1.0, %v1126_v2 }
 0x117   : > { %841 = vst.msk [vmem:[%s1332_s11 + $0xe0] sm:$0xff] %vm266_vm0, %v809_v55  ;;  %v763_v23 = vadd.f32 1.0, %v1128_v4 }
 0x118   : > { %v1130_v11 = vpop.eup %1129  ;;  %828 = vst.msk [vmem:[%s1332_s11 + $0x78] sm:$0xff] %vm266_vm0, %v796_v3  ;;  %v812_v9 = vmul.f32 %v780_v5, %v683_v43 }
 0x119   : > { %v795_v12 = vmul.f32 %v763_v23, %v666_v6  ;;  %v779_v44 = vadd.f32 1.0, %v1130_v11 }
 0x11a   : > { %844 = vst.msk [vmem:[%s1332_s11 + $0xf8] sm:$0xff] %vm266_vm0, %v812_v9 }
 0x11b   : > { %827 = vst.msk [vmem:[%s1332_s11 + $0x70] sm:$0xff] %vm266_vm0, %v795_v12  ;;  %v811_v10 = vmul.f32 %v779_v44, %v682_v13 }
 0x11d   : > { %843 = vst.msk [vmem:[%s1332_s11 + $0xf0] sm:$0xff] %vm266_vm0, %v811_v10 }
 0x11e PF: > { %s14_s15 = sadd.s32 1, %s1137_s15  }
 0x11f   : > { %p11_p4 = scmp.ge.s32.totalorder %s14_s15, 4  }
 0x121   :  { %13 = sbr.rel (!%p11_p4) target bundleno = 1 (0x1), region = 69 }

// kernel: fno2d_forward.18
= control target key start
LH: loop header
LB: loop body
LE: loop exit
PB: predicated region body
PF: predicated region fallthrough
CT: control target
= control target key end

     0   :  { %s939_s15 = smov 0   ;;  %s1179_s0 = inlined_call_operand.vmem [shape: f32[512,32], index: 0, kind: input, shape index: {}]   ;;  %s1180_s1 = inlined_call_operand.vmem [shape: f32[512,32], index: 1, kind: input, shape index: {}]   ;;  %s1181_s2 = inlined_call_operand.vmem [shape: f32[32,32], index: 2, kind: input, shape index: {}]   ;;  %s1182_s3 = inlined_call_operand.vmem [shape: f32[1,32], index: 3, kind: input, shape index: {}]   ;;  %s1183_s4 = inlined_call_operand.vmem [shape: f32[512,32], index: 4, kind: output, shape index: {}]  }
   0x1 LB: > { %s752_s16 = sadd.s32 4294967295, %s912_s15   ;;  %p756_p0 = scmp.ge.s32.totalorder %s912_s15, 1  ;;  %s912_s15 = sphi %s939_s15, %s14_s15  }
   0x2   : > { %p174_p1 = scmp.lt.s32.totalorder %s912_s15, 3 }
   0x4   : > { %p175_p2 = pnand %p756_p0, %p174_p1 }
   0x5   : > { %s757_s21 = sshll.u32 (!%p175_p2), %s752_s16, 5 }
   0x6   : > { %178 = sbr.rel (%p175_p2) target bundleno = 249 (0xf9), region = 36  ;;  %p206_p3 = scmp.lt.s32.totalorder (!%p175_p2), %s757_s21, 63 }
   0xb   : > { %v258_v0 = vld [vmem:[%s1181_s2 + $0x18] sm:$0xff]  ;;  %v257_v1 = vld [vmem:[%s1181_s2 + $0x10] sm:$0xff]  ;;  %v256_v2 = vld [vmem:[%s1181_s2 + $0x8] sm:$0xff]  ;;  %s1185_s21 = smov (!%p206_p3, %s757_s21), 63  ;;  %vm266_vm0 = vcmask 261120  }
   0xc   : > { %834 = vmatprep.subr.mxu0 %v258_v0  ;;  %890 = vmatprep.subr.mxu1 %v258_v0  ;;  %v255_v3 = vld [vmem:[%s1181_s2] sm:$0xff]  ;;  %s959_s26 = sshll.u32 %s1185_s21, 3 }
   0xd   : > { %835 = vmatpush3.msra.mxu0 %v258_v0  ;;  %894 = vmatpush3.msra.mxu1 %v258_v0  ;;  %s965_s29 = scalar_lea.vmem %s1179_s0, %s959_s26  ;;  %s1035_s6 = scalar_lea.vmem %s1180_s1, %s959_s26  ;;  %v1040_v36 = vld [vmem:[%s1182_s3] ss:$0 sm:$0xff] }
   0xe   : > { %836 = vmatprep.subr.mxu0 %v257_v1  ;;  %891 = vmatprep.subr.mxu1 %v257_v1  ;;  %v223_v4 = vld [vmem:[%s965_s29] sm:$0xff]  ;;  %v224_v6 = vld [vmem:[%s965_s29 + $0x8] sm:$0xff]  ;;  %v225_v8 = vld [vmem:[%s965_s29 + $0x10] sm:$0xff]  ;;  %s1050_s11 = scalar_lea.vmem %s1183_s4, %s959_s26 }
   0xf   : > { %837 = vmatpush3.msra.mxu0 %v257_v1  ;;  %895 = vmatpush3.msra.mxu1 %v257_v1  ;;  %v239_v5 = vld [vmem:[%s965_s29 + $0x80] sm:$0xff]  ;;  %v240_v7 = vld [vmem:[%s965_s29 + $0x88] sm:$0xff]  ;;  %v241_v9 = vld [vmem:[%s965_s29 + $0x90] sm:$0xff] }
  0x10   : > { %838 = vmatprep.subr.mxu0 %v256_v2  ;;  %892 = vmatprep.subr.mxu1 %v256_v2  ;;  %v226_v10 = vld [vmem:[%s965_s29 + $0x18] sm:$0xff]  ;;  %v227_v12 = vld [vmem:[%s965_s29 + $0x20] sm:$0xff]  ;;  %v228_v14 = vld [vmem:[%s965_s29 + $0x28] sm:$0xff] }
  0x11   : > { %839 = vmatpush3.msra.mxu0 %v256_v2  ;;  %896 = vmatpush3.msra.mxu1 %v256_v2  ;;  %v242_v11 = vld [vmem:[%s965_s29 + $0x98] sm:$0xff]  ;;  %v243_v13 = vld [vmem:[%s965_s29 + $0xa0] sm:$0xff]  ;;  %v244_v15 = vld [vmem:[%s965_s29 + $0xa8] sm:$0xff] }
  0x12   : > { %840 = vmatprep.subr.mxu0 %v255_v3  ;;  %893 = vmatprep.subr.mxu1 %v255_v3  ;;  %v229_v16 = vld [vmem:[%s965_s29 + $0x30] sm:$0xff]  ;;  %v230_v18 = vld [vmem:[%s965_s29 + $0x38] sm:$0xff]  ;;  %v231_v20 = vld [vmem:[%s965_s29 + $0x40] sm:$0xff] }
  0x13   : > { %841 = vmatpush3.msra.mxu0 %v255_v3  ;;  %897 = vmatpush3.msra.mxu1 %v255_v3  ;;  %v245_v17 = vld [vmem:[%s965_s29 + $0xb0] sm:$0xff]  ;;  %v246_v19 = vld [vmem:[%s965_s29 + $0xb8] sm:$0xff]  ;;  %v247_v21 = vld [vmem:[%s965_s29 + $0xc0] sm:$0xff] }
  0x14   : > { %842 = vmatprep.mubr.msk.f32.mxu0 %vm266_vm0, %v223_v4  ;;  %866 = vmatprep.mubr.msk.f32.mxu1 %vm266_vm0, %v239_v5  ;;  %v232_v22 = vld [vmem:[%s965_s29 + $0x48] sm:$0xff]  ;;  %v233_v24 = vld [vmem:[%s965_s29 + $0x50] sm:$0xff]  ;;  %v234_v26 = vld [vmem:[%s965_s29 + $0x58] sm:$0xff] }
  0x15   : > { %843 = vmatmul.mubr.msk.f32.vlgmr.msra.gmra.mxu0 %vm266_vm0, %v224_v6  ;;  %867 = vmatmul.mubr.msk.f32.vlgmr.msra.gmra.mxu1 %vm266_vm0, %v240_v7  ;;  %v248_v23 = vld [vmem:[%s965_s29 + $0xc8] sm:$0xff]  ;;  %v249_v25 = vld [vmem:[%s965_s29 + $0xd0] sm:$0xff]  ;;  %v250_v27 = vld [vmem:[%s965_s29 + $0xd8] sm:$0xff] }
  0x16   : > { %845 = vmatprep.mubr.msk.f32.mxu0 %vm266_vm0, %v225_v8  ;;  %869 = vmatprep.mubr.msk.f32.mxu1 %vm266_vm0, %v241_v9  ;;  %v235_v28 = vld [vmem:[%s965_s29 + $0x60] sm:$0xff]  ;;  %v236_v30 = vld [vmem:[%s965_s29 + $0x68] sm:$0xff]  ;;  %v237_v32 = vld [vmem:[%s965_s29 + $0x70] sm:$0xff] }
  0x17   : > { %v251_v29 = vld [vmem:[%s965_s29 + $0xe0] sm:$0xff]  ;;  %v252_v31 = vld [vmem:[%s965_s29 + $0xe8] sm:$0xff]  ;;  %v253_v33 = vld [vmem:[%s965_s29 + $0xf0] sm:$0xff] }
  0x18   : > { %v238_v34 = vld [vmem:[%s965_s29 + $0x78] sm:$0xff]  ;;  %v589_v38 = vld [vmem:[%s1035_s6 + $0x8] sm:$0xff]  ;;  %v588_v44 = vld [vmem:[%s1035_s6] sm:$0xff] }
  0x19   : > { %846 = vmatmul.mubr.msk.f32.gmra.mxu0 %vm266_vm0, %v226_v10  ;;  %870 = vmatmul.mubr.msk.f32.gmra.mxu1 %vm266_vm0, %v242_v11  ;;  %v254_v35 = vld [vmem:[%s965_s29 + $0xf8] sm:$0xff]  ;;  %v605_v40 = vld [vmem:[%s1035_s6 + $0x88] sm:$0xff]  ;;  %v604_v46 = vld [vmem:[%s1035_s6 + $0x80] sm:$0xff] }
  0x1a   : > { %848 = vmatprep.mubr.msk.f32.mxu0 %vm266_vm0, %v227_v12  ;;  %872 = vmatprep.mubr.msk.f32.mxu1 %vm266_vm0, %v243_v13  ;;  %v591_v52 = vld [vmem:[%s1035_s6 + $0x18] sm:$0xff]  ;;  %v590_v60 = vld [vmem:[%s1035_s6 + $0x10] sm:$0xff]  ;;  %v593_v4 = vld [vmem:[%s1035_s6 + $0x28] sm:$0xff] }
  0x1b   : > { %v607_v54 = vld [vmem:[%s1035_s6 + $0x98] sm:$0xff]  ;;  %v606_v62 = vld [vmem:[%s1035_s6 + $0x90] sm:$0xff]  ;;  %v609_v6 = vld [vmem:[%s1035_s6 + $0xa8] sm:$0xff] }
  0x1c   : > { %v592_v12 = vld [vmem:[%s1035_s6 + $0x20] sm:$0xff] }
  0x1d   : > { %849 = vmatmul.mubr.msk.f32.gmra.mxu0 %vm266_vm0, %v228_v14  ;;  %873 = vmatmul.mubr.msk.f32.gmra.mxu1 %vm266_vm0, %v244_v15  ;;  %v608_v14 = vld [vmem:[%s1035_s6 + $0xa0] sm:$0xff] }
  0x1e   : > { %851 = vmatprep.mubr.msk.f32.mxu0 %vm266_vm0, %v229_v16  ;;  %875 = vmatprep.mubr.msk.f32.mxu1 %vm266_vm0, %v245_v17 }
  0x21   : > { %852 = vmatmul.mubr.msk.f32.gmra.mxu0 %vm266_vm0, %v230_v18  ;;  %876 = vmatmul.mubr.msk.f32.gmra.mxu1 %vm266_vm0, %v246_v19 }
  0x22   : > { %854 = vmatprep.mubr.msk.f32.mxu0 %vm266_vm0, %v231_v20  ;;  %878 = vmatprep.mubr.msk.f32.mxu1 %vm266_vm0, %v247_v21  ;;  %v595_v20 = vld [vmem:[%s1035_s6 + $0x38] sm:$0xff] }
  0x25   : > { %855 = vmatmul.mubr.msk.f32.gmra.mxu0 %vm266_vm0, %v232_v22  ;;  %879 = vmatmul.mubr.msk.f32.gmra.mxu1 %vm266_vm0, %v248_v23  ;;  %v611_v22 = vld [vmem:[%s1035_s6 + $0xb8] sm:$0xff] }
  0x26   : > { %857 = vmatprep.mubr.msk.f32.mxu0 %vm266_vm0, %v233_v24  ;;  %881 = vmatprep.mubr.msk.f32.mxu1 %vm266_vm0, %v249_v25 }
  0x29   : > { %858 = vmatmul.mubr.msk.f32.gmra.mxu0 %vm266_vm0, %v234_v26  ;;  %882 = vmatmul.mubr.msk.f32.gmra.mxu1 %vm266_vm0, %v250_v27 }
  0x2a   : > { %860 = vmatprep.mubr.msk.f32.mxu0 %vm266_vm0, %v235_v28  ;;  %884 = vmatprep.mubr.msk.f32.mxu1 %vm266_vm0, %v251_v29  ;;  %v594_v28 = vld [vmem:[%s1035_s6 + $0x30] sm:$0xff] }
  0x2d   : > { %861 = vmatmul.mubr.msk.f32.gmra.mxu0 %vm266_vm0, %v236_v30  ;;  %885 = vmatmul.mubr.msk.f32.gmra.mxu1 %vm266_vm0, %v252_v31  ;;  %v610_v30 = vld [vmem:[%s1035_s6 + $0xb0] sm:$0xff] }
  0x2e   : > { %863 = vmatprep.mubr.msk.f32.mxu0 %vm266_vm0, %v237_v32  ;;  %887 = vmatprep.mubr.msk.f32.mxu1 %vm266_vm0, %v253_v33 }
  0x31   : > { %864 = vmatmul.mubr.msk.f32.gmra.mxu0 %vm266_vm0, %v238_v34  ;;  %888 = vmatmul.mubr.msk.f32.gmra.mxu1 %vm266_vm0, %v254_v35 }
  0xd5   : > { %v844_v37 = vpop.f32.mrf.mxu0  ;;  %v868_v39 = vpop.f32.mrf.mxu1 }
  0xd6   : > { %v435_v41 = vadd.f32 %v844_v37, %v1040_v36  ;;  %v515_v42 = vadd.f32 %v868_v39, %v1040_v36  ;;  %v597_v37 = vld [vmem:[%s1035_s6 + $0x48] sm:$0xff] }
  0xd7   : > { %v429_v43 = vpop.f32.mrf.mxu0  ;;  %v509_v45 = vpop.f32.mrf.mxu1  ;;  %v613_v39 = vld [vmem:[%s1035_s6 + $0xc8] sm:$0xff] }
  0xd8   : > { %v621_v47 = vadd.f32 %v589_v38, %v435_v41  ;;  %v637_v48 = vadd.f32 %v605_v40, %v515_v42  ;;  %v430_v49 = vadd.f32 %v1040_v36, %v429_v43  ;;  %v510_v50 = vadd.f32 %v1040_v36, %v509_v45  ;;  %v596_v45 = vld [vmem:[%s1035_s6 + $0x40] sm:$0xff] }
  0xd9   : > { %v847_v51 = vpop.f32.mrf.mxu0  ;;  %v871_v53 = vpop.f32.mrf.mxu1 }
  0xda   : > { %653 = vst.msk [vmem:[%s1050_s11 + $0x8] sm:$0xff] %vm266_vm0, %v621_v47  ;;  %669 = vst.msk [vmem:[%s1050_s11 + $0x88] sm:$0xff] %vm266_vm0, %v637_v48  ;;  %v620_v55 = vadd.f32 %v588_v44, %v430_v49  ;;  %v636_v56 = vadd.f32 %v604_v46, %v510_v50  ;;  %v445_v57 = vadd.f32 %v847_v51, %v1040_v36  ;;  %v612_v47 = vld [vmem:[%s1035_s6 + $0xc0] sm:$0xff] }
  0xdb   : > { %v525_v58 = vadd.f32 %v871_v53, %v1040_v36  ;;  %v439_v59 = vpop.f32.mrf.mxu0  ;;  %v519_v61 = vpop.f32.mrf.mxu1  ;;  %v599_v53 = vld [vmem:[%s1035_s6 + $0x58] sm:$0xff] }
  0xdc   : > { %652 = vst.msk [vmem:[%s1050_s11] sm:$0xff] %vm266_vm0, %v620_v55  ;;  %668 = vst.msk [vmem:[%s1050_s11 + $0x80] sm:$0xff] %vm266_vm0, %v636_v56  ;;  %v623_v63 = vadd.f32 %v591_v52, %v445_v57  ;;  %v440_v1 = vadd.f32 %v1040_v36, %v439_v59  ;;  %v520_v2 = vadd.f32 %v1040_v36, %v519_v61  ;;  %v615_v55 = vld [vmem:[%s1035_s6 + $0xd8] sm:$0xff]  ;;  %v598_v61 = vld [vmem:[%s1035_s6 + $0x50] sm:$0xff] }
  0xdd   : > { %v639_v0 = vadd.f32 %v607_v54, %v525_v58  ;;  %v850_v3 = vpop.f32.mrf.mxu0  ;;  %v874_v5 = vpop.f32.mrf.mxu1 }
  0xde   : > { %655 = vst.msk [vmem:[%s1050_s11 + $0x18] sm:$0xff] %vm266_vm0, %v623_v63  ;;  %v622_v7 = vadd.f32 %v590_v60, %v440_v1  ;;  %v638_v8 = vadd.f32 %v606_v62, %v520_v2  ;;  %v455_v9 = vadd.f32 %v850_v3, %v1040_v36  ;;  %v535_v10 = vadd.f32 %v874_v5, %v1040_v36  ;;  %v614_v63 = vld [vmem:[%s1035_s6 + $0xd0] sm:$0xff]  ;;  %v601_v5 = vld [vmem:[%s1035_s6 + $0x68] sm:$0xff] }
  0xdf   : > { %671 = vst.msk [vmem:[%s1050_s11 + $0x98] sm:$0xff] %vm266_vm0, %v639_v0  ;;  %v449_v11 = vpop.f32.mrf.mxu0  ;;  %v529_v13 = vpop.f32.mrf.mxu1 }
  0xe0   : > { %654 = vst.msk [vmem:[%s1050_s11 + $0x10] sm:$0xff] %vm266_vm0, %v622_v7  ;;  %670 = vst.msk [vmem:[%s1050_s11 + $0x90] sm:$0xff] %vm266_vm0, %v638_v8  ;;  %v625_v15 = vadd.f32 %v593_v4, %v455_v9  ;;  %v641_v16 = vadd.f32 %v609_v6, %v535_v10  ;;  %v450_v17 = vadd.f32 %v1040_v36, %v449_v11  ;;  %v617_v7 = vld [vmem:[%s1035_s6 + $0xe8] sm:$0xff] }
  0xe1   : > { %v530_v18 = vadd.f32 %v1040_v36, %v529_v13  ;;  %v853_v19 = vpop.f32.mrf.mxu0  ;;  %v877_v21 = vpop.f32.mrf.mxu1  ;;  %v600_v13 = vld [vmem:[%s1035_s6 + $0x60] sm:$0xff] }
  0xe2   : > { %657 = vst.msk [vmem:[%s1050_s11 + $0x28] sm:$0xff] %vm266_vm0, %v625_v15  ;;  %673 = vst.msk [vmem:[%s1050_s11 + $0xa8] sm:$0xff] %vm266_vm0, %v641_v16  ;;  %v624_v23 = vadd.f32 %v592_v12, %v450_v17  ;;  %v465_v25 = vadd.f32 %v853_v19, %v1040_v36  ;;  %v545_v26 = vadd.f32 %v877_v21, %v1040_v36  ;;  %v616_v15 = vld [vmem:[%s1035_s6 + $0xe0] sm:$0xff]  ;;  %v603_v21 = vld [vmem:[%s1035_s6 + $0x78] sm:$0xff] }
  0xe3   : > { %v640_v24 = vadd.f32 %v608_v14, %v530_v18  ;;  %v459_v27 = vpop.f32.mrf.mxu0  ;;  %v539_v29 = vpop.f32.mrf.mxu1 }
  0xe4   : > { %656 = vst.msk [vmem:[%s1050_s11 + $0x20] sm:$0xff] %vm266_vm0, %v624_v23  ;;  %v627_v31 = vadd.f32 %v595_v20, %v465_v25  ;;  %v643_v32 = vadd.f32 %v611_v22, %v545_v26  ;;  %v460_v33 = vadd.f32 %v1040_v36, %v459_v27  ;;  %v540_v34 = vadd.f32 %v1040_v36, %v539_v29  ;;  %v619_v23 = vld [vmem:[%s1035_s6 + $0xf8] sm:$0xff]  ;;  %v602_v29 = vld [vmem:[%s1035_s6 + $0x70] sm:$0xff] }
  0xe5   : > { %672 = vst.msk [vmem:[%s1050_s11 + $0xa0] sm:$0xff] %vm266_vm0, %v640_v24  ;;  %v856_v35 = vpop.f32.mrf.mxu0  ;;  %v880_v38 = vpop.f32.mrf.mxu1 }
  0xe6   : > { %659 = vst.msk [vmem:[%s1050_s11 + $0x38] sm:$0xff] %vm266_vm0, %v627_v31  ;;  %675 = vst.msk [vmem:[%s1050_s11 + $0xb8] sm:$0xff] %vm266_vm0, %v643_v32  ;;  %v626_v40 = vadd.f32 %v594_v28, %v460_v33  ;;  %v642_v41 = vadd.f32 %v610_v30, %v540_v34  ;;  %v475_v42 = vadd.f32 %v856_v35, %v1040_v36  ;;  %v618_v31 = vld [vmem:[%s1035_s6 + $0xf0] sm:$0xff] }
  0xe7   : > { %v555_v43 = vadd.f32 %v880_v38, %v1040_v36  ;;  %v469_v44 = vpop.f32.mrf.mxu0  ;;  %v549_v46 = vpop.f32.mrf.mxu1 }
  0xe8   : > { %658 = vst.msk [vmem:[%s1050_s11 + $0x30] sm:$0xff] %vm266_vm0, %v626_v40  ;;  %674 = vst.msk [vmem:[%s1050_s11 + $0xb0] sm:$0xff] %vm266_vm0, %v642_v41  ;;  %v629_v48 = vadd.f32 %v597_v37, %v475_v42  ;;  %v470_v50 = vadd.f32 %v1040_v36, %v469_v44  ;;  %v550_v51 = vadd.f32 %v1040_v36, %v549_v46 }
  0xe9   : > { %v645_v49 = vadd.f32 %v613_v39, %v555_v43  ;;  %v859_v52 = vpop.f32.mrf.mxu0  ;;  %v883_v54 = vpop.f32.mrf.mxu1 }
  0xea   : > { %661 = vst.msk [vmem:[%s1050_s11 + $0x48] sm:$0xff] %vm266_vm0, %v629_v48  ;;  %v628_v56 = vadd.f32 %v596_v45, %v470_v50  ;;  %v644_v57 = vadd.f32 %v612_v47, %v550_v51  ;;  %v485_v58 = vadd.f32 %v859_v52, %v1040_v36  ;;  %v565_v59 = vadd.f32 %v883_v54, %v1040_v36 }
  0xeb   : > { %677 = vst.msk [vmem:[%s1050_s11 + $0xc8] sm:$0xff] %vm266_vm0, %v645_v49  ;;  %v479_v60 = vpop.f32.mrf.mxu0  ;;  %v559_v62 = vpop.f32.mrf.mxu1 }
  0xec   : > { %660 = vst.msk [vmem:[%s1050_s11 + $0x40] sm:$0xff] %vm266_vm0, %v628_v56  ;;  %676 = vst.msk [vmem:[%s1050_s11 + $0xc0] sm:$0xff] %vm266_vm0, %v644_v57  ;;  %v631_v0 = vadd.f32 %v599_v53, %v485_v58  ;;  %v647_v1 = vadd.f32 %v615_v55, %v565_v59  ;;  %v480_v2 = vadd.f32 %v1040_v36, %v479_v60 }
  0xed   : > { %v560_v3 = vadd.f32 %v1040_v36, %v559_v62  ;;  %v862_v4 = vpop.f32.mrf.mxu0  ;;  %v886_v6 = vpop.f32.mrf.mxu1 }
  0xee   : > { %663 = vst.msk [vmem:[%s1050_s11 + $0x58] sm:$0xff] %vm266_vm0, %v631_v0  ;;  %679 = vst.msk [vmem:[%s1050_s11 + $0xd8] sm:$0xff] %vm266_vm0, %v647_v1  ;;  %v630_v8 = vadd.f32 %v598_v61, %v480_v2  ;;  %v495_v10 = vadd.f32 %v862_v4, %v1040_v36  ;;  %v575_v11 = vadd.f32 %v886_v6, %v1040_v36 }
  0xef   : > { %v646_v9 = vadd.f32 %v614_v63, %v560_v3  ;;  %v489_v12 = vpop.f32.mrf.mxu0  ;;  %v569_v14 = vpop.f32.mrf.mxu1 }
  0xf0   : > { %662 = vst.msk [vmem:[%s1050_s11 + $0x50] sm:$0xff] %vm266_vm0, %v630_v8  ;;  %v633_v16 = vadd.f32 %v601_v5, %v495_v10  ;;  %v649_v17 = vadd.f32 %v617_v7, %v575_v11  ;;  %v490_v18 = vadd.f32 %v1040_v36, %v489_v12  ;;  %v570_v19 = vadd.f32 %v1040_v36, %v569_v14 }
  0xf1   : > { %678 = vst.msk [vmem:[%s1050_s11 + $0xd0] sm:$0xff] %vm266_vm0, %v646_v9  ;;  %v865_v20 = vpop.f32.mrf.mxu0  ;;  %v889_v22 = vpop.f32.mrf.mxu1 }
  0xf2   : > { %665 = vst.msk [vmem:[%s1050_s11 + $0x68] sm:$0xff] %vm266_vm0, %v633_v16  ;;  %681 = vst.msk [vmem:[%s1050_s11 + $0xe8] sm:$0xff] %vm266_vm0, %v649_v17  ;;  %v632_v24 = vadd.f32 %v600_v13, %v490_v18  ;;  %v648_v25 = vadd.f32 %v616_v15, %v570_v19  ;;  %v505_v26 = vadd.f32 %v865_v20, %v1040_v36 }
  0xf3   : > { %v585_v27 = vadd.f32 %v889_v22, %v1040_v36  ;;  %v499_v28 = vpop.f32.mrf.mxu0  ;;  %v579_v30 = vpop.f32.mrf.mxu1 }
  0xf4   : > { %664 = vst.msk [vmem:[%s1050_s11 + $0x60] sm:$0xff] %vm266_vm0, %v632_v24  ;;  %680 = vst.msk [vmem:[%s1050_s11 + $0xe0] sm:$0xff] %vm266_vm0, %v648_v25  ;;  %v635_v32 = vadd.f32 %v603_v21, %v505_v26  ;;  %v500_v34 = vadd.f32 %v1040_v36, %v499_v28  ;;  %v580_v35 = vadd.f32 %v1040_v36, %v579_v30 }
  0xf5   : > { %v651_v33 = vadd.f32 %v619_v23, %v585_v27 }
  0xf6   : > { %667 = vst.msk [vmem:[%s1050_s11 + $0x78] sm:$0xff] %vm266_vm0, %v635_v32  ;;  %v634_v37 = vadd.f32 %v602_v29, %v500_v34  ;;  %v650_v38 = vadd.f32 %v618_v31, %v580_v35 }
  0xf7   : > { %683 = vst.msk [vmem:[%s1050_s11 + $0xf8] sm:$0xff] %vm266_vm0, %v651_v33 }
  0xf8   : > { %666 = vst.msk [vmem:[%s1050_s11 + $0x70] sm:$0xff] %vm266_vm0, %v634_v37  ;;  %682 = vst.msk [vmem:[%s1050_s11 + $0xf0] sm:$0xff] %vm266_vm0, %v650_v38 }
  0xf9 PF: > { %s14_s15 = sadd.s32 1, %s912_s15  }
  0xfa   : > { %p11_p4 = scmp.ge.s32.totalorder %s14_s15, 4  }
  0xfc   :  { %13 = sbr.rel (!%p11_p4) target bundleno = 1 (0x1), region = 69 }

// kernel: fno2d_forward.19
= control target key start
LH: loop header
LB: loop body
LE: loop exit
PB: predicated region body
PF: predicated region fallthrough
CT: control target
= control target key end

     0   :  { %s1246_s20 = smov 0   ;;  %s1638_s0 = inlined_call_operand.vmem [shape: f32[512,32], index: 0, kind: input, shape index: {}]   ;;  %s1639_s1 = inlined_call_operand.vmem [shape: f32[32,128], index: 1, kind: input, shape index: {}]   ;;  %s1640_s2 = inlined_call_operand.vmem [shape: f32[1,128], index: 2, kind: input, shape index: {}]   ;;  %s1641_s3 = inlined_call_operand.vmem [shape: f32[1,128], index: 3, kind: input, shape index: {}]   ;;  %s1642_s4 = inlined_call_operand.<no memory space> [shape: f32[1,1], index: 4, kind: input, shape index: {}]   ;;  %s1643_s5 = inlined_call_operand.vmem [shape: f32[512,1], index: 5, kind: output, shape index: {}]  }
   0x1   :  { %v10_v0 = vstv %s1642_s4 }
   0x2   :  { %11 = vst [vmem:[#allocation2] sm:$0x1] %v10_v0 }
   0x3 LB: > { %s987_s21 = sadd.s32 4294967295, %s1211_s20   ;;  %p991_p0 = scmp.ge.s32.totalorder %s1211_s20, 1  ;;  %s1211_s20 = sphi %s1246_s20, %s17_s20  }
   0x4   : > { %p190_p1 = scmp.lt.s32.totalorder %s1211_s20, 3 }
   0x6   : > { %p191_p2 = pnand %p991_p0, %p190_p1 }
   0x7   : > { %s992_s25 = sshll.u32 (!%p191_p2), %s987_s21, 5 }
   0x8   : > { %194 = sbr.rel (%p191_p2) target bundleno = 442 (0x1ba), region = 40  ;;  %p219_p3 = scmp.lt.s32.totalorder (!%p191_p2), %s992_s25, 63 }
   0xd   : > { %v265_v1 = vld [vmem:[%s1639_s1 + $0x18] sm:$0xff]  ;;  %v264_v2 = vld [vmem:[%s1639_s1 + $0x10] sm:$0xff]  ;;  %v263_v3 = vld [vmem:[%s1639_s1 + $0x8] sm:$0xff]  ;;  %s1645_s25 = smov (!%p219_p3, %s992_s25), 63  ;;  %vm273_vm0 = vcmask 261120   ;;  %vm898_vm1 = vcmask 7168  }
   0xe   : > { %1069 = vmatprep.subr.mxu0 %v265_v1  ;;  %1125 = vmatprep.subr.mxu1 %v265_v1  ;;  %v262_v4 = vld [vmem:[%s1639_s1] sm:$0xff]  ;;  %s993_s30 = sshll.u32 %s1645_s25, 3 }
   0xf   : > { %1070 = vmatpush3.msra.mxu0 %v265_v1  ;;  %1129 = vmatpush3.msra.mxu1 %v265_v1  ;;  %s1274_s8 = scalar_lea.vmem %s1638_s0, %s993_s30  ;;  %v1343_v37 = vld [vmem:[%s1640_s2] ss:$0 sm:$0xff]  ;;  %s1537_s15 = scalar_lea.vmem %s1643_s5, %s993_s30 }
  0x10   : > { %1071 = vmatprep.subr.mxu0 %v264_v2  ;;  %1126 = vmatprep.subr.mxu1 %v264_v2  ;;  %v230_v5 = vld [vmem:[%s1274_s8] sm:$0xff]  ;;  %v231_v7 = vld [vmem:[%s1274_s8 + $0x8] sm:$0xff]  ;;  %v232_v9 = vld [vmem:[%s1274_s8 + $0x10] sm:$0xff] }
  0x11   : > { %1072 = vmatpush3.msra.mxu0 %v264_v2  ;;  %1130 = vmatpush3.msra.mxu1 %v264_v2  ;;  %v246_v6 = vld [vmem:[%s1274_s8 + $0x80] sm:$0xff]  ;;  %v247_v8 = vld [vmem:[%s1274_s8 + $0x88] sm:$0xff]  ;;  %v248_v10 = vld [vmem:[%s1274_s8 + $0x90] sm:$0xff] }
  0x12   : > { %1073 = vmatprep.subr.mxu0 %v263_v3  ;;  %1127 = vmatprep.subr.mxu1 %v263_v3  ;;  %v233_v11 = vld [vmem:[%s1274_s8 + $0x18] sm:$0xff]  ;;  %v234_v13 = vld [vmem:[%s1274_s8 + $0x20] sm:$0xff]  ;;  %v235_v15 = vld [vmem:[%s1274_s8 + $0x28] sm:$0xff] }
  0x13   : > { %1074 = vmatpush3.msra.mxu0 %v263_v3  ;;  %1131 = vmatpush3.msra.mxu1 %v263_v3  ;;  %v249_v12 = vld [vmem:[%s1274_s8 + $0x98] sm:$0xff]  ;;  %v250_v14 = vld [vmem:[%s1274_s8 + $0xa0] sm:$0xff]  ;;  %v251_v16 = vld [vmem:[%s1274_s8 + $0xa8] sm:$0xff] }
  0x14   : > { %1075 = vmatprep.subr.mxu0 %v262_v4  ;;  %1128 = vmatprep.subr.mxu1 %v262_v4  ;;  %v236_v17 = vld [vmem:[%s1274_s8 + $0x30] sm:$0xff]  ;;  %v237_v19 = vld [vmem:[%s1274_s8 + $0x38] sm:$0xff]  ;;  %v238_v21 = vld [vmem:[%s1274_s8 + $0x40] sm:$0xff] }
  0x15   : > { %1076 = vmatpush3.msra.mxu0 %v262_v4  ;;  %1132 = vmatpush3.msra.mxu1 %v262_v4  ;;  %v252_v18 = vld [vmem:[%s1274_s8 + $0xb0] sm:$0xff]  ;;  %v253_v20 = vld [vmem:[%s1274_s8 + $0xb8] sm:$0xff]  ;;  %v254_v22 = vld [vmem:[%s1274_s8 + $0xc0] sm:$0xff] }
  0x16   : > { %1077 = vmatprep.mubr.msk.f32.mxu0 %vm273_vm0, %v230_v5  ;;  %1101 = vmatprep.mubr.msk.f32.mxu1 %vm273_vm0, %v246_v6  ;;  %v239_v23 = vld [vmem:[%s1274_s8 + $0x48] sm:$0xff]  ;;  %v240_v25 = vld [vmem:[%s1274_s8 + $0x50] sm:$0xff]  ;;  %v241_v27 = vld [vmem:[%s1274_s8 + $0x58] sm:$0xff] }
  0x17   : > { %1078 = vmatmul.mubr.msk.f32.vlgmr.msra.gmra.mxu0 %vm273_vm0, %v231_v7  ;;  %1102 = vmatmul.mubr.msk.f32.vlgmr.msra.gmra.mxu1 %vm273_vm0, %v247_v8  ;;  %v255_v24 = vld [vmem:[%s1274_s8 + $0xc8] sm:$0xff]  ;;  %v256_v26 = vld [vmem:[%s1274_s8 + $0xd0] sm:$0xff]  ;;  %v257_v28 = vld [vmem:[%s1274_s8 + $0xd8] sm:$0xff] }
  0x18   : > { %1080 = vmatprep.mubr.msk.f32.mxu0 %vm273_vm0, %v232_v9  ;;  %1104 = vmatprep.mubr.msk.f32.mxu1 %vm273_vm0, %v248_v10  ;;  %v242_v29 = vld [vmem:[%s1274_s8 + $0x60] sm:$0xff]  ;;  %v243_v31 = vld [vmem:[%s1274_s8 + $0x68] sm:$0xff]  ;;  %v244_v33 = vld [vmem:[%s1274_s8 + $0x70] sm:$0xff] }
  0x19   : > { %v258_v30 = vld [vmem:[%s1274_s8 + $0xe0] sm:$0xff]  ;;  %v259_v32 = vld [vmem:[%s1274_s8 + $0xe8] sm:$0xff]  ;;  %v260_v34 = vld [vmem:[%s1274_s8 + $0xf0] sm:$0xff] }
  0x1a   : > { %v245_v35 = vld [vmem:[%s1274_s8 + $0x78] sm:$0xff] }
  0x1b   : > { %1081 = vmatmul.mubr.msk.f32.gmra.mxu0 %vm273_vm0, %v233_v11  ;;  %1105 = vmatmul.mubr.msk.f32.gmra.mxu1 %vm273_vm0, %v249_v12  ;;  %v261_v36 = vld [vmem:[%s1274_s8 + $0xf8] sm:$0xff] }
  0x1c   : > { %1083 = vmatprep.mubr.msk.f32.mxu0 %vm273_vm0, %v234_v13  ;;  %1107 = vmatprep.mubr.msk.f32.mxu1 %vm273_vm0, %v250_v14 }
  0x1f   : > { %1084 = vmatmul.mubr.msk.f32.gmra.mxu0 %vm273_vm0, %v235_v15  ;;  %1108 = vmatmul.mubr.msk.f32.gmra.mxu1 %vm273_vm0, %v251_v16 }
  0x20   : > { %1086 = vmatprep.mubr.msk.f32.mxu0 %vm273_vm0, %v236_v17  ;;  %1110 = vmatprep.mubr.msk.f32.mxu1 %vm273_vm0, %v252_v18 }
  0x23   : > { %1087 = vmatmul.mubr.msk.f32.gmra.mxu0 %vm273_vm0, %v237_v19  ;;  %1111 = vmatmul.mubr.msk.f32.gmra.mxu1 %vm273_vm0, %v253_v20 }
  0x24   : > { %1089 = vmatprep.mubr.msk.f32.mxu0 %vm273_vm0, %v238_v21  ;;  %1113 = vmatprep.mubr.msk.f32.mxu1 %vm273_vm0, %v254_v22 }
  0x27   : > { %1090 = vmatmul.mubr.msk.f32.gmra.mxu0 %vm273_vm0, %v239_v23  ;;  %1114 = vmatmul.mubr.msk.f32.gmra.mxu1 %vm273_vm0, %v255_v24 }
  0x28   : > { %1092 = vmatprep.mubr.msk.f32.mxu0 %vm273_vm0, %v240_v25  ;;  %1116 = vmatprep.mubr.msk.f32.mxu1 %vm273_vm0, %v256_v26 }
  0x2b   : > { %1093 = vmatmul.mubr.msk.f32.gmra.mxu0 %vm273_vm0, %v241_v27  ;;  %1117 = vmatmul.mubr.msk.f32.gmra.mxu1 %vm273_vm0, %v257_v28  ;;  %v1400_v27 = vld [vmem:[%s1641_s3] ss:$0 sm:$0xff] }
  0x2c   : > { %1095 = vmatprep.mubr.msk.f32.mxu0 %vm273_vm0, %v242_v29  ;;  %1119 = vmatprep.mubr.msk.f32.mxu1 %vm273_vm0, %v258_v30 }
  0x2f   : > { %1096 = vmatmul.mubr.msk.f32.gmra.mxu0 %vm273_vm0, %v243_v31  ;;  %1120 = vmatmul.mubr.msk.f32.gmra.mxu1 %vm273_vm0, %v259_v32 }
  0x30   : > { %1098 = vmatprep.mubr.msk.f32.mxu0 %vm273_vm0, %v244_v33  ;;  %1122 = vmatprep.mubr.msk.f32.mxu1 %vm273_vm0, %v260_v34 }
  0x33   : > { %1099 = vmatmul.mubr.msk.f32.gmra.mxu0 %vm273_vm0, %v245_v35  ;;  %1123 = vmatmul.mubr.msk.f32.gmra.mxu1 %vm273_vm0, %v261_v36 }
  0xd7   : > { %v1079_v38 = vpop.f32.mrf.mxu0  ;;  %v1103_v39 = vpop.f32.mrf.mxu1 }
  0xd8   : > { %v522_v40 = vadd.f32 %v1103_v39, %v1343_v37  ;;  %v442_v41 = vadd.f32 %v1079_v38, %v1343_v37 }
  0xd9   : > { %v436_v42 = vpop.f32.mrf.mxu0  ;;  %v516_v43 = vpop.f32.mrf.mxu1 }
  0xda   : > { %v645_v44 = vmul.f32 0.70710677, %v522_v40  ;;  %v1348_v45 = vadd.f32 %v1343_v37, %v436_v42  ;;  %v1351_v48 = vadd.f32 %v1343_v37, %v516_v43  ;;  %v629_v49 = vmul.f32 0.70710677, %v442_v41 }
  0xdb   : > { %v1082_v46 = vpop.f32.mrf.mxu0  ;;  %v1106_v47 = vpop.f32.mrf.mxu1  ;;  %v612_v20 = vmul.f32 0.5, %v522_v40  ;;  %v596_v23 = vmul.f32 0.5, %v442_v41 }
  0xdc   : > { %1141 = verf.f32 %v645_v44  ;;  %v452_v50 = vadd.f32 %v1082_v46, %v1343_v37  ;;  %v1355_v53 = vadd.f32 %v1106_v47, %v1343_v37  ;;  %v628_v54 = vmul.f32 0.70710677, %v1348_v45 }
  0xdd   : > { %v446_v51 = vpop.f32.mrf.mxu0  ;;  %v526_v52 = vpop.f32.mrf.mxu1  ;;  %v644_v56 = vmul.f32 0.70710677, %v1351_v48  ;;  %1143 = verf.f32 %v629_v49  ;;  %v595_v34 = vmul.f32 0.5, %v1348_v45 }
  0xde   : > { %v631_v57 = vmul.f32 0.70710677, %v452_v50  ;;  %v647_v60 = vmul.f32 0.70710677, %v1355_v53  ;;  %v1361_v61 = vadd.f32 %v1343_v37, %v446_v51  ;;  %1145 = verf.f32 %v628_v54 }
  0xdf   : > { %v1085_v55 = vpop.f32.mrf.mxu0  ;;  %v1109_v58 = vpop.f32.mrf.mxu1  ;;  %1147 = verf.f32 %v644_v56  ;;  %v1364_v62 = vadd.f32 %v1343_v37, %v526_v52  ;;  %v598_v36 = vmul.f32 0.5, %v452_v50  ;;  %v611_v50 = vmul.f32 0.5, %v1351_v48 }
  0xe0   : > { %1149 = verf.f32 %v631_v57  ;;  %v1367_v0 = vadd.f32 %v1085_v55, %v1343_v37  ;;  %v630_v2 = vmul.f32 0.70710677, %v1361_v61  ;;  %v1375_v5 = vadd.f32 %v1109_v58, %v1343_v37 }
  0xe1   : > { %v456_v59 = vpop.f32.mrf.mxu0  ;;  %v536_v1 = vpop.f32.mrf.mxu1  ;;  %1151 = verf.f32 %v647_v60  ;;  %v646_v4 = vmul.f32 0.70710677, %v1364_v62  ;;  %v614_v51 = vmul.f32 0.5, %v1355_v53 }
  0xe2   : > { %v1371_v3 = vadd.f32 %v1343_v37, %v456_v59  ;;  %v633_v7 = vmul.f32 0.70710677, %v1367_v0  ;;  %v1379_v8 = vadd.f32 %v1343_v37, %v536_v1  ;;  %1153 = verf.f32 %v630_v2 }
  0xe3   : > { %v1088_v63 = vpop.f32.mrf.mxu0  ;;  %v1112_v9 = vpop.f32.mrf.mxu1  ;;  %1155 = verf.f32 %v646_v4  ;;  %v649_v12 = vmul.f32 0.70710677, %v1375_v5 }
  0xe4   : > { %v632_v11 = vmul.f32 0.70710677, %v1371_v3  ;;  %v1384_v13 = vadd.f32 %v1088_v63, %v1343_v37  ;;  %1157 = verf.f32 %v633_v7  ;;  %v648_v15 = vmul.f32 0.70710677, %v1379_v8 }
  0xe5   : > { %v466_v6 = vpop.f32.mrf.mxu0  ;;  %v546_v17 = vpop.f32.mrf.mxu1  ;;  %v1391_v21 = vadd.f32 %v1112_v9, %v1343_v37 }
  0xe6   : > { %v1388_v16 = vadd.f32 %v1343_v37, %v466_v6  ;;  %1159 = verf.f32 %v632_v11  ;;  %v635_v24 = vmul.f32 0.70710677, %v1384_v13  ;;  %v1395_v25 = vadd.f32 %v1343_v37, %v546_v17 }
  0xe7   : > { %v1091_v14 = vpop.f32.mrf.mxu0  ;;  %1161 = verf.f32 %v649_v12  ;;  %v1115_v30 = vpop.f32.mrf.mxu1  ;;  %v651_v38 = vmul.f32 0.70710677, %v1391_v21 }
  0xe8   : > { %1163 = verf.f32 %v648_v15  ;;  %v634_v29 = vmul.f32 0.70710677, %v1388_v16  ;;  %v650_v41 = vmul.f32 0.70710677, %v1395_v25  ;;  %v1408_v42 = vadd.f32 %v1091_v14, %v1343_v37 }
  0xe9   : > { %v1142_v10 = vpop.eup %1141  ;;  %v476_v26 = vpop.f32.mrf.mxu0  ;;  %1165 = verf.f32 %v635_v24  ;;  %v1417_v56 = vadd.f32 %v1115_v30, %v1343_v37  ;;  %v613_v15 = vmul.f32 0.5, %v1364_v62  ;;  %v600_v30 = vmul.f32 0.5, %v1367_v0 }
  0xea   : > { %v709_v18 = vadd.f32 1.0, %v1142_v10  ;;  %v1144_v19 = vpop.eup %1143  ;;  %v1411_v43 = vadd.f32 %v1343_v37, %v476_v26  ;;  %1167 = verf.f32 %v634_v29  ;;  %v556_v46 = vpop.f32.mrf.mxu1  ;;  %v637_v59 = vmul.f32 0.70710677, %v1408_v42 }
  0xeb   : > { %v1146_v22 = vpop.eup %1145  ;;  %v693_v32 = vadd.f32 1.0, %v1144_v19  ;;  %v1094_v44 = vpop.f32.mrf.mxu0  ;;  %1169 = verf.f32 %v651_v38  ;;  %v1422_v63 = vadd.f32 %v1343_v37, %v556_v46  ;;  %v597_v10 = vmul.f32 0.5, %v1361_v61 }
  0xec   : > { %v1148_v28 = vpop.eup %1147  ;;  %v741_v31 = vmul.f32 %v709_v18, %v612_v20  ;;  %v692_v49 = vadd.f32 1.0, %v1146_v22  ;;  %1171 = verf.f32 %v650_v41  ;;  %v636_v60 = vmul.f32 0.70710677, %v1411_v43  ;;  %v1118_v1 = vpop.f32.mrf.mxu1 }
  0xed   : > { %v1150_v33 = vpop.eup %1149  ;;  %v725_v40 = vmul.f32 %v693_v32, %v596_v23  ;;  %v708_v54 = vadd.f32 1.0, %v1148_v28  ;;  %v486_v48 = vpop.f32.mrf.mxu0  ;;  %v1428_v11 = vadd.f32 %v1094_v44, %v1343_v37  ;;  %v653_v17 = vmul.f32 0.70710677, %v1417_v56 }
  0xee   : > { %v1152_v35 = vpop.eup %1151  ;;  %v780_v39 = vmul.f32 %v1400_v27, %v741_v31  ;;  %v695_v47 = vadd.f32 1.0, %v1150_v33  ;;  %v724_v58 = vmul.f32 %v692_v49, %v595_v34  ;;  %v1433_v18 = vadd.f32 %v1343_v37, %v486_v48  ;;  %v566_v23 = vpop.f32.mrf.mxu1 }
  0xef   : > { %v764_v45 = vmul.f32 %v1400_v27, %v725_v40  ;;  %v711_v52 = vadd.f32 1.0, %v1152_v35  ;;  %v1154_v55 = vpop.eup %1153  ;;  %v740_v7 = vmul.f32 %v708_v54, %v611_v50  ;;  %1173 = verf.f32 %v637_v59  ;;  %v1097_v24 = vpop.f32.mrf.mxu0 }
  0xf0   : > { %829 = vadd.xlane.f32.xlu1 %v780_v39  ;;  %v727_v57 = vmul.f32 %v695_v47, %v598_v36  ;;  %v1156_v53 = vpop.eup %1155  ;;  %v763_v4 = vmul.f32 %v1400_v27, %v724_v58  ;;  %v694_v12 = vadd.f32 1.0, %v1154_v55  ;;  %v652_v19 = vmul.f32 0.70710677, %v1422_v63  ;;  %v1121_v39 = vpop.f32.mrf.mxu1 }
  0xf1   : > { %797 = vadd.xlane.f32.xlu0 %v764_v45  ;;  %v743_v6 = vmul.f32 %v711_v52, %v614_v51  ;;  %v1158_v9 = vpop.eup %1157  ;;  %v710_v22 = vadd.f32 1.0, %v1156_v53  ;;  %1175 = verf.f32 %v636_v60  ;;  %v779_v62 = vmul.f32 %v1400_v27, %v740_v7  ;;  %v496_v44 = vpop.f32.mrf.mxu0 }
  0xf2   : > { %v766_v2 = vmul.f32 %v1400_v27, %v727_v57  ;;  %v726_v20 = vmul.f32 %v694_v12, %v597_v10  ;;  %v697_v28 = vadd.f32 1.0, %v1158_v9  ;;  %v639_v31 = vmul.f32 0.70710677, %v1428_v11  ;;  %v576_v59 = vpop.f32.mrf.mxu1 }
  0xf3   : > { %v1160_v14 = vpop.eup %1159  ;;  %v782_v26 = vmul.f32 %v1400_v27, %v743_v6  ;;  %v742_v32 = vmul.f32 %v710_v22, %v613_v15  ;;  %v599_v34 = vmul.f32 0.5, %v1371_v3  ;;  %1177 = verf.f32 %v653_v17 }
  0xf4   : > { %801 = vadd.xlane.f32.xlu1 %v766_v2  ;;  %v1162_v61 = vpop.eup %1161  ;;  %v696_v33 = vadd.f32 1.0, %v1160_v14  ;;  %v638_v35 = vmul.f32 0.70710677, %v1433_v18  ;;  %v1443_v36 = vadd.f32 %v1118_v1, %v1343_v37  ;;  %1179 = verf.f32 %v652_v19 }
  0xf5   : > { %795 = vadd.xlane.f32.xlu0 %v763_v4  ;;  %v1164_v29 = vpop.eup %1163  ;;  %v1446_v38 = vadd.f32 %v1343_v37, %v566_v23  ;;  %v765_v0 = vmul.f32 %v1400_v27, %v726_v20  ;;  %v729_v40 = vmul.f32 %v697_v28, %v600_v30  ;;  %v781_v3 = vmul.f32 %v1400_v27, %v742_v32  ;;  %v1124_v20 = vpop.f32.mrf.mxu1 }
  0xf6   : > { %v1166_v41 = vpop.eup %1165  ;;  %v728_v46 = vmul.f32 %v696_v33, %v599_v34  ;;  %v713_v45 = vadd.f32 1.0, %v1162_v61  ;;  %v712_v47 = vadd.f32 1.0, %v1164_v29  ;;  %v616_v50 = vmul.f32 0.5, %v1375_v5 }
  0xf7   : > { %v1168_v49 = vpop.eup %1167  ;;  %1181 = verf.f32 %v639_v31  ;;  %v615_v51 = vmul.f32 0.5, %v1379_v8  ;;  %v655_v52 = vmul.f32 0.70710677, %v1443_v36  ;;  %v1454_v54 = vadd.f32 %v1097_v24, %v1343_v37  ;;  %v1100_v8 = vpop.f32.mrf.mxu0 }
  0xf8   : > { %833 = vadd.xlane.f32.xlu1 %v782_v26  ;;  %1183 = verf.f32 %v638_v35  ;;  %v1170_v55 = vpop.eup %1169  ;;  %v654_v57 = vmul.f32 0.70710677, %v1446_v38  ;;  %v1458_v58 = vadd.f32 %v1343_v37, %v496_v44  ;;  %v768_v5 = vmul.f32 %v1400_v27, %v729_v40  ;;  %v586_v35 = vpop.f32.mrf.mxu1 }
  0xf9   : > { %827 = vadd.xlane.f32.xlu0 %v779_v62  ;;  %v699_v60 = vadd.f32 1.0, %v1166_v41  ;;  %v1172_v48 = vpop.eup %1171  ;;  %v767_v53 = vmul.f32 %v1400_v27, %v728_v46  ;;  %v745_v1 = vmul.f32 %v713_v45, %v616_v50  ;;  %v744_v2 = vmul.f32 %v712_v47, %v615_v51 }
  0xfa   : > { %v698_v4 = vadd.f32 1.0, %v1168_v49  ;;  %v602_v6 = vmul.f32 0.5, %v1384_v13  ;;  %v1464_v7 = vadd.f32 %v1121_v39, %v1343_v37  ;;  %v601_v9 = vmul.f32 0.5, %v1388_v16  ;;  %v506_v13 = vpop.f32.mrf.mxu0 }
  0xfb   : > { %1185 = verf.f32 %v655_v52  ;;  %v641_v10 = vmul.f32 0.70710677, %v1454_v54  ;;  %v1469_v12 = vadd.f32 %v1343_v37, %v576_v59  ;;  %v640_v14 = vmul.f32 0.70710677, %v1458_v58 }
  0xfc   : > { %799 = vadd.xlane.f32.xlu1 %v765_v0  ;;  %1187 = verf.f32 %v654_v57  ;;  %v731_v15 = vmul.f32 %v699_v60, %v602_v6  ;;  %v715_v17 = vadd.f32 1.0, %v1170_v55  ;;  %v1174_v19 = vpop.eup %1173  ;;  %v784_v22 = vmul.f32 %v1400_v27, %v745_v1 }
  0xfd   : > { %831 = vadd.xlane.f32.xlu0 %v781_v3  ;;  %v783_v16 = vmul.f32 %v1400_v27, %v744_v2  ;;  %v730_v61 = vmul.f32 %v698_v4, %v601_v9  ;;  %v714_v23 = vadd.f32 1.0, %v1172_v48  ;;  %v618_v26 = vmul.f32 0.5, %v1391_v21 }
  0xfe   : > { %v1176_v24 = vpop.eup %1175  ;;  %v657_v62 = vmul.f32 0.70710677, %v1464_v7  ;;  %v617_v28 = vmul.f32 0.5, %v1395_v25  ;;  %1189 = verf.f32 %v641_v10  ;;  %v656_v29 = vmul.f32 0.70710677, %v1469_v12 }
  0xff   : > { %v1479_v30 = vadd.f32 %v1100_v8, %v1343_v37  ;;  %1191 = verf.f32 %v640_v14  ;;  %v1482_v32 = vadd.f32 %v1343_v37, %v506_v13  ;;  %v770_v33 = vmul.f32 %v1400_v27, %v731_v15 }
 0x100   : > { %805 = vadd.xlane.f32.xlu1 %v768_v5  ;;  %v1178_v31 = vpop.eup %1177  ;;  %v701_v21 = vadd.f32 1.0, %v1174_v19  ;;  %v769_v25 = vmul.f32 %v1400_v27, %v730_v61  ;;  %v747_v39 = vmul.f32 %v715_v17, %v618_v26  ;;  %v746_v0 = vmul.f32 %v714_v23, %v617_v28 }
 0x101   : > { %803 = vadd.xlane.f32.xlu0 %v767_v53  ;;  %v1180_v34 = vpop.eup %1179  ;;  %v700_v40 = vadd.f32 1.0, %v1176_v24  ;;  %v604_v41 = vmul.f32 0.5, %v1408_v42  ;;  %v620_v44 = vmul.f32 0.5, %v1417_v56  ;;  %v603_v3 = vmul.f32 0.5, %v1411_v43 }
 0x102   : > { %1193 = verf.f32 %v657_v62  ;;  %v619_v45 = vmul.f32 0.5, %v1422_v63  ;;  %v643_v47 = vmul.f32 0.70710677, %v1479_v30  ;;  %v1492_v49 = vadd.f32 %v1124_v20, %v1343_v37 }
 0x103   : > { %1195 = verf.f32 %v656_v29  ;;  %v642_v51 = vmul.f32 0.70710677, %v1482_v32  ;;  %v1496_v42 = vadd.f32 %v1343_v37, %v586_v35  ;;  %v733_v56 = vmul.f32 %v701_v21, %v604_v41 }
 0x104   : > { %837 = vadd.xlane.f32.xlu1 %v784_v22  ;;  %v1182_v46 = vpop.eup %1181  ;;  %v717_v43 = vadd.f32 1.0, %v1178_v31  ;;  %v786_v52 = vmul.f32 %v1400_v27, %v747_v39  ;;  %v785_v63 = vmul.f32 %v1400_v27, %v746_v0  ;;  %v732_v55 = vmul.f32 %v700_v40, %v603_v3 }
 0x105   : > { %835 = vadd.xlane.f32.xlu0 %v783_v16  ;;  %v1184_v50 = vpop.eup %1183  ;;  %v716_v57 = vadd.f32 1.0, %v1180_v34  ;;  %v606_v59 = vmul.f32 0.5, %v1428_v11  ;;  %v605_v5 = vmul.f32 0.5, %v1433_v18  ;;  %1197 = verf.f32 %v643_v47 }
 0x106   : > { %v659_v60 = vmul.f32 0.70710677, %v1492_v49  ;;  %1199 = verf.f32 %v642_v51  ;;  %v658_v37 = vmul.f32 0.70710677, %v1496_v42  ;;  %v772_v8 = vmul.f32 %v1400_v27, %v733_v56 }
 0x107   : > { %v703_v53 = vadd.f32 1.0, %v1182_v46  ;;  %v771_v2 = vmul.f32 %v1400_v27, %v732_v55  ;;  %v749_v4 = vmul.f32 %v717_v43, %v620_v44  ;;  %v748_v6 = vmul.f32 %v716_v57, %v619_v45 }
 0x108   : > { %809 = vadd.xlane.f32.xlu1 %v770_v33  ;;  %v1186_v48 = vpop.eup %1185  ;;  %v702_v11 = vadd.f32 1.0, %v1184_v50  ;;  %v622_v18 = vmul.f32 0.5, %v1443_v36  ;;  %1201 = verf.f32 %v659_v60  ;;  %v621_v10 = vmul.f32 0.5, %v1446_v38 }
 0x109   : > { %807 = vadd.xlane.f32.xlu0 %v769_v25  ;;  %v1188_v1 = vpop.eup %1187  ;;  %1203 = verf.f32 %v658_v37  ;;  %v735_v14 = vmul.f32 %v703_v53, %v606_v59  ;;  %v719_v15 = vadd.f32 1.0, %v1186_v48  ;;  %v788_v19 = vmul.f32 %v1400_v27, %v749_v4  ;;  %v1530_v48 = vld [vmem:[#allocation2] ss:$0 sm:$0xff] }
 0x10a   : > { %v787_v13 = vmul.f32 %v1400_v27, %v748_v6  ;;  %v734_v20 = vmul.f32 %v702_v11, %v605_v5  ;;  %v718_v22 = vadd.f32 1.0, %v1188_v1  ;;  %v608_v61 = vmul.f32 0.5, %v1454_v54 }
 0x10b   : > { %v1190_v9 = vpop.eup %1189  ;;  %v607_v23 = vmul.f32 0.5, %v1458_v58  ;;  %v774_v26 = vmul.f32 %v1400_v27, %v735_v14  ;;  %v751_v28 = vmul.f32 %v719_v15, %v622_v18  ;;  %v624_v33 = vmul.f32 0.5, %v1464_v7 }
 0x10c   : > { %841 = vadd.xlane.f32.xlu1 %v786_v52  ;;  %v1192_v17 = vpop.eup %1191  ;;  %v705_v24 = vadd.f32 1.0, %v1190_v9  ;;  %v773_v62 = vmul.f32 %v1400_v27, %v734_v20  ;;  %v750_v29 = vmul.f32 %v718_v22, %v621_v10  ;;  %v623_v21 = vmul.f32 0.5, %v1469_v12 }
 0x10d   : > { %839 = vadd.xlane.f32.xlu0 %v785_v63  ;;  %v704_v38 = vadd.f32 1.0, %v1192_v17  ;;  %v790_v58 = vmul.f32 %v1400_v27, %v751_v28  ;;  %v610_v41 = vmul.f32 0.5, %v1479_v30  ;;  %v609_v44 = vmul.f32 0.5, %v1482_v32 }
 0x10e   : > { %v737_v34 = vmul.f32 %v705_v24, %v608_v61  ;;  %v789_v25 = vmul.f32 %v1400_v27, %v750_v29  ;;  %v626_v51 = vmul.f32 0.5, %v1492_v49  ;;  %v625_v56 = vmul.f32 0.5, %v1496_v42 }
 0x10f   : > { %v1194_v16 = vpop.eup %1193  ;;  %v736_v35 = vmul.f32 %v704_v38, %v607_v23 }
 0x110   : > { %813 = vadd.xlane.f32.xlu1 %v772_v8  ;;  %v1196_v36 = vpop.eup %1195  ;;  %v721_v39 = vadd.f32 1.0, %v1194_v16  ;;  %v776_v7 = vmul.f32 %v1400_v27, %v737_v34 }
 0x111   : > { %811 = vadd.xlane.f32.xlu0 %v771_v2  ;;  %v720_v0 = vadd.f32 1.0, %v1196_v36  ;;  %v775_v46 = vmul.f32 %v1400_v27, %v736_v35 }
 0x112   : > { %v1198_v31 = vpop.eup %1197  ;;  %v753_v45 = vmul.f32 %v721_v39, %v624_v33 }
 0x113   : > { %v1200_v54 = vpop.eup %1199  ;;  %v707_v3 = vadd.f32 1.0, %v1198_v31  ;;  %v752_v47 = vmul.f32 %v720_v0, %v623_v21 }
 0x114   : > { %845 = vadd.xlane.f32.xlu1 %v788_v19  ;;  %v706_v50 = vadd.f32 1.0, %v1200_v54  ;;  %v792_v30 = vmul.f32 %v1400_v27, %v753_v45 }
 0x115   : > { %843 = vadd.xlane.f32.xlu0 %v787_v13  ;;  %v1202_v40 = vpop.eup %1201  ;;  %v739_v43 = vmul.f32 %v707_v3, %v610_v41  ;;  %v791_v32 = vmul.f32 %v1400_v27, %v752_v47 }
 0x116   : > { %v1204_v12 = vpop.eup %1203  ;;  %v723_v52 = vadd.f32 1.0, %v1202_v40  ;;  %v738_v63 = vmul.f32 %v706_v50, %v609_v44 }
 0x117   : > { %v722_v55 = vadd.f32 1.0, %v1204_v12  ;;  %v778_v57 = vmul.f32 %v1400_v27, %v739_v43 }
 0x118   : > { %817 = vadd.xlane.f32.xlu1 %v774_v26  ;;  %v777_v59 = vmul.f32 %v1400_v27, %v738_v63  ;;  %v755_v5 = vmul.f32 %v723_v52, %v626_v51 }
 0x119   : > { %815 = vadd.xlane.f32.xlu0 %v773_v62  ;;  %v754_v60 = vmul.f32 %v722_v55, %v625_v56 }
 0x11a   : > { %v794_v49 = vmul.f32 %v1400_v27, %v755_v5 }
 0x11b   : > { %v793_v42 = vmul.f32 %v1400_v27, %v754_v60 }
 0x11c   : > { %849 = vadd.xlane.f32.xlu1 %v790_v58 }
 0x11d   : > { %847 = vadd.xlane.f32.xlu0 %v789_v25 }
 0x120   : > { %821 = vadd.xlane.f32.xlu1 %v776_v7 }
 0x121   : > { %819 = vadd.xlane.f32.xlu0 %v775_v46 }
 0x124   : > { %853 = vadd.xlane.f32.xlu1 %v792_v30 }
 0x125   : > { %851 = vadd.xlane.f32.xlu0 %v791_v32 }
 0x128   : > { %825 = vadd.xlane.f32.xlu1 %v778_v57 }
 0x129   : > { %823 = vadd.xlane.f32.xlu0 %v777_v59 }
 0x12c   : > { %857 = vadd.xlane.f32.xlu1 %v794_v49 }
 0x12d   : > { %855 = vadd.xlane.f32.xlu0 %v793_v42 }
 0x179   : > { %v830_v37 = vpop.xlane.xlu1 %829 }
 0x17a   : > { %v883_v8 = vadd.f32 %v1530_v48, %v830_v37  ;;  %v798_v27 = vpop.xlane.xlu0 %797 }
 0x17b   : > { %v867_v53 = vadd.f32 %v1530_v48, %v798_v27 }
 0x17c   : > { %916 = vst.msk [vmem:[%s1537_s15 + $0x88] sm:$0xff] %vm898_vm1, %v883_v8 }
 0x17d   : > { %900 = vst.msk [vmem:[%s1537_s15 + $0x8] sm:$0xff] %vm898_vm1, %v867_v53  ;;  %v802_v1 = vpop.xlane.xlu1 %801 }
 0x17e   : > { %v796_v2 = vpop.xlane.xlu0 %795  ;;  %v869_v4 = vadd.f32 %v1530_v48, %v802_v1 }
 0x17f   : > { %v866_v6 = vadd.f32 %v1530_v48, %v796_v2 }
 0x180   : > { %902 = vst.msk [vmem:[%s1537_s15 + $0x18] sm:$0xff] %vm898_vm1, %v869_v4 }
 0x181   : > { %899 = vst.msk [vmem:[%s1537_s15] sm:$0xff] %vm898_vm1, %v866_v6  ;;  %v834_v11 = vpop.xlane.xlu1 %833 }
 0x182   : > { %v828_v18 = vpop.xlane.xlu0 %827  ;;  %v885_v9 = vadd.f32 %v1530_v48, %v834_v11 }
 0x183   : > { %v882_v10 = vadd.f32 %v1530_v48, %v828_v18 }
 0x184   : > { %918 = vst.msk [vmem:[%s1537_s15 + $0x98] sm:$0xff] %vm898_vm1, %v885_v9 }
 0x185   : > { %915 = vst.msk [vmem:[%s1537_s15 + $0x80] sm:$0xff] %vm898_vm1, %v882_v10  ;;  %v800_v14 = vpop.xlane.xlu1 %799 }
 0x186   : > { %v832_v15 = vpop.xlane.xlu0 %831  ;;  %v868_v17 = vadd.f32 %v1530_v48, %v800_v14 }
 0x187   : > { %v884_v19 = vadd.f32 %v1530_v48, %v832_v15 }
 0x188   : > { %901 = vst.msk [vmem:[%s1537_s15 + $0x10] sm:$0xff] %vm898_vm1, %v868_v17 }
 0x189   : > { %917 = vst.msk [vmem:[%s1537_s15 + $0x90] sm:$0xff] %vm898_vm1, %v884_v19  ;;  %v806_v13 = vpop.xlane.xlu1 %805 }
 0x18a   : > { %v804_v20 = vpop.xlane.xlu0 %803  ;;  %v871_v22 = vadd.f32 %v1530_v48, %v806_v13 }
 0x18b   : > { %v870_v16 = vadd.f32 %v1530_v48, %v804_v20 }
 0x18c   : > { %904 = vst.msk [vmem:[%s1537_s15 + $0x28] sm:$0xff] %vm898_vm1, %v871_v22 }
 0x18d   : > { %903 = vst.msk [vmem:[%s1537_s15 + $0x20] sm:$0xff] %vm898_vm1, %v870_v16  ;;  %v838_v36 = vpop.xlane.xlu1 %837 }
 0x18e   : > { %v836_v61 = vpop.xlane.xlu0 %835  ;;  %v887_v23 = vadd.f32 %v1530_v48, %v838_v36 }
 0x18f   : > { %v886_v24 = vadd.f32 %v1530_v48, %v836_v61 }
 0x190   : > { %920 = vst.msk [vmem:[%s1537_s15 + $0xa8] sm:$0xff] %vm898_vm1, %v887_v23 }
 0x191   : > { %919 = vst.msk [vmem:[%s1537_s15 + $0xa0] sm:$0xff] %vm898_vm1, %v886_v24  ;;  %v810_v38 = vpop.xlane.xlu1 %809 }
 0x192   : > { %v808_v26 = vpop.xlane.xlu0 %807  ;;  %v873_v62 = vadd.f32 %v1530_v48, %v810_v38 }
 0x193   : > { %v872_v28 = vadd.f32 %v1530_v48, %v808_v26 }
 0x194   : > { %906 = vst.msk [vmem:[%s1537_s15 + $0x38] sm:$0xff] %vm898_vm1, %v873_v62 }
 0x195   : > { %905 = vst.msk [vmem:[%s1537_s15 + $0x30] sm:$0xff] %vm898_vm1, %v872_v28  ;;  %v842_v29 = vpop.xlane.xlu1 %841 }
 0x196   : > { %v840_v31 = vpop.xlane.xlu0 %839  ;;  %v889_v33 = vadd.f32 %v1530_v48, %v842_v29 }
 0x197   : > { %v888_v21 = vadd.f32 %v1530_v48, %v840_v31 }
 0x198   : > { %922 = vst.msk [vmem:[%s1537_s15 + $0xb8] sm:$0xff] %vm898_vm1, %v889_v33 }
 0x199   : > { %921 = vst.msk [vmem:[%s1537_s15 + $0xb0] sm:$0xff] %vm898_vm1, %v888_v21  ;;  %v814_v34 = vpop.xlane.xlu1 %813 }
 0x19a   : > { %v812_v35 = vpop.xlane.xlu0 %811  ;;  %v875_v54 = vadd.f32 %v1530_v48, %v814_v34 }
 0x19b   : > { %v874_v58 = vadd.f32 %v1530_v48, %v812_v35 }
 0x19c   : > { %908 = vst.msk [vmem:[%s1537_s15 + $0x48] sm:$0xff] %vm898_vm1, %v875_v54 }
 0x19d   : > { %907 = vst.msk [vmem:[%s1537_s15 + $0x40] sm:$0xff] %vm898_vm1, %v874_v58  ;;  %v846_v25 = vpop.xlane.xlu1 %845 }
 0x19e   : > { %v844_v39 = vpop.xlane.xlu0 %843  ;;  %v891_v0 = vadd.f32 %v1530_v48, %v846_v25 }
 0x19f   : > { %v890_v40 = vadd.f32 %v1530_v48, %v844_v39 }
 0x1a0   : > { %924 = vst.msk [vmem:[%s1537_s15 + $0xc8] sm:$0xff] %vm898_vm1, %v891_v0 }
 0x1a1   : > { %923 = vst.msk [vmem:[%s1537_s15 + $0xc0] sm:$0xff] %vm898_vm1, %v890_v40  ;;  %v818_v41 = vpop.xlane.xlu1 %817 }
 0x1a2   : > { %v816_v44 = vpop.xlane.xlu0 %815  ;;  %v877_v7 = vadd.f32 %v1530_v48, %v818_v41 }
 0x1a3   : > { %v876_v3 = vadd.f32 %v1530_v48, %v816_v44 }
 0x1a4   : > { %910 = vst.msk [vmem:[%s1537_s15 + $0x58] sm:$0xff] %vm898_vm1, %v877_v7 }
 0x1a5   : > { %909 = vst.msk [vmem:[%s1537_s15 + $0x50] sm:$0xff] %vm898_vm1, %v876_v3  ;;  %v850_v12 = vpop.xlane.xlu1 %849 }
 0x1a6   : > { %v848_v46 = vpop.xlane.xlu0 %847  ;;  %v893_v45 = vadd.f32 %v1530_v48, %v850_v12 }
 0x1a7   : > { %v892_v47 = vadd.f32 %v1530_v48, %v848_v46 }
 0x1a8   : > { %926 = vst.msk [vmem:[%s1537_s15 + $0xd8] sm:$0xff] %vm898_vm1, %v893_v45 }
 0x1a9   : > { %925 = vst.msk [vmem:[%s1537_s15 + $0xd0] sm:$0xff] %vm898_vm1, %v892_v47  ;;  %v822_v50 = vpop.xlane.xlu1 %821 }
 0x1aa   : > { %v820_v51 = vpop.xlane.xlu0 %819  ;;  %v879_v56 = vadd.f32 %v1530_v48, %v822_v50 }
 0x1ab   : > { %v878_v43 = vadd.f32 %v1530_v48, %v820_v51 }
 0x1ac   : > { %912 = vst.msk [vmem:[%s1537_s15 + $0x68] sm:$0xff] %vm898_vm1, %v879_v56 }
 0x1ad   : > { %911 = vst.msk [vmem:[%s1537_s15 + $0x60] sm:$0xff] %vm898_vm1, %v878_v43  ;;  %v854_v52 = vpop.xlane.xlu1 %853 }
 0x1ae   : > { %v852_v30 = vpop.xlane.xlu0 %851  ;;  %v895_v32 = vadd.f32 %v1530_v48, %v854_v52 }
 0x1af   : > { %v894_v63 = vadd.f32 %v1530_v48, %v852_v30 }
 0x1b0   : > { %928 = vst.msk [vmem:[%s1537_s15 + $0xe8] sm:$0xff] %vm898_vm1, %v895_v32 }
 0x1b1   : > { %927 = vst.msk [vmem:[%s1537_s15 + $0xe0] sm:$0xff] %vm898_vm1, %v894_v63  ;;  %v826_v55 = vpop.xlane.xlu1 %825 }
 0x1b2   : > { %v824_v57 = vpop.xlane.xlu0 %823  ;;  %v881_v59 = vadd.f32 %v1530_v48, %v826_v55 }
 0x1b3   : > { %v880_v5 = vadd.f32 %v1530_v48, %v824_v57 }
 0x1b4   : > { %914 = vst.msk [vmem:[%s1537_s15 + $0x78] sm:$0xff] %vm898_vm1, %v881_v59 }
 0x1b5   : > { %913 = vst.msk [vmem:[%s1537_s15 + $0x70] sm:$0xff] %vm898_vm1, %v880_v5  ;;  %v858_v60 = vpop.xlane.xlu1 %857 }
 0x1b6   : > { %v856_v49 = vpop.xlane.xlu0 %855  ;;  %v897_v42 = vadd.f32 %v1530_v48, %v858_v60 }
 0x1b7   : > { %v896_v37 = vadd.f32 %v1530_v48, %v856_v49 }
 0x1b8   : > { %930 = vst.msk [vmem:[%s1537_s15 + $0xf8] sm:$0xff] %vm898_vm1, %v897_v42 }
 0x1b9   : > { %929 = vst.msk [vmem:[%s1537_s15 + $0xf0] sm:$0xff] %vm898_vm1, %v896_v37 }
 0x1ba PF: > { %s17_s20 = sadd.s32 1, %s1211_s20  }
 0x1bb   : > { %p14_p4 = scmp.ge.s32.totalorder %s17_s20, 4  }
 0x1bd   :  { %16 = sbr.rel (!%p14_p4) target bundleno = 3 (0x3), region = 70 }

</bundles_post_ra>
